<compile_context>
chip_gen: v7x
topology: tpu7x:2x2x1
jax: 0.10.0
libtpu: 0.0.40
codegen_flags: <defaults>
</compile_context>

<pallas_src>
from functools import partial

import jax
import jax.numpy as jnp
from jax.experimental import pallas as pl
from jax.experimental.pallas import tpu as pltpu


# ------------------------------ fused Pallas kernel ------------------------------ #

def discriminator_kernel(p_ref, wd_ref, bd_ref,
                         w1_ref, b1_ref, g1_ref, be1_ref,
                         w2_ref, b2_ref, g2_ref, be2_ref,
                         wu_ref, bu_ref,
                         o_ref, x_scr, ypad_scr, *, B, ds, eps1, eps2):
    """down-conv GEMM -> FC1+BN1+ReLU -> FC2+BN2+ReLU -> padded up-conv, all in VMEM."""
    S = ds * ds
    M = B * S

    # ---- down: stride-2 3x3 conv as GEMM + ReLU (patches built in the XLA prologue) ----
    d = jnp.dot(p_ref[...], wd_ref[...], preferred_element_type=jnp.float32)
    d = jnp.maximum(d + bd_ref[...], 0.0)                 # (M, 64) f32, rows (b, h, w)
    d3 = d.reshape(B, S, 64)                              # leading-dim split only (free)

    # ---- boundary: (b, s, c) -> flattened feature row (b, s*64 + c) via VMEM scratch ----
    # Unrolled loop of (B, 64) stores; avoids minor-dim value reshapes entirely.
    for s in range(S):
        x_scr[:, s * 64:(s + 1) * 64] = d3[:, s, :]

    # ---- fc1 -> BN1d(train, eps1) -> ReLU ----
    x = x_scr[...].astype(jnp.bfloat16)                   # cast once, (B, down_dim)
    h = jnp.dot(x, w1_ref[...], preferred_element_type=jnp.float32) + b1_ref[...]
    mu1 = jnp.mean(h, axis=0, keepdims=True)
    var1 = jnp.mean(jnp.square(h - mu1), axis=0, keepdims=True)   # biased var (train mode)
    h = (h - mu1) * jax.lax.rsqrt(var1 + eps1) * g1_ref[...] + be1_ref[...]
    h = jnp.maximum(h, 0.0)                                # (B, 32) f32

    # ---- fc2 -> BN1d(train, eps2) -> ReLU ----
    y = jnp.dot(h.astype(jnp.bfloat16), w2_ref[...],
                preferred_element_type=jnp.float32) + b2_ref[...]
    mu2 = jnp.mean(y, axis=0, keepdims=True)
    var2 = jnp.mean(jnp.square(y - mu2), axis=0, keepdims=True)
    z = (y - mu2) * jax.lax.rsqrt(var2 + eps2) * g2_ref[...] + be2_ref[...]
    z = jnp.maximum(z, 0.0)                                # (B, down_dim) f32, q = s*64+c

    # ---- boundary: in-kernel zero-pad; write FC output interior into the padded map ----
    ypad_scr[...] = jnp.zeros_like(ypad_scr)
    for s in range(S):
        ypad_scr[:, 1 + s // ds, 1 + s % ds, :] = z[:, s * 64:(s + 1) * 64]

    # ---- up: nearest-x2 upsample folded into 4 output phases x 4 taps ----
    # Build the 9 distinct shifted tap matrices ONCE (slice + reshape + bf16 cast hoisted
    # out of the phase/tap loops), then 4 dots per phase with acc initialized by dot #0.
    shifted = {}
    for dy in (-1, 0, 1):
        for dx in (-1, 0, 1):
            sl = ypad_scr[:, pl.ds(1 + dy, ds), pl.ds(1 + dx, ds), :]   # (B, ds, ds, 64)
            shifted[(dy, dx)] = sl.reshape(M, 64).astype(jnp.bfloat16)

    bias = bu_ref[...]                                     # (1, 128) f32
    offs = ((-1, 0), (0, 1))                               # vertical/horizontal taps per phase
    for a in range(2):                                     # output row phase
        for bp in range(2):                                # output col phase
            p = a * 2 + bp
            acc = None
            t = 0
            for dy in offs[a]:
                for dx in offs[bp]:
                    contrib = jnp.dot(shifted[(dy, dx)], wu_ref[p, t],
                                      preferred_element_type=jnp.float32)
                    acc = contrib if acc is None else acc + contrib
                    t += 1
            o_ref[p] = acc + bias                          # (M, 128) lane-dense store


# --------------------------------- Pallas wrapper --------------------------------- #

def pallas_discriminator(patches, prep, *, B, ds, eps1=0.8, eps2=1e-5):
    S = ds * ds
    M = B * S
    down_dim = 64 * S

    def full(shape):
        nd = len(shape)
        return pl.BlockSpec(shape, lambda i, nd=nd: (0,) * nd)

    kernel = partial(discriminator_kernel, B=B, ds=ds, eps1=eps1, eps2=eps2)
    return pl.pallas_call(
        kernel,
        out_shape=jax.ShapeDtypeStruct((4, M, 128), jnp.float32),
        grid=(1,),
        in_specs=[full(patches.shape),                      # patches (M, 9C) bf16
                  full(prep["w_down"].shape), full(prep["b_down"].shape),
                  full(prep["w_fc1"].shape), full(prep["b_fc1"].shape),
                  full(prep["g_bn1"].shape), full(prep["be_bn1"].shape),
                  full(prep["w_fc2"].shape), full(prep["b_fc2"].shape),
                  full(prep["g_bn2"].shape), full(prep["be_bn2"].shape),
                  full(prep["w_up_eff"].shape), full(prep["b_up"].shape)],
        out_specs=full((4, M, 128)),
        scratch_shapes=[pltpu.VMEM((B, down_dim), jnp.float32),          # flattened d
                        pltpu.VMEM((B, ds + 2, ds + 2, 64), jnp.float32)],  # padded map
        compiler_params=pltpu.CompilerParams(
            dimension_semantics=("arbitrary",),
            vmem_limit_bytes=32 * 1024 * 1024),
    )(patches, prep["w_down"], prep["b_down"],
      prep["w_fc1"], prep["b_fc1"], prep["g_bn1"], prep["be_bn1"],
      prep["w_fc2"], prep["b_fc2"], prep["g_bn2"], prep["be_bn2"],
      prep["w_up_eff"], prep["b_up"])


# ------------------------------------- JAX glue ------------------------------------ #

def im2col_nhwc(x, ksize, stride, pad):
    """x: (B, H, W, C) -> (B*Ho*Wo, C*k*k), rows (b, h, w), cols (c, kh, kw).  Tiny (~18 KB)."""
    B, H, W, C = x.shape
    xp = jnp.pad(x, ((0, 0), (pad, pad), (pad, pad), (0, 0)))
    Ho = (H + 2 * pad - ksize) // stride + 1
    Wo = (W + 2 * pad - ksize) // stride + 1
    cols = []
    for kh in range(ksize):
        for kw in range(ksize):
            cols.append(xp[:, kh:kh + stride * Ho:stride, kw:kw + stride * Wo:stride, :])
    patches = jnp.stack(cols, axis=3)                  # (B, Ho, Wo, k*k, C)
    patches = jnp.transpose(patches, (0, 1, 2, 4, 3))  # (B, Ho, Wo, C, k*k)
    return patches.reshape(B * Ho * Wo, C * ksize * ksize)


def prepare_params(params, channels, img_size):
    """One-time conversion of PyTorch-layout f32 params into kernel-ready tensors."""
    assert img_size % 2 == 0 and (img_size // 2) % 8 == 0, \
        "up-conv kernel assumes (img_size // 2) is a multiple of 8"
    assert channels <= 128
    ds = img_size // 2
    S = ds * ds
    down_dim = 64 * S
    bf, f32 = jnp.bfloat16, jnp.float32

    # down conv: (64, C, 3, 3) -> (C*9, 64); column order (c, kh, kw) matches im2col.
    w_down = params["w_down"].reshape(64, channels * 9).T.astype(bf)
    b_down = params["b_down"].reshape(1, 64).astype(f32)

    # Feature permutation: PyTorch flatten p = c*S + s  ->  kernel NHWC flatten q = s*64 + c.
    def perm_rows(w):                       # (down_dim, N) indexed by p -> indexed by q
        n = w.shape[1]
        return w.reshape(64, S, n).transpose(1, 0, 2).reshape(down_dim, n)

    def perm_vec(v):                        # (down_dim,) indexed by p -> (1, down_dim) by q
        return v.reshape(64, S).T.reshape(1, down_dim)

    w_fc1 = perm_rows(params["w_fc1"].T).astype(bf)       # (down_dim, 32)
    w_fc2 = perm_rows(params["w_fc2"]).T.astype(bf)       # (32, down_dim)
    b_fc1 = params["b_fc1"].reshape(1, 32).astype(f32)
    g_bn1 = params["g_bn1"].reshape(1, 32).astype(f32)
    be_bn1 = params["be_bn1"].reshape(1, 32).astype(f32)
    b_fc2 = perm_vec(params["b_fc2"]).astype(f32)
    g_bn2 = perm_vec(params["g_bn2"]).astype(f32)
    be_bn2 = perm_vec(params["be_bn2"]).astype(f32)

    # up conv: fold nearest-x2 upsample into 4 phases x 4 taps of (64, 128) combined weights.
    wt = jnp.transpose(params["w_up"], (2, 3, 1, 0))      # (3, 3, 64, C): [kh, kw, cin, cout]
    groups = (((0,), (1, 2)), ((0, 1), (2,)))             # phase -> kernel-index set per tap
    taps = []
    for a in range(2):
        for bph in range(2):
            for khs in groups[a]:
                for kws in groups[bph]:
                    w = sum(wt[kh, kw] for kh in khs for kw in kws)       # (64, C)
                    taps.append(jnp.pad(w, ((0, 0), (0, 128 - channels))))
    w_up_eff = jnp.stack(taps).reshape(4, 4, 64, 128).astype(bf)
    b_up = jnp.pad(params["b_up"], (0, 128 - channels)).reshape(1, 128).astype(f32)

    return {"w_down": w_down, "b_down": b_down,
            "w_fc1": w_fc1, "b_fc1": b_fc1, "g_bn1": g_bn1, "be_bn1": be_bn1,
            "w_fc2": w_fc2, "b_fc2": b_fc2, "g_bn2": g_bn2, "be_bn2": be_bn2,
            "w_up_eff": w_up_eff, "b_up": b_up}


def discriminator_forward(img_nchw, prep):
    B, C, H, W = img_nchw.shape
    ds = H // 2
    S = ds * ds

    # --- prologue (tiny, one XLA fusion): NHWC + stride-2 im2col on the 8 KB input ---
    x = jnp.transpose(img_nchw, (0, 2, 3, 1)).astype(jnp.bfloat16)   # NHWC bf16
    patches = im2col_nhwc(x, 3, 2, 1)                                # (B*S, 9C) bf16

    # --- single fused kernel: down + fc + up, intermediates VMEM-resident ---
    up = pallas_discriminator(patches, prep, B=B, ds=ds)             # (4, B*S, 128)

    # --- epilogue (tiny, 8 KB of real data): interleave the 4 phases back into NCHW ---
    up = up[..., :C].reshape(2, 2, B, ds, ds, C)                     # [a, b', b, h, w, c]
    out = jnp.transpose(up, (2, 5, 3, 0, 4, 1)).reshape(B, C, H, W)  # [b, c, 2h+a, 2w+b']
    return out


# ------------------------- plain-JAX reference (checking) ------------------- #

def reference_forward(img, params, eps1=0.8, eps2=1e-5):
    """Follows the PyTorch graph exactly; uses the same bf16-operand / f32-accumulate split."""
    bf, f32 = jnp.bfloat16, jnp.float32
    B, C, H, W = img.shape
    ds = H // 2
    down_dim = 64 * ds * ds

    def conv(x, w, stride):
        return jax.lax.conv_general_dilated(
            x.astype(bf), w.astype(bf), (stride, stride), ((1, 1), (1, 1)),
            dimension_numbers=("NCHW", "OIHW", "NCHW"),
            preferred_element_type=f32)

    def bn(x, g, b, eps):
        mu = jnp.mean(x, axis=0, keepdims=True)
        var = jnp.mean(jnp.square(x - mu), axis=0, keepdims=True)
        return (x - mu) * jax.lax.rsqrt(var + eps) * g + b

    d = jnp.maximum(conv(img, params["w_down"], 2)
                    + params["b_down"].reshape(1, 64, 1, 1), 0.0)
    h = jnp.dot(d.reshape(B, down_dim).astype(bf), params["w_fc1"].T.astype(bf),
                preferred_element_type=f32) + params["b_fc1"]
    h = jnp.maximum(bn(h, params["g_bn1"], params["be_bn1"], eps1), 0.0)
    y = jnp.dot(h.astype(bf), params["w_fc2"].T.astype(bf),
                preferred_element_type=f32) + params["b_fc2"]
    y = jnp.maximum(bn(y, params["g_bn2"], params["be_bn2"], eps2), 0.0)
    u = y.reshape(B, 64, ds, ds)
    u = jnp.repeat(jnp.repeat(u, 2, axis=2), 2, axis=3)
    return conv(u, params["w_up"], 1) + params["b_up"].reshape(1, C, 1, 1)


# ------------------------------ parameter init ------------------------------ #

def init_params(key, channels, img_size):
    ds = img_size // 2
    down_dim = 64 * ds * ds
    ks = jax.random.split(key, 10)
    n = lambda k, shape, s=0.05: jax.random.normal(k, shape, jnp.float32) * s
    return {
        "w_down": n(ks[0], (64, channels, 3, 3)),
        "b_down": n(ks[1], (64,)),
        "w_fc1":  n(ks[2], (32, down_dim)),          # PyTorch Linear weight (out, in)
        "b_fc1":  n(ks[3], (32,)),
        "g_bn1":  1.0 + n(ks[4], (32,)),
        "be_bn1": jnp.zeros((32,), jnp.float32),
        "w_fc2":  n(ks[5], (down_dim, 32)),
        "b_fc2":  n(ks[6], (down_dim,)),
        "g_bn2":  1.0 + n(ks[7], (down_dim,)),
        "be_bn2": jnp.zeros((down_dim,), jnp.float32),
        "w_up":   n(ks[8], (channels, 64, 3, 3)),
        "b_up":   n(ks[9], (channels,)),
    }


# ----------------------------------- main ----------------------------------- #

if __name__ == "__main__":
    channels, img_size, batch = 4, 16, 2

    key = jax.random.PRNGKey(0)
    k_img, k_par = jax.random.split(key)
    img = jax.random.normal(k_img, (batch, channels, img_size, img_size), jnp.float32)  # NCHW
    params = init_params(k_par, channels, img_size)
    prep = prepare_params(params, channels, img_size)   # one-time weight prep (permute/cast/pad)

    fwd = jax.jit(discriminator_forward)
    out = jax.block_until_ready(fwd(img, prep))

    assert out.shape == (batch, channels, img_size, img_size), out.shape
    assert bool(jnp.isfinite(out).all())

    ref = jax.block_until_ready(jax.jit(reference_forward)(img, params))
    diff = jnp.abs(out - ref)
    max_err, mean_err = float(jnp.max(diff)), float(jnp.mean(diff))
    assert max_err < 1.0 and mean_err < 0.03, (max_err, mean_err)

    print("KERNEL_OK")
</pallas_src>

<mosaic_0001>
module attributes {stable_mosaic.version = 11 : i64} {
  func.func @discriminator_kernel(%arg0: i32, %arg1: memref<128x36xbf16, #tpu.memory_space<vmem>>, %arg2: memref<36x64xbf16, #tpu.memory_space<vmem>>, %arg3: memref<1x64xf32, #tpu.memory_space<vmem>>, %arg4: memref<4096x32xbf16, #tpu.memory_space<vmem>>, %arg5: memref<1x32xf32, #tpu.memory_space<vmem>>, %arg6: memref<1x32xf32, #tpu.memory_space<vmem>>, %arg7: memref<1x32xf32, #tpu.memory_space<vmem>>, %arg8: memref<32x4096xbf16, #tpu.memory_space<vmem>>, %arg9: memref<1x4096xf32, #tpu.memory_space<vmem>>, %arg10: memref<1x4096xf32, #tpu.memory_space<vmem>>, %arg11: memref<1x4096xf32, #tpu.memory_space<vmem>>, %arg12: memref<4x4x64x128xbf16, #tpu.memory_space<vmem>>, %arg13: memref<1x128xf32, #tpu.memory_space<vmem>>, %arg14: memref<4x128x128xf32, #tpu.memory_space<vmem>>, %arg15: memref<2x4096xf32, #tpu.memory_space<vmem>>, %arg16: memref<2x10x10x64xf32, #tpu.memory_space<vmem>>) attributes {dimension_semantics = [#tpu.dimension_semantics<arbitrary>], iteration_bounds = array<i64: 1>, scalar_prefetch = 0 : i64, scratch_operands = 2 : i64, tpu.core_type = #tpu.core_type<tc>, window_params = [{pipeline_mode = #tpu.pipeline_mode<synchronous>, transform_indices = @transform_0, window_bounds = array<i64: 128, 36>}, {pipeline_mode = #tpu.pipeline_mode<synchronous>, transform_indices = @transform_1, window_bounds = array<i64: 36, 64>}, {pipeline_mode = #tpu.pipeline_mode<synchronous>, transform_indices = @transform_2, window_bounds = array<i64: 1, 64>}, {pipeline_mode = #tpu.pipeline_mode<synchronous>, transform_indices = @transform_3, window_bounds = array<i64: 4096, 32>}, {pipeline_mode = #tpu.pipeline_mode<synchronous>, transform_indices = @transform_4, window_bounds = array<i64: 1, 32>}, {pipeline_mode = #tpu.pipeline_mode<synchronous>, transform_indices = @transform_5, window_bounds = array<i64: 1, 32>}, {pipeline_mode = #tpu.pipeline_mode<synchronous>, transform_indices = @transform_6, window_bounds = array<i64: 1, 32>}, {pipeline_mode = #tpu.pipeline_mode<synchronous>, transform_indices = @transform_7, window_bounds = array<i64: 32, 4096>}, {pipeline_mode = #tpu.pipeline_mode<synchronous>, transform_indices = @transform_8, window_bounds = array<i64: 1, 4096>}, {pipeline_mode = #tpu.pipeline_mode<synchronous>, transform_indices = @transform_9, window_bounds = array<i64: 1, 4096>}, {pipeline_mode = #tpu.pipeline_mode<synchronous>, transform_indices = @transform_10, window_bounds = array<i64: 1, 4096>}, {pipeline_mode = #tpu.pipeline_mode<synchronous>, transform_indices = @transform_11, window_bounds = array<i64: 4, 4, 64, 128>}, {pipeline_mode = #tpu.pipeline_mode<synchronous>, transform_indices = @transform_12, window_bounds = array<i64: 1, 128>}, {pipeline_mode = #tpu.pipeline_mode<synchronous>, transform_indices = @transform_13, window_bounds = array<i64: 4, 128, 128>}]} {
    %c0 = arith.constant 0 : index
    %c0_0 = arith.constant 0 : index
    %0 = vector.load %arg1[%c0, %c0_0] : memref<128x36xbf16, #tpu.memory_space<vmem>>, vector<128x36xbf16>
    %c0_1 = arith.constant 0 : index
    %c0_2 = arith.constant 0 : index
    %1 = vector.load %arg2[%c0_1, %c0_2] : memref<36x64xbf16, #tpu.memory_space<vmem>>, vector<36x64xbf16>
    %cst = arith.constant dense<0.000000e+00> : vector<128x64xf32>
    %2 = tpu.matmul %0, %1, %cst {dimension_numbers = #tpu.dot_dimension_numbers<[1], [0], [0], [1], [0, 0, 1, 1], [], []>} : vector<128x36xbf16>, vector<36x64xbf16>, vector<128x64xf32> -> vector<128x64xf32>
    %c0_3 = arith.constant 0 : index
    %c0_4 = arith.constant 0 : index
    %3 = vector.load %arg3[%c0_3, %c0_4] : memref<1x64xf32, #tpu.memory_space<vmem>>, vector<1x64xf32>
    %4 = vector.broadcast %3 : vector<1x64xf32> to vector<128x64xf32>
    %5 = arith.addf %2, %4 : vector<128x64xf32>
    %cst_5 = arith.constant 0.000000e+00 : f32
    %6 = vector.broadcast %cst_5 : f32 to vector<128x64xf32>
    %7 = arith.maximumf %5, %6 : vector<128x64xf32>
    %8 = vector.shape_cast %7 : vector<128x64xf32> to vector<2x64x64xf32>
    %9 = vector.extract_strided_slice %8 {offsets = [0, 0, 0], sizes = [2, 1, 64], strides = [1, 1, 1]} : vector<2x64x64xf32> to vector<2x1x64xf32>
    %10 = vector.shape_cast %9 : vector<2x1x64xf32> to vector<2x64xf32>
    %c0_6 = arith.constant 0 : index
    %c0_7 = arith.constant 0 : index
    %11 = vector.load %arg15[%c0_6, %c0_7] : memref<2x4096xf32, #tpu.memory_space<vmem>>, vector<2x64xf32>
    tpu.vector_store %arg15[%c0_6, %c0_7], %10 {strides = array<i32>} : memref<2x4096xf32, #tpu.memory_space<vmem>>, vector<2x64xf32>,
    %12 = vector.extract_strided_slice %8 {offsets = [0, 1, 0], sizes = [2, 1, 64], strides = [1, 1, 1]} : vector<2x64x64xf32> to vector<2x1x64xf32>
    %13 = vector.shape_cast %12 : vector<2x1x64xf32> to vector<2x64xf32>
    %c0_8 = arith.constant 0 : index
    %c64 = arith.constant 64 : index
    %14 = vector.load %arg15[%c0_8, %c64] : memref<2x4096xf32, #tpu.memory_space<vmem>>, vector<2x64xf32>
    tpu.vector_store %arg15[%c0_8, %c64], %13 {strides = array<i32>} : memref<2x4096xf32, #tpu.memory_space<vmem>>, vector<2x64xf32>,
    %15 = vector.extract_strided_slice %8 {offsets = [0, 2, 0], sizes = [2, 1, 64], strides = [1, 1, 1]} : vector<2x64x64xf32> to vector<2x1x64xf32>
    %16 = vector.shape_cast %15 : vector<2x1x64xf32> to vector<2x64xf32>
    %c0_9 = arith.constant 0 : index
    %c128 = arith.constant 128 : index
    %17 = vector.load %arg15[%c0_9, %c128] : memref<2x4096xf32, #tpu.memory_space<vmem>>, vector<2x64xf32>
    tpu.vector_store %arg15[%c0_9, %c128], %16 {strides = array<i32>} : memref<2x4096xf32, #tpu.memory_space<vmem>>, vector<2x64xf32>,
    %18 = vector.extract_strided_slice %8 {offsets = [0, 3, 0], sizes = [2, 1, 64], strides = [1, 1, 1]} : vector<2x64x64xf32> to vector<2x1x64xf32>
    %19 = vector.shape_cast %18 : vector<2x1x64xf32> to vector<2x64xf32>
    %c0_10 = arith.constant 0 : index
    %c192 = arith.constant 192 : index
    %20 = vector.load %arg15[%c0_10, %c192] : memref<2x4096xf32, #tpu.memory_space<vmem>>, vector<2x64xf32>
    tpu.vector_store %arg15[%c0_10, %c192], %19 {strides = array<i32>} : memref<2x4096xf32, #tpu.memory_space<vmem>>, vector<2x64xf32>,
    %21 = vector.extract_strided_slice %8 {offsets = [0, 4, 0], sizes = [2, 1, 64], strides = [1, 1, 1]} : vector<2x64x64xf32> to vector<2x1x64xf32>
    %22 = vector.shape_cast %21 : vector<2x1x64xf32> to vector<2x64xf32>
    %c0_11 = arith.constant 0 : index
    %c256 = arith.constant 256 : index
    %23 = vector.load %arg15[%c0_11, %c256] : memref<2x4096xf32, #tpu.memory_space<vmem>>, vector<2x64xf32>
    tpu.vector_store %arg15[%c0_11, %c256], %22 {strides = array<i32>} : memref<2x4096xf32, #tpu.memory_space<vmem>>, vector<2x64xf32>,
    %24 = vector.extract_strided_slice %8 {offsets = [0, 5, 0], sizes = [2, 1, 64], strides = [1, 1, 1]} : vector<2x64x64xf32> to vector<2x1x64xf32>
    %25 = vector.shape_cast %24 : vector<2x1x64xf32> to vector<2x64xf32>
    %c0_12 = arith.constant 0 : index
    %c320 = arith.constant 320 : index
    %26 = vector.load %arg15[%c0_12, %c320] : memref<2x4096xf32, #tpu.memory_space<vmem>>, vector<2x64xf32>
    tpu.vector_store %arg15[%c0_12, %c320], %25 {strides = array<i32>} : memref<2x4096xf32, #tpu.memory_space<vmem>>, vector<2x64xf32>,
    %27 = vector.extract_strided_slice %8 {offsets = [0, 6, 0], sizes = [2, 1, 64], strides = [1, 1, 1]} : vector<2x64x64xf32> to vector<2x1x64xf32>
    %28 = vector.shape_cast %27 : vector<2x1x64xf32> to vector<2x64xf32>
    %c0_13 = arith.constant 0 : index
    %c384 = arith.constant 384 : index
    %29 = vector.load %arg15[%c0_13, %c384] : memref<2x4096xf32, #tpu.memory_space<vmem>>, vector<2x64xf32>
    tpu.vector_store %arg15[%c0_13, %c384], %28 {strides = array<i32>} : memref<2x4096xf32, #tpu.memory_space<vmem>>, vector<2x64xf32>,
    %30 = vector.extract_strided_slice %8 {offsets = [0, 7, 0], sizes = [2, 1, 64], strides = [1, 1, 1]} : vector<2x64x64xf32> to vector<2x1x64xf32>
    %31 = vector.shape_cast %30 : vector<2x1x64xf32> to vector<2x64xf32>
    %c0_14 = arith.constant 0 : index
    %c448 = arith.constant 448 : index
    %32 = vector.load %arg15[%c0_14, %c448] : memref<2x4096xf32, #tpu.memory_space<vmem>>, vector<2x64xf32>
    tpu.vector_store %arg15[%c0_14, %c448], %31 {strides = array<i32>} : memref<2x4096xf32, #tpu.memory_space<vmem>>, vector<2x64xf32>,
    %33 = vector.extract_strided_slice %8 {offsets = [0, 8, 0], sizes = [2, 1, 64], strides = [1, 1, 1]} : vector<2x64x64xf32> to vector<2x1x64xf32>
    %34 = vector.shape_cast %33 : vector<2x1x64xf32> to vector<2x64xf32>
    %c0_15 = arith.constant 0 : index
    %c512 = arith.constant 512 : index
    %35 = vector.load %arg15[%c0_15, %c512] : memref<2x4096xf32, #tpu.memory_space<vmem>>, vector<2x64xf32>
    tpu.vector_store %arg15[%c0_15, %c512], %34 {strides = array<i32>} : memref<2x4096xf32, #tpu.memory_space<vmem>>, vector<2x64xf32>,
    %36 = vector.extract_strided_slice %8 {offsets = [0, 9, 0], sizes = [2, 1, 64], strides = [1, 1, 1]} : vector<2x64x64xf32> to vector<2x1x64xf32>
    %37 = vector.shape_cast %36 : vector<2x1x64xf32> to vector<2x64xf32>
    %c0_16 = arith.constant 0 : index
    %c576 = arith.constant 576 : index
    %38 = vector.load %arg15[%c0_16, %c576] : memref<2x4096xf32, #tpu.memory_space<vmem>>, vector<2x64xf32>
    tpu.vector_store %arg15[%c0_16, %c576], %37 {strides = array<i32>} : memref<2x4096xf32, #tpu.memory_space<vmem>>, vector<2x64xf32>,
    %39 = vector.extract_strided_slice %8 {offsets = [0, 10, 0], sizes = [2, 1, 64], strides = [1, 1, 1]} : vector<2x64x64xf32> to vector<2x1x64xf32>
    %40 = vector.shape_cast %39 : vector<2x1x64xf32> to vector<2x64xf32>
    %c0_17 = arith.constant 0 : index
    %c640 = arith.constant 640 : index
    %41 = vector.load %arg15[%c0_17, %c640] : memref<2x4096xf32, #tpu.memory_space<vmem>>, vector<2x64xf32>
    tpu.vector_store %arg15[%c0_17, %c640], %40 {strides = array<i32>} : memref<2x4096xf32, #tpu.memory_space<vmem>>, vector<2x64xf32>,
    %42 = vector.extract_strided_slice %8 {offsets = [0, 11, 0], sizes = [2, 1, 64], strides = [1, 1, 1]} : vector<2x64x64xf32> to vector<2x1x64xf32>
    %43 = vector.shape_cast %42 : vector<2x1x64xf32> to vector<2x64xf32>
    %c0_18 = arith.constant 0 : index
    %c704 = arith.constant 704 : index
    %44 = vector.load %arg15[%c0_18, %c704] : memref<2x4096xf32, #tpu.memory_space<vmem>>, vector<2x64xf32>
    tpu.vector_store %arg15[%c0_18, %c704], %43 {strides = array<i32>} : memref<2x4096xf32, #tpu.memory_space<vmem>>, vector<2x64xf32>,
    %45 = vector.extract_strided_slice %8 {offsets = [0, 12, 0], sizes = [2, 1, 64], strides = [1, 1, 1]} : vector<2x64x64xf32> to vector<2x1x64xf32>
    %46 = vector.shape_cast %45 : vector<2x1x64xf32> to vector<2x64xf32>
    %c0_19 = arith.constant 0 : index
    %c768 = arith.constant 768 : index
    %47 = vector.load %arg15[%c0_19, %c768] : memref<2x4096xf32, #tpu.memory_space<vmem>>, vector<2x64xf32>
    tpu.vector_store %arg15[%c0_19, %c768], %46 {strides = array<i32>} : memref<2x4096xf32, #tpu.memory_space<vmem>>, vector<2x64xf32>,
    %48 = vector.extract_strided_slice %8 {offsets = [0, 13, 0], sizes = [2, 1, 64], strides = [1, 1, 1]} : vector<2x64x64xf32> to vector<2x1x64xf32>
    %49 = vector.shape_cast %48 : vector<2x1x64xf32> to vector<2x64xf32>
    %c0_20 = arith.constant 0 : index
    %c832 = arith.constant 832 : index
    %50 = vector.load %arg15[%c0_20, %c832] : memref<2x4096xf32, #tpu.memory_space<vmem>>, vector<2x64xf32>
    tpu.vector_store %arg15[%c0_20, %c832], %49 {strides = array<i32>} : memref<2x4096xf32, #tpu.memory_space<vmem>>, vector<2x64xf32>,
    %51 = vector.extract_strided_slice %8 {offsets = [0, 14, 0], sizes = [2, 1, 64], strides = [1, 1, 1]} : vector<2x64x64xf32> to vector<2x1x64xf32>
    %52 = vector.shape_cast %51 : vector<2x1x64xf32> to vector<2x64xf32>
    %c0_21 = arith.constant 0 : index
    %c896 = arith.constant 896 : index
    %53 = vector.load %arg15[%c0_21, %c896] : memref<2x4096xf32, #tpu.memory_space<vmem>>, vector<2x64xf32>
    tpu.vector_store %arg15[%c0_21, %c896], %52 {strides = array<i32>} : memref<2x4096xf32, #tpu.memory_space<vmem>>, vector<2x64xf32>,
    %54 = vector.extract_strided_slice %8 {offsets = [0, 15, 0], sizes = [2, 1, 64], strides = [1, 1, 1]} : vector<2x64x64xf32> to vector<2x1x64xf32>
    %55 = vector.shape_cast %54 : vector<2x1x64xf32> to vector<2x64xf32>
    %c0_22 = arith.constant 0 : index
    %c960 = arith.constant 960 : index
    %56 = vector.load %arg15[%c0_22, %c960] : memref<2x4096xf32, #tpu.memory_space<vmem>>, vector<2x64xf32>
    tpu.vector_store %arg15[%c0_22, %c960], %55 {strides = array<i32>} : memref<2x4096xf32, #tpu.memory_space<vmem>>, vector<2x64xf32>,
    %57 = vector.extract_strided_slice %8 {offsets = [0, 16, 0], sizes = [2, 1, 64], strides = [1, 1, 1]} : vector<2x64x64xf32> to vector<2x1x64xf32>
    %58 = vector.shape_cast %57 : vector<2x1x64xf32> to vector<2x64xf32>
    %c0_23 = arith.constant 0 : index
    %c1024 = arith.constant 1024 : index
    %59 = vector.load %arg15[%c0_23, %c1024] : memref<2x4096xf32, #tpu.memory_space<vmem>>, vector<2x64xf32>
    tpu.vector_store %arg15[%c0_23, %c1024], %58 {strides = array<i32>} : memref<2x4096xf32, #tpu.memory_space<vmem>>, vector<2x64xf32>,
    %60 = vector.extract_strided_slice %8 {offsets = [0, 17, 0], sizes = [2, 1, 64], strides = [1, 1, 1]} : vector<2x64x64xf32> to vector<2x1x64xf32>
    %61 = vector.shape_cast %60 : vector<2x1x64xf32> to vector<2x64xf32>
    %c0_24 = arith.constant 0 : index
    %c1088 = arith.constant 1088 : index
    %62 = vector.load %arg15[%c0_24, %c1088] : memref<2x4096xf32, #tpu.memory_space<vmem>>, vector<2x64xf32>
    tpu.vector_store %arg15[%c0_24, %c1088], %61 {strides = array<i32>} : memref<2x4096xf32, #tpu.memory_space<vmem>>, vector<2x64xf32>,
    %63 = vector.extract_strided_slice %8 {offsets = [0, 18, 0], sizes = [2, 1, 64], strides = [1, 1, 1]} : vector<2x64x64xf32> to vector<2x1x64xf32>
    %64 = vector.shape_cast %63 : vector<2x1x64xf32> to vector<2x64xf32>
    %c0_25 = arith.constant 0 : index
    %c1152 = arith.constant 1152 : index
    %65 = vector.load %arg15[%c0_25, %c1152] : memref<2x4096xf32, #tpu.memory_space<vmem>>, vector<2x64xf32>
    tpu.vector_store %arg15[%c0_25, %c1152], %64 {strides = array<i32>} : memref<2x4096xf32, #tpu.memory_space<vmem>>, vector<2x64xf32>,
    %66 = vector.extract_strided_slice %8 {offsets = [0, 19, 0], sizes = [2, 1, 64], strides = [1, 1, 1]} : vector<2x64x64xf32> to vector<2x1x64xf32>
    %67 = vector.shape_cast %66 : vector<2x1x64xf32> to vector<2x64xf32>
    %c0_26 = arith.constant 0 : index
    %c1216 = arith.constant 1216 : index
    %68 = vector.load %arg15[%c0_26, %c1216] : memref<2x4096xf32, #tpu.memory_space<vmem>>, vector<2x64xf32>
    tpu.vector_store %arg15[%c0_26, %c1216], %67 {strides = array<i32>} : memref<2x4096xf32, #tpu.memory_space<vmem>>, vector<2x64xf32>,
    %69 = vector.extract_strided_slice %8 {offsets = [0, 20, 0], sizes = [2, 1, 64], strides = [1, 1, 1]} : vector<2x64x64xf32> to vector<2x1x64xf32>
    %70 = vector.shape_cast %69 : vector<2x1x64xf32> to vector<2x64xf32>
    %c0_27 = arith.constant 0 : index
    %c1280 = arith.constant 1280 : index
    %71 = vector.load %arg15[%c0_27, %c1280] : memref<2x4096xf32, #tpu.memory_space<vmem>>, vector<2x64xf32>
    tpu.vector_store %arg15[%c0_27, %c1280], %70 {strides = array<i32>} : memref<2x4096xf32, #tpu.memory_space<vmem>>, vector<2x64xf32>,
    %72 = vector.extract_strided_slice %8 {offsets = [0, 21, 0], sizes = [2, 1, 64], strides = [1, 1, 1]} : vector<2x64x64xf32> to vector<2x1x64xf32>
    %73 = vector.shape_cast %72 : vector<2x1x64xf32> to vector<2x64xf32>
    %c0_28 = arith.constant 0 : index
    %c1344 = arith.constant 1344 : index
    %74 = vector.load %arg15[%c0_28, %c1344] : memref<2x4096xf32, #tpu.memory_space<vmem>>, vector<2x64xf32>
    tpu.vector_store %arg15[%c0_28, %c1344], %73 {strides = array<i32>} : memref<2x4096xf32, #tpu.memory_space<vmem>>, vector<2x64xf32>,
    %75 = vector.extract_strided_slice %8 {offsets = [0, 22, 0], sizes = [2, 1, 64], strides = [1, 1, 1]} : vector<2x64x64xf32> to vector<2x1x64xf32>
    %76 = vector.shape_cast %75 : vector<2x1x64xf32> to vector<2x64xf32>
    %c0_29 = arith.constant 0 : index
    %c1408 = arith.constant 1408 : index
    %77 = vector.load %arg15[%c0_29, %c1408] : memref<2x4096xf32, #tpu.memory_space<vmem>>, vector<2x64xf32>
    tpu.vector_store %arg15[%c0_29, %c1408], %76 {strides = array<i32>} : memref<2x4096xf32, #tpu.memory_space<vmem>>, vector<2x64xf32>,
    %78 = vector.extract_strided_slice %8 {offsets = [0, 23, 0], sizes = [2, 1, 64], strides = [1, 1, 1]} : vector<2x64x64xf32> to vector<2x1x64xf32>
    %79 = vector.shape_cast %78 : vector<2x1x64xf32> to vector<2x64xf32>
    %c0_30 = arith.constant 0 : index
    %c1472 = arith.constant 1472 : index
    %80 = vector.load %arg15[%c0_30, %c1472] : memref<2x4096xf32, #tpu.memory_space<vmem>>, vector<2x64xf32>
    tpu.vector_store %arg15[%c0_30, %c1472], %79 {strides = array<i32>} : memref<2x4096xf32, #tpu.memory_space<vmem>>, vector<2x64xf32>,
    %81 = vector.extract_strided_slice %8 {offsets = [0, 24, 0], sizes = [2, 1, 64], strides = [1, 1, 1]} : vector<2x64x64xf32> to vector<2x1x64xf32>
    %82 = vector.shape_cast %81 : vector<2x1x64xf32> to vector<2x64xf32>
    %c0_31 = arith.constant 0 : index
    %c1536 = arith.constant 1536 : index
    %83 = vector.load %arg15[%c0_31, %c1536] : memref<2x4096xf32, #tpu.memory_space<vmem>>, vector<2x64xf32>
    tpu.vector_store %arg15[%c0_31, %c1536], %82 {strides = array<i32>} : memref<2x4096xf32, #tpu.memory_space<vmem>>, vector<2x64xf32>,
    %84 = vector.extract_strided_slice %8 {offsets = [0, 25, 0], sizes = [2, 1, 64], strides = [1, 1, 1]} : vector<2x64x64xf32> to vector<2x1x64xf32>
    %85 = vector.shape_cast %84 : vector<2x1x64xf32> to vector<2x64xf32>
    %c0_32 = arith.constant 0 : index
    %c1600 = arith.constant 1600 : index
    %86 = vector.load %arg15[%c0_32, %c1600] : memref<2x4096xf32, #tpu.memory_space<vmem>>, vector<2x64xf32>
    tpu.vector_store %arg15[%c0_32, %c1600], %85 {strides = array<i32>} : memref<2x4096xf32, #tpu.memory_space<vmem>>, vector<2x64xf32>,
    %87 = vector.extract_strided_slice %8 {offsets = [0, 26, 0], sizes = [2, 1, 64], strides = [1, 1, 1]} : vector<2x64x64xf32> to vector<2x1x64xf32>
    %88 = vector.shape_cast %87 : vector<2x1x64xf32> to vector<2x64xf32>
    %c0_33 = arith.constant 0 : index
    %c1664 = arith.constant 1664 : index
    %89 = vector.load %arg15[%c0_33, %c1664] : memref<2x4096xf32, #tpu.memory_space<vmem>>, vector<2x64xf32>
    tpu.vector_store %arg15[%c0_33, %c1664], %88 {strides = array<i32>} : memref<2x4096xf32, #tpu.memory_space<vmem>>, vector<2x64xf32>,
    %90 = vector.extract_strided_slice %8 {offsets = [0, 27, 0], sizes = [2, 1, 64], strides = [1, 1, 1]} : vector<2x64x64xf32> to vector<2x1x64xf32>
    %91 = vector.shape_cast %90 : vector<2x1x64xf32> to vector<2x64xf32>
    %c0_34 = arith.constant 0 : index
    %c1728 = arith.constant 1728 : index
    %92 = vector.load %arg15[%c0_34, %c1728] : memref<2x4096xf32, #tpu.memory_space<vmem>>, vector<2x64xf32>
    tpu.vector_store %arg15[%c0_34, %c1728], %91 {strides = array<i32>} : memref<2x4096xf32, #tpu.memory_space<vmem>>, vector<2x64xf32>,
    %93 = vector.extract_strided_slice %8 {offsets = [0, 28, 0], sizes = [2, 1, 64], strides = [1, 1, 1]} : vector<2x64x64xf32> to vector<2x1x64xf32>
    %94 = vector.shape_cast %93 : vector<2x1x64xf32> to vector<2x64xf32>
    %c0_35 = arith.constant 0 : index
    %c1792 = arith.constant 1792 : index
    %95 = vector.load %arg15[%c0_35, %c1792] : memref<2x4096xf32, #tpu.memory_space<vmem>>, vector<2x64xf32>
    tpu.vector_store %arg15[%c0_35, %c1792], %94 {strides = array<i32>} : memref<2x4096xf32, #tpu.memory_space<vmem>>, vector<2x64xf32>,
    %96 = vector.extract_strided_slice %8 {offsets = [0, 29, 0], sizes = [2, 1, 64], strides = [1, 1, 1]} : vector<2x64x64xf32> to vector<2x1x64xf32>
    %97 = vector.shape_cast %96 : vector<2x1x64xf32> to vector<2x64xf32>
    %c0_36 = arith.constant 0 : index
    %c1856 = arith.constant 1856 : index
    %98 = vector.load %arg15[%c0_36, %c1856] : memref<2x4096xf32, #tpu.memory_space<vmem>>, vector<2x64xf32>
    tpu.vector_store %arg15[%c0_36, %c1856], %97 {strides = array<i32>} : memref<2x4096xf32, #tpu.memory_space<vmem>>, vector<2x64xf32>,
    %99 = vector.extract_strided_slice %8 {offsets = [0, 30, 0], sizes = [2, 1, 64], strides = [1, 1, 1]} : vector<2x64x64xf32> to vector<2x1x64xf32>
    %100 = vector.shape_cast %99 : vector<2x1x64xf32> to vector<2x64xf32>
    %c0_37 = arith.constant 0 : index
    %c1920 = arith.constant 1920 : index
    %101 = vector.load %arg15[%c0_37, %c1920] : memref<2x4096xf32, #tpu.memory_space<vmem>>, vector<2x64xf32>
    tpu.vector_store %arg15[%c0_37, %c1920], %100 {strides = array<i32>} : memref<2x4096xf32, #tpu.memory_space<vmem>>, vector<2x64xf32>,
    %102 = vector.extract_strided_slice %8 {offsets = [0, 31, 0], sizes = [2, 1, 64], strides = [1, 1, 1]} : vector<2x64x64xf32> to vector<2x1x64xf32>
    %103 = vector.shape_cast %102 : vector<2x1x64xf32> to vector<2x64xf32>
    %c0_38 = arith.constant 0 : index
    %c1984 = arith.constant 1984 : index
    %104 = vector.load %arg15[%c0_38, %c1984] : memref<2x4096xf32, #tpu.memory_space<vmem>>, vector<2x64xf32>
    tpu.vector_store %arg15[%c0_38, %c1984], %103 {strides = array<i32>} : memref<2x4096xf32, #tpu.memory_space<vmem>>, vector<2x64xf32>,
    %105 = vector.extract_strided_slice %8 {offsets = [0, 32, 0], sizes = [2, 1, 64], strides = [1, 1, 1]} : vector<2x64x64xf32> to vector<2x1x64xf32>
    %106 = vector.shape_cast %105 : vector<2x1x64xf32> to vector<2x64xf32>
    %c0_39 = arith.constant 0 : index
    %c2048 = arith.constant 2048 : index
    %107 = vector.load %arg15[%c0_39, %c2048] : memref<2x4096xf32, #tpu.memory_space<vmem>>, vector<2x64xf32>
    tpu.vector_store %arg15[%c0_39, %c2048], %106 {strides = array<i32>} : memref<2x4096xf32, #tpu.memory_space<vmem>>, vector<2x64xf32>,
    %108 = vector.extract_strided_slice %8 {offsets = [0, 33, 0], sizes = [2, 1, 64], strides = [1, 1, 1]} : vector<2x64x64xf32> to vector<2x1x64xf32>
    %109 = vector.shape_cast %108 : vector<2x1x64xf32> to vector<2x64xf32>
    %c0_40 = arith.constant 0 : index
    %c2112 = arith.constant 2112 : index
    %110 = vector.load %arg15[%c0_40, %c2112] : memref<2x4096xf32, #tpu.memory_space<vmem>>, vector<2x64xf32>
    tpu.vector_store %arg15[%c0_40, %c2112], %109 {strides = array<i32>} : memref<2x4096xf32, #tpu.memory_space<vmem>>, vector<2x64xf32>,
    %111 = vector.extract_strided_slice %8 {offsets = [0, 34, 0], sizes = [2, 1, 64], strides = [1, 1, 1]} : vector<2x64x64xf32> to vector<2x1x64xf32>
    %112 = vector.shape_cast %111 : vector<2x1x64xf32> to vector<2x64xf32>
    %c0_41 = arith.constant 0 : index
    %c2176 = arith.constant 2176 : index
    %113 = vector.load %arg15[%c0_41, %c2176] : memref<2x4096xf32, #tpu.memory_space<vmem>>, vector<2x64xf32>
    tpu.vector_store %arg15[%c0_41, %c2176], %112 {strides = array<i32>} : memref<2x4096xf32, #tpu.memory_space<vmem>>, vector<2x64xf32>,
    %114 = vector.extract_strided_slice %8 {offsets = [0, 35, 0], sizes = [2, 1, 64], strides = [1, 1, 1]} : vector<2x64x64xf32> to vector<2x1x64xf32>
    %115 = vector.shape_cast %114 : vector<2x1x64xf32> to vector<2x64xf32>
    %c0_42 = arith.constant 0 : index
    %c2240 = arith.constant 2240 : index
    %116 = vector.load %arg15[%c0_42, %c2240] : memref<2x4096xf32, #tpu.memory_space<vmem>>, vector<2x64xf32>
    tpu.vector_store %arg15[%c0_42, %c2240], %115 {strides = array<i32>} : memref<2x4096xf32, #tpu.memory_space<vmem>>, vector<2x64xf32>,
    %117 = vector.extract_strided_slice %8 {offsets = [0, 36, 0], sizes = [2, 1, 64], strides = [1, 1, 1]} : vector<2x64x64xf32> to vector<2x1x64xf32>
    %118 = vector.shape_cast %117 : vector<2x1x64xf32> to vector<2x64xf32>
    %c0_43 = arith.constant 0 : index
    %c2304 = arith.constant 2304 : index
    %119 = vector.load %arg15[%c0_43, %c2304] : memref<2x4096xf32, #tpu.memory_space<vmem>>, vector<2x64xf32>
    tpu.vector_store %arg15[%c0_43, %c2304], %118 {strides = array<i32>} : memref<2x4096xf32, #tpu.memory_space<vmem>>, vector<2x64xf32>,
    %120 = vector.extract_strided_slice %8 {offsets = [0, 37, 0], sizes = [2, 1, 64], strides = [1, 1, 1]} : vector<2x64x64xf32> to vector<2x1x64xf32>
    %121 = vector.shape_cast %120 : vector<2x1x64xf32> to vector<2x64xf32>
    %c0_44 = arith.constant 0 : index
    %c2368 = arith.constant 2368 : index
    %122 = vector.load %arg15[%c0_44, %c2368] : memref<2x4096xf32, #tpu.memory_space<vmem>>, vector<2x64xf32>
    tpu.vector_store %arg15[%c0_44, %c2368], %121 {strides = array<i32>} : memref<2x4096xf32, #tpu.memory_space<vmem>>, vector<2x64xf32>,
    %123 = vector.extract_strided_slice %8 {offsets = [0, 38, 0], sizes = [2, 1, 64], strides = [1, 1, 1]} : vector<2x64x64xf32> to vector<2x1x64xf32>
    %124 = vector.shape_cast %123 : vector<2x1x64xf32> to vector<2x64xf32>
    %c0_45 = arith.constant 0 : index
    %c2432 = arith.constant 2432 : index
    %125 = vector.load %arg15[%c0_45, %c2432] : memref<2x4096xf32, #tpu.memory_space<vmem>>, vector<2x64xf32>
    tpu.vector_store %arg15[%c0_45, %c2432], %124 {strides = array<i32>} : memref<2x4096xf32, #tpu.memory_space<vmem>>, vector<2x64xf32>,
    %126 = vector.extract_strided_slice %8 {offsets = [0, 39, 0], sizes = [2, 1, 64], strides = [1, 1, 1]} : vector<2x64x64xf32> to vector<2x1x64xf32>
    %127 = vector.shape_cast %126 : vector<2x1x64xf32> to vector<2x64xf32>
    %c0_46 = arith.constant 0 : index
    %c2496 = arith.constant 2496 : index
    %128 = vector.load %arg15[%c0_46, %c2496] : memref<2x4096xf32, #tpu.memory_space<vmem>>, vector<2x64xf32>
    tpu.vector_store %arg15[%c0_46, %c2496], %127 {strides = array<i32>} : memref<2x4096xf32, #tpu.memory_space<vmem>>, vector<2x64xf32>,
    %129 = vector.extract_strided_slice %8 {offsets = [0, 40, 0], sizes = [2, 1, 64], strides = [1, 1, 1]} : vector<2x64x64xf32> to vector<2x1x64xf32>
    %130 = vector.shape_cast %129 : vector<2x1x64xf32> to vector<2x64xf32>
    %c0_47 = arith.constant 0 : index
    %c2560 = arith.constant 2560 : index
    %131 = vector.load %arg15[%c0_47, %c2560] : memref<2x4096xf32, #tpu.memory_space<vmem>>, vector<2x64xf32>
    tpu.vector_store %arg15[%c0_47, %c2560], %130 {strides = array<i32>} : memref<2x4096xf32, #tpu.memory_space<vmem>>, vector<2x64xf32>,
    %132 = vector.extract_strided_slice %8 {offsets = [0, 41, 0], sizes = [2, 1, 64], strides = [1, 1, 1]} : vector<2x64x64xf32> to vector<2x1x64xf32>
    %133 = vector.shape_cast %132 : vector<2x1x64xf32> to vector<2x64xf32>
    %c0_48 = arith.constant 0 : index
    %c2624 = arith.constant 2624 : index
    %134 = vector.load %arg15[%c0_48, %c2624] : memref<2x4096xf32, #tpu.memory_space<vmem>>, vector<2x64xf32>
    tpu.vector_store %arg15[%c0_48, %c2624], %133 {strides = array<i32>} : memref<2x4096xf32, #tpu.memory_space<vmem>>, vector<2x64xf32>,
    %135 = vector.extract_strided_slice %8 {offsets = [0, 42, 0], sizes = [2, 1, 64], strides = [1, 1, 1]} : vector<2x64x64xf32> to vector<2x1x64xf32>
    %136 = vector.shape_cast %135 : vector<2x1x64xf32> to vector<2x64xf32>
    %c0_49 = arith.constant 0 : index
    %c2688 = arith.constant 2688 : index
    %137 = vector.load %arg15[%c0_49, %c2688] : memref<2x4096xf32, #tpu.memory_space<vmem>>, vector<2x64xf32>
    tpu.vector_store %arg15[%c0_49, %c2688], %136 {strides = array<i32>} : memref<2x4096xf32, #tpu.memory_space<vmem>>, vector<2x64xf32>,
    %138 = vector.extract_strided_slice %8 {offsets = [0, 43, 0], sizes = [2, 1, 64], strides = [1, 1, 1]} : vector<2x64x64xf32> to vector<2x1x64xf32>
    %139 = vector.shape_cast %138 : vector<2x1x64xf32> to vector<2x64xf32>
    %c0_50 = arith.constant 0 : index
    %c2752 = arith.constant 2752 : index
    %140 = vector.load %arg15[%c0_50, %c2752] : memref<2x4096xf32, #tpu.memory_space<vmem>>, vector<2x64xf32>
    tpu.vector_store %arg15[%c0_50, %c2752], %139 {strides = array<i32>} : memref<2x4096xf32, #tpu.memory_space<vmem>>, vector<2x64xf32>,
    %141 = vector.extract_strided_slice %8 {offsets = [0, 44, 0], sizes = [2, 1, 64], strides = [1, 1, 1]} : vector<2x64x64xf32> to vector<2x1x64xf32>
    %142 = vector.shape_cast %141 : vector<2x1x64xf32> to vector<2x64xf32>
    %c0_51 = arith.constant 0 : index
    %c2816 = arith.constant 2816 : index
    %143 = vector.load %arg15[%c0_51, %c2816] : memref<2x4096xf32, #tpu.memory_space<vmem>>, vector<2x64xf32>
    tpu.vector_store %arg15[%c0_51, %c2816], %142 {strides = array<i32>} : memref<2x4096xf32, #tpu.memory_space<vmem>>, vector<2x64xf32>,
    %144 = vector.extract_strided_slice %8 {offsets = [0, 45, 0], sizes = [2, 1, 64], strides = [1, 1, 1]} : vector<2x64x64xf32> to vector<2x1x64xf32>
    %145 = vector.shape_cast %144 : vector<2x1x64xf32> to vector<2x64xf32>
    %c0_52 = arith.constant 0 : index
    %c2880 = arith.constant 2880 : index
    %146 = vector.load %arg15[%c0_52, %c2880] : memref<2x4096xf32, #tpu.memory_space<vmem>>, vector<2x64xf32>
    tpu.vector_store %arg15[%c0_52, %c2880], %145 {strides = array<i32>} : memref<2x4096xf32, #tpu.memory_space<vmem>>, vector<2x64xf32>,
    %147 = vector.extract_strided_slice %8 {offsets = [0, 46, 0], sizes = [2, 1, 64], strides = [1, 1, 1]} : vector<2x64x64xf32> to vector<2x1x64xf32>
    %148 = vector.shape_cast %147 : vector<2x1x64xf32> to vector<2x64xf32>
    %c0_53 = arith.constant 0 : index
    %c2944 = arith.constant 2944 : index
    %149 = vector.load %arg15[%c0_53, %c2944] : memref<2x4096xf32, #tpu.memory_space<vmem>>, vector<2x64xf32>
    tpu.vector_store %arg15[%c0_53, %c2944], %148 {strides = array<i32>} : memref<2x4096xf32, #tpu.memory_space<vmem>>, vector<2x64xf32>,
    %150 = vector.extract_strided_slice %8 {offsets = [0, 47, 0], sizes = [2, 1, 64], strides = [1, 1, 1]} : vector<2x64x64xf32> to vector<2x1x64xf32>
    %151 = vector.shape_cast %150 : vector<2x1x64xf32> to vector<2x64xf32>
    %c0_54 = arith.constant 0 : index
    %c3008 = arith.constant 3008 : index
    %152 = vector.load %arg15[%c0_54, %c3008] : memref<2x4096xf32, #tpu.memory_space<vmem>>, vector<2x64xf32>
    tpu.vector_store %arg15[%c0_54, %c3008], %151 {strides = array<i32>} : memref<2x4096xf32, #tpu.memory_space<vmem>>, vector<2x64xf32>,
    %153 = vector.extract_strided_slice %8 {offsets = [0, 48, 0], sizes = [2, 1, 64], strides = [1, 1, 1]} : vector<2x64x64xf32> to vector<2x1x64xf32>
    %154 = vector.shape_cast %153 : vector<2x1x64xf32> to vector<2x64xf32>
    %c0_55 = arith.constant 0 : index
    %c3072 = arith.constant 3072 : index
    %155 = vector.load %arg15[%c0_55, %c3072] : memref<2x4096xf32, #tpu.memory_space<vmem>>, vector<2x64xf32>
    tpu.vector_store %arg15[%c0_55, %c3072], %154 {strides = array<i32>} : memref<2x4096xf32, #tpu.memory_space<vmem>>, vector<2x64xf32>,
    %156 = vector.extract_strided_slice %8 {offsets = [0, 49, 0], sizes = [2, 1, 64], strides = [1, 1, 1]} : vector<2x64x64xf32> to vector<2x1x64xf32>
    %157 = vector.shape_cast %156 : vector<2x1x64xf32> to vector<2x64xf32>
    %c0_56 = arith.constant 0 : index
    %c3136 = arith.constant 3136 : index
    %158 = vector.load %arg15[%c0_56, %c3136] : memref<2x4096xf32, #tpu.memory_space<vmem>>, vector<2x64xf32>
    tpu.vector_store %arg15[%c0_56, %c3136], %157 {strides = array<i32>} : memref<2x4096xf32, #tpu.memory_space<vmem>>, vector<2x64xf32>,
    %159 = vector.extract_strided_slice %8 {offsets = [0, 50, 0], sizes = [2, 1, 64], strides = [1, 1, 1]} : vector<2x64x64xf32> to vector<2x1x64xf32>
    %160 = vector.shape_cast %159 : vector<2x1x64xf32> to vector<2x64xf32>
    %c0_57 = arith.constant 0 : index
    %c3200 = arith.constant 3200 : index
    %161 = vector.load %arg15[%c0_57, %c3200] : memref<2x4096xf32, #tpu.memory_space<vmem>>, vector<2x64xf32>
    tpu.vector_store %arg15[%c0_57, %c3200], %160 {strides = array<i32>} : memref<2x4096xf32, #tpu.memory_space<vmem>>, vector<2x64xf32>,
    %162 = vector.extract_strided_slice %8 {offsets = [0, 51, 0], sizes = [2, 1, 64], strides = [1, 1, 1]} : vector<2x64x64xf32> to vector<2x1x64xf32>
    %163 = vector.shape_cast %162 : vector<2x1x64xf32> to vector<2x64xf32>
    %c0_58 = arith.constant 0 : index
    %c3264 = arith.constant 3264 : index
    %164 = vector.load %arg15[%c0_58, %c3264] : memref<2x4096xf32, #tpu.memory_space<vmem>>, vector<2x64xf32>
    tpu.vector_store %arg15[%c0_58, %c3264], %163 {strides = array<i32>} : memref<2x4096xf32, #tpu.memory_space<vmem>>, vector<2x64xf32>,
    %165 = vector.extract_strided_slice %8 {offsets = [0, 52, 0], sizes = [2, 1, 64], strides = [1, 1, 1]} : vector<2x64x64xf32> to vector<2x1x64xf32>
    %166 = vector.shape_cast %165 : vector<2x1x64xf32> to vector<2x64xf32>
    %c0_59 = arith.constant 0 : index
    %c3328 = arith.constant 3328 : index
    %167 = vector.load %arg15[%c0_59, %c3328] : memref<2x4096xf32, #tpu.memory_space<vmem>>, vector<2x64xf32>
    tpu.vector_store %arg15[%c0_59, %c3328], %166 {strides = array<i32>} : memref<2x4096xf32, #tpu.memory_space<vmem>>, vector<2x64xf32>,
    %168 = vector.extract_strided_slice %8 {offsets = [0, 53, 0], sizes = [2, 1, 64], strides = [1, 1, 1]} : vector<2x64x64xf32> to vector<2x1x64xf32>
    %169 = vector.shape_cast %168 : vector<2x1x64xf32> to vector<2x64xf32>
    %c0_60 = arith.constant 0 : index
    %c3392 = arith.constant 3392 : index
    %170 = vector.load %arg15[%c0_60, %c3392] : memref<2x4096xf32, #tpu.memory_space<vmem>>, vector<2x64xf32>
    tpu.vector_store %arg15[%c0_60, %c3392], %169 {strides = array<i32>} : memref<2x4096xf32, #tpu.memory_space<vmem>>, vector<2x64xf32>,
    %171 = vector.extract_strided_slice %8 {offsets = [0, 54, 0], sizes = [2, 1, 64], strides = [1, 1, 1]} : vector<2x64x64xf32> to vector<2x1x64xf32>
    %172 = vector.shape_cast %171 : vector<2x1x64xf32> to vector<2x64xf32>
    %c0_61 = arith.constant 0 : index
    %c3456 = arith.constant 3456 : index
    %173 = vector.load %arg15[%c0_61, %c3456] : memref<2x4096xf32, #tpu.memory_space<vmem>>, vector<2x64xf32>
    tpu.vector_store %arg15[%c0_61, %c3456], %172 {strides = array<i32>} : memref<2x4096xf32, #tpu.memory_space<vmem>>, vector<2x64xf32>,
    %174 = vector.extract_strided_slice %8 {offsets = [0, 55, 0], sizes = [2, 1, 64], strides = [1, 1, 1]} : vector<2x64x64xf32> to vector<2x1x64xf32>
    %175 = vector.shape_cast %174 : vector<2x1x64xf32> to vector<2x64xf32>
    %c0_62 = arith.constant 0 : index
    %c3520 = arith.constant 3520 : index
    %176 = vector.load %arg15[%c0_62, %c3520] : memref<2x4096xf32, #tpu.memory_space<vmem>>, vector<2x64xf32>
    tpu.vector_store %arg15[%c0_62, %c3520], %175 {strides = array<i32>} : memref<2x4096xf32, #tpu.memory_space<vmem>>, vector<2x64xf32>,
    %177 = vector.extract_strided_slice %8 {offsets = [0, 56, 0], sizes = [2, 1, 64], strides = [1, 1, 1]} : vector<2x64x64xf32> to vector<2x1x64xf32>
    %178 = vector.shape_cast %177 : vector<2x1x64xf32> to vector<2x64xf32>
    %c0_63 = arith.constant 0 : index
    %c3584 = arith.constant 3584 : index
    %179 = vector.load %arg15[%c0_63, %c3584] : memref<2x4096xf32, #tpu.memory_space<vmem>>, vector<2x64xf32>
    tpu.vector_store %arg15[%c0_63, %c3584], %178 {strides = array<i32>} : memref<2x4096xf32, #tpu.memory_space<vmem>>, vector<2x64xf32>,
    %180 = vector.extract_strided_slice %8 {offsets = [0, 57, 0], sizes = [2, 1, 64], strides = [1, 1, 1]} : vector<2x64x64xf32> to vector<2x1x64xf32>
    %181 = vector.shape_cast %180 : vector<2x1x64xf32> to vector<2x64xf32>
    %c0_64 = arith.constant 0 : index
    %c3648 = arith.constant 3648 : index
    %182 = vector.load %arg15[%c0_64, %c3648] : memref<2x4096xf32, #tpu.memory_space<vmem>>, vector<2x64xf32>
    tpu.vector_store %arg15[%c0_64, %c3648], %181 {strides = array<i32>} : memref<2x4096xf32, #tpu.memory_space<vmem>>, vector<2x64xf32>,
    %183 = vector.extract_strided_slice %8 {offsets = [0, 58, 0], sizes = [2, 1, 64], strides = [1, 1, 1]} : vector<2x64x64xf32> to vector<2x1x64xf32>
    %184 = vector.shape_cast %183 : vector<2x1x64xf32> to vector<2x64xf32>
    %c0_65 = arith.constant 0 : index
    %c3712 = arith.constant 3712 : index
    %185 = vector.load %arg15[%c0_65, %c3712] : memref<2x4096xf32, #tpu.memory_space<vmem>>, vector<2x64xf32>
    tpu.vector_store %arg15[%c0_65, %c3712], %184 {strides = array<i32>} : memref<2x4096xf32, #tpu.memory_space<vmem>>, vector<2x64xf32>,
    %186 = vector.extract_strided_slice %8 {offsets = [0, 59, 0], sizes = [2, 1, 64], strides = [1, 1, 1]} : vector<2x64x64xf32> to vector<2x1x64xf32>
    %187 = vector.shape_cast %186 : vector<2x1x64xf32> to vector<2x64xf32>
    %c0_66 = arith.constant 0 : index
    %c3776 = arith.constant 3776 : index
    %188 = vector.load %arg15[%c0_66, %c3776] : memref<2x4096xf32, #tpu.memory_space<vmem>>, vector<2x64xf32>
    tpu.vector_store %arg15[%c0_66, %c3776], %187 {strides = array<i32>} : memref<2x4096xf32, #tpu.memory_space<vmem>>, vector<2x64xf32>,
    %189 = vector.extract_strided_slice %8 {offsets = [0, 60, 0], sizes = [2, 1, 64], strides = [1, 1, 1]} : vector<2x64x64xf32> to vector<2x1x64xf32>
    %190 = vector.shape_cast %189 : vector<2x1x64xf32> to vector<2x64xf32>
    %c0_67 = arith.constant 0 : index
    %c3840 = arith.constant 3840 : index
    %191 = vector.load %arg15[%c0_67, %c3840] : memref<2x4096xf32, #tpu.memory_space<vmem>>, vector<2x64xf32>
    tpu.vector_store %arg15[%c0_67, %c3840], %190 {strides = array<i32>} : memref<2x4096xf32, #tpu.memory_space<vmem>>, vector<2x64xf32>,
    %192 = vector.extract_strided_slice %8 {offsets = [0, 61, 0], sizes = [2, 1, 64], strides = [1, 1, 1]} : vector<2x64x64xf32> to vector<2x1x64xf32>
    %193 = vector.shape_cast %192 : vector<2x1x64xf32> to vector<2x64xf32>
    %c0_68 = arith.constant 0 : index
    %c3904 = arith.constant 3904 : index
    %194 = vector.load %arg15[%c0_68, %c3904] : memref<2x4096xf32, #tpu.memory_space<vmem>>, vector<2x64xf32>
    tpu.vector_store %arg15[%c0_68, %c3904], %193 {strides = array<i32>} : memref<2x4096xf32, #tpu.memory_space<vmem>>, vector<2x64xf32>,
    %195 = vector.extract_strided_slice %8 {offsets = [0, 62, 0], sizes = [2, 1, 64], strides = [1, 1, 1]} : vector<2x64x64xf32> to vector<2x1x64xf32>
    %196 = vector.shape_cast %195 : vector<2x1x64xf32> to vector<2x64xf32>
    %c0_69 = arith.constant 0 : index
    %c3968 = arith.constant 3968 : index
    %197 = vector.load %arg15[%c0_69, %c3968] : memref<2x4096xf32, #tpu.memory_space<vmem>>, vector<2x64xf32>
    tpu.vector_store %arg15[%c0_69, %c3968], %196 {strides = array<i32>} : memref<2x4096xf32, #tpu.memory_space<vmem>>, vector<2x64xf32>,
    %198 = vector.extract_strided_slice %8 {offsets = [0, 63, 0], sizes = [2, 1, 64], strides = [1, 1, 1]} : vector<2x64x64xf32> to vector<2x1x64xf32>
    %199 = vector.shape_cast %198 : vector<2x1x64xf32> to vector<2x64xf32>
    %c0_70 = arith.constant 0 : index
    %c4032 = arith.constant 4032 : index
    %200 = vector.load %arg15[%c0_70, %c4032] : memref<2x4096xf32, #tpu.memory_space<vmem>>, vector<2x64xf32>
    tpu.vector_store %arg15[%c0_70, %c4032], %199 {strides = array<i32>} : memref<2x4096xf32, #tpu.memory_space<vmem>>, vector<2x64xf32>,
    %c0_71 = arith.constant 0 : index
    %c0_72 = arith.constant 0 : index
    %201 = vector.load %arg15[%c0_71, %c0_72] : memref<2x4096xf32, #tpu.memory_space<vmem>>, vector<2x4096xf32>
    %202 = arith.truncf %201 : vector<2x4096xf32> to vector<2x4096xbf16>
    %c0_73 = arith.constant 0 : index
    %c0_74 = arith.constant 0 : index
    %203 = vector.load %arg4[%c0_73, %c0_74] : memref<4096x32xbf16, #tpu.memory_space<vmem>>, vector<4096x32xbf16>
    %cst_75 = arith.constant dense<0.000000e+00> : vector<2x32xf32>
    %204 = tpu.matmul %202, %203, %cst_75 {dimension_numbers = #tpu.dot_dimension_numbers<[1], [0], [0], [1], [0, 0, 1, 1], [], []>} : vector<2x4096xbf16>, vector<4096x32xbf16>, vector<2x32xf32> -> vector<2x32xf32>
    %c0_76 = arith.constant 0 : index
    %c0_77 = arith.constant 0 : index
    %205 = vector.load %arg5[%c0_76, %c0_77] : memref<1x32xf32, #tpu.memory_space<vmem>>, vector<1x32xf32>
    %206 = vector.broadcast %205 : vector<1x32xf32> to vector<2x32xf32>
    %207 = arith.addf %204, %206 : vector<2x32xf32>
    %cst_78 = arith.constant dense<0.000000e+00> : vector<32xf32>
    %208 = vector.multi_reduction <add>, %207, %cst_78 [0] : vector<2x32xf32> to vector<32xf32>
    %209 = vector.shape_cast %208 : vector<32xf32> to vector<1x32xf32>
    %cst_79 = arith.constant 2.000000e+00 : f32
    %210 = vector.broadcast %cst_79 : f32 to vector<1x32xf32>
    %211 = arith.divf %209, %210 : vector<1x32xf32>
    %212 = vector.broadcast %211 : vector<1x32xf32> to vector<2x32xf32>
    %213 = arith.subf %207, %212 : vector<2x32xf32>
    %214 = arith.mulf %213, %213 : vector<2x32xf32>
    %cst_80 = arith.constant dense<0.000000e+00> : vector<32xf32>
    %215 = vector.multi_reduction <add>, %214, %cst_80 [0] : vector<2x32xf32> to vector<32xf32>
    %216 = vector.shape_cast %215 : vector<32xf32> to vector<1x32xf32>
    %cst_81 = arith.constant 2.000000e+00 : f32
    %217 = vector.broadcast %cst_81 : f32 to vector<1x32xf32>
    %218 = arith.divf %216, %217 : vector<1x32xf32>
    %219 = vector.broadcast %211 : vector<1x32xf32> to vector<2x32xf32>
    %220 = arith.subf %207, %219 : vector<2x32xf32>
    %cst_82 = arith.constant 8.000000e-01 : f32
    %221 = vector.broadcast %cst_82 : f32 to vector<1x32xf32>
    %222 = arith.addf %218, %221 : vector<1x32xf32>
    %223 = math.rsqrt %222 : vector<1x32xf32>
    %224 = vector.broadcast %223 : vector<1x32xf32> to vector<2x32xf32>
    %225 = arith.mulf %220, %224 : vector<2x32xf32>
    %c0_83 = arith.constant 0 : index
    %c0_84 = arith.constant 0 : index
    %226 = vector.load %arg6[%c0_83, %c0_84] : memref<1x32xf32, #tpu.memory_space<vmem>>, vector<1x32xf32>
    %227 = vector.broadcast %226 : vector<1x32xf32> to vector<2x32xf32>
    %228 = arith.mulf %225, %227 : vector<2x32xf32>
    %c0_85 = arith.constant 0 : index
    %c0_86 = arith.constant 0 : index
    %229 = vector.load %arg7[%c0_85, %c0_86] : memref<1x32xf32, #tpu.memory_space<vmem>>, vector<1x32xf32>
    %230 = vector.broadcast %229 : vector<1x32xf32> to vector<2x32xf32>
    %231 = arith.addf %228, %230 : vector<2x32xf32>
    %cst_87 = arith.constant 0.000000e+00 : f32
    %232 = vector.broadcast %cst_87 : f32 to vector<2x32xf32>
    %233 = arith.maximumf %231, %232 : vector<2x32xf32>
    %234 = arith.truncf %233 : vector<2x32xf32> to vector<2x32xbf16>
    %c0_88 = arith.constant 0 : index
    %c0_89 = arith.constant 0 : index
    %235 = vector.load %arg8[%c0_88, %c0_89] : memref<32x4096xbf16, #tpu.memory_space<vmem>>, vector<32x4096xbf16>
    %cst_90 = arith.constant dense<0.000000e+00> : vector<2x4096xf32>
    %236 = tpu.matmul %234, %235, %cst_90 {dimension_numbers = #tpu.dot_dimension_numbers<[1], [0], [0], [1], [0, 0, 1, 1], [], []>} : vector<2x32xbf16>, vector<32x4096xbf16>, vector<2x4096xf32> -> vector<2x4096xf32>
    %c0_91 = arith.constant 0 : index
    %c0_92 = arith.constant 0 : index
    %237 = vector.load %arg9[%c0_91, %c0_92] : memref<1x4096xf32, #tpu.memory_space<vmem>>, vector<1x4096xf32>
    %238 = vector.broadcast %237 : vector<1x4096xf32> to vector<2x4096xf32>
    %239 = arith.addf %236, %238 : vector<2x4096xf32>
    %cst_93 = arith.constant dense<0.000000e+00> : vector<4096xf32>
    %240 = vector.multi_reduction <add>, %239, %cst_93 [0] : vector<2x4096xf32> to vector<4096xf32>
    %241 = vector.shape_cast %240 : vector<4096xf32> to vector<1x4096xf32>
    %cst_94 = arith.constant 2.000000e+00 : f32
    %242 = vector.broadcast %cst_94 : f32 to vector<1x4096xf32>
    %243 = arith.divf %241, %242 : vector<1x4096xf32>
    %244 = vector.broadcast %243 : vector<1x4096xf32> to vector<2x4096xf32>
    %245 = arith.subf %239, %244 : vector<2x4096xf32>
    %246 = arith.mulf %245, %245 : vector<2x4096xf32>
    %cst_95 = arith.constant dense<0.000000e+00> : vector<4096xf32>
    %247 = vector.multi_reduction <add>, %246, %cst_95 [0] : vector<2x4096xf32> to vector<4096xf32>
    %248 = vector.shape_cast %247 : vector<4096xf32> to vector<1x4096xf32>
    %cst_96 = arith.constant 2.000000e+00 : f32
    %249 = vector.broadcast %cst_96 : f32 to vector<1x4096xf32>
    %250 = arith.divf %248, %249 : vector<1x4096xf32>
    %251 = vector.broadcast %243 : vector<1x4096xf32> to vector<2x4096xf32>
    %252 = arith.subf %239, %251 : vector<2x4096xf32>
    %cst_97 = arith.constant 9.99999974E-6 : f32
    %253 = vector.broadcast %cst_97 : f32 to vector<1x4096xf32>
    %254 = arith.addf %250, %253 : vector<1x4096xf32>
    %255 = math.rsqrt %254 : vector<1x4096xf32>
    %256 = vector.broadcast %255 : vector<1x4096xf32> to vector<2x4096xf32>
    %257 = arith.mulf %252, %256 : vector<2x4096xf32>
    %c0_98 = arith.constant 0 : index
    %c0_99 = arith.constant 0 : index
    %258 = vector.load %arg10[%c0_98, %c0_99] : memref<1x4096xf32, #tpu.memory_space<vmem>>, vector<1x4096xf32>
    %259 = vector.broadcast %258 : vector<1x4096xf32> to vector<2x4096xf32>
    %260 = arith.mulf %257, %259 : vector<2x4096xf32>
    %c0_100 = arith.constant 0 : index
    %c0_101 = arith.constant 0 : index
    %261 = vector.load %arg11[%c0_100, %c0_101] : memref<1x4096xf32, #tpu.memory_space<vmem>>, vector<1x4096xf32>
    %262 = vector.broadcast %261 : vector<1x4096xf32> to vector<2x4096xf32>
    %263 = arith.addf %260, %262 : vector<2x4096xf32>
    %cst_102 = arith.constant 0.000000e+00 : f32
    %264 = vector.broadcast %cst_102 : f32 to vector<2x4096xf32>
    %265 = arith.maximumf %263, %264 : vector<2x4096xf32>
    %cst_103 = arith.constant 0.000000e+00 : f32
    %266 = vector.broadcast %cst_103 : f32 to vector<2x10x10x64xf32>
    %c0_104 = arith.constant 0 : index
    %c0_105 = arith.constant 0 : index
    %c0_106 = arith.constant 0 : index
    %c0_107 = arith.constant 0 : index
    %267 = vector.load %arg16[%c0_104, %c0_105, %c0_106, %c0_107] : memref<2x10x10x64xf32, #tpu.memory_space<vmem>>, vector<2x10x10x64xf32>
    tpu.vector_store %arg16[%c0_104, %c0_105, %c0_106, %c0_107], %266 {strides = array<i32>} : memref<2x10x10x64xf32, #tpu.memory_space<vmem>>, vector<2x10x10x64xf32>,
    %268 = vector.extract_strided_slice %265 {offsets = [0, 0], sizes = [2, 64], strides = [1, 1]} : vector<2x4096xf32> to vector<2x64xf32>
    %c0_108 = arith.constant 0 : index
    %c1 = arith.constant 1 : index
    %c1_109 = arith.constant 1 : index
    %c0_110 = arith.constant 0 : index
    %269 = vector.load %arg16[%c0_108, %c1, %c1_109, %c0_110] : memref<2x10x10x64xf32, #tpu.memory_space<vmem>>, vector<2x1x1x64xf32>
    %270 = vector.shape_cast %269 : vector<2x1x1x64xf32> to vector<2x64xf32>
    %271 = vector.shape_cast %268 : vector<2x64xf32> to vector<2x1x1x64xf32>
    tpu.vector_store %arg16[%c0_108, %c1, %c1_109, %c0_110], %271 {strides = array<i32>} : memref<2x10x10x64xf32, #tpu.memory_space<vmem>>, vector<2x1x1x64xf32>,
    %272 = vector.extract_strided_slice %265 {offsets = [0, 64], sizes = [2, 64], strides = [1, 1]} : vector<2x4096xf32> to vector<2x64xf32>
    %c0_111 = arith.constant 0 : index
    %c1_112 = arith.constant 1 : index
    %c2 = arith.constant 2 : index
    %c0_113 = arith.constant 0 : index
    %273 = vector.load %arg16[%c0_111, %c1_112, %c2, %c0_113] : memref<2x10x10x64xf32, #tpu.memory_space<vmem>>, vector<2x1x1x64xf32>
    %274 = vector.shape_cast %273 : vector<2x1x1x64xf32> to vector<2x64xf32>
    %275 = vector.shape_cast %272 : vector<2x64xf32> to vector<2x1x1x64xf32>
    tpu.vector_store %arg16[%c0_111, %c1_112, %c2, %c0_113], %275 {strides = array<i32>} : memref<2x10x10x64xf32, #tpu.memory_space<vmem>>, vector<2x1x1x64xf32>,
    %276 = vector.extract_strided_slice %265 {offsets = [0, 128], sizes = [2, 64], strides = [1, 1]} : vector<2x4096xf32> to vector<2x64xf32>
    %c0_114 = arith.constant 0 : index
    %c1_115 = arith.constant 1 : index
    %c3 = arith.constant 3 : index
    %c0_116 = arith.constant 0 : index
    %277 = vector.load %arg16[%c0_114, %c1_115, %c3, %c0_116] : memref<2x10x10x64xf32, #tpu.memory_space<vmem>>, vector<2x1x1x64xf32>
    %278 = vector.shape_cast %277 : vector<2x1x1x64xf32> to vector<2x64xf32>
    %279 = vector.shape_cast %276 : vector<2x64xf32> to vector<2x1x1x64xf32>
    tpu.vector_store %arg16[%c0_114, %c1_115, %c3, %c0_116], %279 {strides = array<i32>} : memref<2x10x10x64xf32, #tpu.memory_space<vmem>>, vector<2x1x1x64xf32>,
    %280 = vector.extract_strided_slice %265 {offsets = [0, 192], sizes = [2, 64], strides = [1, 1]} : vector<2x4096xf32> to vector<2x64xf32>
    %c0_117 = arith.constant 0 : index
    %c1_118 = arith.constant 1 : index
    %c4 = arith.constant 4 : index
    %c0_119 = arith.constant 0 : index
    %281 = vector.load %arg16[%c0_117, %c1_118, %c4, %c0_119] : memref<2x10x10x64xf32, #tpu.memory_space<vmem>>, vector<2x1x1x64xf32>
    %282 = vector.shape_cast %281 : vector<2x1x1x64xf32> to vector<2x64xf32>
    %283 = vector.shape_cast %280 : vector<2x64xf32> to vector<2x1x1x64xf32>
    tpu.vector_store %arg16[%c0_117, %c1_118, %c4, %c0_119], %283 {strides = array<i32>} : memref<2x10x10x64xf32, #tpu.memory_space<vmem>>, vector<2x1x1x64xf32>,
    %284 = vector.extract_strided_slice %265 {offsets = [0, 256], sizes = [2, 64], strides = [1, 1]} : vector<2x4096xf32> to vector<2x64xf32>
    %c0_120 = arith.constant 0 : index
    %c1_121 = arith.constant 1 : index
    %c5 = arith.constant 5 : index
    %c0_122 = arith.constant 0 : index
    %285 = vector.load %arg16[%c0_120, %c1_121, %c5, %c0_122] : memref<2x10x10x64xf32, #tpu.memory_space<vmem>>, vector<2x1x1x64xf32>
    %286 = vector.shape_cast %285 : vector<2x1x1x64xf32> to vector<2x64xf32>
    %287 = vector.shape_cast %284 : vector<2x64xf32> to vector<2x1x1x64xf32>
    tpu.vector_store %arg16[%c0_120, %c1_121, %c5, %c0_122], %287 {strides = array<i32>} : memref<2x10x10x64xf32, #tpu.memory_space<vmem>>, vector<2x1x1x64xf32>,
    %288 = vector.extract_strided_slice %265 {offsets = [0, 320], sizes = [2, 64], strides = [1, 1]} : vector<2x4096xf32> to vector<2x64xf32>
    %c0_123 = arith.constant 0 : index
    %c1_124 = arith.constant 1 : index
    %c6 = arith.constant 6 : index
    %c0_125 = arith.constant 0 : index
    %289 = vector.load %arg16[%c0_123, %c1_124, %c6, %c0_125] : memref<2x10x10x64xf32, #tpu.memory_space<vmem>>, vector<2x1x1x64xf32>
    %290 = vector.shape_cast %289 : vector<2x1x1x64xf32> to vector<2x64xf32>
    %291 = vector.shape_cast %288 : vector<2x64xf32> to vector<2x1x1x64xf32>
    tpu.vector_store %arg16[%c0_123, %c1_124, %c6, %c0_125], %291 {strides = array<i32>} : memref<2x10x10x64xf32, #tpu.memory_space<vmem>>, vector<2x1x1x64xf32>,
    %292 = vector.extract_strided_slice %265 {offsets = [0, 384], sizes = [2, 64], strides = [1, 1]} : vector<2x4096xf32> to vector<2x64xf32>
    %c0_126 = arith.constant 0 : index
    %c1_127 = arith.constant 1 : index
    %c7 = arith.constant 7 : index
    %c0_128 = arith.constant 0 : index
    %293 = vector.load %arg16[%c0_126, %c1_127, %c7, %c0_128] : memref<2x10x10x64xf32, #tpu.memory_space<vmem>>, vector<2x1x1x64xf32>
    %294 = vector.shape_cast %293 : vector<2x1x1x64xf32> to vector<2x64xf32>
    %295 = vector.shape_cast %292 : vector<2x64xf32> to vector<2x1x1x64xf32>
    tpu.vector_store %arg16[%c0_126, %c1_127, %c7, %c0_128], %295 {strides = array<i32>} : memref<2x10x10x64xf32, #tpu.memory_space<vmem>>, vector<2x1x1x64xf32>,
    %296 = vector.extract_strided_slice %265 {offsets = [0, 448], sizes = [2, 64], strides = [1, 1]} : vector<2x4096xf32> to vector<2x64xf32>
    %c0_129 = arith.constant 0 : index
    %c1_130 = arith.constant 1 : index
    %c8 = arith.constant 8 : index
    %c0_131 = arith.constant 0 : index
    %297 = vector.load %arg16[%c0_129, %c1_130, %c8, %c0_131] : memref<2x10x10x64xf32, #tpu.memory_space<vmem>>, vector<2x1x1x64xf32>
    %298 = vector.shape_cast %297 : vector<2x1x1x64xf32> to vector<2x64xf32>
    %299 = vector.shape_cast %296 : vector<2x64xf32> to vector<2x1x1x64xf32>
    tpu.vector_store %arg16[%c0_129, %c1_130, %c8, %c0_131], %299 {strides = array<i32>} : memref<2x10x10x64xf32, #tpu.memory_space<vmem>>, vector<2x1x1x64xf32>,
    %300 = vector.extract_strided_slice %265 {offsets = [0, 512], sizes = [2, 64], strides = [1, 1]} : vector<2x4096xf32> to vector<2x64xf32>
    %c0_132 = arith.constant 0 : index
    %c2_133 = arith.constant 2 : index
    %c1_134 = arith.constant 1 : index
    %c0_135 = arith.constant 0 : index
    %301 = vector.load %arg16[%c0_132, %c2_133, %c1_134, %c0_135] : memref<2x10x10x64xf32, #tpu.memory_space<vmem>>, vector<2x1x1x64xf32>
    %302 = vector.shape_cast %301 : vector<2x1x1x64xf32> to vector<2x64xf32>
    %303 = vector.shape_cast %300 : vector<2x64xf32> to vector<2x1x1x64xf32>
    tpu.vector_store %arg16[%c0_132, %c2_133, %c1_134, %c0_135], %303 {strides = array<i32>} : memref<2x10x10x64xf32, #tpu.memory_space<vmem>>, vector<2x1x1x64xf32>,
    %304 = vector.extract_strided_slice %265 {offsets = [0, 576], sizes = [2, 64], strides = [1, 1]} : vector<2x4096xf32> to vector<2x64xf32>
    %c0_136 = arith.constant 0 : index
    %c2_137 = arith.constant 2 : index
    %c2_138 = arith.constant 2 : index
    %c0_139 = arith.constant 0 : index
    %305 = vector.load %arg16[%c0_136, %c2_137, %c2_138, %c0_139] : memref<2x10x10x64xf32, #tpu.memory_space<vmem>>, vector<2x1x1x64xf32>
    %306 = vector.shape_cast %305 : vector<2x1x1x64xf32> to vector<2x64xf32>
    %307 = vector.shape_cast %304 : vector<2x64xf32> to vector<2x1x1x64xf32>
    tpu.vector_store %arg16[%c0_136, %c2_137, %c2_138, %c0_139], %307 {strides = array<i32>} : memref<2x10x10x64xf32, #tpu.memory_space<vmem>>, vector<2x1x1x64xf32>,
    %308 = vector.extract_strided_slice %265 {offsets = [0, 640], sizes = [2, 64], strides = [1, 1]} : vector<2x4096xf32> to vector<2x64xf32>
    %c0_140 = arith.constant 0 : index
    %c2_141 = arith.constant 2 : index
    %c3_142 = arith.constant 3 : index
    %c0_143 = arith.constant 0 : index
    %309 = vector.load %arg16[%c0_140, %c2_141, %c3_142, %c0_143] : memref<2x10x10x64xf32, #tpu.memory_space<vmem>>, vector<2x1x1x64xf32>
    %310 = vector.shape_cast %309 : vector<2x1x1x64xf32> to vector<2x64xf32>
    %311 = vector.shape_cast %308 : vector<2x64xf32> to vector<2x1x1x64xf32>
    tpu.vector_store %arg16[%c0_140, %c2_141, %c3_142, %c0_143], %311 {strides = array<i32>} : memref<2x10x10x64xf32, #tpu.memory_space<vmem>>, vector<2x1x1x64xf32>,
    %312 = vector.extract_strided_slice %265 {offsets = [0, 704], sizes = [2, 64], strides = [1, 1]} : vector<2x4096xf32> to vector<2x64xf32>
    %c0_144 = arith.constant 0 : index
    %c2_145 = arith.constant 2 : index
    %c4_146 = arith.constant 4 : index
    %c0_147 = arith.constant 0 : index
    %313 = vector.load %arg16[%c0_144, %c2_145, %c4_146, %c0_147] : memref<2x10x10x64xf32, #tpu.memory_space<vmem>>, vector<2x1x1x64xf32>
    %314 = vector.shape_cast %313 : vector<2x1x1x64xf32> to vector<2x64xf32>
    %315 = vector.shape_cast %312 : vector<2x64xf32> to vector<2x1x1x64xf32>
    tpu.vector_store %arg16[%c0_144, %c2_145, %c4_146, %c0_147], %315 {strides = array<i32>} : memref<2x10x10x64xf32, #tpu.memory_space<vmem>>, vector<2x1x1x64xf32>,
    %316 = vector.extract_strided_slice %265 {offsets = [0, 768], sizes = [2, 64], strides = [1, 1]} : vector<2x4096xf32> to vector<2x64xf32>
    %c0_148 = arith.constant 0 : index
    %c2_149 = arith.constant 2 : index
    %c5_150 = arith.constant 5 : index
    %c0_151 = arith.constant 0 : index
    %317 = vector.load %arg16[%c0_148, %c2_149, %c5_150, %c0_151] : memref<2x10x10x64xf32, #tpu.memory_space<vmem>>, vector<2x1x1x64xf32>
    %318 = vector.shape_cast %317 : vector<2x1x1x64xf32> to vector<2x64xf32>
    %319 = vector.shape_cast %316 : vector<2x64xf32> to vector<2x1x1x64xf32>
    tpu.vector_store %arg16[%c0_148, %c2_149, %c5_150, %c0_151], %319 {strides = array<i32>} : memref<2x10x10x64xf32, #tpu.memory_space<vmem>>, vector<2x1x1x64xf32>,
    %320 = vector.extract_strided_slice %265 {offsets = [0, 832], sizes = [2, 64], strides = [1, 1]} : vector<2x4096xf32> to vector<2x64xf32>
    %c0_152 = arith.constant 0 : index
    %c2_153 = arith.constant 2 : index
    %c6_154 = arith.constant 6 : index
    %c0_155 = arith.constant 0 : index
    %321 = vector.load %arg16[%c0_152, %c2_153, %c6_154, %c0_155] : memref<2x10x10x64xf32, #tpu.memory_space<vmem>>, vector<2x1x1x64xf32>
    %322 = vector.shape_cast %321 : vector<2x1x1x64xf32> to vector<2x64xf32>
    %323 = vector.shape_cast %320 : vector<2x64xf32> to vector<2x1x1x64xf32>
    tpu.vector_store %arg16[%c0_152, %c2_153, %c6_154, %c0_155], %323 {strides = array<i32>} : memref<2x10x10x64xf32, #tpu.memory_space<vmem>>, vector<2x1x1x64xf32>,
    %324 = vector.extract_strided_slice %265 {offsets = [0, 896], sizes = [2, 64], strides = [1, 1]} : vector<2x4096xf32> to vector<2x64xf32>
    %c0_156 = arith.constant 0 : index
    %c2_157 = arith.constant 2 : index
    %c7_158 = arith.constant 7 : index
    %c0_159 = arith.constant 0 : index
    %325 = vector.load %arg16[%c0_156, %c2_157, %c7_158, %c0_159] : memref<2x10x10x64xf32, #tpu.memory_space<vmem>>, vector<2x1x1x64xf32>
    %326 = vector.shape_cast %325 : vector<2x1x1x64xf32> to vector<2x64xf32>
    %327 = vector.shape_cast %324 : vector<2x64xf32> to vector<2x1x1x64xf32>
    tpu.vector_store %arg16[%c0_156, %c2_157, %c7_158, %c0_159], %327 {strides = array<i32>} : memref<2x10x10x64xf32, #tpu.memory_space<vmem>>, vector<2x1x1x64xf32>,
    %328 = vector.extract_strided_slice %265 {offsets = [0, 960], sizes = [2, 64], strides = [1, 1]} : vector<2x4096xf32> to vector<2x64xf32>
    %c0_160 = arith.constant 0 : index
    %c2_161 = arith.constant 2 : index
    %c8_162 = arith.constant 8 : index
    %c0_163 = arith.constant 0 : index
    %329 = vector.load %arg16[%c0_160, %c2_161, %c8_162, %c0_163] : memref<2x10x10x64xf32, #tpu.memory_space<vmem>>, vector<2x1x1x64xf32>
    %330 = vector.shape_cast %329 : vector<2x1x1x64xf32> to vector<2x64xf32>
    %331 = vector.shape_cast %328 : vector<2x64xf32> to vector<2x1x1x64xf32>
    tpu.vector_store %arg16[%c0_160, %c2_161, %c8_162, %c0_163], %331 {strides = array<i32>} : memref<2x10x10x64xf32, #tpu.memory_space<vmem>>, vector<2x1x1x64xf32>,
    %332 = vector.extract_strided_slice %265 {offsets = [0, 1024], sizes = [2, 64], strides = [1, 1]} : vector<2x4096xf32> to vector<2x64xf32>
    %c0_164 = arith.constant 0 : index
    %c3_165 = arith.constant 3 : index
    %c1_166 = arith.constant 1 : index
    %c0_167 = arith.constant 0 : index
    %333 = vector.load %arg16[%c0_164, %c3_165, %c1_166, %c0_167] : memref<2x10x10x64xf32, #tpu.memory_space<vmem>>, vector<2x1x1x64xf32>
    %334 = vector.shape_cast %333 : vector<2x1x1x64xf32> to vector<2x64xf32>
    %335 = vector.shape_cast %332 : vector<2x64xf32> to vector<2x1x1x64xf32>
    tpu.vector_store %arg16[%c0_164, %c3_165, %c1_166, %c0_167], %335 {strides = array<i32>} : memref<2x10x10x64xf32, #tpu.memory_space<vmem>>, vector<2x1x1x64xf32>,
    %336 = vector.extract_strided_slice %265 {offsets = [0, 1088], sizes = [2, 64], strides = [1, 1]} : vector<2x4096xf32> to vector<2x64xf32>
    %c0_168 = arith.constant 0 : index
    %c3_169 = arith.constant 3 : index
    %c2_170 = arith.constant 2 : index
    %c0_171 = arith.constant 0 : index
    %337 = vector.load %arg16[%c0_168, %c3_169, %c2_170, %c0_171] : memref<2x10x10x64xf32, #tpu.memory_space<vmem>>, vector<2x1x1x64xf32>
    %338 = vector.shape_cast %337 : vector<2x1x1x64xf32> to vector<2x64xf32>
    %339 = vector.shape_cast %336 : vector<2x64xf32> to vector<2x1x1x64xf32>
    tpu.vector_store %arg16[%c0_168, %c3_169, %c2_170, %c0_171], %339 {strides = array<i32>} : memref<2x10x10x64xf32, #tpu.memory_space<vmem>>, vector<2x1x1x64xf32>,
    %340 = vector.extract_strided_slice %265 {offsets = [0, 1152], sizes = [2, 64], strides = [1, 1]} : vector<2x4096xf32> to vector<2x64xf32>
    %c0_172 = arith.constant 0 : index
    %c3_173 = arith.constant 3 : index
    %c3_174 = arith.constant 3 : index
    %c0_175 = arith.constant 0 : index
    %341 = vector.load %arg16[%c0_172, %c3_173, %c3_174, %c0_175] : memref<2x10x10x64xf32, #tpu.memory_space<vmem>>, vector<2x1x1x64xf32>
    %342 = vector.shape_cast %341 : vector<2x1x1x64xf32> to vector<2x64xf32>
    %343 = vector.shape_cast %340 : vector<2x64xf32> to vector<2x1x1x64xf32>
    tpu.vector_store %arg16[%c0_172, %c3_173, %c3_174, %c0_175], %343 {strides = array<i32>} : memref<2x10x10x64xf32, #tpu.memory_space<vmem>>, vector<2x1x1x64xf32>,
    %344 = vector.extract_strided_slice %265 {offsets = [0, 1216], sizes = [2, 64], strides = [1, 1]} : vector<2x4096xf32> to vector<2x64xf32>
    %c0_176 = arith.constant 0 : index
    %c3_177 = arith.constant 3 : index
    %c4_178 = arith.constant 4 : index
    %c0_179 = arith.constant 0 : index
    %345 = vector.load %arg16[%c0_176, %c3_177, %c4_178, %c0_179] : memref<2x10x10x64xf32, #tpu.memory_space<vmem>>, vector<2x1x1x64xf32>
    %346 = vector.shape_cast %345 : vector<2x1x1x64xf32> to vector<2x64xf32>
    %347 = vector.shape_cast %344 : vector<2x64xf32> to vector<2x1x1x64xf32>
    tpu.vector_store %arg16[%c0_176, %c3_177, %c4_178, %c0_179], %347 {strides = array<i32>} : memref<2x10x10x64xf32, #tpu.memory_space<vmem>>, vector<2x1x1x64xf32>,
    %348 = vector.extract_strided_slice %265 {offsets = [0, 1280], sizes = [2, 64], strides = [1, 1]} : vector<2x4096xf32> to vector<2x64xf32>
    %c0_180 = arith.constant 0 : index
    %c3_181 = arith.constant 3 : index
    %c5_182 = arith.constant 5 : index
    %c0_183 = arith.constant 0 : index
    %349 = vector.load %arg16[%c0_180, %c3_181, %c5_182, %c0_183] : memref<2x10x10x64xf32, #tpu.memory_space<vmem>>, vector<2x1x1x64xf32>
    %350 = vector.shape_cast %349 : vector<2x1x1x64xf32> to vector<2x64xf32>
    %351 = vector.shape_cast %348 : vector<2x64xf32> to vector<2x1x1x64xf32>
    tpu.vector_store %arg16[%c0_180, %c3_181, %c5_182, %c0_183], %351 {strides = array<i32>} : memref<2x10x10x64xf32, #tpu.memory_space<vmem>>, vector<2x1x1x64xf32>,
    %352 = vector.extract_strided_slice %265 {offsets = [0, 1344], sizes = [2, 64], strides = [1, 1]} : vector<2x4096xf32> to vector<2x64xf32>
    %c0_184 = arith.constant 0 : index
    %c3_185 = arith.constant 3 : index
    %c6_186 = arith.constant 6 : index
    %c0_187 = arith.constant 0 : index
    %353 = vector.load %arg16[%c0_184, %c3_185, %c6_186, %c0_187] : memref<2x10x10x64xf32, #tpu.memory_space<vmem>>, vector<2x1x1x64xf32>
    %354 = vector.shape_cast %353 : vector<2x1x1x64xf32> to vector<2x64xf32>
    %355 = vector.shape_cast %352 : vector<2x64xf32> to vector<2x1x1x64xf32>
    tpu.vector_store %arg16[%c0_184, %c3_185, %c6_186, %c0_187], %355 {strides = array<i32>} : memref<2x10x10x64xf32, #tpu.memory_space<vmem>>, vector<2x1x1x64xf32>,
    %356 = vector.extract_strided_slice %265 {offsets = [0, 1408], sizes = [2, 64], strides = [1, 1]} : vector<2x4096xf32> to vector<2x64xf32>
    %c0_188 = arith.constant 0 : index
    %c3_189 = arith.constant 3 : index
    %c7_190 = arith.constant 7 : index
    %c0_191 = arith.constant 0 : index
    %357 = vector.load %arg16[%c0_188, %c3_189, %c7_190, %c0_191] : memref<2x10x10x64xf32, #tpu.memory_space<vmem>>, vector<2x1x1x64xf32>
    %358 = vector.shape_cast %357 : vector<2x1x1x64xf32> to vector<2x64xf32>
    %359 = vector.shape_cast %356 : vector<2x64xf32> to vector<2x1x1x64xf32>
    tpu.vector_store %arg16[%c0_188, %c3_189, %c7_190, %c0_191], %359 {strides = array<i32>} : memref<2x10x10x64xf32, #tpu.memory_space<vmem>>, vector<2x1x1x64xf32>,
    %360 = vector.extract_strided_slice %265 {offsets = [0, 1472], sizes = [2, 64], strides = [1, 1]} : vector<2x4096xf32> to vector<2x64xf32>
    %c0_192 = arith.constant 0 : index
    %c3_193 = arith.constant 3 : index
    %c8_194 = arith.constant 8 : index
    %c0_195 = arith.constant 0 : index
    %361 = vector.load %arg16[%c0_192, %c3_193, %c8_194, %c0_195] : memref<2x10x10x64xf32, #tpu.memory_space<vmem>>, vector<2x1x1x64xf32>
    %362 = vector.shape_cast %361 : vector<2x1x1x64xf32> to vector<2x64xf32>
    %363 = vector.shape_cast %360 : vector<2x64xf32> to vector<2x1x1x64xf32>
    tpu.vector_store %arg16[%c0_192, %c3_193, %c8_194, %c0_195], %363 {strides = array<i32>} : memref<2x10x10x64xf32, #tpu.memory_space<vmem>>, vector<2x1x1x64xf32>,
    %364 = vector.extract_strided_slice %265 {offsets = [0, 1536], sizes = [2, 64], strides = [1, 1]} : vector<2x4096xf32> to vector<2x64xf32>
    %c0_196 = arith.constant 0 : index
    %c4_197 = arith.constant 4 : index
    %c1_198 = arith.constant 1 : index
    %c0_199 = arith.constant 0 : index
    %365 = vector.load %arg16[%c0_196, %c4_197, %c1_198, %c0_199] : memref<2x10x10x64xf32, #tpu.memory_space<vmem>>, vector<2x1x1x64xf32>
    %366 = vector.shape_cast %365 : vector<2x1x1x64xf32> to vector<2x64xf32>
    %367 = vector.shape_cast %364 : vector<2x64xf32> to vector<2x1x1x64xf32>
    tpu.vector_store %arg16[%c0_196, %c4_197, %c1_198, %c0_199], %367 {strides = array<i32>} : memref<2x10x10x64xf32, #tpu.memory_space<vmem>>, vector<2x1x1x64xf32>,
    %368 = vector.extract_strided_slice %265 {offsets = [0, 1600], sizes = [2, 64], strides = [1, 1]} : vector<2x4096xf32> to vector<2x64xf32>
    %c0_200 = arith.constant 0 : index
    %c4_201 = arith.constant 4 : index
    %c2_202 = arith.constant 2 : index
    %c0_203 = arith.constant 0 : index
    %369 = vector.load %arg16[%c0_200, %c4_201, %c2_202, %c0_203] : memref<2x10x10x64xf32, #tpu.memory_space<vmem>>, vector<2x1x1x64xf32>
    %370 = vector.shape_cast %369 : vector<2x1x1x64xf32> to vector<2x64xf32>
    %371 = vector.shape_cast %368 : vector<2x64xf32> to vector<2x1x1x64xf32>
    tpu.vector_store %arg16[%c0_200, %c4_201, %c2_202, %c0_203], %371 {strides = array<i32>} : memref<2x10x10x64xf32, #tpu.memory_space<vmem>>, vector<2x1x1x64xf32>,
    %372 = vector.extract_strided_slice %265 {offsets = [0, 1664], sizes = [2, 64], strides = [1, 1]} : vector<2x4096xf32> to vector<2x64xf32>
    %c0_204 = arith.constant 0 : index
    %c4_205 = arith.constant 4 : index
    %c3_206 = arith.constant 3 : index
    %c0_207 = arith.constant 0 : index
    %373 = vector.load %arg16[%c0_204, %c4_205, %c3_206, %c0_207] : memref<2x10x10x64xf32, #tpu.memory_space<vmem>>, vector<2x1x1x64xf32>
    %374 = vector.shape_cast %373 : vector<2x1x1x64xf32> to vector<2x64xf32>
    %375 = vector.shape_cast %372 : vector<2x64xf32> to vector<2x1x1x64xf32>
    tpu.vector_store %arg16[%c0_204, %c4_205, %c3_206, %c0_207], %375 {strides = array<i32>} : memref<2x10x10x64xf32, #tpu.memory_space<vmem>>, vector<2x1x1x64xf32>,
    %376 = vector.extract_strided_slice %265 {offsets = [0, 1728], sizes = [2, 64], strides = [1, 1]} : vector<2x4096xf32> to vector<2x64xf32>
    %c0_208 = arith.constant 0 : index
    %c4_209 = arith.constant 4 : index
    %c4_210 = arith.constant 4 : index
    %c0_211 = arith.constant 0 : index
    %377 = vector.load %arg16[%c0_208, %c4_209, %c4_210, %c0_211] : memref<2x10x10x64xf32, #tpu.memory_space<vmem>>, vector<2x1x1x64xf32>
    %378 = vector.shape_cast %377 : vector<2x1x1x64xf32> to vector<2x64xf32>
    %379 = vector.shape_cast %376 : vector<2x64xf32> to vector<2x1x1x64xf32>
    tpu.vector_store %arg16[%c0_208, %c4_209, %c4_210, %c0_211], %379 {strides = array<i32>} : memref<2x10x10x64xf32, #tpu.memory_space<vmem>>, vector<2x1x1x64xf32>,
    %380 = vector.extract_strided_slice %265 {offsets = [0, 1792], sizes = [2, 64], strides = [1, 1]} : vector<2x4096xf32> to vector<2x64xf32>
    %c0_212 = arith.constant 0 : index
    %c4_213 = arith.constant 4 : index
    %c5_214 = arith.constant 5 : index
    %c0_215 = arith.constant 0 : index
    %381 = vector.load %arg16[%c0_212, %c4_213, %c5_214, %c0_215] : memref<2x10x10x64xf32, #tpu.memory_space<vmem>>, vector<2x1x1x64xf32>
    %382 = vector.shape_cast %381 : vector<2x1x1x64xf32> to vector<2x64xf32>
    %383 = vector.shape_cast %380 : vector<2x64xf32> to vector<2x1x1x64xf32>
    tpu.vector_store %arg16[%c0_212, %c4_213, %c5_214, %c0_215], %383 {strides = array<i32>} : memref<2x10x10x64xf32, #tpu.memory_space<vmem>>, vector<2x1x1x64xf32>,
    %384 = vector.extract_strided_slice %265 {offsets = [0, 1856], sizes = [2, 64], strides = [1, 1]} : vector<2x4096xf32> to vector<2x64xf32>
    %c0_216 = arith.constant 0 : index
    %c4_217 = arith.constant 4 : index
    %c6_218 = arith.constant 6 : index
    %c0_219 = arith.constant 0 : index
    %385 = vector.load %arg16[%c0_216, %c4_217, %c6_218, %c0_219] : memref<2x10x10x64xf32, #tpu.memory_space<vmem>>, vector<2x1x1x64xf32>
    %386 = vector.shape_cast %385 : vector<2x1x1x64xf32> to vector<2x64xf32>
    %387 = vector.shape_cast %384 : vector<2x64xf32> to vector<2x1x1x64xf32>
    tpu.vector_store %arg16[%c0_216, %c4_217, %c6_218, %c0_219], %387 {strides = array<i32>} : memref<2x10x10x64xf32, #tpu.memory_space<vmem>>, vector<2x1x1x64xf32>,
    %388 = vector.extract_strided_slice %265 {offsets = [0, 1920], sizes = [2, 64], strides = [1, 1]} : vector<2x4096xf32> to vector<2x64xf32>
    %c0_220 = arith.constant 0 : index
    %c4_221 = arith.constant 4 : index
    %c7_222 = arith.constant 7 : index
    %c0_223 = arith.constant 0 : index
    %389 = vector.load %arg16[%c0_220, %c4_221, %c7_222, %c0_223] : memref<2x10x10x64xf32, #tpu.memory_space<vmem>>, vector<2x1x1x64xf32>
    %390 = vector.shape_cast %389 : vector<2x1x1x64xf32> to vector<2x64xf32>
    %391 = vector.shape_cast %388 : vector<2x64xf32> to vector<2x1x1x64xf32>
    tpu.vector_store %arg16[%c0_220, %c4_221, %c7_222, %c0_223], %391 {strides = array<i32>} : memref<2x10x10x64xf32, #tpu.memory_space<vmem>>, vector<2x1x1x64xf32>,
    %392 = vector.extract_strided_slice %265 {offsets = [0, 1984], sizes = [2, 64], strides = [1, 1]} : vector<2x4096xf32> to vector<2x64xf32>
    %c0_224 = arith.constant 0 : index
    %c4_225 = arith.constant 4 : index
    %c8_226 = arith.constant 8 : index
    %c0_227 = arith.constant 0 : index
    %393 = vector.load %arg16[%c0_224, %c4_225, %c8_226, %c0_227] : memref<2x10x10x64xf32, #tpu.memory_space<vmem>>, vector<2x1x1x64xf32>
    %394 = vector.shape_cast %393 : vector<2x1x1x64xf32> to vector<2x64xf32>
    %395 = vector.shape_cast %392 : vector<2x64xf32> to vector<2x1x1x64xf32>
    tpu.vector_store %arg16[%c0_224, %c4_225, %c8_226, %c0_227], %395 {strides = array<i32>} : memref<2x10x10x64xf32, #tpu.memory_space<vmem>>, vector<2x1x1x64xf32>,
    %396 = vector.extract_strided_slice %265 {offsets = [0, 2048], sizes = [2, 64], strides = [1, 1]} : vector<2x4096xf32> to vector<2x64xf32>
    %c0_228 = arith.constant 0 : index
    %c5_229 = arith.constant 5 : index
    %c1_230 = arith.constant 1 : index
    %c0_231 = arith.constant 0 : index
    %397 = vector.load %arg16[%c0_228, %c5_229, %c1_230, %c0_231] : memref<2x10x10x64xf32, #tpu.memory_space<vmem>>, vector<2x1x1x64xf32>
    %398 = vector.shape_cast %397 : vector<2x1x1x64xf32> to vector<2x64xf32>
    %399 = vector.shape_cast %396 : vector<2x64xf32> to vector<2x1x1x64xf32>
    tpu.vector_store %arg16[%c0_228, %c5_229, %c1_230, %c0_231], %399 {strides = array<i32>} : memref<2x10x10x64xf32, #tpu.memory_space<vmem>>, vector<2x1x1x64xf32>,
    %400 = vector.extract_strided_slice %265 {offsets = [0, 2112], sizes = [2, 64], strides = [1, 1]} : vector<2x4096xf32> to vector<2x64xf32>
    %c0_232 = arith.constant 0 : index
    %c5_233 = arith.constant 5 : index
    %c2_234 = arith.constant 2 : index
    %c0_235 = arith.constant 0 : index
    %401 = vector.load %arg16[%c0_232, %c5_233, %c2_234, %c0_235] : memref<2x10x10x64xf32, #tpu.memory_space<vmem>>, vector<2x1x1x64xf32>
    %402 = vector.shape_cast %401 : vector<2x1x1x64xf32> to vector<2x64xf32>
    %403 = vector.shape_cast %400 : vector<2x64xf32> to vector<2x1x1x64xf32>
    tpu.vector_store %arg16[%c0_232, %c5_233, %c2_234, %c0_235], %403 {strides = array<i32>} : memref<2x10x10x64xf32, #tpu.memory_space<vmem>>, vector<2x1x1x64xf32>,
    %404 = vector.extract_strided_slice %265 {offsets = [0, 2176], sizes = [2, 64], strides = [1, 1]} : vector<2x4096xf32> to vector<2x64xf32>
    %c0_236 = arith.constant 0 : index
    %c5_237 = arith.constant 5 : index
    %c3_238 = arith.constant 3 : index
    %c0_239 = arith.constant 0 : index
    %405 = vector.load %arg16[%c0_236, %c5_237, %c3_238, %c0_239] : memref<2x10x10x64xf32, #tpu.memory_space<vmem>>, vector<2x1x1x64xf32>
    %406 = vector.shape_cast %405 : vector<2x1x1x64xf32> to vector<2x64xf32>
    %407 = vector.shape_cast %404 : vector<2x64xf32> to vector<2x1x1x64xf32>
    tpu.vector_store %arg16[%c0_236, %c5_237, %c3_238, %c0_239], %407 {strides = array<i32>} : memref<2x10x10x64xf32, #tpu.memory_space<vmem>>, vector<2x1x1x64xf32>,
    %408 = vector.extract_strided_slice %265 {offsets = [0, 2240], sizes = [2, 64], strides = [1, 1]} : vector<2x4096xf32> to vector<2x64xf32>
    %c0_240 = arith.constant 0 : index
    %c5_241 = arith.constant 5 : index
    %c4_242 = arith.constant 4 : index
    %c0_243 = arith.constant 0 : index
    %409 = vector.load %arg16[%c0_240, %c5_241, %c4_242, %c0_243] : memref<2x10x10x64xf32, #tpu.memory_space<vmem>>, vector<2x1x1x64xf32>
    %410 = vector.shape_cast %409 : vector<2x1x1x64xf32> to vector<2x64xf32>
    %411 = vector.shape_cast %408 : vector<2x64xf32> to vector<2x1x1x64xf32>
    tpu.vector_store %arg16[%c0_240, %c5_241, %c4_242, %c0_243], %411 {strides = array<i32>} : memref<2x10x10x64xf32, #tpu.memory_space<vmem>>, vector<2x1x1x64xf32>,
    %412 = vector.extract_strided_slice %265 {offsets = [0, 2304], sizes = [2, 64], strides = [1, 1]} : vector<2x4096xf32> to vector<2x64xf32>
    %c0_244 = arith.constant 0 : index
    %c5_245 = arith.constant 5 : index
    %c5_246 = arith.constant 5 : index
    %c0_247 = arith.constant 0 : index
    %413 = vector.load %arg16[%c0_244, %c5_245, %c5_246, %c0_247] : memref<2x10x10x64xf32, #tpu.memory_space<vmem>>, vector<2x1x1x64xf32>
    %414 = vector.shape_cast %413 : vector<2x1x1x64xf32> to vector<2x64xf32>
    %415 = vector.shape_cast %412 : vector<2x64xf32> to vector<2x1x1x64xf32>
    tpu.vector_store %arg16[%c0_244, %c5_245, %c5_246, %c0_247], %415 {strides = array<i32>} : memref<2x10x10x64xf32, #tpu.memory_space<vmem>>, vector<2x1x1x64xf32>,
    %416 = vector.extract_strided_slice %265 {offsets = [0, 2368], sizes = [2, 64], strides = [1, 1]} : vector<2x4096xf32> to vector<2x64xf32>
    %c0_248 = arith.constant 0 : index
    %c5_249 = arith.constant 5 : index
    %c6_250 = arith.constant 6 : index
    %c0_251 = arith.constant 0 : index
    %417 = vector.load %arg16[%c0_248, %c5_249, %c6_250, %c0_251] : memref<2x10x10x64xf32, #tpu.memory_space<vmem>>, vector<2x1x1x64xf32>
    %418 = vector.shape_cast %417 : vector<2x1x1x64xf32> to vector<2x64xf32>
    %419 = vector.shape_cast %416 : vector<2x64xf32> to vector<2x1x1x64xf32>
    tpu.vector_store %arg16[%c0_248, %c5_249, %c6_250, %c0_251], %419 {strides = array<i32>} : memref<2x10x10x64xf32, #tpu.memory_space<vmem>>, vector<2x1x1x64xf32>,
    %420 = vector.extract_strided_slice %265 {offsets = [0, 2432], sizes = [2, 64], strides = [1, 1]} : vector<2x4096xf32> to vector<2x64xf32>
    %c0_252 = arith.constant 0 : index
    %c5_253 = arith.constant 5 : index
    %c7_254 = arith.constant 7 : index
    %c0_255 = arith.constant 0 : index
    %421 = vector.load %arg16[%c0_252, %c5_253, %c7_254, %c0_255] : memref<2x10x10x64xf32, #tpu.memory_space<vmem>>, vector<2x1x1x64xf32>
    %422 = vector.shape_cast %421 : vector<2x1x1x64xf32> to vector<2x64xf32>
    %423 = vector.shape_cast %420 : vector<2x64xf32> to vector<2x1x1x64xf32>
    tpu.vector_store %arg16[%c0_252, %c5_253, %c7_254, %c0_255], %423 {strides = array<i32>} : memref<2x10x10x64xf32, #tpu.memory_space<vmem>>, vector<2x1x1x64xf32>,
    %424 = vector.extract_strided_slice %265 {offsets = [0, 2496], sizes = [2, 64], strides = [1, 1]} : vector<2x4096xf32> to vector<2x64xf32>
    %c0_256 = arith.constant 0 : index
    %c5_257 = arith.constant 5 : index
    %c8_258 = arith.constant 8 : index
    %c0_259 = arith.constant 0 : index
    %425 = vector.load %arg16[%c0_256, %c5_257, %c8_258, %c0_259] : memref<2x10x10x64xf32, #tpu.memory_space<vmem>>, vector<2x1x1x64xf32>
    %426 = vector.shape_cast %425 : vector<2x1x1x64xf32> to vector<2x64xf32>
    %427 = vector.shape_cast %424 : vector<2x64xf32> to vector<2x1x1x64xf32>
    tpu.vector_store %arg16[%c0_256, %c5_257, %c8_258, %c0_259], %427 {strides = array<i32>} : memref<2x10x10x64xf32, #tpu.memory_space<vmem>>, vector<2x1x1x64xf32>,
    %428 = vector.extract_strided_slice %265 {offsets = [0, 2560], sizes = [2, 64], strides = [1, 1]} : vector<2x4096xf32> to vector<2x64xf32>
    %c0_260 = arith.constant 0 : index
    %c6_261 = arith.constant 6 : index
    %c1_262 = arith.constant 1 : index
    %c0_263 = arith.constant 0 : index
    %429 = vector.load %arg16[%c0_260, %c6_261, %c1_262, %c0_263] : memref<2x10x10x64xf32, #tpu.memory_space<vmem>>, vector<2x1x1x64xf32>
    %430 = vector.shape_cast %429 : vector<2x1x1x64xf32> to vector<2x64xf32>
    %431 = vector.shape_cast %428 : vector<2x64xf32> to vector<2x1x1x64xf32>
    tpu.vector_store %arg16[%c0_260, %c6_261, %c1_262, %c0_263], %431 {strides = array<i32>} : memref<2x10x10x64xf32, #tpu.memory_space<vmem>>, vector<2x1x1x64xf32>,
    %432 = vector.extract_strided_slice %265 {offsets = [0, 2624], sizes = [2, 64], strides = [1, 1]} : vector<2x4096xf32> to vector<2x64xf32>
    %c0_264 = arith.constant 0 : index
    %c6_265 = arith.constant 6 : index
    %c2_266 = arith.constant 2 : index
    %c0_267 = arith.constant 0 : index
    %433 = vector.load %arg16[%c0_264, %c6_265, %c2_266, %c0_267] : memref<2x10x10x64xf32, #tpu.memory_space<vmem>>, vector<2x1x1x64xf32>
    %434 = vector.shape_cast %433 : vector<2x1x1x64xf32> to vector<2x64xf32>
    %435 = vector.shape_cast %432 : vector<2x64xf32> to vector<2x1x1x64xf32>
    tpu.vector_store %arg16[%c0_264, %c6_265, %c2_266, %c0_267], %435 {strides = array<i32>} : memref<2x10x10x64xf32, #tpu.memory_space<vmem>>, vector<2x1x1x64xf32>,
    %436 = vector.extract_strided_slice %265 {offsets = [0, 2688], sizes = [2, 64], strides = [1, 1]} : vector<2x4096xf32> to vector<2x64xf32>
    %c0_268 = arith.constant 0 : index
    %c6_269 = arith.constant 6 : index
    %c3_270 = arith.constant 3 : index
    %c0_271 = arith.constant 0 : index
    %437 = vector.load %arg16[%c0_268, %c6_269, %c3_270, %c0_271] : memref<2x10x10x64xf32, #tpu.memory_space<vmem>>, vector<2x1x1x64xf32>
    %438 = vector.shape_cast %437 : vector<2x1x1x64xf32> to vector<2x64xf32>
    %439 = vector.shape_cast %436 : vector<2x64xf32> to vector<2x1x1x64xf32>
    tpu.vector_store %arg16[%c0_268, %c6_269, %c3_270, %c0_271], %439 {strides = array<i32>} : memref<2x10x10x64xf32, #tpu.memory_space<vmem>>, vector<2x1x1x64xf32>,
    %440 = vector.extract_strided_slice %265 {offsets = [0, 2752], sizes = [2, 64], strides = [1, 1]} : vector<2x4096xf32> to vector<2x64xf32>
    %c0_272 = arith.constant 0 : index
    %c6_273 = arith.constant 6 : index
    %c4_274 = arith.constant 4 : index
    %c0_275 = arith.constant 0 : index
    %441 = vector.load %arg16[%c0_272, %c6_273, %c4_274, %c0_275] : memref<2x10x10x64xf32, #tpu.memory_space<vmem>>, vector<2x1x1x64xf32>
    %442 = vector.shape_cast %441 : vector<2x1x1x64xf32> to vector<2x64xf32>
    %443 = vector.shape_cast %440 : vector<2x64xf32> to vector<2x1x1x64xf32>
    tpu.vector_store %arg16[%c0_272, %c6_273, %c4_274, %c0_275], %443 {strides = array<i32>} : memref<2x10x10x64xf32, #tpu.memory_space<vmem>>, vector<2x1x1x64xf32>,
    %444 = vector.extract_strided_slice %265 {offsets = [0, 2816], sizes = [2, 64], strides = [1, 1]} : vector<2x4096xf32> to vector<2x64xf32>
    %c0_276 = arith.constant 0 : index
    %c6_277 = arith.constant 6 : index
    %c5_278 = arith.constant 5 : index
    %c0_279 = arith.constant 0 : index
    %445 = vector.load %arg16[%c0_276, %c6_277, %c5_278, %c0_279] : memref<2x10x10x64xf32, #tpu.memory_space<vmem>>, vector<2x1x1x64xf32>
    %446 = vector.shape_cast %445 : vector<2x1x1x64xf32> to vector<2x64xf32>
    %447 = vector.shape_cast %444 : vector<2x64xf32> to vector<2x1x1x64xf32>
    tpu.vector_store %arg16[%c0_276, %c6_277, %c5_278, %c0_279], %447 {strides = array<i32>} : memref<2x10x10x64xf32, #tpu.memory_space<vmem>>, vector<2x1x1x64xf32>,
    %448 = vector.extract_strided_slice %265 {offsets = [0, 2880], sizes = [2, 64], strides = [1, 1]} : vector<2x4096xf32> to vector<2x64xf32>
    %c0_280 = arith.constant 0 : index
    %c6_281 = arith.constant 6 : index
    %c6_282 = arith.constant 6 : index
    %c0_283 = arith.constant 0 : index
    %449 = vector.load %arg16[%c0_280, %c6_281, %c6_282, %c0_283] : memref<2x10x10x64xf32, #tpu.memory_space<vmem>>, vector<2x1x1x64xf32>
    %450 = vector.shape_cast %449 : vector<2x1x1x64xf32> to vector<2x64xf32>
    %451 = vector.shape_cast %448 : vector<2x64xf32> to vector<2x1x1x64xf32>
    tpu.vector_store %arg16[%c0_280, %c6_281, %c6_282, %c0_283], %451 {strides = array<i32>} : memref<2x10x10x64xf32, #tpu.memory_space<vmem>>, vector<2x1x1x64xf32>,
    %452 = vector.extract_strided_slice %265 {offsets = [0, 2944], sizes = [2, 64], strides = [1, 1]} : vector<2x4096xf32> to vector<2x64xf32>
    %c0_284 = arith.constant 0 : index
    %c6_285 = arith.constant 6 : index
    %c7_286 = arith.constant 7 : index
    %c0_287 = arith.constant 0 : index
    %453 = vector.load %arg16[%c0_284, %c6_285, %c7_286, %c0_287] : memref<2x10x10x64xf32, #tpu.memory_space<vmem>>, vector<2x1x1x64xf32>
    %454 = vector.shape_cast %453 : vector<2x1x1x64xf32> to vector<2x64xf32>
    %455 = vector.shape_cast %452 : vector<2x64xf32> to vector<2x1x1x64xf32>
    tpu.vector_store %arg16[%c0_284, %c6_285, %c7_286, %c0_287], %455 {strides = array<i32>} : memref<2x10x10x64xf32, #tpu.memory_space<vmem>>, vector<2x1x1x64xf32>,
    %456 = vector.extract_strided_slice %265 {offsets = [0, 3008], sizes = [2, 64], strides = [1, 1]} : vector<2x4096xf32> to vector<2x64xf32>
    %c0_288 = arith.constant 0 : index
    %c6_289 = arith.constant 6 : index
    %c8_290 = arith.constant 8 : index
    %c0_291 = arith.constant 0 : index
    %457 = vector.load %arg16[%c0_288, %c6_289, %c8_290, %c0_291] : memref<2x10x10x64xf32, #tpu.memory_space<vmem>>, vector<2x1x1x64xf32>
    %458 = vector.shape_cast %457 : vector<2x1x1x64xf32> to vector<2x64xf32>
    %459 = vector.shape_cast %456 : vector<2x64xf32> to vector<2x1x1x64xf32>
    tpu.vector_store %arg16[%c0_288, %c6_289, %c8_290, %c0_291], %459 {strides = array<i32>} : memref<2x10x10x64xf32, #tpu.memory_space<vmem>>, vector<2x1x1x64xf32>,
    %460 = vector.extract_strided_slice %265 {offsets = [0, 3072], sizes = [2, 64], strides = [1, 1]} : vector<2x4096xf32> to vector<2x64xf32>
    %c0_292 = arith.constant 0 : index
    %c7_293 = arith.constant 7 : index
    %c1_294 = arith.constant 1 : index
    %c0_295 = arith.constant 0 : index
    %461 = vector.load %arg16[%c0_292, %c7_293, %c1_294, %c0_295] : memref<2x10x10x64xf32, #tpu.memory_space<vmem>>, vector<2x1x1x64xf32>
    %462 = vector.shape_cast %461 : vector<2x1x1x64xf32> to vector<2x64xf32>
    %463 = vector.shape_cast %460 : vector<2x64xf32> to vector<2x1x1x64xf32>
    tpu.vector_store %arg16[%c0_292, %c7_293, %c1_294, %c0_295], %463 {strides = array<i32>} : memref<2x10x10x64xf32, #tpu.memory_space<vmem>>, vector<2x1x1x64xf32>,
    %464 = vector.extract_strided_slice %265 {offsets = [0, 3136], sizes = [2, 64], strides = [1, 1]} : vector<2x4096xf32> to vector<2x64xf32>
    %c0_296 = arith.constant 0 : index
    %c7_297 = arith.constant 7 : index
    %c2_298 = arith.constant 2 : index
    %c0_299 = arith.constant 0 : index
    %465 = vector.load %arg16[%c0_296, %c7_297, %c2_298, %c0_299] : memref<2x10x10x64xf32, #tpu.memory_space<vmem>>, vector<2x1x1x64xf32>
    %466 = vector.shape_cast %465 : vector<2x1x1x64xf32> to vector<2x64xf32>
    %467 = vector.shape_cast %464 : vector<2x64xf32> to vector<2x1x1x64xf32>
    tpu.vector_store %arg16[%c0_296, %c7_297, %c2_298, %c0_299], %467 {strides = array<i32>} : memref<2x10x10x64xf32, #tpu.memory_space<vmem>>, vector<2x1x1x64xf32>,
    %468 = vector.extract_strided_slice %265 {offsets = [0, 3200], sizes = [2, 64], strides = [1, 1]} : vector<2x4096xf32> to vector<2x64xf32>
    %c0_300 = arith.constant 0 : index
    %c7_301 = arith.constant 7 : index
    %c3_302 = arith.constant 3 : index
    %c0_303 = arith.constant 0 : index
    %469 = vector.load %arg16[%c0_300, %c7_301, %c3_302, %c0_303] : memref<2x10x10x64xf32, #tpu.memory_space<vmem>>, vector<2x1x1x64xf32>
    %470 = vector.shape_cast %469 : vector<2x1x1x64xf32> to vector<2x64xf32>
    %471 = vector.shape_cast %468 : vector<2x64xf32> to vector<2x1x1x64xf32>
    tpu.vector_store %arg16[%c0_300, %c7_301, %c3_302, %c0_303], %471 {strides = array<i32>} : memref<2x10x10x64xf32, #tpu.memory_space<vmem>>, vector<2x1x1x64xf32>,
    %472 = vector.extract_strided_slice %265 {offsets = [0, 3264], sizes = [2, 64], strides = [1, 1]} : vector<2x4096xf32> to vector<2x64xf32>
    %c0_304 = arith.constant 0 : index
    %c7_305 = arith.constant 7 : index
    %c4_306 = arith.constant 4 : index
    %c0_307 = arith.constant 0 : index
    %473 = vector.load %arg16[%c0_304, %c7_305, %c4_306, %c0_307] : memref<2x10x10x64xf32, #tpu.memory_space<vmem>>, vector<2x1x1x64xf32>
    %474 = vector.shape_cast %473 : vector<2x1x1x64xf32> to vector<2x64xf32>
    %475 = vector.shape_cast %472 : vector<2x64xf32> to vector<2x1x1x64xf32>
    tpu.vector_store %arg16[%c0_304, %c7_305, %c4_306, %c0_307], %475 {strides = array<i32>} : memref<2x10x10x64xf32, #tpu.memory_space<vmem>>, vector<2x1x1x64xf32>,
    %476 = vector.extract_strided_slice %265 {offsets = [0, 3328], sizes = [2, 64], strides = [1, 1]} : vector<2x4096xf32> to vector<2x64xf32>
    %c0_308 = arith.constant 0 : index
    %c7_309 = arith.constant 7 : index
    %c5_310 = arith.constant 5 : index
    %c0_311 = arith.constant 0 : index
    %477 = vector.load %arg16[%c0_308, %c7_309, %c5_310, %c0_311] : memref<2x10x10x64xf32, #tpu.memory_space<vmem>>, vector<2x1x1x64xf32>
    %478 = vector.shape_cast %477 : vector<2x1x1x64xf32> to vector<2x64xf32>
    %479 = vector.shape_cast %476 : vector<2x64xf32> to vector<2x1x1x64xf32>
    tpu.vector_store %arg16[%c0_308, %c7_309, %c5_310, %c0_311], %479 {strides = array<i32>} : memref<2x10x10x64xf32, #tpu.memory_space<vmem>>, vector<2x1x1x64xf32>,
    %480 = vector.extract_strided_slice %265 {offsets = [0, 3392], sizes = [2, 64], strides = [1, 1]} : vector<2x4096xf32> to vector<2x64xf32>
    %c0_312 = arith.constant 0 : index
    %c7_313 = arith.constant 7 : index
    %c6_314 = arith.constant 6 : index
    %c0_315 = arith.constant 0 : index
    %481 = vector.load %arg16[%c0_312, %c7_313, %c6_314, %c0_315] : memref<2x10x10x64xf32, #tpu.memory_space<vmem>>, vector<2x1x1x64xf32>
    %482 = vector.shape_cast %481 : vector<2x1x1x64xf32> to vector<2x64xf32>
    %483 = vector.shape_cast %480 : vector<2x64xf32> to vector<2x1x1x64xf32>
    tpu.vector_store %arg16[%c0_312, %c7_313, %c6_314, %c0_315], %483 {strides = array<i32>} : memref<2x10x10x64xf32, #tpu.memory_space<vmem>>, vector<2x1x1x64xf32>,
    %484 = vector.extract_strided_slice %265 {offsets = [0, 3456], sizes = [2, 64], strides = [1, 1]} : vector<2x4096xf32> to vector<2x64xf32>
    %c0_316 = arith.constant 0 : index
    %c7_317 = arith.constant 7 : index
    %c7_318 = arith.constant 7 : index
    %c0_319 = arith.constant 0 : index
    %485 = vector.load %arg16[%c0_316, %c7_317, %c7_318, %c0_319] : memref<2x10x10x64xf32, #tpu.memory_space<vmem>>, vector<2x1x1x64xf32>
    %486 = vector.shape_cast %485 : vector<2x1x1x64xf32> to vector<2x64xf32>
    %487 = vector.shape_cast %484 : vector<2x64xf32> to vector<2x1x1x64xf32>
    tpu.vector_store %arg16[%c0_316, %c7_317, %c7_318, %c0_319], %487 {strides = array<i32>} : memref<2x10x10x64xf32, #tpu.memory_space<vmem>>, vector<2x1x1x64xf32>,
    %488 = vector.extract_strided_slice %265 {offsets = [0, 3520], sizes = [2, 64], strides = [1, 1]} : vector<2x4096xf32> to vector<2x64xf32>
    %c0_320 = arith.constant 0 : index
    %c7_321 = arith.constant 7 : index
    %c8_322 = arith.constant 8 : index
    %c0_323 = arith.constant 0 : index
    %489 = vector.load %arg16[%c0_320, %c7_321, %c8_322, %c0_323] : memref<2x10x10x64xf32, #tpu.memory_space<vmem>>, vector<2x1x1x64xf32>
    %490 = vector.shape_cast %489 : vector<2x1x1x64xf32> to vector<2x64xf32>
    %491 = vector.shape_cast %488 : vector<2x64xf32> to vector<2x1x1x64xf32>
    tpu.vector_store %arg16[%c0_320, %c7_321, %c8_322, %c0_323], %491 {strides = array<i32>} : memref<2x10x10x64xf32, #tpu.memory_space<vmem>>, vector<2x1x1x64xf32>,
    %492 = vector.extract_strided_slice %265 {offsets = [0, 3584], sizes = [2, 64], strides = [1, 1]} : vector<2x4096xf32> to vector<2x64xf32>
    %c0_324 = arith.constant 0 : index
    %c8_325 = arith.constant 8 : index
    %c1_326 = arith.constant 1 : index
    %c0_327 = arith.constant 0 : index
    %493 = vector.load %arg16[%c0_324, %c8_325, %c1_326, %c0_327] : memref<2x10x10x64xf32, #tpu.memory_space<vmem>>, vector<2x1x1x64xf32>
    %494 = vector.shape_cast %493 : vector<2x1x1x64xf32> to vector<2x64xf32>
    %495 = vector.shape_cast %492 : vector<2x64xf32> to vector<2x1x1x64xf32>
    tpu.vector_store %arg16[%c0_324, %c8_325, %c1_326, %c0_327], %495 {strides = array<i32>} : memref<2x10x10x64xf32, #tpu.memory_space<vmem>>, vector<2x1x1x64xf32>,
    %496 = vector.extract_strided_slice %265 {offsets = [0, 3648], sizes = [2, 64], strides = [1, 1]} : vector<2x4096xf32> to vector<2x64xf32>
    %c0_328 = arith.constant 0 : index
    %c8_329 = arith.constant 8 : index
    %c2_330 = arith.constant 2 : index
    %c0_331 = arith.constant 0 : index
    %497 = vector.load %arg16[%c0_328, %c8_329, %c2_330, %c0_331] : memref<2x10x10x64xf32, #tpu.memory_space<vmem>>, vector<2x1x1x64xf32>
    %498 = vector.shape_cast %497 : vector<2x1x1x64xf32> to vector<2x64xf32>
    %499 = vector.shape_cast %496 : vector<2x64xf32> to vector<2x1x1x64xf32>
    tpu.vector_store %arg16[%c0_328, %c8_329, %c2_330, %c0_331], %499 {strides = array<i32>} : memref<2x10x10x64xf32, #tpu.memory_space<vmem>>, vector<2x1x1x64xf32>,
    %500 = vector.extract_strided_slice %265 {offsets = [0, 3712], sizes = [2, 64], strides = [1, 1]} : vector<2x4096xf32> to vector<2x64xf32>
    %c0_332 = arith.constant 0 : index
    %c8_333 = arith.constant 8 : index
    %c3_334 = arith.constant 3 : index
    %c0_335 = arith.constant 0 : index
    %501 = vector.load %arg16[%c0_332, %c8_333, %c3_334, %c0_335] : memref<2x10x10x64xf32, #tpu.memory_space<vmem>>, vector<2x1x1x64xf32>
    %502 = vector.shape_cast %501 : vector<2x1x1x64xf32> to vector<2x64xf32>
    %503 = vector.shape_cast %500 : vector<2x64xf32> to vector<2x1x1x64xf32>
    tpu.vector_store %arg16[%c0_332, %c8_333, %c3_334, %c0_335], %503 {strides = array<i32>} : memref<2x10x10x64xf32, #tpu.memory_space<vmem>>, vector<2x1x1x64xf32>,
    %504 = vector.extract_strided_slice %265 {offsets = [0, 3776], sizes = [2, 64], strides = [1, 1]} : vector<2x4096xf32> to vector<2x64xf32>
    %c0_336 = arith.constant 0 : index
    %c8_337 = arith.constant 8 : index
    %c4_338 = arith.constant 4 : index
    %c0_339 = arith.constant 0 : index
    %505 = vector.load %arg16[%c0_336, %c8_337, %c4_338, %c0_339] : memref<2x10x10x64xf32, #tpu.memory_space<vmem>>, vector<2x1x1x64xf32>
    %506 = vector.shape_cast %505 : vector<2x1x1x64xf32> to vector<2x64xf32>
    %507 = vector.shape_cast %504 : vector<2x64xf32> to vector<2x1x1x64xf32>
    tpu.vector_store %arg16[%c0_336, %c8_337, %c4_338, %c0_339], %507 {strides = array<i32>} : memref<2x10x10x64xf32, #tpu.memory_space<vmem>>, vector<2x1x1x64xf32>,
    %508 = vector.extract_strided_slice %265 {offsets = [0, 3840], sizes = [2, 64], strides = [1, 1]} : vector<2x4096xf32> to vector<2x64xf32>
    %c0_340 = arith.constant 0 : index
    %c8_341 = arith.constant 8 : index
    %c5_342 = arith.constant 5 : index
    %c0_343 = arith.constant 0 : index
    %509 = vector.load %arg16[%c0_340, %c8_341, %c5_342, %c0_343] : memref<2x10x10x64xf32, #tpu.memory_space<vmem>>, vector<2x1x1x64xf32>
    %510 = vector.shape_cast %509 : vector<2x1x1x64xf32> to vector<2x64xf32>
    %511 = vector.shape_cast %508 : vector<2x64xf32> to vector<2x1x1x64xf32>
    tpu.vector_store %arg16[%c0_340, %c8_341, %c5_342, %c0_343], %511 {strides = array<i32>} : memref<2x10x10x64xf32, #tpu.memory_space<vmem>>, vector<2x1x1x64xf32>,
    %512 = vector.extract_strided_slice %265 {offsets = [0, 3904], sizes = [2, 64], strides = [1, 1]} : vector<2x4096xf32> to vector<2x64xf32>
    %c0_344 = arith.constant 0 : index
    %c8_345 = arith.constant 8 : index
    %c6_346 = arith.constant 6 : index
    %c0_347 = arith.constant 0 : index
    %513 = vector.load %arg16[%c0_344, %c8_345, %c6_346, %c0_347] : memref<2x10x10x64xf32, #tpu.memory_space<vmem>>, vector<2x1x1x64xf32>
    %514 = vector.shape_cast %513 : vector<2x1x1x64xf32> to vector<2x64xf32>
    %515 = vector.shape_cast %512 : vector<2x64xf32> to vector<2x1x1x64xf32>
    tpu.vector_store %arg16[%c0_344, %c8_345, %c6_346, %c0_347], %515 {strides = array<i32>} : memref<2x10x10x64xf32, #tpu.memory_space<vmem>>, vector<2x1x1x64xf32>,
    %516 = vector.extract_strided_slice %265 {offsets = [0, 3968], sizes = [2, 64], strides = [1, 1]} : vector<2x4096xf32> to vector<2x64xf32>
    %c0_348 = arith.constant 0 : index
    %c8_349 = arith.constant 8 : index
    %c7_350 = arith.constant 7 : index
    %c0_351 = arith.constant 0 : index
    %517 = vector.load %arg16[%c0_348, %c8_349, %c7_350, %c0_351] : memref<2x10x10x64xf32, #tpu.memory_space<vmem>>, vector<2x1x1x64xf32>
    %518 = vector.shape_cast %517 : vector<2x1x1x64xf32> to vector<2x64xf32>
    %519 = vector.shape_cast %516 : vector<2x64xf32> to vector<2x1x1x64xf32>
    tpu.vector_store %arg16[%c0_348, %c8_349, %c7_350, %c0_351], %519 {strides = array<i32>} : memref<2x10x10x64xf32, #tpu.memory_space<vmem>>, vector<2x1x1x64xf32>,
    %520 = vector.extract_strided_slice %265 {offsets = [0, 4032], sizes = [2, 64], strides = [1, 1]} : vector<2x4096xf32> to vector<2x64xf32>
    %c0_352 = arith.constant 0 : index
    %c8_353 = arith.constant 8 : index
    %c8_354 = arith.constant 8 : index
    %c0_355 = arith.constant 0 : index
    %521 = vector.load %arg16[%c0_352, %c8_353, %c8_354, %c0_355] : memref<2x10x10x64xf32, #tpu.memory_space<vmem>>, vector<2x1x1x64xf32>
    %522 = vector.shape_cast %521 : vector<2x1x1x64xf32> to vector<2x64xf32>
    %523 = vector.shape_cast %520 : vector<2x64xf32> to vector<2x1x1x64xf32>
    tpu.vector_store %arg16[%c0_352, %c8_353, %c8_354, %c0_355], %523 {strides = array<i32>} : memref<2x10x10x64xf32, #tpu.memory_space<vmem>>, vector<2x1x1x64xf32>,
    %c0_356 = arith.constant 0 : index
    %c0_357 = arith.constant 0 : index
    %c0_358 = arith.constant 0 : index
    %c0_359 = arith.constant 0 : index
    %524 = vector.load %arg16[%c0_356, %c0_357, %c0_358, %c0_359] : memref<2x10x10x64xf32, #tpu.memory_space<vmem>>, vector<2x8x8x64xf32>
    %525 = vector.shape_cast %524 : vector<2x8x8x64xf32> to vector<128x64xf32>
    %526 = arith.truncf %525 : vector<128x64xf32> to vector<128x64xbf16>
    %c0_360 = arith.constant 0 : index
    %c0_361 = arith.constant 0 : index
    %c1_362 = arith.constant 1 : index
    %c0_363 = arith.constant 0 : index
    %527 = vector.load %arg16[%c0_360, %c0_361, %c1_362, %c0_363] : memref<2x10x10x64xf32, #tpu.memory_space<vmem>>, vector<2x8x8x64xf32>
    %528 = vector.shape_cast %527 : vector<2x8x8x64xf32> to vector<128x64xf32>
    %529 = arith.truncf %528 : vector<128x64xf32> to vector<128x64xbf16>
    %c0_364 = arith.constant 0 : index
    %c0_365 = arith.constant 0 : index
    %c2_366 = arith.constant 2 : index
    %c0_367 = arith.constant 0 : index
    %530 = vector.load %arg16[%c0_364, %c0_365, %c2_366, %c0_367] : memref<2x10x10x64xf32, #tpu.memory_space<vmem>>, vector<2x8x8x64xf32>
    %531 = vector.shape_cast %530 : vector<2x8x8x64xf32> to vector<128x64xf32>
    %532 = arith.truncf %531 : vector<128x64xf32> to vector<128x64xbf16>
    %c0_368 = arith.constant 0 : index
    %c1_369 = arith.constant 1 : index
    %c0_370 = arith.constant 0 : index
    %c0_371 = arith.constant 0 : index
    %533 = vector.load %arg16[%c0_368, %c1_369, %c0_370, %c0_371] : memref<2x10x10x64xf32, #tpu.memory_space<vmem>>, vector<2x8x8x64xf32>
    %534 = vector.shape_cast %533 : vector<2x8x8x64xf32> to vector<128x64xf32>
    %535 = arith.truncf %534 : vector<128x64xf32> to vector<128x64xbf16>
    %c0_372 = arith.constant 0 : index
    %c1_373 = arith.constant 1 : index
    %c1_374 = arith.constant 1 : index
    %c0_375 = arith.constant 0 : index
    %536 = vector.load %arg16[%c0_372, %c1_373, %c1_374, %c0_375] : memref<2x10x10x64xf32, #tpu.memory_space<vmem>>, vector<2x8x8x64xf32>
    %537 = vector.shape_cast %536 : vector<2x8x8x64xf32> to vector<128x64xf32>
    %538 = arith.truncf %537 : vector<128x64xf32> to vector<128x64xbf16>
    %c0_376 = arith.constant 0 : index
    %c1_377 = arith.constant 1 : index
    %c2_378 = arith.constant 2 : index
    %c0_379 = arith.constant 0 : index
    %539 = vector.load %arg16[%c0_376, %c1_377, %c2_378, %c0_379] : memref<2x10x10x64xf32, #tpu.memory_space<vmem>>, vector<2x8x8x64xf32>
    %540 = vector.shape_cast %539 : vector<2x8x8x64xf32> to vector<128x64xf32>
    %541 = arith.truncf %540 : vector<128x64xf32> to vector<128x64xbf16>
    %c0_380 = arith.constant 0 : index
    %c2_381 = arith.constant 2 : index
    %c0_382 = arith.constant 0 : index
    %c0_383 = arith.constant 0 : index
    %542 = vector.load %arg16[%c0_380, %c2_381, %c0_382, %c0_383] : memref<2x10x10x64xf32, #tpu.memory_space<vmem>>, vector<2x8x8x64xf32>
    %543 = vector.shape_cast %542 : vector<2x8x8x64xf32> to vector<128x64xf32>
    %544 = arith.truncf %543 : vector<128x64xf32> to vector<128x64xbf16>
    %c0_384 = arith.constant 0 : index
    %c2_385 = arith.constant 2 : index
    %c1_386 = arith.constant 1 : index
    %c0_387 = arith.constant 0 : index
    %545 = vector.load %arg16[%c0_384, %c2_385, %c1_386, %c0_387] : memref<2x10x10x64xf32, #tpu.memory_space<vmem>>, vector<2x8x8x64xf32>
    %546 = vector.shape_cast %545 : vector<2x8x8x64xf32> to vector<128x64xf32>
    %547 = arith.truncf %546 : vector<128x64xf32> to vector<128x64xbf16>
    %c0_388 = arith.constant 0 : index
    %c2_389 = arith.constant 2 : index
    %c2_390 = arith.constant 2 : index
    %c0_391 = arith.constant 0 : index
    %548 = vector.load %arg16[%c0_388, %c2_389, %c2_390, %c0_391] : memref<2x10x10x64xf32, #tpu.memory_space<vmem>>, vector<2x8x8x64xf32>
    %549 = vector.shape_cast %548 : vector<2x8x8x64xf32> to vector<128x64xf32>
    %550 = arith.truncf %549 : vector<128x64xf32> to vector<128x64xbf16>
    %c0_392 = arith.constant 0 : index
    %c0_393 = arith.constant 0 : index
    %551 = vector.load %arg13[%c0_392, %c0_393] : memref<1x128xf32, #tpu.memory_space<vmem>>, vector<1x128xf32>
    %c0_394 = arith.constant 0 : index
    %c0_395 = arith.constant 0 : index
    %c0_396 = arith.constant 0 : index
    %c0_397 = arith.constant 0 : index
    %552 = vector.load %arg12[%c0_394, %c0_395, %c0_396, %c0_397] : memref<4x4x64x128xbf16, #tpu.memory_space<vmem>>, vector<1x1x64x128xbf16>
    %553 = vector.shape_cast %552 : vector<1x1x64x128xbf16> to vector<64x128xbf16>
    %cst_398 = arith.constant dense<0.000000e+00> : vector<128x128xf32>
    %554 = tpu.matmul %526, %553, %cst_398 {dimension_numbers = #tpu.dot_dimension_numbers<[1], [0], [0], [1], [0, 0, 1, 1], [], []>} : vector<128x64xbf16>, vector<64x128xbf16>, vector<128x128xf32> -> vector<128x128xf32>
    %c0_399 = arith.constant 0 : index
    %c1_400 = arith.constant 1 : index
    %c0_401 = arith.constant 0 : index
    %c0_402 = arith.constant 0 : index
    %555 = vector.load %arg12[%c0_399, %c1_400, %c0_401, %c0_402] : memref<4x4x64x128xbf16, #tpu.memory_space<vmem>>, vector<1x1x64x128xbf16>
    %556 = vector.shape_cast %555 : vector<1x1x64x128xbf16> to vector<64x128xbf16>
    %cst_403 = arith.constant dense<0.000000e+00> : vector<128x128xf32>
    %557 = tpu.matmul %529, %556, %cst_403 {dimension_numbers = #tpu.dot_dimension_numbers<[1], [0], [0], [1], [0, 0, 1, 1], [], []>} : vector<128x64xbf16>, vector<64x128xbf16>, vector<128x128xf32> -> vector<128x128xf32>
    %558 = arith.addf %554, %557 : vector<128x128xf32>
    %c0_404 = arith.constant 0 : index
    %c2_405 = arith.constant 2 : index
    %c0_406 = arith.constant 0 : index
    %c0_407 = arith.constant 0 : index
    %559 = vector.load %arg12[%c0_404, %c2_405, %c0_406, %c0_407] : memref<4x4x64x128xbf16, #tpu.memory_space<vmem>>, vector<1x1x64x128xbf16>
    %560 = vector.shape_cast %559 : vector<1x1x64x128xbf16> to vector<64x128xbf16>
    %cst_408 = arith.constant dense<0.000000e+00> : vector<128x128xf32>
    %561 = tpu.matmul %535, %560, %cst_408 {dimension_numbers = #tpu.dot_dimension_numbers<[1], [0], [0], [1], [0, 0, 1, 1], [], []>} : vector<128x64xbf16>, vector<64x128xbf16>, vector<128x128xf32> -> vector<128x128xf32>
    %562 = arith.addf %558, %561 : vector<128x128xf32>
    %c0_409 = arith.constant 0 : index
    %c3_410 = arith.constant 3 : index
    %c0_411 = arith.constant 0 : index
    %c0_412 = arith.constant 0 : index
    %563 = vector.load %arg12[%c0_409, %c3_410, %c0_411, %c0_412] : memref<4x4x64x128xbf16, #tpu.memory_space<vmem>>, vector<1x1x64x128xbf16>
    %564 = vector.shape_cast %563 : vector<1x1x64x128xbf16> to vector<64x128xbf16>
    %cst_413 = arith.constant dense<0.000000e+00> : vector<128x128xf32>
    %565 = tpu.matmul %538, %564, %cst_413 {dimension_numbers = #tpu.dot_dimension_numbers<[1], [0], [0], [1], [0, 0, 1, 1], [], []>} : vector<128x64xbf16>, vector<64x128xbf16>, vector<128x128xf32> -> vector<128x128xf32>
    %566 = arith.addf %562, %565 : vector<128x128xf32>
    %567 = vector.broadcast %551 : vector<1x128xf32> to vector<128x128xf32>
    %568 = arith.addf %566, %567 : vector<128x128xf32>
    %c0_414 = arith.constant 0 : index
    %c0_415 = arith.constant 0 : index
    %c0_416 = arith.constant 0 : index
    %569 = vector.load %arg14[%c0_414, %c0_415, %c0_416] : memref<4x128x128xf32, #tpu.memory_space<vmem>>, vector<1x128x128xf32>
    %570 = vector.shape_cast %569 : vector<1x128x128xf32> to vector<128x128xf32>
    %571 = vector.shape_cast %568 : vector<128x128xf32> to vector<1x128x128xf32>
    tpu.vector_store %arg14[%c0_414, %c0_415, %c0_416], %571 {strides = array<i32>} : memref<4x128x128xf32, #tpu.memory_space<vmem>>, vector<1x128x128xf32>,
    %c1_417 = arith.constant 1 : index
    %c0_418 = arith.constant 0 : index
    %c0_419 = arith.constant 0 : index
    %c0_420 = arith.constant 0 : index
    %572 = vector.load %arg12[%c1_417, %c0_418, %c0_419, %c0_420] : memref<4x4x64x128xbf16, #tpu.memory_space<vmem>>, vector<1x1x64x128xbf16>
    %573 = vector.shape_cast %572 : vector<1x1x64x128xbf16> to vector<64x128xbf16>
    %cst_421 = arith.constant dense<0.000000e+00> : vector<128x128xf32>
    %574 = tpu.matmul %529, %573, %cst_421 {dimension_numbers = #tpu.dot_dimension_numbers<[1], [0], [0], [1], [0, 0, 1, 1], [], []>} : vector<128x64xbf16>, vector<64x128xbf16>, vector<128x128xf32> -> vector<128x128xf32>
    %c1_422 = arith.constant 1 : index
    %c1_423 = arith.constant 1 : index
    %c0_424 = arith.constant 0 : index
    %c0_425 = arith.constant 0 : index
    %575 = vector.load %arg12[%c1_422, %c1_423, %c0_424, %c0_425] : memref<4x4x64x128xbf16, #tpu.memory_space<vmem>>, vector<1x1x64x128xbf16>
    %576 = vector.shape_cast %575 : vector<1x1x64x128xbf16> to vector<64x128xbf16>
    %cst_426 = arith.constant dense<0.000000e+00> : vector<128x128xf32>
    %577 = tpu.matmul %532, %576, %cst_426 {dimension_numbers = #tpu.dot_dimension_numbers<[1], [0], [0], [1], [0, 0, 1, 1], [], []>} : vector<128x64xbf16>, vector<64x128xbf16>, vector<128x128xf32> -> vector<128x128xf32>
    %578 = arith.addf %574, %577 : vector<128x128xf32>
    %c1_427 = arith.constant 1 : index
    %c2_428 = arith.constant 2 : index
    %c0_429 = arith.constant 0 : index
    %c0_430 = arith.constant 0 : index
    %579 = vector.load %arg12[%c1_427, %c2_428, %c0_429, %c0_430] : memref<4x4x64x128xbf16, #tpu.memory_space<vmem>>, vector<1x1x64x128xbf16>
    %580 = vector.shape_cast %579 : vector<1x1x64x128xbf16> to vector<64x128xbf16>
    %cst_431 = arith.constant dense<0.000000e+00> : vector<128x128xf32>
    %581 = tpu.matmul %538, %580, %cst_431 {dimension_numbers = #tpu.dot_dimension_numbers<[1], [0], [0], [1], [0, 0, 1, 1], [], []>} : vector<128x64xbf16>, vector<64x128xbf16>, vector<128x128xf32> -> vector<128x128xf32>
    %582 = arith.addf %578, %581 : vector<128x128xf32>
    %c1_432 = arith.constant 1 : index
    %c3_433 = arith.constant 3 : index
    %c0_434 = arith.constant 0 : index
    %c0_435 = arith.constant 0 : index
    %583 = vector.load %arg12[%c1_432, %c3_433, %c0_434, %c0_435] : memref<4x4x64x128xbf16, #tpu.memory_space<vmem>>, vector<1x1x64x128xbf16>
    %584 = vector.shape_cast %583 : vector<1x1x64x128xbf16> to vector<64x128xbf16>
    %cst_436 = arith.constant dense<0.000000e+00> : vector<128x128xf32>
    %585 = tpu.matmul %541, %584, %cst_436 {dimension_numbers = #tpu.dot_dimension_numbers<[1], [0], [0], [1], [0, 0, 1, 1], [], []>} : vector<128x64xbf16>, vector<64x128xbf16>, vector<128x128xf32> -> vector<128x128xf32>
    %586 = arith.addf %582, %585 : vector<128x128xf32>
    %587 = vector.broadcast %551 : vector<1x128xf32> to vector<128x128xf32>
    %588 = arith.addf %586, %587 : vector<128x128xf32>
    %c1_437 = arith.constant 1 : index
    %c0_438 = arith.constant 0 : index
    %c0_439 = arith.constant 0 : index
    %589 = vector.load %arg14[%c1_437, %c0_438, %c0_439] : memref<4x128x128xf32, #tpu.memory_space<vmem>>, vector<1x128x128xf32>
    %590 = vector.shape_cast %589 : vector<1x128x128xf32> to vector<128x128xf32>
    %591 = vector.shape_cast %588 : vector<128x128xf32> to vector<1x128x128xf32>
    tpu.vector_store %arg14[%c1_437, %c0_438, %c0_439], %591 {strides = array<i32>} : memref<4x128x128xf32, #tpu.memory_space<vmem>>, vector<1x128x128xf32>,
    %c2_440 = arith.constant 2 : index
    %c0_441 = arith.constant 0 : index
    %c0_442 = arith.constant 0 : index
    %c0_443 = arith.constant 0 : index
    %592 = vector.load %arg12[%c2_440, %c0_441, %c0_442, %c0_443] : memref<4x4x64x128xbf16, #tpu.memory_space<vmem>>, vector<1x1x64x128xbf16>
    %593 = vector.shape_cast %592 : vector<1x1x64x128xbf16> to vector<64x128xbf16>
    %cst_444 = arith.constant dense<0.000000e+00> : vector<128x128xf32>
    %594 = tpu.matmul %535, %593, %cst_444 {dimension_numbers = #tpu.dot_dimension_numbers<[1], [0], [0], [1], [0, 0, 1, 1], [], []>} : vector<128x64xbf16>, vector<64x128xbf16>, vector<128x128xf32> -> vector<128x128xf32>
    %c2_445 = arith.constant 2 : index
    %c1_446 = arith.constant 1 : index
    %c0_447 = arith.constant 0 : index
    %c0_448 = arith.constant 0 : index
    %595 = vector.load %arg12[%c2_445, %c1_446, %c0_447, %c0_448] : memref<4x4x64x128xbf16, #tpu.memory_space<vmem>>, vector<1x1x64x128xbf16>
    %596 = vector.shape_cast %595 : vector<1x1x64x128xbf16> to vector<64x128xbf16>
    %cst_449 = arith.constant dense<0.000000e+00> : vector<128x128xf32>
    %597 = tpu.matmul %538, %596, %cst_449 {dimension_numbers = #tpu.dot_dimension_numbers<[1], [0], [0], [1], [0, 0, 1, 1], [], []>} : vector<128x64xbf16>, vector<64x128xbf16>, vector<128x128xf32> -> vector<128x128xf32>
    %598 = arith.addf %594, %597 : vector<128x128xf32>
    %c2_450 = arith.constant 2 : index
    %c2_451 = arith.constant 2 : index
    %c0_452 = arith.constant 0 : index
    %c0_453 = arith.constant 0 : index
    %599 = vector.load %arg12[%c2_450, %c2_451, %c0_452, %c0_453] : memref<4x4x64x128xbf16, #tpu.memory_space<vmem>>, vector<1x1x64x128xbf16>
    %600 = vector.shape_cast %599 : vector<1x1x64x128xbf16> to vector<64x128xbf16>
    %cst_454 = arith.constant dense<0.000000e+00> : vector<128x128xf32>
    %601 = tpu.matmul %544, %600, %cst_454 {dimension_numbers = #tpu.dot_dimension_numbers<[1], [0], [0], [1], [0, 0, 1, 1], [], []>} : vector<128x64xbf16>, vector<64x128xbf16>, vector<128x128xf32> -> vector<128x128xf32>
    %602 = arith.addf %598, %601 : vector<128x128xf32>
    %c2_455 = arith.constant 2 : index
    %c3_456 = arith.constant 3 : index
    %c0_457 = arith.constant 0 : index
    %c0_458 = arith.constant 0 : index
    %603 = vector.load %arg12[%c2_455, %c3_456, %c0_457, %c0_458] : memref<4x4x64x128xbf16, #tpu.memory_space<vmem>>, vector<1x1x64x128xbf16>
    %604 = vector.shape_cast %603 : vector<1x1x64x128xbf16> to vector<64x128xbf16>
    %cst_459 = arith.constant dense<0.000000e+00> : vector<128x128xf32>
    %605 = tpu.matmul %547, %604, %cst_459 {dimension_numbers = #tpu.dot_dimension_numbers<[1], [0], [0], [1], [0, 0, 1, 1], [], []>} : vector<128x64xbf16>, vector<64x128xbf16>, vector<128x128xf32> -> vector<128x128xf32>
    %606 = arith.addf %602, %605 : vector<128x128xf32>
    %607 = vector.broadcast %551 : vector<1x128xf32> to vector<128x128xf32>
    %608 = arith.addf %606, %607 : vector<128x128xf32>
    %c2_460 = arith.constant 2 : index
    %c0_461 = arith.constant 0 : index
    %c0_462 = arith.constant 0 : index
    %609 = vector.load %arg14[%c2_460, %c0_461, %c0_462] : memref<4x128x128xf32, #tpu.memory_space<vmem>>, vector<1x128x128xf32>
    %610 = vector.shape_cast %609 : vector<1x128x128xf32> to vector<128x128xf32>
    %611 = vector.shape_cast %608 : vector<128x128xf32> to vector<1x128x128xf32>
    tpu.vector_store %arg14[%c2_460, %c0_461, %c0_462], %611 {strides = array<i32>} : memref<4x128x128xf32, #tpu.memory_space<vmem>>, vector<1x128x128xf32>,
    %c3_463 = arith.constant 3 : index
    %c0_464 = arith.constant 0 : index
    %c0_465 = arith.constant 0 : index
    %c0_466 = arith.constant 0 : index
    %612 = vector.load %arg12[%c3_463, %c0_464, %c0_465, %c0_466] : memref<4x4x64x128xbf16, #tpu.memory_space<vmem>>, vector<1x1x64x128xbf16>
    %613 = vector.shape_cast %612 : vector<1x1x64x128xbf16> to vector<64x128xbf16>
    %cst_467 = arith.constant dense<0.000000e+00> : vector<128x128xf32>
    %614 = tpu.matmul %538, %613, %cst_467 {dimension_numbers = #tpu.dot_dimension_numbers<[1], [0], [0], [1], [0, 0, 1, 1], [], []>} : vector<128x64xbf16>, vector<64x128xbf16>, vector<128x128xf32> -> vector<128x128xf32>
    %c3_468 = arith.constant 3 : index
    %c1_469 = arith.constant 1 : index
    %c0_470 = arith.constant 0 : index
    %c0_471 = arith.constant 0 : index
    %615 = vector.load %arg12[%c3_468, %c1_469, %c0_470, %c0_471] : memref<4x4x64x128xbf16, #tpu.memory_space<vmem>>, vector<1x1x64x128xbf16>
    %616 = vector.shape_cast %615 : vector<1x1x64x128xbf16> to vector<64x128xbf16>
    %cst_472 = arith.constant dense<0.000000e+00> : vector<128x128xf32>
    %617 = tpu.matmul %541, %616, %cst_472 {dimension_numbers = #tpu.dot_dimension_numbers<[1], [0], [0], [1], [0, 0, 1, 1], [], []>} : vector<128x64xbf16>, vector<64x128xbf16>, vector<128x128xf32> -> vector<128x128xf32>
    %618 = arith.addf %614, %617 : vector<128x128xf32>
    %c3_473 = arith.constant 3 : index
    %c2_474 = arith.constant 2 : index
    %c0_475 = arith.constant 0 : index
    %c0_476 = arith.constant 0 : index
    %619 = vector.load %arg12[%c3_473, %c2_474, %c0_475, %c0_476] : memref<4x4x64x128xbf16, #tpu.memory_space<vmem>>, vector<1x1x64x128xbf16>
    %620 = vector.shape_cast %619 : vector<1x1x64x128xbf16> to vector<64x128xbf16>
    %cst_477 = arith.constant dense<0.000000e+00> : vector<128x128xf32>
    %621 = tpu.matmul %547, %620, %cst_477 {dimension_numbers = #tpu.dot_dimension_numbers<[1], [0], [0], [1], [0, 0, 1, 1], [], []>} : vector<128x64xbf16>, vector<64x128xbf16>, vector<128x128xf32> -> vector<128x128xf32>
    %622 = arith.addf %618, %621 : vector<128x128xf32>
    %c3_478 = arith.constant 3 : index
    %c3_479 = arith.constant 3 : index
    %c0_480 = arith.constant 0 : index
    %c0_481 = arith.constant 0 : index
    %623 = vector.load %arg12[%c3_478, %c3_479, %c0_480, %c0_481] : memref<4x4x64x128xbf16, #tpu.memory_space<vmem>>, vector<1x1x64x128xbf16>
    %624 = vector.shape_cast %623 : vector<1x1x64x128xbf16> to vector<64x128xbf16>
    %cst_482 = arith.constant dense<0.000000e+00> : vector<128x128xf32>
    %625 = tpu.matmul %550, %624, %cst_482 {dimension_numbers = #tpu.dot_dimension_numbers<[1], [0], [0], [1], [0, 0, 1, 1], [], []>} : vector<128x64xbf16>, vector<64x128xbf16>, vector<128x128xf32> -> vector<128x128xf32>
    %626 = arith.addf %622, %625 : vector<128x128xf32>
    %627 = vector.broadcast %551 : vector<1x128xf32> to vector<128x128xf32>
    %628 = arith.addf %626, %627 : vector<128x128xf32>
    %c3_483 = arith.constant 3 : index
    %c0_484 = arith.constant 0 : index
    %c0_485 = arith.constant 0 : index
    %629 = vector.load %arg14[%c3_483, %c0_484, %c0_485] : memref<4x128x128xf32, #tpu.memory_space<vmem>>, vector<1x128x128xf32>
    %630 = vector.shape_cast %629 : vector<1x128x128xf32> to vector<128x128xf32>
    %631 = vector.shape_cast %628 : vector<128x128xf32> to vector<1x128x128xf32>
    tpu.vector_store %arg14[%c3_483, %c0_484, %c0_485], %631 {strides = array<i32>} : memref<4x128x128xf32, #tpu.memory_space<vmem>>, vector<1x128x128xf32>,
    return
  }
  func.func @transform_0(%arg0: i32) -> (i32, i32) {
    %c0_i32 = arith.constant 0 : i32
    %c0_i32_0 = arith.constant 0 : i32
    %c0_i32_1 = arith.constant 0 : i32
    return %c0_i32, %c0_i32_0 : i32, i32
  }
  func.func @transform_1(%arg0: i32) -> (i32, i32) {
    %c0_i32 = arith.constant 0 : i32
    %c0_i32_0 = arith.constant 0 : i32
    %c0_i32_1 = arith.constant 0 : i32
    return %c0_i32, %c0_i32_0 : i32, i32
  }
  func.func @transform_2(%arg0: i32) -> (i32, i32) {
    %c0_i32 = arith.constant 0 : i32
    %c0_i32_0 = arith.constant 0 : i32
    %c0_i32_1 = arith.constant 0 : i32
    return %c0_i32, %c0_i32_0 : i32, i32
  }
  func.func @transform_3(%arg0: i32) -> (i32, i32) {
    %c0_i32 = arith.constant 0 : i32
    %c0_i32_0 = arith.constant 0 : i32
    %c0_i32_1 = arith.constant 0 : i32
    return %c0_i32, %c0_i32_0 : i32, i32
  }
  func.func @transform_4(%arg0: i32) -> (i32, i32) {
    %c0_i32 = arith.constant 0 : i32
    %c0_i32_0 = arith.constant 0 : i32
    %c0_i32_1 = arith.constant 0 : i32
    return %c0_i32, %c0_i32_0 : i32, i32
  }
  func.func @transform_5(%arg0: i32) -> (i32, i32) {
    %c0_i32 = arith.constant 0 : i32
    %c0_i32_0 = arith.constant 0 : i32
    %c0_i32_1 = arith.constant 0 : i32
    return %c0_i32, %c0_i32_0 : i32, i32
  }
  func.func @transform_6(%arg0: i32) -> (i32, i32) {
    %c0_i32 = arith.constant 0 : i32
    %c0_i32_0 = arith.constant 0 : i32
    %c0_i32_1 = arith.constant 0 : i32
    return %c0_i32, %c0_i32_0 : i32, i32
  }
  func.func @transform_7(%arg0: i32) -> (i32, i32) {
    %c0_i32 = arith.constant 0 : i32
    %c0_i32_0 = arith.constant 0 : i32
    %c0_i32_1 = arith.constant 0 : i32
    return %c0_i32, %c0_i32_0 : i32, i32
  }
  func.func @transform_8(%arg0: i32) -> (i32, i32) {
    %c0_i32 = arith.constant 0 : i32
    %c0_i32_0 = arith.constant 0 : i32
    %c0_i32_1 = arith.constant 0 : i32
    return %c0_i32, %c0_i32_0 : i32, i32
  }
  func.func @transform_9(%arg0: i32) -> (i32, i32) {
    %c0_i32 = arith.constant 0 : i32
    %c0_i32_0 = arith.constant 0 : i32
    %c0_i32_1 = arith.constant 0 : i32
    return %c0_i32, %c0_i32_0 : i32, i32
  }
  func.func @transform_10(%arg0: i32) -> (i32, i32) {
    %c0_i32 = arith.constant 0 : i32
    %c0_i32_0 = arith.constant 0 : i32
    %c0_i32_1 = arith.constant 0 : i32
    return %c0_i32, %c0_i32_0 : i32, i32
  }
  func.func @transform_11(%arg0: i32) -> (i32, i32, i32, i32) {
    %c0_i32 = arith.constant 0 : i32
    %c0_i32_0 = arith.constant 0 : i32
    %c0_i32_1 = arith.constant 0 : i32
    %c0_i32_2 = arith.constant 0 : i32
    %c0_i32_3 = arith.constant 0 : i32
    return %c0_i32, %c0_i32_0, %c0_i32_1, %c0_i32_2 : i32, i32, i32, i32
  }
  func.func @transform_12(%arg0: i32) -> (i32, i32) {
    %c0_i32 = arith.constant 0 : i32
    %c0_i32_0 = arith.constant 0 : i32
    %c0_i32_1 = arith.constant 0 : i32
    return %c0_i32, %c0_i32_0 : i32, i32
  }
  func.func @transform_13(%arg0: i32) -> (i32, i32, i32) {
    %c0_i32 = arith.constant 0 : i32
    %c0_i32_0 = arith.constant 0 : i32
    %c0_i32_1 = arith.constant 0 : i32
    %c0_i32_2 = arith.constant 0 : i32
    return %c0_i32, %c0_i32_0, %c0_i32_1 : i32, i32, i32
  }
}

</mosaic_0001>

<bundles_post_ra>
// kernel: discriminator_forward.1
= control target key start
LH: loop header
LB: loop body
LE: loop exit
PB: predicated region body
PF: predicated region fallthrough
CT: control target
= control target key end

     0   :  { %vm128_vm0 = vcmask 293888   ;;  %vm153_vm1 = vcmask 1041408   ;;  %v275_v19 = vlaneseq  ;;  %v12970_v26 = vmov 1983009808   ;;  %s12971_s26 = smov 64   ;;  %s17851_s1 = inlined_call_operand.vmem [shape: bf16[36,64], index: 1, kind: input, shape index: {}]   ;;  %s17852_s0 = inlined_call_operand.vmem [shape: bf16[128,36], index: 0, kind: input, shape index: {}]   ;;  %s17853_s3 = inlined_call_operand.vmem [shape: bf16[4096,32], index: 3, kind: input, shape index: {}]   ;;  %s17854_s2 = inlined_call_operand.vmem [shape: f32[1,64], index: 2, kind: input, shape index: {}]   ;;  %s17855_s4 = inlined_call_operand.vmem [shape: f32[1,32], index: 4, kind: input, shape index: {}]   ;;  %s17856_s7 = inlined_call_operand.vmem [shape: bf16[32,4096], index: 7, kind: input, shape index: {}]   ;;  %s17857_s5 = inlined_call_operand.vmem [shape: f32[1,32], index: 5, kind: input, shape index: {}]   ;;  %s17858_s6 = inlined_call_operand.vmem [shape: f32[1,32], index: 6, kind: input, shape index: {}]   ;;  %s17859_s8 = inlined_call_operand.vmem [shape: f32[1,4096], index: 8, kind: input, shape index: {}]   ;;  %s17860_s9 = inlined_call_operand.vmem [shape: f32[1,4096], index: 9, kind: input, shape index: {}]   ;;  %s17861_s10 = inlined_call_operand.vmem [shape: f32[1,4096], index: 10, kind: input, shape index: {}]   ;;  %s17862_s11 = inlined_call_operand.vmem [shape: bf16[4,4,64,128], index: 11, kind: input, shape index: {}]   ;;  %s17863_s12 = inlined_call_operand.vmem [shape: f32[1,128], index: 12, kind: input, shape index: {}]   ;;  %s17864_s13 = inlined_call_operand.vmem [shape: f32[4,128,128], index: 13, kind: output, shape index: {}]  }
   0x1   :  { %v12560_v0 = vld [vmem:[%s17851_s1] sm:$0xff]   ;;  %v12561_v1 = vld [vmem:[%s17851_s1 + $0x8] sm:$0xff]   ;;  %v12562_v2 = vld [vmem:[%s17851_s1 + $0x10] ss:$0 sps:$4 sm:$0x33]   ;;  %v273_v27 = vunpack.c.l.s4 %v12970_v26  ;;  %vm291_vm2 = vcmask 1041409  }
   0x2   :  { %11956 = vmatprep.subr.bf16.mxu0 %v12560_v0  ;;  %v12563_v3 = vld [vmem:[%s17852_s0] sm:$0xff]   ;;  %v155_v4 = vsel %vm153_vm1, %v12562_v2, 0  ;;  %v12564_v5 = vld [vmem:[%s17852_s0 + $0x8] sm:$0xff]   ;;  %v12565_v6 = vld [vmem:[%s17852_s0 + $0x10] sm:$0xff]   ;;  %v13121_v24 = vshrl.u32 %v275_v19, 7  ;;  %vm293_vm3 = vcmask 1043459  }
   0x3   :  { %11957 = vmatpush3.bf16.msra.mxu0 %v12560_v0  ;;  %11962 = vmatprep.mubr.msk.bf16.mxu0 %vm128_vm0, %v12563_v3  ;;  %v12566_v7 = vld [vmem:[%s17852_s0 + $0x18] sm:$0xff]   ;;  %v12567_v8 = vld [vmem:[%s17852_s0 + $0x20] sm:$0xff]   ;;  %v12568_v9 = vld [vmem:[%s17852_s0 + $0x28] sm:$0xff]   ;;  %v274_v29 = vunpack.c.0.s8 %v273_v27  ;;  %vm295_vm4 = vcmask 1045509   ;;  %vm297_vm5 = vcmask 1047559   ;;  %vm300_vm6 = vcmask 517120  }
   0x4   :  { %11958 = vmatprep.subr.bf16.mxu0 %v12561_v1  ;;  %v12569_v10 = vld [vmem:[%s17852_s0 + $0x30] sm:$0xff]   ;;  %v12570_v11 = vld [vmem:[%s17852_s0 + $0x38] sm:$0xff]   ;;  %v12571_v12 = vld [vmem:[%s17853_s3 + $0x40] sm:$0xff]   ;;  %17899 = vst [vmem:[#allocation4_spill] sm:$0xff] %v13121_v24  ;;  %vm312_vm7 = vcmask 1041920   ;;  %vm4117_vm8 = vcmask 254976  }
   0x5   :  { %v12572_v13 = vld [vmem:[%s17853_s3] sm:$0xff]   ;;  %11412 = vmatprep.subr.bf16.mxu1 %v12571_v12  ;;  %v12575_v16 = vld [vmem:[%s17853_s3 + $0x48] sm:$0xff]   ;;  %v12579_v21 = vld [vmem:[%s17853_s3 + $0x50] sm:$0xff]   ;;  %v13133_v32 = vsub.s32 %v274_v29, %v13121_v24  ;;  %vm4710_vm9 = vcmask 261120   ;;  %vm6474_vm10 = vcmask 523264   ;;  %vm6541_vm11 = vcmask 516096  }
   0x6   :  { %v12573_v14 = vld [vmem:[%s17853_s3 + $0xc0] sm:$0xff]   ;;  %11413 = vmatpush3.bf16.msra.mxu1 %v12572_v13  ;;  %v12576_v17 = vld [vmem:[%s17853_s3 + $0x8] sm:$0xff]   ;;  %v12580_v22 = vld [vmem:[%s17853_s3 + $0x10] sm:$0xff]  }
   0x7   :  { %11959 = vmatpush3.bf16.msra.mxu0 %v12561_v1  ;;  %v12574_v15 = vld [vmem:[%s17853_s3 + $0x80] sm:$0xff]   ;;  %11414 = vmatprep.subr.bf16.mxu1 %v12575_v16  ;;  %v12577_v18 = vld [vmem:[%s17853_s3 + $0xc8] sm:$0xff]   ;;  %v12581_v23 = vld [vmem:[%s17853_s3 + $0xd0] sm:$0xff]   ;;  %17900 = vst [vmem:[#allocation5_spill] sm:$0xff] %v13133_v32 }
   0x8   :  { %12554 = vmatprep.subr.msk.bf16.mxu0 %vm153_vm1, %v12562_v2  ;;  %v12578_v20 = vld [vmem:[%s17853_s3 + $0x88] sm:$0xff]   ;;  %v12582_v25 = vld [vmem:[%s17853_s3 + $0x90] sm:$0xff]   ;;  %v13129_v28 = vld [vmem:[%s17854_s2] ss:$0 sm:$0xff] }
   0xa   :  { %11415 = vmatpush3.bf16.msra.mxu1 %v12576_v17 }
   0xb   :  { %11961 = vmatpush3.bf16.msra.mxu0 %v155_v4  ;;  %11416 = vmatprep.subr.bf16.mxu1 %v12579_v21 }
   0xc   :  { %11434 = vmatprep.subr.bf16.mxu0 %v12573_v14 }
   0xe   :  { %11963 = vmatmul.mubr.msk.bf16.vlgmr.msra.gmra.mrb[0].mxu0 %vm128_vm0, %v12564_v5  ;;  %11417 = vmatpush3.bf16.msra.mxu1 %v12580_v22 }
   0xf   :  { %11966 = vmatprep.mubr.msk.bf16.mxu0 %vm128_vm0, %v12565_v6  ;;  %11435 = vmatpush3.bf16.msra.mxu0 %v12574_v15 }
  0x10   :  { %11436 = vmatprep.subr.bf16.mxu0 %v12577_v18 }
  0x13   :  { %11437 = vmatpush3.bf16.msra.mxu0 %v12578_v20 }
  0x14   :  { %11438 = vmatprep.subr.bf16.mxu0 %v12581_v23 }
  0x16   :  { %11967 = vmatmul.mubr.msk.bf16.gmra.mrb[4].mxu0 %vm128_vm0, %v12566_v7 }
  0x17   :  { %11970 = vmatprep.mubr.msk.bf16.mxu0 %vm128_vm0, %v12567_v8  ;;  %11439 = vmatpush3.bf16.msra.mxu0 %v12582_v25  ;;  %v12583_v8 = vld [vmem:[%s17853_s3 + $0x58] sm:$0xff]  }
  0x18   :  { %11418 = vmatprep.subr.bf16.mxu1 %v12583_v8  ;;  %v12587_v8 = vld [vmem:[%s17853_s3 + $0x60] sm:$0xff]  }
  0x1e   :  { %11971 = vmatmul.mubr.msk.bf16.gmra.mrb[8].mxu0 %vm128_vm0, %v12568_v9 }
  0x1f   :  { %11974 = vmatprep.mubr.msk.bf16.mxu0 %vm128_vm0, %v12569_v10 }
  0x26   :  { %11975 = vmatmul.mubr.msk.bf16.gmra.mrb[12].mxu0 %vm128_vm0, %v12570_v11 }
  0xe1   :  { %v11964_v30 = vpop.f32.mrb[0].mxu0 }
  0xe2   :  { %v200_v31 = vadd.f32 %v11964_v30, %v13129_v28  ;;  %v191_v33 = vpop.f32.mrb[1].mxu0 }
  0xe3   :  { %v192_v34 = vadd.f32 %v13129_v28, %v191_v33  ;;  %v11965_v35 = vpop.f32.mrb[2].mxu0 }
  0xe4   :  { %v256_v36 = vmax.f32 %v200_v31, 0.0  ;;  %v203_v37 = vadd.f32 %v11965_v35, %v13129_v28  ;;  %v194_v38 = vpop.f32.mrb[3].mxu0 }
  0xe5   :  { %v254_v39 = vmax.f32 %v192_v34, 0.0  ;;  %v195_v40 = vadd.f32 %v13129_v28, %v194_v38 }
  0xe6   :  { %v13139_v41 = vrot.slane %v256_v36, %v13133_v32  ;;  %v568_v42 = vcombine.high %v256_v36, %v256_v36  ;;  %v257_v43 = vmax.f32 %v203_v37, 0.0 }
  0xe7   :  { %v13142_v44 = vrot.slane %v254_v39, %v13133_v32  ;;  %v336_v45 = vcombine.high %v254_v39, %v254_v39  ;;  %v255_v46 = vmax.f32 %v195_v40, 0.0  ;;  %v12586_v40 = vld [vmem:[%s17853_s3 + $0x98] sm:$0xff]  }
  0xe8   :  { %17901 = vst [vmem:[#allocation6_spill] sm:$0xff] %v13139_v41  ;;  %v13147_v48 = vcombine.high %v13139_v41, %v13139_v41  ;;  %v13150_v49 = vrot.slane %v568_v42, %v13133_v32  ;;  %v13153_v50 = vrot.slane %v257_v43, %v13133_v32  ;;  %v684_v54 = vcombine.high %v257_v43, %v257_v43 }
  0xe9   :  { %v302_v51 = vrot.slane %v13142_v44, 1  ;;  %v13158_v52 = vcombine.high %v13142_v44, %v13142_v44  ;;  %v13161_v53 = vrot.slane %v336_v45, %v13133_v32  ;;  %v11968_v55 = vpop.f32.mrb[4].mxu0  ;;  %v13185_v4 = vrot.slane %v255_v46, %v13133_v32 }
  0xea   :  { %17902 = vst [vmem:[#allocation7_spill] sm:$0xff] %v13147_v48  ;;  %17903 = vst [vmem:[#allocation8_spill] sm:$0xff] %v13150_v49  ;;  %v13167_v58 = vcombine.high %v13150_v49, %v13150_v49  ;;  %v207_v60 = vpop.f32.mrb[5].mxu0  ;;  %v13178_v0 = vcombine.high %v13153_v50, %v13153_v50  ;;  %v13182_v3 = vrot.slane %v684_v54, %v13133_v32 }
  0xeb   :  { %v325_v61 = vrot.slane %v13158_v52, 1  ;;  %v361_v62 = vrot.slane %v13161_v53, 1  ;;  %v13174_v63 = vcombine.high %v13161_v53, %v13161_v53  ;;  %v11969_v1 = vpop.f32.mrb[6].mxu0  ;;  %17905 = vst [vmem:[#allocation10_spill] sm:$0xff] %v13185_v4  ;;  %v452_v5 = vcombine.high %v255_v46, %v255_v46 }
  0xec   :  { %17904 = vst [vmem:[#allocation9_spill] sm:$0xff] %v13167_v58  ;;  %v210_v6 = vpop.f32.mrb[7].mxu0  ;;  %v216_v9 = vadd.f32 %v11968_v55, %v13129_v28  ;;  %v208_v10 = vadd.f32 %v13129_v28, %v207_v60  ;;  %v13194_v12 = vcombine.high %v13182_v3, %v13182_v3  ;;  %v13199_v14 = vcombine.high %v13185_v4, %v13185_v4 }
  0xed   :  { %v13202_v15 = vrot.slane %v452_v5, %v13133_v32  ;;  %v219_v18 = vadd.f32 %v11969_v1, %v13129_v28  ;;  %v211_v21 = vadd.f32 %v13129_v28, %v210_v6 }
  0xee   :  { %17906 = vst [vmem:[#allocation11_spill] sm:$0xff] %v13199_v14  ;;  %v260_v16 = vmax.f32 %v216_v9, 0.0  ;;  %v258_v17 = vmax.f32 %v208_v10, 0.0 }
  0xef   :  { %17907 = vst [vmem:[#allocation12_spill] sm:$0xff] %v13202_v15  ;;  %v13211_v23 = vcombine.high %v13202_v15, %v13202_v15  ;;  %v261_v31 = vmax.f32 %v219_v18, 0.0  ;;  %v259_v33 = vmax.f32 %v211_v21, 0.0 }
  0xf0   :  { %v13214_v25 = vrot.slane %v260_v16, %v13133_v32  ;;  %v1032_v26 = vcombine.high %v260_v16, %v260_v16  ;;  %v13217_v29 = vrot.slane %v258_v17, %v13133_v32  ;;  %v800_v30 = vcombine.high %v258_v17, %v258_v17 }
  0xf1   :  { %17908 = vst [vmem:[#allocation13_spill] sm:$0xff] %v13211_v23  ;;  %v11972_v27 = vpop.f32.mrb[8].mxu0  ;;  %v13237_v45 = vrot.slane %v261_v31, %v13133_v32  ;;  %v1148_v1 = vcombine.high %v261_v31, %v261_v31  ;;  %v13261_v21 = vrot.slane %v259_v33, %v13133_v32 }
  0xf2   :  { %17909 = vst [vmem:[#allocation14_spill] sm:$0xff] %v13214_v25  ;;  %17910 = vst [vmem:[#allocation15_spill] sm:$0xff] %v13217_v29  ;;  %v223_v34 = vpop.f32.mrb[9].mxu0  ;;  %v13223_v37 = vcombine.high %v13214_v25, %v13214_v25  ;;  %v13226_v38 = vrot.slane %v1032_v26, %v13133_v32  ;;  %v13231_v42 = vcombine.high %v13217_v29, %v13217_v29 }
  0xf3   :  { %v11973_v39 = vpop.f32.mrb[10].mxu0  ;;  %v13234_v43 = vrot.slane %v800_v30, %v13133_v32  ;;  %17913 = vst [vmem:[#allocation18_spill] sm:$0xff] %v13237_v45  ;;  %v13255_v17 = vcombine.high %v13237_v45, %v13237_v45  ;;  %v13258_v18 = vrot.slane %v1148_v1, %v13133_v32  ;;  %17917 = vst [vmem:[#allocation22_spill] sm:$0xff] %v13261_v21 }
  0xf4   :  { %17911 = vst [vmem:[#allocation16_spill] sm:$0xff] %v13226_v38  ;;  %v226_v46 = vpop.f32.mrb[11].mxu0  ;;  %v13243_v60 = vcombine.high %v13226_v38, %v13226_v38  ;;  %v916_v30 = vcombine.high %v259_v33, %v259_v33  ;;  %v232_v31 = vadd.f32 %v11972_v27, %v13129_v28  ;;  %v224_v54 = vadd.f32 %v13129_v28, %v223_v34 }
  0xf5   :  { %17912 = vst [vmem:[#allocation17_spill] sm:$0xff] %v13234_v43  ;;  %v13249_v9 = vcombine.high %v13234_v43, %v13234_v43  ;;  %17915 = vst [vmem:[#allocation20_spill] sm:$0xff] %v13255_v17  ;;  %v13270_v55 = vcombine.high %v13258_v18, %v13258_v18  ;;  %v13275_v26 = vcombine.high %v13261_v21, %v13261_v21 }
  0xf6   :  { %17916 = vst [vmem:[#allocation21_spill] sm:$0xff] %v13258_v18  ;;  %v13278_v27 = vrot.slane %v916_v30, %v13133_v32  ;;  %v264_v33 = vmax.f32 %v232_v31, 0.0  ;;  %v262_v34 = vmax.f32 %v224_v54, 0.0  ;;  %v235_v5 = vadd.f32 %v11973_v39, %v13129_v28  ;;  %v12584_v30 = vld [vmem:[%s17853_s3 + $0x18] sm:$0xff]  }
  0xf7   :  { %17914 = vst [vmem:[#allocation19_spill] sm:$0xff] %v13249_v9  ;;  %17918 = vst [vmem:[#allocation23_spill] sm:$0xff] %v13270_v55  ;;  %v227_v19 = vadd.f32 %v13129_v28, %v226_v46  ;;  %v12585_v54 = vld [vmem:[%s17853_s3 + $0xd8] sm:$0xff]   ;;  %11419 = vmatpush3.bf16.msra.mxu1 %v12584_v30 }
  0xf8   :  { %17919 = vst [vmem:[#allocation24_spill] sm:$0xff] %v13278_v27  ;;  %v13300_v31 = vrot.slane %v264_v33, %v13133_v32  ;;  %v576_v11 = vcombine.high %v264_v33, %v264_v33  ;;  %v13306_v59 = vrot.slane %v262_v34, %v13133_v32  ;;  %v344_v39 = vcombine.high %v262_v34, %v262_v34  ;;  %v12590_v34 = vld [vmem:[%s17853_s3 + $0xa0] sm:$0xff]  }
  0xf9   :  { %v11976_v36 = vpop.f32.mrb[12].mxu0  ;;  %v265_v2 = vmax.f32 %v235_v5, 0.0  ;;  %11440 = vmatprep.subr.bf16.mxu0 %v12585_v54  ;;  %v263_v56 = vmax.f32 %v227_v19, 0.0  ;;  %v12588_v19 = vld [vmem:[%s17853_s3 + $0x20] sm:$0xff]   ;;  %11420 = vmatprep.subr.bf16.mxu1 %v12587_v8  ;;  %v12591_v8 = vld [vmem:[%s17853_s3 + $0x68] sm:$0xff]  }
  0xfa   :  { %v239_v16 = vpop.f32.mrb[13].mxu0  ;;  %v248_v1 = vadd.f32 %v11976_v36, %v13129_v28  ;;  %v13297_v36 = vcombine.high %v13278_v27, %v13278_v27  ;;  %11441 = vmatpush3.bf16.msra.mxu0 %v12586_v40  ;;  %v13311_v35 = vrot.slane %v576_v11, %v13133_v32  ;;  %v13314_v33 = vrot.slane %v344_v39, %v13133_v32  ;;  %v12589_v11 = vld [vmem:[%s17853_s3 + $0xe0] sm:$0xff]  }
  0xfb   :  { %v11977_v6 = vpop.f32.mrb[14].mxu0  ;;  %v240_v47 = vadd.f32 %v13129_v28, %v239_v16  ;;  %v13317_v20 = vrot.slane %v265_v2, %v13133_v32  ;;  %v692_v5 = vcombine.high %v265_v2, %v265_v2  ;;  %v13329_v40 = vrot.slane %v263_v56, %v13133_v32  ;;  %11442 = vmatprep.subr.bf16.mxu0 %v12589_v11 }
  0xfc   :  { %17920 = vst [vmem:[#allocation25_spill] sm:$0xff] %v13297_v36  ;;  %v242_v10 = vpop.f32.mrb[15].mxu0  ;;  %v268_v57 = vmax.f32 %v248_v1, 0.0  ;;  %v460_v16 = vcombine.high %v263_v56, %v263_v56  ;;  %v251_v39 = vadd.f32 %v11977_v6, %v13129_v28  ;;  %11421 = vmatpush3.bf16.msra.mxu1 %v12588_v19 }
  0xfd   :  { %v13338_v30 = vrot.slane %v692_v5, %v13133_v32  ;;  %v266_v54 = vmax.f32 %v240_v47, 0.0  ;;  %v243_v46 = vadd.f32 %v13129_v28, %v242_v10  ;;  %v364_v47 = vsel %vm291_vm2, %v13314_v33, %v361_v62  ;;  %v12593_v62 = vld [vmem:[%s17853_s3 + $0xe8] sm:$0xff]   ;;  %11422 = vmatprep.subr.bf16.mxu1 %v12591_v8 }
  0xfe   :  { %v13332_v1 = vrot.slane %v268_v57, %v13133_v32  ;;  %v1040_v2 = vcombine.high %v268_v57, %v268_v57  ;;  %v13343_v56 = vrot.slane %v460_v16, %v13133_v32  ;;  %v305_v57 = vsel %vm291_vm2, %v13306_v59, %v302_v51  ;;  %11443 = vmatpush3.bf16.msra.mxu0 %v12590_v34  ;;  %v12592_v51 = vld [vmem:[%s17853_s3 + $0x28] sm:$0xff]  }
  0xff   :  { %v13357_v28 = vrot.slane %v266_v54, %v13133_v32  ;;  %v808_v6 = vcombine.high %v266_v54, %v266_v54  ;;  %v269_v10 = vmax.f32 %v251_v39, 0.0  ;;  %v267_v5 = vmax.f32 %v243_v46, 0.0  ;;  %11444 = vmatprep.subr.bf16.mxu0 %v12593_v62 }
 0x100   :  { %v13346_v22 = vrot.slane %v1040_v2, %v13133_v32  ;;  %v306_v19 = vsel %vm293_vm3, %v13306_v59, %v305_v57  ;;  %v365_v11 = vsel %vm293_vm3, %v13314_v33, %v364_v47  ;;  %v13374_v46 = vcombine.high %v13306_v59, %v13306_v59  ;;  %v12594_v2 = vld [vmem:[%s17853_s3 + $0xa8] sm:$0xff]   ;;  %11423 = vmatpush3.bf16.msra.mxu1 %v12592_v51  ;;  %v12597_v51 = vld [vmem:[%s17853_s3 + $0xf0] sm:$0xff]  }
 0x101   :  { %v13378_v16 = vcombine.high %v13314_v33, %v13314_v33  ;;  %v13384_v34 = vrot.slane %v808_v6, %v13133_v32  ;;  %v13387_v54 = vrot.slane %v269_v10, %v13133_v32  ;;  %v1156_v39 = vcombine.high %v269_v10, %v269_v10 }
 0x102   :  { %v13390_v57 = vrot.slane %v267_v5, %v13133_v32  ;;  %v924_v47 = vcombine.high %v267_v5, %v267_v5  ;;  %v307_v13 = vsel %vm295_vm4, %v13306_v59, %v306_v19  ;;  %v366_v7 = vsel %vm295_vm4, %v13314_v33, %v365_v11  ;;  %v12595_v19 = vld [vmem:[%s17853_s3 + $0x70] sm:$0xff]   ;;  %11445 = vmatpush3.bf16.msra.mxu0 %v12594_v2 }
 0x103   :  { %v328_v6 = vsel %vm291_vm2, %v13374_v46, %v325_v61  ;;  %v13401_v24 = vrot.slane %v1156_v39, %v13133_v32  ;;  %v308_v10 = vsel %vm297_vm5, %v13306_v59, %v307_v13  ;;  %v367_v5 = vsel %vm297_vm5, %v13314_v33, %v366_v7  ;;  %v12596_v61 = vld [vmem:[%s17853_s3 + $0x30] sm:$0xff]   ;;  %11424 = vmatprep.subr.bf16.mxu1 %v12595_v19  ;;  %v12600_v19 = vld [vmem:[%s17853_s3 + $0x38] sm:$0xff]  }
 0x104   :  { %v329_v8 = vsel %vm293_vm3, %v13374_v46, %v328_v6  ;;  %v13419_v13 = vrot.slane %v924_v47, %v13133_v32  ;;  %309 = vrot.lane.b32.xlu0 %v308_v10, %s12971_s26  ;;  %368 = vrot.lane.b32.xlu1 %v367_v5, %s12971_s26  ;;  %v17922_v62 = vrot.slane %v13174_v63, 1  ;;  %v13430_v39 = vrot.slane %v13306_v59, 7  ;;  %v12598_v47 = vld [vmem:[%s17853_s3 + $0xb0] sm:$0xff]  }
 0x105   :  { %v330_v7 = vsel %vm295_vm4, %v13374_v46, %v329_v8  ;;  %v17923_v5 = vrot.slane %v13185_v4, 1  ;;  %v13457_v4 = vcombine.high %v13343_v56, %v13343_v56  ;;  %11425 = vmatpush3.bf16.msra.mxu1 %v12596_v61  ;;  %11446 = vmatprep.subr.bf16.mxu0 %v12597_v51 }
 0x106   :  { %17921 = vst [vmem:[#allocation26_spill] sm:$0xff] %v13419_v13  ;;  %v386_v11 = vsel %vm291_vm2, %v13378_v16, %v17922_v62  ;;  %v331_v6 = vsel %vm297_vm5, %v13374_v46, %v330_v7  ;;  %v13445_v62 = vcombine.high %v13329_v40, %v13329_v40  ;;  %v17924_v7 = vrot.slane %v13202_v15, 1  ;;  %11447 = vmatpush3.bf16.msra.mxu0 %v12598_v47  ;;  %v12602_v47 = vld [vmem:[%s17853_s3 + $0xb8] sm:$0xff]  }
 0x107   :  { %v387_v10 = vsel %vm293_vm3, %v13378_v16, %v386_v11  ;;  %v422_v8 = vsel %vm291_vm2, %v13329_v40, %v17923_v5 }
 0x108   :  { %v388_v59 = vsel %vm295_vm4, %v13378_v16, %v387_v10  ;;  %v423_v32 = vsel %vm293_vm3, %v13329_v40, %v422_v8  ;;  %v480_v11 = vsel %vm291_vm2, %v13343_v56, %v17924_v7  ;;  %v17925_v10 = vrot.slane %v13199_v14, 1  ;;  %v12599_v7 = vld [vmem:[%s17853_s3 + $0x78] sm:$0xff]   ;;  %332 = vrot.lane.b32.xlu0 %v331_v6, %s12971_s26 }
 0x109   :  { %v389_v5 = vsel %vm297_vm5, %v13378_v16, %v388_v59  ;;  %v424_v2 = vsel %vm295_vm4, %v13329_v40, %v423_v32  ;;  %v481_v15 = vsel %vm293_vm3, %v13343_v56, %v480_v11  ;;  %v13484_v11 = vrot.slane %v13314_v33, 7  ;;  %11426 = vmatprep.subr.bf16.mxu1 %v12599_v7 }
 0x10a   :  { %v444_v8 = vsel %vm291_vm2, %v13445_v62, %v17925_v10  ;;  %390 = vrot.lane.b32.xlu1 %v389_v5, %s12971_s26  ;;  %v425_v32 = vsel %vm297_vm5, %v13329_v40, %v424_v2  ;;  %v482_v61 = vsel %vm295_vm4, %v13343_v56, %v481_v15  ;;  %v12601_v10 = vld [vmem:[%s17853_s3 + $0xf8] sm:$0xff]   ;;  %v17926_v2 = vrot.slane %v13211_v23, 1  ;;  %11427 = vmatpush3.bf16.msra.mxu1 %v12600_v19 }
 0x10b   :  { %v445_v59 = vsel %vm293_vm3, %v13445_v62, %v444_v8  ;;  %v483_v5 = vsel %vm297_vm5, %v13343_v56, %v482_v61  ;;  %v17927_v15 = vrot.slane %v13139_v41, 1  ;;  %v13509_v23 = vcombine.high %v13300_v31, %v13300_v31  ;;  %11448 = vmatprep.subr.bf16.mxu0 %v12601_v10 }
 0x10c   :  { %v446_v6 = vsel %vm295_vm4, %v13445_v62, %v445_v59  ;;  %v502_v8 = vsel %vm291_vm2, %v13457_v4, %v17926_v2  ;;  %426 = vrot.lane.b32.xlu0 %v425_v32, %s12971_s26  ;;  %v17929_v7 = vrot.slane %v13147_v48, 1  ;;  %v12606_v32 = vld [vmem:[%s17853_s3 + $0x1c0] sm:$0xff]   ;;  %11449 = vmatpush3.bf16.msra.mxu0 %v12602_v47  ;;  %v13581_v10 = vcombine.high %v13317_v20, %v13317_v20 }
 0x10d   :  { %v538_v33 = vsel %vm291_vm2, %v13300_v31, %v17927_v15  ;;  %v447_v14 = vsel %vm297_vm5, %v13445_v62, %v446_v6  ;;  %v503_v59 = vsel %vm293_vm3, %v13457_v4, %v502_v8  ;;  %v17928_v15 = vrot.slane %v13150_v49, 1  ;;  %11478 = vmatprep.subr.bf16.mxu0 %v12606_v32 }
 0x10e   :  { %v539_v61 = vsel %vm293_vm3, %v13300_v31, %v538_v33  ;;  %v504_v2 = vsel %vm295_vm4, %v13457_v4, %v503_v59  ;;  %v13521_v8 = vcombine.high %v13311_v35, %v13311_v35  ;;  %v12604_v33 = vld [vmem:[%s17853_s3 + $0x140] sm:$0xff]   ;;  %448 = vrot.lane.b32.xlu1 %v447_v14, %s12971_s26  ;;  %v13540_v49 = vrot.slane %v13374_v46, 7 }
 0x10f   :  { %v540_v51 = vsel %vm295_vm4, %v13300_v31, %v539_v61  ;;  %v596_v6 = vsel %vm291_vm2, %v13311_v35, %v17928_v15  ;;  %v505_v59 = vsel %vm297_vm5, %v13457_v4, %v504_v2  ;;  %v560_v15 = vsel %vm291_vm2, %v13509_v23, %v17929_v7  ;;  %11456 = vmatprep.subr.bf16.mxu1 %v12604_v33 }
 0x110   :  { %v541_v61 = vsel %vm297_vm5, %v13300_v31, %v540_v51  ;;  %v561_v14 = vsel %vm293_vm3, %v13509_v23, %v560_v15  ;;  %v597_v2 = vsel %vm293_vm3, %v13311_v35, %v596_v6  ;;  %v17930_v51 = vrot.slane %v13167_v58, 1  ;;  %484 = vrot.lane.b32.xlu0 %v483_v5, %s12971_s26 }
 0x111   :  { %v17931_v7 = vrot.slane %v13153_v50, 1  ;;  %v562_v41 = vsel %vm295_vm4, %v13509_v23, %v561_v14  ;;  %v598_v15 = vsel %vm295_vm4, %v13311_v35, %v597_v2  ;;  %v13584_v2 = vrot.slane %v13378_v16, 7 }
 0x112   :  { %v618_v48 = vsel %vm291_vm2, %v13521_v8, %v17930_v51  ;;  %v563_v51 = vsel %vm297_vm5, %v13509_v23, %v562_v41  ;;  %506 = vrot.lane.b32.xlu1 %v505_v59, %s12971_s26  ;;  %v13592_v47 = vcombine.high %v13338_v30, %v13338_v30  ;;  %v17933_v59 = vrot.slane %v13217_v29, 1 }
 0x113   :  { %v654_v46 = vsel %vm291_vm2, %v13317_v20, %v17931_v7  ;;  %v619_v6 = vsel %vm293_vm3, %v13521_v8, %v618_v48  ;;  %v599_v7 = vsel %vm297_vm5, %v13311_v35, %v598_v15  ;;  %v13600_v15 = vcombine.high %v13357_v28, %v13357_v28 }
 0x114   :  { %v655_v58 = vsel %vm293_vm3, %v13317_v20, %v654_v46  ;;  %v620_v19 = vsel %vm295_vm4, %v13521_v8, %v619_v6  ;;  %v770_v46 = vsel %vm291_vm2, %v13357_v28, %v17933_v59  ;;  %v17934_v16 = vrot.slane %v13178_v0, 1  ;;  %542 = vrot.lane.b32.xlu0 %v541_v61, %s12971_s26 }
 0x115   :  { %v656_v14 = vsel %vm295_vm4, %v13317_v20, %v655_v58  ;;  %v621_v48 = vsel %vm297_vm5, %v13521_v8, %v620_v19  ;;  %v17932_v58 = vrot.slane %v13182_v3, 1 }
 0x116   :  { %v657_v41 = vsel %vm297_vm5, %v13317_v20, %v656_v14  ;;  %v676_v6 = vsel %vm291_vm2, %v13581_v10, %v17934_v16  ;;  %v771_v14 = vsel %vm293_vm3, %v13357_v28, %v770_v46  ;;  %v17936_v16 = vrot.slane %v13194_v12, 1  ;;  %564 = vrot.lane.b32.xlu1 %v563_v51, %s12971_s26 }
 0x117   :  { %v712_v5 = vsel %vm291_vm2, %v13338_v30, %v17932_v58  ;;  %v17935_v58 = vrot.slane %v13234_v43, 1  ;;  %v677_v33 = vsel %vm293_vm3, %v13581_v10, %v676_v6  ;;  %v772_v46 = vsel %vm295_vm4, %v13357_v28, %v771_v14 }
 0x118   :  { %v713_v19 = vsel %vm293_vm3, %v13338_v30, %v712_v5  ;;  %v734_v5 = vsel %vm291_vm2, %v13592_v47, %v17936_v16  ;;  %v678_v32 = vsel %vm295_vm4, %v13581_v10, %v677_v33  ;;  %v13641_v51 = vsel %vm297_vm5, %v13357_v28, %v772_v46  ;;  %600 = vrot.lane.b32.xlu0 %v599_v7, %s12971_s26 }
 0x119   :  { %v828_v59 = vsel %vm291_vm2, %v13384_v34, %v17935_v58  ;;  %v714_v29 = vsel %vm295_vm4, %v13338_v30, %v713_v19  ;;  %v735_v19 = vsel %vm293_vm3, %v13592_v47, %v734_v5  ;;  %v13633_v58 = vrot.slane %v13329_v40, 7 }
 0x11a   :  { %v715_v6 = vsel %vm297_vm5, %v13338_v30, %v714_v29  ;;  %v679_v16 = vsel %vm297_vm5, %v13581_v10, %v678_v32  ;;  %v736_v61 = vsel %vm295_vm4, %v13592_v47, %v735_v19  ;;  %v17937_v14 = vrot.slane %v13231_v42, 1  ;;  %622 = vrot.lane.b32.xlu1 %v621_v48, %s12971_s26 }
 0x11b   :  { %v737_v33 = vsel %vm297_vm5, %v13592_v47, %v736_v61  ;;  %v829_v5 = vsel %vm293_vm3, %v13384_v34, %v828_v59  ;;  %v13655_v32 = vcombine.high %v13384_v34, %v13384_v34  ;;  %v17941_v43 = vrot.slane %v13278_v27, 1 }
 0x11c   :  { %v792_v29 = vsel %vm291_vm2, %v13600_v15, %v17937_v14  ;;  %v830_v19 = vsel %vm295_vm4, %v13384_v34, %v829_v5  ;;  %v17938_v14 = vrot.slane %v13261_v21, 1  ;;  %v17939_v5 = vrot.slane %v13249_v9, 1  ;;  %658 = vrot.lane.b32.xlu0 %v657_v41, %s12971_s26 }
 0x11d   :  { %v793_v40 = vsel %vm293_vm3, %v13600_v15, %v792_v29  ;;  %v13667_v29 = vcombine.high %v13390_v57, %v13390_v57  ;;  %v13682_v21 = vrot.slane %v13445_v62, 7  ;;  %v944_v9 = vsel %vm291_vm2, %v13419_v13, %v17941_v43 }
 0x11e   :  { %v794_v46 = vsel %vm295_vm4, %v13600_v15, %v793_v40  ;;  %v886_v61 = vsel %vm291_vm2, %v13390_v57, %v17938_v14  ;;  %v13675_v40 = vsel %vm297_vm5, %v13384_v34, %v830_v19  ;;  %v850_v14 = vsel %vm291_vm2, %v13655_v32, %v17939_v5  ;;  %680 = vrot.lane.b32.xlu1 %v679_v16, %s12971_s26 }
 0x11f   :  { %v795_v59 = vsel %vm297_vm5, %v13600_v15, %v794_v46  ;;  %v851_v7 = vsel %vm293_vm3, %v13655_v32, %v850_v14  ;;  %v887_v48 = vsel %vm293_vm3, %v13390_v57, %v886_v61  ;;  %v17940_v46 = vrot.slane %v13275_v26, 1 }
 0x120   :  { %v852_v62 = vsel %vm295_vm4, %v13655_v32, %v851_v7  ;;  %v888_v5 = vsel %vm295_vm4, %v13390_v57, %v887_v48  ;;  %v945_v61 = vsel %vm293_vm3, %v13419_v13, %v944_v9  ;;  %v13737_v16 = vcombine.high %v13332_v1, %v13332_v1  ;;  %716 = vrot.lane.b32.xlu0 %v715_v6, %s12971_s26 }
 0x121   :  { %v908_v19 = vsel %vm291_vm2, %v13667_v29, %v17940_v46  ;;  %v853_v46 = vsel %vm297_vm5, %v13655_v32, %v852_v62  ;;  %v13708_v27 = vsel %vm297_vm5, %v13390_v57, %v888_v5  ;;  %v946_v7 = vsel %vm295_vm4, %v13419_v13, %v945_v61 }
 0x122   :  { %v909_v14 = vsel %vm293_vm3, %v13667_v29, %v908_v19  ;;  %v13722_v48 = vsel %vm297_vm5, %v13419_v13, %v946_v7  ;;  %v13726_v19 = vcombine.high %v13419_v13, %v13419_v13  ;;  %v13729_v62 = vrot.slane %v13343_v56, 7  ;;  %738 = vrot.lane.b32.xlu1 %v737_v33, %s12971_s26 }
 0x123   :  { %v910_v43 = vsel %vm295_vm4, %v13667_v29, %v909_v14  ;;  %v17942_v5 = vrot.slane %v13214_v25, 1  ;;  %v17943_v14 = vrot.slane %v13226_v38, 1  ;;  %v17944_v56 = vrot.slane %v13297_v36, 1 }
 0x124   :  { %v13718_v9 = vsel %vm297_vm5, %v13667_v29, %v910_v43  ;;  %v13745_v43 = vcombine.high %v13346_v22, %v13346_v22  ;;  %v17945_v38 = vrot.slane %v13237_v45, 1  ;;  %v13780_v45 = vrot.slane %v13457_v4, 7  ;;  %774 = vrot.lane.b32.xlu0 %v13641_v51, %s12971_s26 }
 0x125   :  { %v1002_v41 = vsel %vm291_vm2, %v13332_v1, %v17942_v5  ;;  %v1060_v61 = vsel %vm291_vm2, %v13346_v22, %v17943_v14  ;;  %v966_v7 = vsel %vm291_vm2, %v13726_v19, %v17944_v56  ;;  %v17946_v56 = vrot.slane %v13223_v37, 1 }
 0x126   :  { %v1003_v5 = vsel %vm293_vm3, %v13332_v1, %v1002_v41  ;;  %v1061_v25 = vsel %vm293_vm3, %v13346_v22, %v1060_v61  ;;  %v1118_v14 = vsel %vm291_vm2, %v13387_v54, %v17945_v38  ;;  %v967_v13 = vsel %vm293_vm3, %v13726_v19, %v966_v7  ;;  %796 = vrot.lane.b32.xlu1 %v795_v59, %s12971_s26 }
 0x127   :  { %v1004_v36 = vsel %vm295_vm4, %v13332_v1, %v1003_v5  ;;  %v1024_v41 = vsel %vm291_vm2, %v13737_v16, %v17946_v56  ;;  %v1062_v61 = vsel %vm295_vm4, %v13346_v22, %v1061_v25  ;;  %v968_v38 = vsel %vm295_vm4, %v13726_v19, %v967_v13 }
 0x128   :  { %v13775_v7 = vsel %vm297_vm5, %v13332_v1, %v1004_v36  ;;  %v1025_v5 = vsel %vm293_vm3, %v13737_v16, %v1024_v41  ;;  %v13784_v25 = vsel %vm297_vm5, %v13726_v19, %v968_v38  ;;  %v13790_v13 = vsel %vm297_vm5, %v13346_v22, %v1062_v61  ;;  %832 = vrot.lane.b32.xlu0 %v13675_v40, %s12971_s26 }
 0x129   :  { %v1026_v6 = vsel %vm295_vm4, %v13737_v16, %v1025_v5  ;;  %v17947_v36 = vrot.slane %v13243_v60, 1  ;;  %v1119_v41 = vsel %vm293_vm3, %v13387_v54, %v1118_v14  ;;  %v13806_v38 = vcombine.high %v13387_v54, %v13387_v54 }
 0x12a   :  { %v13798_v4 = vsel %vm297_vm5, %v13737_v16, %v1026_v6  ;;  %v1120_v5 = vsel %vm295_vm4, %v13387_v54, %v1119_v41  ;;  %v17949_v41 = vrot.slane %v13255_v17, 1  ;;  %v292_v17 = vsel %vm291_vm2, %v13430_v39, %v13142_v44  ;;  %854 = vrot.lane.b32.xlu1 %v853_v46, %s12971_s26 }
 0x12b   :  { %v1082_v33 = vsel %vm291_vm2, %v13745_v43, %v17947_v36  ;;  %v17948_v36 = vrot.slane %v13258_v18, 1  ;;  %v13836_v18 = vrot.slane %v13300_v31, 7  ;;  %v319_v46 = vsel %vm291_vm2, %v13540_v49, %v13158_v52 }
 0x12c   :  { %v1083_v56 = vsel %vm293_vm3, %v13745_v43, %v1082_v33  ;;  %v13818_v33 = vcombine.high %v13401_v24, %v13401_v24  ;;  %890 = vrot.lane.b32.xlu0 %v13708_v27, %s12971_s26  ;;  %v17952_v27 = vld [vmem:[#allocation11_spill] sm:$0xff] }
 0x12d   :  { %v1084_v61 = vsel %vm295_vm4, %v13745_v43, %v1083_v56  ;;  %v1176_v6 = vsel %vm291_vm2, %v13401_v24, %v17948_v36  ;;  %v13829_v56 = vsel %vm297_vm5, %v13387_v54, %v1120_v5  ;;  %v1140_v36 = vsel %vm291_vm2, %v13806_v38, %v17949_v41 }
 0x12e   :  { %v13825_v14 = vsel %vm297_vm5, %v13745_v43, %v1084_v61  ;;  %v1141_v51 = vsel %vm293_vm3, %v13806_v38, %v1140_v36  ;;  %v1177_v59 = vsel %vm293_vm3, %v13401_v24, %v1176_v6  ;;  %v17950_v61 = vrot.slane %v13270_v55, 1  ;;  %912 = vrot.lane.b32.xlu1 %v13718_v9, %s12971_s26 }
 0x12f   :  { %v1142_v41 = vsel %vm295_vm4, %v13806_v38, %v1141_v51  ;;  %v1178_v31 = vsel %vm295_vm4, %v13401_v24, %v1177_v59  ;;  %v294_v6 = vsel %vm293_vm3, %v13430_v39, %v292_v17  ;;  %v435_v9 = vsel %vm291_vm2, %v13682_v21, %v17952_v27  ;;  %v17957_v27 = vld [vmem:[#allocation8_spill] sm:$0xff] }
 0x130   :  { %v1198_v5 = vsel %vm291_vm2, %v13818_v33, %v17950_v61  ;;  %v13859_v55 = vsel %vm297_vm5, %v13806_v38, %v1142_v41  ;;  %v13863_v61 = vsel %vm297_vm5, %v13401_v24, %v1178_v31  ;;  %v296_v51 = vsel %vm295_vm4, %v13430_v39, %v294_v6  ;;  %948 = vrot.lane.b32.xlu0 %v13722_v48, %s12971_s26 }
 0x131   :  { %v1199_v36 = vsel %vm293_vm3, %v13818_v33, %v1198_v5  ;;  %v298_v59 = vsel %vm297_vm5, %v13430_v39, %v296_v51  ;;  %v355_v5 = vsel %vm291_vm2, %v13484_v11, %v13161_v53  ;;  %v550_v41 = vrot.slane %v13509_v23, 7  ;;  %v17951_v39 = vld [vmem:[#allocation10_spill] sm:$0xff] }
 0x132   :  { %v1200_v44 = vsel %vm295_vm4, %v13818_v33, %v1199_v36  ;;  %301 = vst.msk [vmem:[#allocation2] sm:$0x3] %vm300_vm6, %v298_v59  ;;  %v356_v40 = vsel %vm293_vm3, %v13484_v11, %v355_v5  ;;  %v377_v31 = vsel %vm291_vm2, %v13584_v2, %v13174_v63  ;;  %v413_v36 = vsel %vm291_vm2, %v13633_v58, %v17951_v39  ;;  %v17955_v39 = vld [vmem:[#allocation6_spill] sm:$0xff] }
 0x133   :  { %v13874_v17 = vsel %vm297_vm5, %v13818_v33, %v1200_v44  ;;  %v357_v53 = vsel %vm295_vm4, %v13484_v11, %v356_v40  ;;  %v320_v23 = vsel %vm293_vm3, %v13540_v49, %v319_v46  ;;  %v378_v6 = vsel %vm293_vm3, %v13584_v2, %v377_v31  ;;  %v17953_v31 = vld [vmem:[#allocation12_spill] sm:$0xff]  ;;  %970 = vrot.lane.b32.xlu1 %v13784_v25, %s12971_s26  ;;  %v17956_v25 = vld [vmem:[#allocation7_spill] sm:$0xff] }
 0x134   :  { %v414_v52 = vsel %vm293_vm3, %v13633_v58, %v413_v36  ;;  %v358_v44 = vsel %vm297_vm5, %v13484_v11, %v357_v53  ;;  %v321_v63 = vsel %vm295_vm4, %v13540_v49, %v320_v23  ;;  %v379_v51 = vsel %vm295_vm4, %v13584_v2, %v378_v6  ;;  %1006 = vrot.lane.b32.xlu0 %v13775_v7, %s12971_s26 }
 0x135   :  { %v415_v59 = vsel %vm295_vm4, %v13633_v58, %v414_v52  ;;  %360 = vst.msk [vmem:[#allocation2 + $0x4] sm:$0x3] %vm300_vm6, %v358_v44  ;;  %v322_v11 = vsel %vm297_vm5, %v13540_v49, %v321_v63  ;;  %v380_v5 = vsel %vm297_vm5, %v13584_v2, %v379_v51  ;;  %v586_v46 = vrot.slane %v13311_v35, 7  ;;  %v17954_v2 = vld [vmem:[#allocation13_spill] sm:$0xff] }
 0x136   :  { %v416_v40 = vsel %vm297_vm5, %v13633_v58, %v415_v59  ;;  %324 = vst.msk [vmem:[#allocation2 + $0x2] sm:$0x3] %vm300_vm6, %v322_v11  ;;  %382 = vst.msk [vmem:[#allocation2 + $0x6] sm:$0x3] %vm300_vm6, %v380_v5  ;;  %v471_v49 = vsel %vm291_vm2, %v13729_v62, %v17953_v31  ;;  %v493_v58 = vsel %vm291_vm2, %v13780_v45, %v17954_v2  ;;  %v17958_v31 = vld [vmem:[#allocation9_spill] sm:$0xff]  ;;  %v666_v2 = vrot.slane %v13581_v10, 7 }
 0x137   :  { %418 = vst.msk [vmem:[#allocation2 + $0x8] sm:$0x3] %vm300_vm6, %v416_v40  ;;  %v529_v35 = vsel %vm291_vm2, %v13836_v18, %v17955_v39  ;;  %v436_v36 = vsel %vm293_vm3, %v13682_v21, %v435_v9  ;;  %v472_v53 = vsel %vm293_vm3, %v13729_v62, %v471_v49  ;;  %v494_v23 = vsel %vm293_vm3, %v13780_v45, %v493_v58 }
 0x138   :  { %v530_v6 = vsel %vm293_vm3, %v13836_v18, %v529_v35  ;;  %v437_v52 = vsel %vm295_vm4, %v13682_v21, %v436_v36  ;;  %v473_v44 = vsel %vm295_vm4, %v13729_v62, %v472_v53  ;;  %v495_v63 = vsel %vm295_vm4, %v13780_v45, %v494_v23  ;;  %1028 = vrot.lane.b32.xlu1 %v13798_v4, %s12971_s26 }
 0x139   :  { %v531_v51 = vsel %vm295_vm4, %v13836_v18, %v530_v6  ;;  %v438_v59 = vsel %vm297_vm5, %v13682_v21, %v437_v52  ;;  %v474_v11 = vsel %vm297_vm5, %v13729_v62, %v473_v44  ;;  %v496_v5 = vsel %vm297_vm5, %v13780_v45, %v495_v63  ;;  %1064 = vrot.lane.b32.xlu0 %v13790_v13, %s12971_s26  ;;  %v17959_v13 = vld [vmem:[#allocation15_spill] sm:$0xff] }
 0x13a   :  { %v608_v40 = vrot.slane %v13521_v8, 7  ;;  %440 = vst.msk [vmem:[#allocation2 + $0xa] sm:$0x3] %vm300_vm6, %v438_v59  ;;  %476 = vst.msk [vmem:[#allocation2 + $0xc] sm:$0x3] %vm300_vm6, %v474_v11  ;;  %v532_v48 = vsel %vm297_vm5, %v13836_v18, %v531_v51  ;;  %v551_v21 = vsel %vm291_vm2, %v550_v41, %v17956_v25  ;;  %v587_v62 = vsel %vm291_vm2, %v586_v46, %v17957_v27  ;;  %v17960_v27 = vld [vmem:[#allocation17_spill] sm:$0xff] }
 0x13b   :  { %498 = vst.msk [vmem:[#allocation2 + $0xe] sm:$0x3] %vm300_vm6, %v496_v5  ;;  %v644_v9 = vrot.slane %v13317_v20, 7  ;;  %534 = vst.msk [vmem:[#allocation2 + $0x10] sm:$0x3] %vm300_vm6, %v532_v48  ;;  %v552_v45 = vsel %vm293_vm3, %v550_v41, %v551_v21  ;;  %v588_v8 = vsel %vm293_vm3, %v586_v46, %v587_v62  ;;  %v702_v53 = vrot.slane %v13338_v30, 7 }
 0x13c   :  { %v609_v49 = vsel %vm291_vm2, %v608_v40, %v17958_v31  ;;  %v553_v18 = vsel %vm295_vm4, %v550_v41, %v552_v45  ;;  %v589_v58 = vsel %vm295_vm4, %v586_v46, %v588_v8  ;;  %v667_v7 = vsel %vm291_vm2, %v666_v2, %v13178_v0  ;;  %1086 = vrot.lane.b32.xlu1 %v13825_v14, %s12971_s26  ;;  %v17961_v31 = vld [vmem:[#allocation19_spill] sm:$0xff] }
 0x13d   :  { %v610_v39 = vsel %vm293_vm3, %v608_v40, %v609_v49  ;;  %v645_v20 = vsel %vm291_vm2, %v644_v9, %v13153_v50  ;;  %v554_v35 = vsel %vm297_vm5, %v550_v41, %v553_v18  ;;  %v590_v36 = vsel %vm297_vm5, %v586_v46, %v589_v58  ;;  %1122 = vrot.lane.b32.xlu0 %v13829_v56, %s12971_s26  ;;  %v17962_v49 = vld [vmem:[#allocation22_spill] sm:$0xff] }
 0x13e   :  { %v611_v10 = vsel %vm295_vm4, %v608_v40, %v610_v39  ;;  %556 = vst.msk [vmem:[#allocation2 + $0x12] sm:$0x3] %vm300_vm6, %v554_v35  ;;  %592 = vst.msk [vmem:[#allocation2 + $0x14] sm:$0x3] %vm300_vm6, %v590_v36  ;;  %v646_v23 = vsel %vm293_vm3, %v644_v9, %v645_v20  ;;  %v724_v4 = vrot.slane %v13592_v47, 7  ;;  %v668_v46 = vsel %vm293_vm3, %v666_v2, %v667_v7  ;;  %v17963_v36 = vld [vmem:[#allocation26_spill] sm:$0xff] }
 0x13f   :  { %v612_v50 = vsel %vm297_vm5, %v608_v40, %v611_v10  ;;  %v647_v41 = vsel %vm295_vm4, %v644_v9, %v646_v23  ;;  %v703_v30 = vsel %vm291_vm2, %v702_v53, %v13182_v3  ;;  %v760_v6 = vrot.slane %v13357_v28, 7 }
 0x140   :  { %614 = vst.msk [vmem:[#allocation2 + $0x16] sm:$0x3] %vm300_vm6, %v612_v50  ;;  %v648_v52 = vsel %vm297_vm5, %v644_v9, %v647_v41  ;;  %v669_v44 = vsel %vm295_vm4, %v666_v2, %v668_v46  ;;  %v704_v63 = vsel %vm293_vm3, %v702_v53, %v703_v30  ;;  %v725_v0 = vsel %vm291_vm2, %v724_v4, %v13194_v12  ;;  %v17965_v30 = vld [vmem:[#allocation25_spill] sm:$0xff] }
 0x141   :  { %650 = vst.msk [vmem:[#allocation2 + $0x18] sm:$0x3] %vm300_vm6, %v648_v52  ;;  %v670_v3 = vsel %vm297_vm5, %v666_v2, %v669_v44  ;;  %v705_v28 = vsel %vm295_vm4, %v702_v53, %v704_v63  ;;  %v726_v47 = vsel %vm293_vm3, %v724_v4, %v725_v0  ;;  %v782_v51 = vrot.slane %v13600_v15, 7  ;;  %1144 = vrot.lane.b32.xlu1 %v13859_v55, %s12971_s26  ;;  %v17966_v0 = vld [vmem:[#allocation14_spill] sm:$0xff] }
 0x142   :  { %672 = vst.msk [vmem:[#allocation2 + $0x1a] sm:$0x3] %vm300_vm6, %v670_v3  ;;  %v706_v12 = vsel %vm297_vm5, %v702_v53, %v705_v28  ;;  %v727_v59 = vsel %vm295_vm4, %v724_v4, %v726_v47  ;;  %v761_v11 = vsel %vm291_vm2, %v760_v6, %v17959_v13  ;;  %v818_v14 = vrot.slane %v13384_v34, 7  ;;  %1180 = vrot.lane.b32.xlu0 %v13863_v61, %s12971_s26 }
 0x143   :  { %708 = vst.msk [vmem:[#allocation2 + $0x1c] sm:$0x3] %vm300_vm6, %v706_v12  ;;  %v728_v5 = vsel %vm297_vm5, %v724_v4, %v727_v59  ;;  %v762_v40 = vsel %vm293_vm3, %v760_v6, %v761_v11  ;;  %v783_v15 = vsel %vm291_vm2, %v782_v51, %v13231_v42  ;;  %v840_v48 = vrot.slane %v13655_v32, 7  ;;  %v17964_v4 = vld [vmem:[#allocation24_spill] sm:$0xff] }
 0x144   :  { %730 = vst.msk [vmem:[#allocation2 + $0x1e] sm:$0x3] %vm300_vm6, %v728_v5  ;;  %v763_v25 = vsel %vm295_vm4, %v760_v6, %v762_v40  ;;  %v784_v21 = vsel %vm293_vm3, %v782_v51, %v783_v15  ;;  %v819_v34 = vsel %vm291_vm2, %v818_v14, %v17960_v27  ;;  %v876_v62 = vrot.slane %v13390_v57, 7  ;;  %v17967_v59 = vld [vmem:[#allocation16_spill] sm:$0xff] }
 0x145   :  { %v764_v42 = vsel %vm297_vm5, %v760_v6, %v763_v25  ;;  %v785_v32 = vsel %vm295_vm4, %v782_v51, %v784_v21  ;;  %v820_v9 = vsel %vm293_vm3, %v818_v14, %v819_v34  ;;  %v898_v45 = vrot.slane %v13667_v29, 7  ;;  %1202 = vrot.lane.b32.xlu1 %v13874_v17, %s12971_s26 }
 0x146   :  { %766 = vst.msk [vmem:[#allocation2 + $0x20] sm:$0x3] %vm300_vm6, %v764_v42  ;;  %v786_v8 = vsel %vm297_vm5, %v782_v51, %v785_v32  ;;  %v821_v57 = vsel %vm295_vm4, %v818_v14, %v820_v9  ;;  %v841_v56 = vsel %vm291_vm2, %v840_v48, %v17961_v31  ;;  %v877_v55 = vsel %vm291_vm2, %v876_v62, %v17962_v49  ;;  %v17968_v42 = vld [vmem:[#allocation18_spill] sm:$0xff]  ;;  %v17969_v9 = vld [vmem:[#allocation20_spill] sm:$0xff] }
 0x147   :  { %788 = vst.msk [vmem:[#allocation2 + $0x22] sm:$0x3] %vm300_vm6, %v786_v8  ;;  %v822_v2 = vsel %vm297_vm5, %v818_v14, %v821_v57  ;;  %v842_v18 = vsel %vm293_vm3, %v840_v48, %v841_v56  ;;  %v878_v29 = vsel %vm293_vm3, %v876_v62, %v877_v55  ;;  %v899_v58 = vsel %vm291_vm2, %v898_v45, %v13275_v26  ;;  %v17970_v8 = vld [vmem:[#allocation21_spill] sm:$0xff] }
 0x148   :  { %824 = vst.msk [vmem:[#allocation2 + $0x24] sm:$0x3] %vm300_vm6, %v822_v2  ;;  %v843_v39 = vsel %vm295_vm4, %v840_v48, %v842_v18  ;;  %v879_v20 = vsel %vm295_vm4, %v876_v62, %v878_v29  ;;  %v900_v35 = vsel %vm293_vm3, %v898_v45, %v899_v58  ;;  %v934_v10 = vrot.slane %v17963_v36, 7 }
 0x149   :  { %v844_v53 = vsel %vm297_vm5, %v840_v48, %v843_v39  ;;  %v880_v26 = vsel %vm297_vm5, %v876_v62, %v879_v20  ;;  %v901_v50 = vsel %vm295_vm4, %v898_v45, %v900_v35  ;;  %v956_v23 = vrot.slane %v13726_v19, 7 }
 0x14a   :  { %846 = vst.msk [vmem:[#allocation2 + $0x26] sm:$0x3] %vm300_vm6, %v844_v53  ;;  %882 = vst.msk [vmem:[#allocation2 + $0x28] sm:$0x3] %vm300_vm6, %v880_v26  ;;  %v902_v7 = vsel %vm297_vm5, %v898_v45, %v901_v50  ;;  %v935_v61 = vsel %vm291_vm2, %v934_v10, %v17964_v4  ;;  %v992_v41 = vrot.slane %v13332_v1, 7  ;;  %v1014_v17 = vrot.slane %v13737_v16, 7 }
 0x14b   :  { %904 = vst.msk [vmem:[#allocation2 + $0x2a] sm:$0x3] %vm300_vm6, %v902_v7  ;;  %v936_v46 = vsel %vm293_vm3, %v934_v10, %v935_v61  ;;  %v957_v19 = vsel %vm291_vm2, %v956_v23, %v17965_v30  ;;  %v1050_v6 = vrot.slane %v13346_v22, 7  ;;  %v1072_v52 = vrot.slane %v13745_v43, 7  ;;  %v12605_v30 = vld [vmem:[%s17853_s3 + $0x100] sm:$0xff]  }
 0x14c   :  { %v937_v44 = vsel %vm295_vm4, %v934_v10, %v936_v46  ;;  %v958_v63 = vsel %vm293_vm3, %v956_v23, %v957_v19  ;;  %v993_v1 = vsel %vm291_vm2, %v992_v41, %v17966_v0  ;;  %v1015_v16 = vsel %vm291_vm2, %v1014_v17, %v13223_v37  ;;  %v12607_v0 = vld [vmem:[%s17853_s3 + $0x180] sm:$0xff]  }
 0x14d   :  { %v938_v3 = vsel %vm297_vm5, %v934_v10, %v937_v44  ;;  %v959_v28 = vsel %vm295_vm4, %v956_v23, %v958_v63  ;;  %v994_v47 = vsel %vm293_vm3, %v992_v41, %v993_v1  ;;  %v1016_v22 = vsel %vm293_vm3, %v1014_v17, %v1015_v16  ;;  %v12608_v1 = vld [vmem:[%s17853_s3 + $0x148] sm:$0xff]  }
 0x14e   :  { %940 = vst.msk [vmem:[#allocation2 + $0x2c] sm:$0x3] %vm300_vm6, %v938_v3  ;;  %v960_v43 = vsel %vm297_vm5, %v956_v23, %v959_v28  ;;  %v995_v51 = vsel %vm295_vm4, %v992_v41, %v994_v47  ;;  %v1017_v12 = vsel %vm295_vm4, %v1014_v17, %v1016_v22  ;;  %v1051_v13 = vsel %vm291_vm2, %v1050_v6, %v17967_v59 }
 0x14f   :  { %962 = vst.msk [vmem:[#allocation2 + $0x2e] sm:$0x3] %vm300_vm6, %v960_v43  ;;  %v996_v37 = vsel %vm297_vm5, %v992_v41, %v995_v51  ;;  %v1018_v11 = vsel %vm297_vm5, %v1014_v17, %v1017_v12  ;;  %v1052_v14 = vsel %vm293_vm3, %v1050_v6, %v1051_v13  ;;  %v1073_v5 = vsel %vm291_vm2, %v1072_v52, %v13243_v60  ;;  %v17972_v41 = vld [vmem:[#allocation5_spill] sm:$0xff] }
 0x150   :  { %998 = vst.msk [vmem:[#allocation2 + $0x30] sm:$0x3] %vm300_vm6, %v996_v37  ;;  %1020 = vst.msk [vmem:[#allocation2 + $0x32] sm:$0x3] %vm300_vm6, %v1018_v11  ;;  %v1053_v40 = vsel %vm295_vm4, %v1050_v6, %v1052_v14  ;;  %v1074_v15 = vsel %vm293_vm3, %v1072_v52, %v1073_v5  ;;  %v1108_v48 = vrot.slane %v13387_v54, 7  ;;  %v1130_v25 = vrot.slane %v13806_v38, 7 }
 0x151   :  { %v1054_v21 = vsel %vm297_vm5, %v1050_v6, %v1053_v40  ;;  %v1075_v27 = vsel %vm295_vm4, %v1072_v52, %v1074_v15  ;;  %v1166_v34 = vrot.slane %v13401_v24, 7  ;;  %v1188_v60 = vrot.slane %v13818_v33, 7  ;;  %v17971_v33 = vld [vmem:[#allocation23_spill] sm:$0xff]  ;;  %v12609_v43 = vld [vmem:[%s17853_s3 + $0x108] sm:$0xff]   ;;  %v12612_v37 = vld [vmem:[%s17853_s3 + $0x150] sm:$0xff]  }
 0x152   :  { %1056 = vst.msk [vmem:[#allocation2 + $0x34] sm:$0x3] %vm300_vm6, %v1054_v21  ;;  %v1076_v62 = vsel %vm297_vm5, %v1072_v52, %v1075_v27  ;;  %v1109_v32 = vsel %vm291_vm2, %v1108_v48, %v17968_v42  ;;  %v1131_v54 = vsel %vm291_vm2, %v1130_v25, %v17969_v9  ;;  %v12610_v51 = vld [vmem:[%s17853_s3 + $0x1c8] sm:$0xff]   ;;  %v12614_v5 = vld [vmem:[%s17853_s3 + $0x1d0] sm:$0xff]   ;;  %v12618_v9 = vld [vmem:[%s17853_s3 + $0x1d8] sm:$0xff]  }
 0x153   :  { %1078 = vst.msk [vmem:[#allocation2 + $0x36] sm:$0x3] %vm300_vm6, %v1076_v62  ;;  %v1110_v38 = vsel %vm293_vm3, %v1108_v48, %v1109_v32  ;;  %v1132_v45 = vsel %vm293_vm3, %v1130_v25, %v1131_v54  ;;  %v1167_v24 = vsel %vm291_vm2, %v1166_v34, %v17970_v8  ;;  %v1189_v57 = vsel %vm291_vm2, %v1188_v60, %v17971_v33  ;;  %v12611_v11 = vld [vmem:[%s17853_s3 + $0x188] sm:$0xff]   ;;  %v12613_v21 = vld [vmem:[%s17853_s3 + $0x110] sm:$0xff]   ;;  %v12617_v54 = vld [vmem:[%s17853_s3 + $0x118] sm:$0xff]  }
 0x154   :  { %v1111_v31 = vsel %vm295_vm4, %v1108_v48, %v1110_v38  ;;  %v1133_v56 = vsel %vm295_vm4, %v1130_v25, %v1132_v45  ;;  %v1168_v49 = vsel %vm293_vm3, %v1166_v34, %v1167_v24  ;;  %v1190_v55 = vsel %vm293_vm3, %v1188_v60, %v1189_v57  ;;  %v12615_v62 = vld [vmem:[%s17853_s3 + $0x190] sm:$0xff]   ;;  %v12620_v38 = vld [vmem:[%s17853_s3 + $0x160] sm:$0xff]   ;;  %v12619_v45 = vld [vmem:[%s17853_s3 + $0x198] sm:$0xff]  }
 0x155   :  { %v1112_v2 = vsel %vm297_vm5, %v1108_v48, %v1111_v31  ;;  %v1134_v18 = vsel %vm297_vm5, %v1130_v25, %v1133_v56  ;;  %v1169_v29 = vsel %vm295_vm4, %v1166_v34, %v1168_v49  ;;  %v1191_v58 = vsel %vm295_vm4, %v1188_v60, %v1190_v55  ;;  %v12622_v8 = vld [vmem:[%s17853_s3 + $0x1e0] sm:$0xff]   ;;  %v12624_v31 = vld [vmem:[%s17853_s3 + $0x168] sm:$0xff]  }
 0x156   :  { %1114 = vst.msk [vmem:[#allocation2 + $0x38] sm:$0x3] %vm300_vm6, %v1112_v2  ;;  %1136 = vst.msk [vmem:[#allocation2 + $0x3a] sm:$0x3] %vm300_vm6, %v1134_v18  ;;  %v1170_v39 = vsel %vm297_vm5, %v1166_v34, %v1169_v29  ;;  %v1192_v20 = vsel %vm297_vm5, %v1188_v60, %v1191_v58  ;;  %v12616_v34 = vld [vmem:[%s17853_s3 + $0x158] sm:$0xff]   ;;  %v12621_v57 = vld [vmem:[%s17853_s3 + $0x120] sm:$0xff]  }
 0x157   :  { %1172 = vst.msk [vmem:[#allocation2 + $0x3c] sm:$0x3] %vm300_vm6, %v1170_v39  ;;  %1194 = vst.msk [vmem:[#allocation2 + $0x3e] sm:$0x3] %vm300_vm6, %v1192_v20  ;;  %v12623_v56 = vld [vmem:[%s17853_s3 + $0x1a0] sm:$0xff]   ;;  %v12625_v49 = vld [vmem:[%s17853_s3 + $0x128] sm:$0xff]  }
 0x158   :  { %v12626_v18 = vld [vmem:[%s17853_s3 + $0x1e8] sm:$0xff]   ;;  %v12628_v29 = vld [vmem:[%s17853_s3 + $0x170] sm:$0xff]  }
 0x159   :  { %v12627_v39 = vld [vmem:[%s17853_s3 + $0x1a8] sm:$0xff]   ;;  %v12630_v20 = vld [vmem:[%s17853_s3 + $0x1f0] sm:$0xff]  }
 0x176   :  { %v310_v35 = vpop.permute.xlu0 %309  ;;  %v369_v36 = vpop.permute.xlu1 %368 }
 0x177   :  { %313 = vst.msk [vmem:[#allocation2] sm:$0x3] %vm312_vm7, %v310_v35  ;;  %371 = vst.msk [vmem:[#allocation2 + $0x4] sm:$0x3] %vm312_vm7, %v369_v36 }
 0x17a   :  { %v333_v10 = vpop.permute.xlu0 %332 }
 0x17b   :  { %335 = vst.msk [vmem:[#allocation2 + $0x2] sm:$0x3] %vm312_vm7, %v333_v10  ;;  %v12629_v10 = vld [vmem:[%s17853_s3 + $0x130] sm:$0xff]  }
 0x17c   :  { %v391_v53 = vpop.permute.xlu1 %390 }
 0x17d   :  { %393 = vst.msk [vmem:[#allocation2 + $0x6] sm:$0x3] %vm312_vm7, %v391_v53  ;;  %v12632_v53 = vld [vmem:[%s17853_s3 + $0x178] sm:$0xff]  }
 0x17e   :  { %v427_v26 = vpop.permute.xlu0 %426 }
 0x17f   :  { %429 = vst.msk [vmem:[#allocation2 + $0x8] sm:$0x3] %vm312_vm7, %v427_v26 }
 0x180   :  { %v449_v50 = vpop.permute.xlu1 %448 }
 0x181   :  { %451 = vst.msk [vmem:[#allocation2 + $0xa] sm:$0x3] %vm312_vm7, %v449_v50  ;;  %v12631_v50 = vld [vmem:[%s17853_s3 + $0x1b0] sm:$0xff]  }
 0x182   :  { %v485_v23 = vpop.permute.xlu0 %484 }
 0x183   :  { %487 = vst.msk [vmem:[#allocation2 + $0xc] sm:$0x3] %vm312_vm7, %v485_v23  ;;  %v12633_v23 = vld [vmem:[%s17853_s3 + $0x138] sm:$0xff]  }
 0x184   :  { %v507_v7 = vpop.permute.xlu1 %506  ;;  %v1206_v4 = vld [vmem:[#allocation2] sm:$0xff] }
 0x185   :  { %509 = vst.msk [vmem:[#allocation2 + $0xe] sm:$0x3] %vm312_vm7, %v507_v7  ;;  %v1222_v61 = vcombine.high %v1206_v4, %v1206_v4  ;;  %v1229_v17 = vrot.slane %v1206_v4, %v17972_v41 }
 0x186   :  { %v543_v6 = vpop.permute.xlu0 %542 }
 0x187   :  { %v1237_v46 = vcombine.high %v1229_v17, %v1229_v17  ;;  %v1236_v19 = vrot.slane %v1222_v61, %v17972_v41  ;;  %545 = vst.msk [vmem:[#allocation2 + $0x10] sm:$0x3] %vm312_vm7, %v543_v6  ;;  %v1390_v16 = vpack.c.bf16 %v1229_v17, %v1229_v17  ;;  %v12634_v17 = vld [vmem:[%s17853_s3 + $0x1f8] sm:$0xff]   ;;  %v12637_v6 = vld [vmem:[%s17853_s3 + $0x200] sm:$0xff]  }
 0x188   :  { %v565_v52 = vpop.permute.xlu1 %564 }
 0x189   :  { %567 = vst.msk [vmem:[#allocation2 + $0x12] sm:$0x3] %vm312_vm7, %v565_v52  ;;  %v1391_v44 = vpack.c.bf16 %v1237_v46, %v1237_v46  ;;  %v1238_v63 = vcombine.high %v1236_v19, %v1236_v19  ;;  %v1392_v22 = vpack.c.bf16 %v1236_v19, %v1236_v19  ;;  %v12635_v46 = vld [vmem:[%s17853_s3 + $0x1b8] sm:$0xff]  }
 0x18a   :  { %v601_v28 = vpop.permute.xlu0 %600 }
 0x18b   :  { %3509 = vmatprep.mubr.bf16.mxu1 %v1391_v44  ;;  %v1393_v3 = vpack.c.bf16 %v1238_v63, %v1238_v63  ;;  %603 = vst.msk [vmem:[#allocation2 + $0x14] sm:$0x3] %vm312_vm7, %v601_v28  ;;  %v12638_v44 = vld [vmem:[%s17853_s3 + $0x2c0] sm:$0xff]  }
 0x18c   :  { %v623_v47 = vpop.permute.xlu1 %622  ;;  %3510 = vmatmul.mubr.bf16.vlgmr.msra.gmra.mrb[0].mxu1 %v1390_v16  ;;  %v1207_v12 = vld [vmem:[#allocation2 + $0x8] sm:$0xff] }
 0x18d   :  { %625 = vst.msk [vmem:[#allocation2 + $0x16] sm:$0x3] %vm312_vm7, %v623_v47  ;;  %11457 = vmatpush3.bf16.msra.mxu1 %v12605_v30  ;;  %3549 = vmatprep.mubr.bf16.mxu0 %v1393_v3  ;;  %v14174_v59 = vrot.slane %v1207_v12, %v17972_v41  ;;  %v1239_v13 = vcombine.high %v1207_v12, %v1207_v12  ;;  %v12636_v30 = vld [vmem:[%s17853_s3 + $0x240] sm:$0xff]   ;;  %v12640_v3 = vld [vmem:[%s17853_s3 + $0x248] sm:$0xff]  }
 0x18e   :  { %3550 = vmatmul.mubr.bf16.vlgmr.msra.gmra.mrb[16].mxu0 %v1392_v22  ;;  %11458 = vmatprep.subr.bf16.mxu1 %v12608_v1  ;;  %v659_v15 = vpop.permute.xlu0 %658  ;;  %v12639_v1 = vld [vmem:[%s17853_s3 + $0x280] sm:$0xff]   ;;  %v12641_v12 = vld [vmem:[%s17853_s3 + $0x208] sm:$0xff]  }
 0x18f   :  { %11479 = vmatpush3.bf16.msra.mxu0 %v12607_v0  ;;  %v1254_v14 = vcombine.high %v14174_v59, %v14174_v59  ;;  %v14188_v40 = vrot.slane %v1239_v13, %v17972_v41  ;;  %661 = vst.msk [vmem:[#allocation2 + $0x18] sm:$0x3] %vm312_vm7, %v659_v15  ;;  %v1394_v28 = vpack.c.bf16 %v14174_v59, %v14174_v59  ;;  %v12642_v13 = vld [vmem:[%s17853_s3 + $0x2c8] sm:$0xff]   ;;  %v12645_v15 = vld [vmem:[%s17853_s3 + $0x210] sm:$0xff]  }
 0x190   :  { %v681_v48 = vpop.permute.xlu1 %680  ;;  %11480 = vmatprep.subr.bf16.mxu0 %v12610_v51 }
 0x191   :  { %683 = vst.msk [vmem:[#allocation2 + $0x1a] sm:$0x3] %vm312_vm7, %v681_v48  ;;  %11459 = vmatpush3.bf16.msra.mxu1 %v12609_v43  ;;  %v1395_v25 = vpack.c.bf16 %v1254_v14, %v1254_v14  ;;  %v1255_v27 = vcombine.high %v14188_v40, %v14188_v40  ;;  %v1396_v51 = vpack.c.bf16 %v14188_v40, %v14188_v40  ;;  %v12646_v14 = vld [vmem:[%s17853_s3 + $0x2d0] sm:$0xff]   ;;  %v12648_v48 = vld [vmem:[%s17853_s3 + $0x258] sm:$0xff]  }
 0x192   :  { %11460 = vmatprep.subr.bf16.mxu1 %v12612_v37  ;;  %v717_v42 = vpop.permute.xlu0 %716  ;;  %v12644_v37 = vld [vmem:[%s17853_s3 + $0x250] sm:$0xff]  }
 0x193   :  { %11481 = vmatpush3.bf16.msra.mxu0 %v12611_v11  ;;  %3589 = vmatprep.mubr.bf16.mxu1 %v1395_v25  ;;  %v1397_v60 = vpack.c.bf16 %v1255_v27, %v1255_v27  ;;  %719 = vst.msk [vmem:[#allocation2 + $0x1c] sm:$0x3] %vm312_vm7, %v717_v42  ;;  %v12643_v11 = vld [vmem:[%s17853_s3 + $0x288] sm:$0xff]   ;;  %v12647_v25 = vld [vmem:[%s17853_s3 + $0x290] sm:$0xff]   ;;  %v12651_v42 = vld [vmem:[%s17853_s3 + $0x298] sm:$0xff]  }
 0x194   :  { %v739_v32 = vpop.permute.xlu1 %738  ;;  %11482 = vmatprep.subr.bf16.mxu0 %v12614_v5  ;;  %v1208_v58 = vld [vmem:[#allocation2 + $0x10] sm:$0xff] }
 0x195   :  { %741 = vst.msk [vmem:[#allocation2 + $0x1e] sm:$0x3] %vm312_vm7, %v739_v32  ;;  %11461 = vmatpush3.bf16.msra.mxu1 %v12613_v21  ;;  %3629 = vmatprep.mubr.bf16.mxu0 %v1397_v60  ;;  %v1256_v26 = vcombine.high %v1208_v58, %v1208_v58  ;;  %v14263_v7 = vrot.slane %v1208_v58, %v17972_v41  ;;  %v12649_v60 = vld [vmem:[%s17853_s3 + $0x218] sm:$0xff]   ;;  %v12654_v32 = vld [vmem:[%s17853_s3 + $0x2e0] sm:$0xff]  }
 0x196   :  { %11462 = vmatprep.subr.bf16.mxu1 %v12616_v34  ;;  %v775_v24 = vpop.permute.xlu0 %774  ;;  %v12650_v34 = vld [vmem:[%s17853_s3 + $0x2d8] sm:$0xff]  }
 0x197   :  { %11483 = vmatpush3.bf16.msra.mxu0 %v12615_v62  ;;  %777 = vst.msk [vmem:[#allocation2 + $0x20] sm:$0x3] %vm312_vm7, %v775_v24  ;;  %v14277_v19 = vrot.slane %v1256_v26, %v17972_v41  ;;  %v1271_v52 = vcombine.high %v14263_v7, %v14263_v7  ;;  %v12652_v62 = vld [vmem:[%s17853_s3 + $0x260] sm:$0xff]   ;;  %v12659_v24 = vld [vmem:[%s17853_s3 + $0x2a8] sm:$0xff]  }
 0x198   :  { %v797_v33 = vpop.permute.xlu1 %796  ;;  %11484 = vmatprep.subr.bf16.mxu0 %v12618_v9  ;;  %v12653_v9 = vld [vmem:[%s17853_s3 + $0x220] sm:$0xff]  }
 0x199   :  { %799 = vst.msk [vmem:[#allocation2 + $0x22] sm:$0x3] %vm312_vm7, %v797_v33  ;;  %11463 = vmatpush3.bf16.msra.mxu1 %v12617_v54  ;;  %v1272_v16 = vcombine.high %v14277_v19, %v14277_v19  ;;  %v1399_v47 = vpack.c.bf16 %v1271_v52, %v1271_v52  ;;  %v12656_v54 = vld [vmem:[%s17853_s3 + $0x268] sm:$0xff]   ;;  %v12660_v33 = vld [vmem:[%s17853_s3 + $0x270] sm:$0xff]   ;;  %v12671_v26 = vld [vmem:[%s17853_s3 + $0x380] sm:$0xff]  }
 0x19a   :  { %11464 = vmatprep.subr.bf16.mxu1 %v12620_v38  ;;  %v833_v55 = vpop.permute.xlu0 %832  ;;  %v12655_v38 = vld [vmem:[%s17853_s3 + $0x2a0] sm:$0xff]   ;;  %v12679_v52 = vld [vmem:[%s17853_s3 + $0x3d0] sm:$0xff]  }
 0x19b   :  { %11485 = vmatpush3.bf16.msra.mxu0 %v12619_v45  ;;  %835 = vst.msk [vmem:[#allocation2 + $0x24] sm:$0x3] %vm312_vm7, %v833_v55  ;;  %v1401_v59 = vpack.c.bf16 %v1272_v16, %v1272_v16  ;;  %v12657_v45 = vld [vmem:[%s17853_s3 + $0x228] sm:$0xff]   ;;  %v12664_v55 = vld [vmem:[%s17853_s3 + $0x278] sm:$0xff]  }
 0x19c   :  { %v855_v2 = vpop.permute.xlu1 %854  ;;  %11486 = vmatprep.subr.bf16.mxu0 %v12622_v8  ;;  %v12658_v8 = vld [vmem:[%s17853_s3 + $0x2e8] sm:$0xff]   ;;  %v12682_v16 = vld [vmem:[%s17853_s3 + $0x318] sm:$0xff]  }
 0x19d   :  { %857 = vst.msk [vmem:[#allocation2 + $0x26] sm:$0x3] %vm312_vm7, %v855_v2  ;;  %11465 = vmatpush3.bf16.msra.mxu1 %v12621_v57  ;;  %v1209_v57 = vld [vmem:[#allocation2 + $0x18] sm:$0xff] }
 0x19e   :  { %11466 = vmatprep.subr.bf16.mxu1 %v12624_v31  ;;  %v891_v35 = vpop.permute.xlu0 %890  ;;  %v12661_v31 = vld [vmem:[%s17853_s3 + $0x230] sm:$0xff]   ;;  %v1273_v2 = vcombine.high %v1209_v57, %v1209_v57  ;;  %v14386_v58 = vrot.slane %v1209_v57, %v17972_v41  ;;  %v12708_v57 = vld [vmem:[%s17853_s3 + $0x4c8] sm:$0xff]  }
 0x19f   :  { %11487 = vmatpush3.bf16.msra.mxu0 %v12623_v56  ;;  %893 = vst.msk [vmem:[#allocation2 + $0x28] sm:$0x3] %vm312_vm7, %v891_v35  ;;  %v12662_v56 = vld [vmem:[%s17853_s3 + $0x2f0] sm:$0xff]  }
 0x1a0   :  { %v913_v36 = vpop.permute.xlu1 %912  ;;  %11488 = vmatprep.subr.bf16.mxu0 %v12626_v18  ;;  %v12665_v18 = vld [vmem:[%s17853_s3 + $0x238] sm:$0xff]   ;;  %v14395_v35 = vrot.slane %v1273_v2, %v17972_v41  ;;  %v12712_v2 = vld [vmem:[%s17853_s3 + $0x4d0] sm:$0xff]  }
 0x1a1   :  { %915 = vst.msk [vmem:[#allocation2 + $0x2a] sm:$0x3] %vm312_vm7, %v913_v36  ;;  %11467 = vmatpush3.bf16.msra.mxu1 %v12625_v49  ;;  %v12663_v49 = vld [vmem:[%s17853_s3 + $0x2b0] sm:$0xff]   ;;  %v12669_v36 = vld [vmem:[%s17853_s3 + $0x300] sm:$0xff]  }
 0x1a2   :  { %11468 = vmatprep.subr.bf16.mxu1 %v12628_v29  ;;  %v949_v4 = vpop.permute.xlu0 %948  ;;  %v12666_v29 = vld [vmem:[%s17853_s3 + $0x2f8] sm:$0xff]  }
 0x1a3   :  { %11489 = vmatpush3.bf16.msra.mxu0 %v12627_v39  ;;  %951 = vst.msk [vmem:[#allocation2 + $0x2c] sm:$0x3] %vm312_vm7, %v949_v4  ;;  %v12667_v39 = vld [vmem:[%s17853_s3 + $0x2b8] sm:$0xff]   ;;  %v1398_v4 = vpack.c.bf16 %v14263_v7, %v14263_v7  ;;  %v12677_v7 = vld [vmem:[%s17853_s3 + $0x350] sm:$0xff]  }
 0x1a4   :  { %11490 = vmatprep.subr.bf16.mxu0 %v12630_v20  ;;  %v12668_v20 = vld [vmem:[%s17853_s3 + $0x340] sm:$0xff]  }
 0x1a5   :  { %v971_v61 = vpop.permute.xlu1 %970  ;;  %11469 = vmatpush3.bf16.msra.mxu1 %v12629_v10  ;;  %v1288_v10 = vcombine.high %v14386_v58, %v14386_v58 }
 0x1a6   :  { %973 = vst.msk [vmem:[#allocation2 + $0x2e] sm:$0x3] %vm312_vm7, %v971_v61  ;;  %11470 = vmatprep.subr.bf16.mxu1 %v12632_v53  ;;  %v1007_v63 = vpop.permute.xlu0 %1006  ;;  %v12670_v53 = vld [vmem:[%s17853_s3 + $0x3c0] sm:$0xff]  }
 0x1a7   :  { %11491 = vmatpush3.bf16.msra.mxu0 %v12631_v50  ;;  %1009 = vst.msk [vmem:[#allocation2 + $0x30] sm:$0x3] %vm312_vm7, %v1007_v63  ;;  %v1289_v50 = vcombine.high %v14395_v35, %v14395_v35  ;;  %v1403_v61 = vpack.c.bf16 %v1288_v10, %v1288_v10  ;;  %v12681_v63 = vld [vmem:[%s17853_s3 + $0x358] sm:$0xff]   ;;  %v12720_v10 = vld [vmem:[%s17853_s3 + $0x4e0] sm:$0xff]  }
 0x1a8   :  { %11492 = vmatprep.subr.bf16.mxu0 %v12634_v17  ;;  %v1400_v17 = vpack.c.bf16 %v14277_v19, %v14277_v19  ;;  %v12676_v19 = vld [vmem:[%s17853_s3 + $0x388] sm:$0xff]  }
 0x1a9   :  { %11471 = vmatpush3.bf16.msra.mxu1 %v12633_v23  ;;  %v12673_v23 = vld [vmem:[%s17853_s3 + $0x348] sm:$0xff]  }
 0x1aa   :  { %v1029_v0 = vpop.permute.xlu1 %1028  ;;  %11500 = vmatprep.subr.bf16.mxu1 %v12636_v30  ;;  %v12675_v30 = vld [vmem:[%s17853_s3 + $0x3c8] sm:$0xff]  }
 0x1ab   :  { %1031 = vst.msk [vmem:[#allocation2 + $0x32] sm:$0x3] %vm312_vm7, %v1029_v0  ;;  %11493 = vmatpush3.bf16.msra.mxu0 %v12635_v46  ;;  %v1065_v22 = vpop.permute.xlu0 %1064  ;;  %v12674_v46 = vld [vmem:[%s17853_s3 + $0x308] sm:$0xff]   ;;  %v12680_v0 = vld [vmem:[%s17853_s3 + $0x390] sm:$0xff]  }
 0x1ac   :  { %3590 = vmatmul.mubr.bf16.vlgmr.msra.gmra.mrb[4].mxu1 %v1394_v28  ;;  %11522 = vmatprep.subr.bf16.mxu0 %v12638_v44  ;;  %1067 = vst.msk [vmem:[#allocation2 + $0x34] sm:$0x3] %vm312_vm7, %v1065_v22  ;;  %v12678_v44 = vld [vmem:[%s17853_s3 + $0x310] sm:$0xff]   ;;  %v12684_v28 = vld [vmem:[%s17853_s3 + $0x398] sm:$0xff]   ;;  %v12686_v22 = vld [vmem:[%s17853_s3 + $0x320] sm:$0xff]  }
 0x1ad   :  { %11501 = vmatpush3.bf16.msra.mxu1 %v12637_v6  ;;  %3669 = vmatprep.mubr.bf16.mxu1 %v1399_v47  ;;  %v1405_v6 = vpack.c.bf16 %v1289_v50, %v1289_v50  ;;  %v12687_v47 = vld [vmem:[%s17853_s3 + $0x3e0] sm:$0xff]  }
 0x1ae   :  { %v1087_v43 = vpop.permute.xlu1 %1086  ;;  %3630 = vmatmul.mubr.bf16.vlgmr.msra.gmra.mrb[20].mxu0 %v1396_v51  ;;  %11502 = vmatprep.subr.bf16.mxu1 %v12640_v3  ;;  %v12685_v3 = vld [vmem:[%s17853_s3 + $0x360] sm:$0xff]  }
 0x1af   :  { %1089 = vst.msk [vmem:[#allocation2 + $0x36] sm:$0x3] %vm312_vm7, %v1087_v43  ;;  %11523 = vmatpush3.bf16.msra.mxu0 %v12639_v1  ;;  %3709 = vmatprep.mubr.bf16.mxu0 %v1401_v59  ;;  %v1123_v5 = vpop.permute.xlu0 %1122  ;;  %v12683_v1 = vld [vmem:[%s17853_s3 + $0x3d8] sm:$0xff]   ;;  %v12689_v43 = vld [vmem:[%s17853_s3 + $0x368] sm:$0xff]   ;;  %v12688_v51 = vld [vmem:[%s17853_s3 + $0x3a0] sm:$0xff]  }
 0x1b0   :  { %11524 = vmatprep.subr.bf16.mxu0 %v12642_v13  ;;  %1125 = vst.msk [vmem:[#allocation2 + $0x38] sm:$0x3] %vm312_vm7, %v1123_v5  ;;  %v12690_v13 = vld [vmem:[%s17853_s3 + $0x328] sm:$0xff]   ;;  %v12693_v59 = vld [vmem:[%s17853_s3 + $0x370] sm:$0xff]   ;;  %v12721_v50 = vld [vmem:[%s17853_s3 + $0x4a0] sm:$0xff]  }
 0x1b1   :  { %11503 = vmatpush3.bf16.msra.mxu1 %v12641_v12  ;;  %v12691_v12 = vld [vmem:[%s17853_s3 + $0x3e8] sm:$0xff]   ;;  %v12694_v5 = vld [vmem:[%s17853_s3 + $0x330] sm:$0xff]  }
 0x1b2   :  { %11504 = vmatprep.subr.bf16.mxu1 %v12644_v37  ;;  %v1210_v37 = vld [vmem:[#allocation2 + $0x20] sm:$0xff] }
 0x1b3   :  { %v1145_v40 = vpop.permute.xlu1 %1144  ;;  %11525 = vmatpush3.bf16.msra.mxu0 %v12643_v11  ;;  %v12692_v11 = vld [vmem:[%s17853_s3 + $0x3a8] sm:$0xff]  }
 0x1b4   :  { %1147 = vst.msk [vmem:[#allocation2 + $0x3a] sm:$0x3] %vm312_vm7, %v1145_v40  ;;  %v1181_v21 = vpop.permute.xlu0 %1180  ;;  %11526 = vmatprep.subr.bf16.mxu0 %v12646_v14  ;;  %v12695_v14 = vld [vmem:[%s17853_s3 + $0x3f0] sm:$0xff]   ;;  %v1290_v40 = vcombine.high %v1210_v37, %v1210_v37 }
 0x1b5   :  { %1183 = vst.msk [vmem:[#allocation2 + $0x3c] sm:$0x3] %vm312_vm7, %v1181_v21  ;;  %11505 = vmatpush3.bf16.msra.mxu1 %v12645_v15  ;;  %v12697_v15 = vld [vmem:[%s17853_s3 + $0x378] sm:$0xff]  }
 0x1b6   :  { %11506 = vmatprep.subr.bf16.mxu1 %v12648_v48  ;;  %v12696_v48 = vld [vmem:[%s17853_s3 + $0x3b0] sm:$0xff]   ;;  %v12699_v21 = vld [vmem:[%s17853_s3 + $0x3f8] sm:$0xff]  }
 0x1b7   :  { %v1203_v27 = vpop.permute.xlu1 %1202  ;;  %11527 = vmatpush3.bf16.msra.mxu0 %v12647_v25  ;;  %v14490_v25 = vrot.slane %v1210_v37, %v17972_v41 }
 0x1b8   :  { %1205 = vst.msk [vmem:[#allocation2 + $0x3e] sm:$0x3] %vm312_vm7, %v1203_v27  ;;  %11528 = vmatprep.subr.bf16.mxu0 %v12650_v34  ;;  %v12698_v27 = vld [vmem:[%s17853_s3 + $0x338] sm:$0xff]   ;;  %v14499_v34 = vrot.slane %v1290_v40, %v17972_v41  ;;  %v12743_v40 = vld [vmem:[%s17853_s3 + $0x550] sm:$0xff]  }
 0x1b9   :  { %11507 = vmatpush3.bf16.msra.mxu1 %v12649_v60  ;;  %v12701_v60 = vld [vmem:[%s17853_s3 + $0x440] sm:$0xff]  }
 0x1ba   :  { %11508 = vmatprep.subr.bf16.mxu1 %v12652_v62  ;;  %v12700_v62 = vld [vmem:[%s17853_s3 + $0x3b8] sm:$0xff]   ;;  %v1408_v37 = vpack.c.bf16 %v14499_v34, %v14499_v34 }
 0x1bb   :  { %11529 = vmatpush3.bf16.msra.mxu0 %v12651_v42  ;;  %v1305_v42 = vcombine.high %v14490_v25, %v14490_v25 }
 0x1bc   :  { %11530 = vmatprep.subr.bf16.mxu0 %v12654_v32  ;;  %v12703_v32 = vld [vmem:[%s17853_s3 + $0x4c0] sm:$0xff]  }
 0x1bd   :  { %11509 = vmatpush3.bf16.msra.mxu1 %v12653_v9  ;;  %v12702_v9 = vld [vmem:[%s17853_s3 + $0x400] sm:$0xff]  }
 0x1be   :  { %11510 = vmatprep.subr.bf16.mxu1 %v12656_v54  ;;  %v1306_v54 = vcombine.high %v14499_v34, %v14499_v34  ;;  %v12749_v34 = vld [vmem:[%s17853_s3 + $0x5d8] sm:$0xff]  }
 0x1bf   :  { %11531 = vmatpush3.bf16.msra.mxu0 %v12655_v38  ;;  %v1402_v38 = vpack.c.bf16 %v14386_v58, %v14386_v58  ;;  %v12713_v58 = vld [vmem:[%s17853_s3 + $0x490] sm:$0xff]  }
 0x1c0   :  { %11532 = vmatprep.subr.bf16.mxu0 %v12658_v8  ;;  %v1407_v8 = vpack.c.bf16 %v1305_v42, %v1305_v42  ;;  %v12750_v42 = vld [vmem:[%s17853_s3 + $0x598] sm:$0xff]  }
 0x1c1   :  { %11511 = vmatpush3.bf16.msra.mxu1 %v12657_v45  ;;  %v12706_v45 = vld [vmem:[%s17853_s3 + $0x448] sm:$0xff]  }
 0x1c2   :  { %11512 = vmatprep.subr.bf16.mxu1 %v12660_v33  ;;  %v1404_v33 = vpack.c.bf16 %v14395_v35, %v14395_v35  ;;  %v12718_v35 = vld [vmem:[%s17853_s3 + $0x460] sm:$0xff]  }
 0x1c3   :  { %11533 = vmatpush3.bf16.msra.mxu0 %v12659_v24  ;;  %v12704_v24 = vld [vmem:[%s17853_s3 + $0x480] sm:$0xff]  }
 0x1c4   :  { %11534 = vmatprep.subr.bf16.mxu0 %v12662_v56  ;;  %v12707_v56 = vld [vmem:[%s17853_s3 + $0x408] sm:$0xff]  }
 0x1c5   :  { %11513 = vmatpush3.bf16.msra.mxu1 %v12661_v31  ;;  %v1409_v31 = vpack.c.bf16 %v1306_v54, %v1306_v54  ;;  %v12755_v54 = vld [vmem:[%s17853_s3 + $0x568] sm:$0xff]  }
 0x1c6   :  { %11514 = vmatprep.subr.bf16.mxu1 %v12664_v55  ;;  %v12709_v55 = vld [vmem:[%s17853_s3 + $0x488] sm:$0xff]  }
 0x1c7   :  { %11535 = vmatpush3.bf16.msra.mxu0 %v12663_v49  ;;  %v12710_v49 = vld [vmem:[%s17853_s3 + $0x450] sm:$0xff]  }
 0x1c8   :  { %11536 = vmatprep.subr.bf16.mxu0 %v12666_v29  ;;  %v12714_v29 = vld [vmem:[%s17853_s3 + $0x458] sm:$0xff]  }
 0x1c9   :  { %11515 = vmatpush3.bf16.msra.mxu1 %v12665_v18  ;;  %v12711_v18 = vld [vmem:[%s17853_s3 + $0x410] sm:$0xff]  }
 0x1ca   :  { %11544 = vmatprep.subr.bf16.mxu1 %v12668_v20  ;;  %v12715_v20 = vld [vmem:[%s17853_s3 + $0x418] sm:$0xff]  }
 0x1cb   :  { %11537 = vmatpush3.bf16.msra.mxu0 %v12667_v39  ;;  %v12716_v39 = vld [vmem:[%s17853_s3 + $0x4d8] sm:$0xff]  }
 0x1cc   :  { %3670 = vmatmul.mubr.bf16.vlgmr.msra.gmra.mrb[8].mxu1 %v1398_v4  ;;  %11566 = vmatprep.subr.bf16.mxu0 %v12670_v53  ;;  %v12719_v53 = vld [vmem:[%s17853_s3 + $0x420] sm:$0xff]   ;;  %v12723_v4 = vld [vmem:[%s17853_s3 + $0x428] sm:$0xff]  }
 0x1cd   :  { %11545 = vmatpush3.bf16.msra.mxu1 %v12669_v36  ;;  %3749 = vmatprep.mubr.bf16.mxu1 %v1403_v61  ;;  %v12717_v36 = vld [vmem:[%s17853_s3 + $0x498] sm:$0xff]   ;;  %v12726_v61 = vld [vmem:[%s17853_s3 + $0x470] sm:$0xff]  }
 0x1ce   :  { %3710 = vmatmul.mubr.bf16.vlgmr.msra.gmra.mrb[24].mxu0 %v1400_v17  ;;  %11546 = vmatprep.subr.bf16.mxu1 %v12673_v23  ;;  %v12724_v23 = vld [vmem:[%s17853_s3 + $0x4e8] sm:$0xff]  }
 0x1cf   :  { %11567 = vmatpush3.bf16.msra.mxu0 %v12671_v26  ;;  %3789 = vmatprep.mubr.bf16.mxu0 %v1405_v6  ;;  %v12722_v26 = vld [vmem:[%s17853_s3 + $0x468] sm:$0xff]   ;;  %v12727_v6 = vld [vmem:[%s17853_s3 + $0x430] sm:$0xff]  }
 0x1d0   :  { %11568 = vmatprep.subr.bf16.mxu0 %v12675_v30  ;;  %v1211_v17 = vld [vmem:[#allocation2 + $0x28] sm:$0xff]  ;;  %v12728_v30 = vld [vmem:[%s17853_s3 + $0x4f0] sm:$0xff]  }
 0x1d1   :  { %11547 = vmatpush3.bf16.msra.mxu1 %v12674_v46  ;;  %v12725_v46 = vld [vmem:[%s17853_s3 + $0x4a8] sm:$0xff]  }
 0x1d2   :  { %11548 = vmatprep.subr.bf16.mxu1 %v12677_v7  ;;  %v1307_v7 = vcombine.high %v1211_v17, %v1211_v17 }
 0x1d3   :  { %11569 = vmatpush3.bf16.msra.mxu0 %v12676_v19  ;;  %v12730_v19 = vld [vmem:[%s17853_s3 + $0x478] sm:$0xff]  }
 0x1d4   :  { %11570 = vmatprep.subr.bf16.mxu0 %v12679_v52  ;;  %v12729_v52 = vld [vmem:[%s17853_s3 + $0x4b0] sm:$0xff]  }
 0x1d5   :  { %11549 = vmatpush3.bf16.msra.mxu1 %v12678_v44  ;;  %v14600_v44 = vrot.slane %v1211_v17, %v17972_v41 }
 0x1d6   :  { %11550 = vmatprep.subr.bf16.mxu1 %v12681_v63  ;;  %v12732_v63 = vld [vmem:[%s17853_s3 + $0x4f8] sm:$0xff]  }
 0x1d7   :  { %11571 = vmatpush3.bf16.msra.mxu0 %v12680_v0  ;;  %v12731_v0 = vld [vmem:[%s17853_s3 + $0x438] sm:$0xff]  }
 0x1d8   :  { %11572 = vmatprep.subr.bf16.mxu0 %v12683_v1  ;;  %v14609_v1 = vrot.slane %v1307_v7, %v17972_v41  ;;  %v12776_v7 = vld [vmem:[%s17853_s3 + $0x650] sm:$0xff]  }
 0x1d9   :  { %11551 = vmatpush3.bf16.msra.mxu1 %v12682_v16  ;;  %v12734_v16 = vld [vmem:[%s17853_s3 + $0x540] sm:$0xff]  }
 0x1da   :  { %11552 = vmatprep.subr.bf16.mxu1 %v12685_v3  ;;  %v12733_v3 = vld [vmem:[%s17853_s3 + $0x4b8] sm:$0xff]   ;;  %v1412_v17 = vpack.c.bf16 %v14609_v1, %v14609_v1 }
 0x1db   :  { %11573 = vmatpush3.bf16.msra.mxu0 %v12684_v28  ;;  %v1322_v28 = vcombine.high %v14600_v44, %v14600_v44 }
 0x1dc   :  { %11574 = vmatprep.subr.bf16.mxu0 %v12687_v47  ;;  %v12736_v47 = vld [vmem:[%s17853_s3 + $0x5c0] sm:$0xff]  }
 0x1dd   :  { %11553 = vmatpush3.bf16.msra.mxu1 %v12686_v22  ;;  %v12735_v22 = vld [vmem:[%s17853_s3 + $0x500] sm:$0xff]  }
 0x1de   :  { %11554 = vmatprep.subr.bf16.mxu1 %v12689_v43  ;;  %v1323_v43 = vcombine.high %v14609_v1, %v14609_v1  ;;  %v12782_v1 = vld [vmem:[%s17853_s3 + $0x6d8] sm:$0xff]  }
 0x1df   :  { %11575 = vmatpush3.bf16.msra.mxu0 %v12688_v51  ;;  %v1406_v51 = vpack.c.bf16 %v14490_v25, %v14490_v25  ;;  %v12744_v25 = vld [vmem:[%s17853_s3 + $0x510] sm:$0xff]  }
 0x1e0   :  { %11576 = vmatprep.subr.bf16.mxu0 %v12691_v12  ;;  %v12739_v12 = vld [vmem:[%s17853_s3 + $0x548] sm:$0xff]  }
 0x1e1   :  { %11555 = vmatpush3.bf16.msra.mxu1 %v12690_v13  ;;  %v1411_v13 = vpack.c.bf16 %v1322_v28, %v1322_v28  ;;  %v12783_v28 = vld [vmem:[%s17853_s3 + $0x698] sm:$0xff]  }
 0x1e2   :  { %11556 = vmatprep.subr.bf16.mxu1 %v12693_v59  ;;  %v12737_v59 = vld [vmem:[%s17853_s3 + $0x580] sm:$0xff]  }
 0x1e3   :  { %11577 = vmatpush3.bf16.msra.mxu0 %v12692_v11  ;;  %v12741_v11 = vld [vmem:[%s17853_s3 + $0x5c8] sm:$0xff]  }
 0x1e4   :  { %11578 = vmatprep.subr.bf16.mxu0 %v12695_v14  ;;  %v1413_v14 = vpack.c.bf16 %v1323_v43, %v1323_v43  ;;  %v12788_v43 = vld [vmem:[%s17853_s3 + $0x668] sm:$0xff]  }
 0x1e5   :  { %11557 = vmatpush3.bf16.msra.mxu1 %v12694_v5  ;;  %v12740_v5 = vld [vmem:[%s17853_s3 + $0x508] sm:$0xff]  }
 0x1e6   :  { %11558 = vmatprep.subr.bf16.mxu1 %v12697_v15  ;;  %v12742_v15 = vld [vmem:[%s17853_s3 + $0x588] sm:$0xff]  }
 0x1e7   :  { %11579 = vmatpush3.bf16.msra.mxu0 %v12696_v48  ;;  %v12745_v48 = vld [vmem:[%s17853_s3 + $0x5d0] sm:$0xff]  }
 0x1e8   :  { %11580 = vmatprep.subr.bf16.mxu0 %v12699_v21  ;;  %v12747_v21 = vld [vmem:[%s17853_s3 + $0x558] sm:$0xff]  }
 0x1e9   :  { %11559 = vmatpush3.bf16.msra.mxu1 %v12698_v27  ;;  %v12746_v27 = vld [vmem:[%s17853_s3 + $0x590] sm:$0xff]  }
 0x1ea   :  { %11588 = vmatprep.subr.bf16.mxu1 %v12701_v60  ;;  %v12748_v60 = vld [vmem:[%s17853_s3 + $0x518] sm:$0xff]  }
 0x1eb   :  { %11581 = vmatpush3.bf16.msra.mxu0 %v12700_v62  ;;  %v12751_v62 = vld [vmem:[%s17853_s3 + $0x560] sm:$0xff]  }
 0x1ec   :  { %3750 = vmatmul.mubr.bf16.vlgmr.msra.gmra.mrb[12].mxu1 %v1402_v38  ;;  %11610 = vmatprep.subr.bf16.mxu0 %v12703_v32  ;;  %v12753_v32 = vld [vmem:[%s17853_s3 + $0x5e0] sm:$0xff]  }
 0x1ed   :  { %11589 = vmatpush3.bf16.msra.mxu1 %v12702_v9  ;;  %3829 = vmatprep.mubr.bf16.mxu1 %v1407_v8  ;;  %v12752_v9 = vld [vmem:[%s17853_s3 + $0x520] sm:$0xff]   ;;  %v12756_v8 = vld [vmem:[%s17853_s3 + $0x528] sm:$0xff]  }
 0x1ee   :  { %3790 = vmatmul.mubr.bf16.vlgmr.msra.gmra.mrb[28].mxu0 %v1404_v33  ;;  %11590 = vmatprep.subr.bf16.mxu1 %v12706_v45  ;;  %v12754_v38 = vld [vmem:[%s17853_s3 + $0x5a0] sm:$0xff]   ;;  %v12757_v45 = vld [vmem:[%s17853_s3 + $0x5e8] sm:$0xff]   ;;  %v1212_v33 = vld [vmem:[#allocation2 + $0x30] sm:$0xff] }
 0x1ef   :  { %11611 = vmatpush3.bf16.msra.mxu0 %v12704_v24  ;;  %3869 = vmatprep.mubr.bf16.mxu0 %v1409_v31  ;;  %v12759_v24 = vld [vmem:[%s17853_s3 + $0x570] sm:$0xff]  }
 0x1f0   :  { %11612 = vmatprep.subr.bf16.mxu0 %v12708_v57  ;;  %v12758_v57 = vld [vmem:[%s17853_s3 + $0x5a8] sm:$0xff]   ;;  %v12761_v31 = vld [vmem:[%s17853_s3 + $0x5f0] sm:$0xff]  }
 0x1f1   :  { %11591 = vmatpush3.bf16.msra.mxu1 %v12707_v56  ;;  %v12760_v56 = vld [vmem:[%s17853_s3 + $0x530] sm:$0xff]  }
 0x1f2   :  { %11592 = vmatprep.subr.bf16.mxu1 %v12710_v49  ;;  %v1324_v49 = vcombine.high %v1212_v33, %v1212_v33 }
 0x1f3   :  { %11613 = vmatpush3.bf16.msra.mxu0 %v12709_v55  ;;  %v12763_v55 = vld [vmem:[%s17853_s3 + $0x578] sm:$0xff]  }
 0x1f4   :  { %11614 = vmatprep.subr.bf16.mxu0 %v12712_v2  ;;  %v12762_v2 = vld [vmem:[%s17853_s3 + $0x5b0] sm:$0xff]  }
 0x1f5   :  { %11593 = vmatpush3.bf16.msra.mxu1 %v12711_v18  ;;  %v14710_v18 = vrot.slane %v1212_v33, %v17972_v41  ;;  %v12807_v33 = vld [vmem:[%s17853_s3 + $0x7c8] sm:$0xff]  }
 0x1f6   :  { %11594 = vmatprep.subr.bf16.mxu1 %v12714_v29  ;;  %v12765_v29 = vld [vmem:[%s17853_s3 + $0x5f8] sm:$0xff]  }
 0x1f7   :  { %11615 = vmatpush3.bf16.msra.mxu0 %v12713_v58  ;;  %v12764_v58 = vld [vmem:[%s17853_s3 + $0x538] sm:$0xff]  }
 0x1f8   :  { %11616 = vmatprep.subr.bf16.mxu0 %v12716_v39  ;;  %v14719_v39 = vrot.slane %v1324_v49, %v17972_v41  ;;  %v12808_v49 = vld [vmem:[%s17853_s3 + $0x788] sm:$0xff]  }
 0x1f9   :  { %11595 = vmatpush3.bf16.msra.mxu1 %v12715_v20  ;;  %v12767_v20 = vld [vmem:[%s17853_s3 + $0x640] sm:$0xff]  }
 0x1fa   :  { %11596 = vmatprep.subr.bf16.mxu1 %v12718_v35  ;;  %v12766_v35 = vld [vmem:[%s17853_s3 + $0x5b8] sm:$0xff]  }
 0x1fb   :  { %11617 = vmatpush3.bf16.msra.mxu0 %v12717_v36  ;;  %v1339_v36 = vcombine.high %v14710_v18, %v14710_v18 }
 0x1fc   :  { %11618 = vmatprep.subr.bf16.mxu0 %v12720_v10  ;;  %v12769_v10 = vld [vmem:[%s17853_s3 + $0x6c0] sm:$0xff]  }
 0x1fd   :  { %11597 = vmatpush3.bf16.msra.mxu1 %v12719_v53  ;;  %v12768_v53 = vld [vmem:[%s17853_s3 + $0x600] sm:$0xff]  }
 0x1fe   :  { %11598 = vmatprep.subr.bf16.mxu1 %v12722_v26  ;;  %v1340_v26 = vcombine.high %v14719_v39, %v14719_v39 }
 0x1ff   :  { %11619 = vmatpush3.bf16.msra.mxu0 %v12721_v50  ;;  %v1410_v50 = vpack.c.bf16 %v14600_v44, %v14600_v44  ;;  %v12777_v44 = vld [vmem:[%s17853_s3 + $0x610] sm:$0xff]  }
 0x200   :  { %11620 = vmatprep.subr.bf16.mxu0 %v12724_v23  ;;  %v12772_v23 = vld [vmem:[%s17853_s3 + $0x648] sm:$0xff]  }
 0x201   :  { %11599 = vmatpush3.bf16.msra.mxu1 %v12723_v4  ;;  %v1415_v4 = vpack.c.bf16 %v1339_v36, %v1339_v36  ;;  %v12819_v36 = vld [vmem:[%s17853_s3 + $0x7e0] sm:$0xff]  }
 0x202   :  { %11600 = vmatprep.subr.bf16.mxu1 %v12726_v61  ;;  %v12770_v61 = vld [vmem:[%s17853_s3 + $0x680] sm:$0xff]  }
 0x203   :  { %11621 = vmatpush3.bf16.msra.mxu0 %v12725_v46  ;;  %v12774_v46 = vld [vmem:[%s17853_s3 + $0x6c8] sm:$0xff]  }
 0x204   :  { %11622 = vmatprep.subr.bf16.mxu0 %v12728_v30  ;;  %v1417_v30 = vpack.c.bf16 %v1340_v26, %v1340_v26  ;;  %v12820_v26 = vld [vmem:[%s17853_s3 + $0x7a0] sm:$0xff]  }
 0x205   :  { %11601 = vmatpush3.bf16.msra.mxu1 %v12727_v6  ;;  %v12773_v6 = vld [vmem:[%s17853_s3 + $0x608] sm:$0xff]  }
 0x206   :  { %11602 = vmatprep.subr.bf16.mxu1 %v12730_v19  ;;  %v12775_v19 = vld [vmem:[%s17853_s3 + $0x688] sm:$0xff]  }
 0x207   :  { %11623 = vmatpush3.bf16.msra.mxu0 %v12729_v52  ;;  %v12778_v52 = vld [vmem:[%s17853_s3 + $0x6d0] sm:$0xff]  }
 0x208   :  { %11624 = vmatprep.subr.bf16.mxu0 %v12732_v63  ;;  %v12780_v63 = vld [vmem:[%s17853_s3 + $0x658] sm:$0xff]  }
 0x209   :  { %11603 = vmatpush3.bf16.msra.mxu1 %v12731_v0  ;;  %v12779_v0 = vld [vmem:[%s17853_s3 + $0x690] sm:$0xff]  }
 0x20a   :  { %11632 = vmatprep.subr.bf16.mxu1 %v12734_v16  ;;  %v12781_v16 = vld [vmem:[%s17853_s3 + $0x618] sm:$0xff]  }
 0x20b   :  { %11625 = vmatpush3.bf16.msra.mxu0 %v12733_v3  ;;  %v12784_v3 = vld [vmem:[%s17853_s3 + $0x660] sm:$0xff]  }
 0x20c   :  { %3830 = vmatmul.mubr.bf16.vlgmr.msra.gmra.mrb[16].mxu1 %v1406_v51  ;;  %11654 = vmatprep.subr.bf16.mxu0 %v12736_v47  ;;  %v12786_v47 = vld [vmem:[%s17853_s3 + $0x6e0] sm:$0xff]  }
 0x20d   :  { %11633 = vmatpush3.bf16.msra.mxu1 %v12735_v22  ;;  %3909 = vmatprep.mubr.bf16.mxu1 %v1411_v13  ;;  %v12785_v22 = vld [vmem:[%s17853_s3 + $0x620] sm:$0xff]   ;;  %v12789_v13 = vld [vmem:[%s17853_s3 + $0x628] sm:$0xff]  }
 0x20e   :  { %3870 = vmatmul.mubr.bf16.vlgmr.msra.gmra.mrb[32].mxu0 %v1408_v37  ;;  %11634 = vmatprep.subr.bf16.mxu1 %v12739_v12  ;;  %v12787_v51 = vld [vmem:[%s17853_s3 + $0x6a0] sm:$0xff]   ;;  %v12790_v12 = vld [vmem:[%s17853_s3 + $0x6e8] sm:$0xff]   ;;  %v1213_v37 = vld [vmem:[#allocation2 + $0x38] sm:$0xff] }
 0x20f   :  { %11655 = vmatpush3.bf16.msra.mxu0 %v12737_v59  ;;  %3949 = vmatprep.mubr.bf16.mxu0 %v1413_v14  ;;  %v12792_v59 = vld [vmem:[%s17853_s3 + $0x670] sm:$0xff]  }
 0x210   :  { %11656 = vmatprep.subr.bf16.mxu0 %v12741_v11  ;;  %v12791_v11 = vld [vmem:[%s17853_s3 + $0x6a8] sm:$0xff]   ;;  %v12794_v14 = vld [vmem:[%s17853_s3 + $0x6f0] sm:$0xff]  }
 0x211   :  { %11635 = vmatpush3.bf16.msra.mxu1 %v12740_v5  ;;  %v12793_v5 = vld [vmem:[%s17853_s3 + $0x630] sm:$0xff]  }
 0x212   :  { %11636 = vmatprep.subr.bf16.mxu1 %v12743_v40  ;;  %v1341_v40 = vcombine.high %v1213_v37, %v1213_v37 }
 0x213   :  { %11657 = vmatpush3.bf16.msra.mxu0 %v12742_v15  ;;  %v12796_v15 = vld [vmem:[%s17853_s3 + $0x678] sm:$0xff]  }
 0x214   :  { %11658 = vmatprep.subr.bf16.mxu0 %v12745_v48  ;;  %v12795_v48 = vld [vmem:[%s17853_s3 + $0x6b0] sm:$0xff]  }
 0x215   :  { %11637 = vmatpush3.bf16.msra.mxu1 %v12744_v25  ;;  %v14820_v25 = vrot.slane %v1213_v37, %v17972_v41 }
 0x216   :  { %11638 = vmatprep.subr.bf16.mxu1 %v12747_v21  ;;  %v12798_v21 = vld [vmem:[%s17853_s3 + $0x6f8] sm:$0xff]  }
 0x217   :  { %11659 = vmatpush3.bf16.msra.mxu0 %v12746_v27  ;;  %v12797_v27 = vld [vmem:[%s17853_s3 + $0x638] sm:$0xff]  }
 0x218   :  { %11660 = vmatprep.subr.bf16.mxu0 %v12749_v34  ;;  %v14829_v34 = vrot.slane %v1341_v40, %v17972_v41  ;;  %v12801_v41 = vld [vmem:[%s17853_s3 + $0x700] sm:$0xff]  }
 0x219   :  { %11639 = vmatpush3.bf16.msra.mxu1 %v12748_v60  ;;  %v12800_v60 = vld [vmem:[%s17853_s3 + $0x740] sm:$0xff]  }
 0x21a   :  { %11640 = vmatprep.subr.bf16.mxu1 %v12751_v62  ;;  %v12799_v62 = vld [vmem:[%s17853_s3 + $0x6b8] sm:$0xff]   ;;  %v1420_v37 = vpack.c.bf16 %v14829_v34, %v14829_v34 }
 0x21b   :  { %11661 = vmatpush3.bf16.msra.mxu0 %v12750_v42  ;;  %v1356_v42 = vcombine.high %v14820_v25, %v14820_v25 }
 0x21c   :  { %11662 = vmatprep.subr.bf16.mxu0 %v12753_v32  ;;  %v12802_v32 = vld [vmem:[%s17853_s3 + $0x7c0] sm:$0xff]  }
 0x21d   :  { %11641 = vmatpush3.bf16.msra.mxu1 %v12752_v9  ;;  %v1357_v9 = vcombine.high %v14829_v34, %v14829_v34 }
 0x21e   :  { %11642 = vmatprep.subr.bf16.mxu1 %v12755_v54  ;;  %v1414_v54 = vpack.c.bf16 %v14710_v18, %v14710_v18  ;;  %v12813_v18 = vld [vmem:[%s17853_s3 + $0x758] sm:$0xff]  }
 0x21f   :  { %11663 = vmatpush3.bf16.msra.mxu0 %v12754_v38  ;;  %v12805_v38 = vld [vmem:[%s17853_s3 + $0x748] sm:$0xff]  }
 0x220   :  { %11664 = vmatprep.subr.bf16.mxu0 %v12757_v45  ;;  %v1419_v45 = vpack.c.bf16 %v1356_v42, %v1356_v42 }
 0x221   :  { %11643 = vmatpush3.bf16.msra.mxu1 %v12756_v8  ;;  %v12803_v8 = vld [vmem:[%s17853_s3 + $0x780] sm:$0xff]  }
 0x222   :  { %11644 = vmatprep.subr.bf16.mxu1 %v12759_v24  ;;  %v1416_v24 = vpack.c.bf16 %v14719_v39, %v14719_v39  ;;  %v12814_v39 = vld [vmem:[%s17853_s3 + $0x718] sm:$0xff]  }
 0x223   :  { %11665 = vmatpush3.bf16.msra.mxu0 %v12758_v57  ;;  %v1421_v57 = vpack.c.bf16 %v1357_v9, %v1357_v9 }
 0x224   :  { %11666 = vmatprep.subr.bf16.mxu0 %v12761_v31  ;;  %v12806_v31 = vld [vmem:[%s17853_s3 + $0x708] sm:$0xff]  }
 0x225   :  { %11645 = vmatpush3.bf16.msra.mxu1 %v12760_v56  ;;  %v12809_v56 = vld [vmem:[%s17853_s3 + $0x750] sm:$0xff]  }
 0x226   :  { %11646 = vmatprep.subr.bf16.mxu1 %v12763_v55  ;;  %v12811_v55 = vld [vmem:[%s17853_s3 + $0x7d0] sm:$0xff]  }
 0x227   :  { %11667 = vmatpush3.bf16.msra.mxu0 %v12762_v2  ;;  %v12810_v2 = vld [vmem:[%s17853_s3 + $0x710] sm:$0xff]  }
 0x228   :  { %11668 = vmatprep.subr.bf16.mxu0 %v12765_v29  ;;  %v12812_v29 = vld [vmem:[%s17853_s3 + $0x790] sm:$0xff]  }
 0x229   :  { %11647 = vmatpush3.bf16.msra.mxu1 %v12764_v58  ;;  %v12815_v58 = vld [vmem:[%s17853_s3 + $0x7d8] sm:$0xff]  }
 0x22a   :  { %11676 = vmatprep.subr.bf16.mxu1 %v12767_v20  ;;  %v12817_v20 = vld [vmem:[%s17853_s3 + $0x760] sm:$0xff]  }
 0x22b   :  { %11669 = vmatpush3.bf16.msra.mxu0 %v12766_v35  ;;  %v12816_v35 = vld [vmem:[%s17853_s3 + $0x798] sm:$0xff]  }
 0x22c   :  { %3910 = vmatmul.mubr.bf16.vlgmr.msra.gmra.mrb[20].mxu1 %v1410_v50  ;;  %11698 = vmatprep.subr.bf16.mxu0 %v12769_v10  ;;  %v12818_v10 = vld [vmem:[%s17853_s3 + $0x720] sm:$0xff]   ;;  %v12823_v50 = vld [vmem:[%s17853_s3 + $0x7e8] sm:$0xff]  }
 0x22d   :  { %11677 = vmatpush3.bf16.msra.mxu1 %v12768_v53  ;;  %3989 = vmatprep.mubr.bf16.mxu1 %v1415_v4  ;;  %v12821_v53 = vld [vmem:[%s17853_s3 + $0x768] sm:$0xff]   ;;  %v12825_v4 = vld [vmem:[%s17853_s3 + $0x770] sm:$0xff]  }
 0x22e   :  { %3950 = vmatmul.mubr.bf16.vlgmr.msra.gmra.mrb[36].mxu0 %v1412_v17  ;;  %11678 = vmatprep.subr.bf16.mxu1 %v12772_v23  ;;  %v12822_v23 = vld [vmem:[%s17853_s3 + $0x728] sm:$0xff]  }
 0x22f   :  { %11699 = vmatpush3.bf16.msra.mxu0 %v12770_v61  ;;  %4029 = vmatprep.mubr.bf16.mxu0 %v1417_v30  ;;  %v12824_v17 = vld [vmem:[%s17853_s3 + $0x7a8] sm:$0xff]  }
 0x230   :  { %11700 = vmatprep.subr.bf16.mxu0 %v12774_v46  ;;  %v10701_v46 = vld [vmem:[%s17855_s4] ss:$0 sm:$0xff] }
 0x231   :  { %11679 = vmatpush3.bf16.msra.mxu1 %v12773_v6  ;;  %v12827_v6 = vld [vmem:[%s17853_s3 + $0x7f0] sm:$0xff]  }
 0x232   :  { %11680 = vmatprep.subr.bf16.mxu1 %v12776_v7 }
 0x233   :  { %11701 = vmatpush3.bf16.msra.mxu0 %v12775_v19 }
 0x234   :  { %11702 = vmatprep.subr.bf16.mxu0 %v12778_v52 }
 0x235   :  { %11681 = vmatpush3.bf16.msra.mxu1 %v12777_v44  ;;  %v12826_v44 = vld [vmem:[%s17853_s3 + $0x730] sm:$0xff]  }
 0x236   :  { %11682 = vmatprep.subr.bf16.mxu1 %v12780_v63 }
 0x237   :  { %11703 = vmatpush3.bf16.msra.mxu0 %v12779_v0 }
 0x238   :  { %11704 = vmatprep.subr.bf16.mxu0 %v12782_v1  ;;  %v12829_v1 = vld [vmem:[%s17853_s3 + $0x778] sm:$0xff]  }
 0x239   :  { %11683 = vmatpush3.bf16.msra.mxu1 %v12781_v16 }
 0x23a   :  { %11684 = vmatprep.subr.bf16.mxu1 %v12784_v3 }
 0x23b   :  { %11705 = vmatpush3.bf16.msra.mxu0 %v12783_v28 }
 0x23c   :  { %11706 = vmatprep.subr.bf16.mxu0 %v12786_v47  ;;  %v12828_v47 = vld [vmem:[%s17853_s3 + $0x7b0] sm:$0xff]  }
 0x23d   :  { %11685 = vmatpush3.bf16.msra.mxu1 %v12785_v22 }
 0x23e   :  { %11686 = vmatprep.subr.bf16.mxu1 %v12788_v43  ;;  %v12831_v43 = vld [vmem:[%s17853_s3 + $0x7f8] sm:$0xff]  }
 0x23f   :  { %11707 = vmatpush3.bf16.msra.mxu0 %v12787_v51 }
 0x240   :  { %11708 = vmatprep.subr.bf16.mxu0 %v12790_v12  ;;  %v12830_v12 = vld [vmem:[%s17853_s3 + $0x738] sm:$0xff]  }
 0x241   :  { %11687 = vmatpush3.bf16.msra.mxu1 %v12789_v13  ;;  %v12832_v13 = vld [vmem:[%s17853_s3 + $0x7b8] sm:$0xff]  }
 0x242   :  { %11688 = vmatprep.subr.bf16.mxu1 %v12792_v59  ;;  %v1418_v59 = vpack.c.bf16 %v14820_v25, %v14820_v25 }
 0x243   :  { %11709 = vmatpush3.bf16.msra.mxu0 %v12791_v11 }
 0x244   :  { %11710 = vmatprep.subr.bf16.mxu0 %v12794_v14 }
 0x245   :  { %11689 = vmatpush3.bf16.msra.mxu1 %v12793_v5 }
 0x246   :  { %11690 = vmatprep.subr.bf16.mxu1 %v12796_v15 }
 0x247   :  { %11711 = vmatpush3.bf16.msra.mxu0 %v12795_v48 }
 0x248   :  { %11712 = vmatprep.subr.bf16.mxu0 %v12798_v21 }
 0x249   :  { %11691 = vmatpush3.bf16.msra.mxu1 %v12797_v27 }
 0x24a   :  { %11720 = vmatprep.subr.bf16.mxu1 %v12800_v60 }
 0x24b   :  { %11713 = vmatpush3.bf16.msra.mxu0 %v12799_v62 }
 0x24c   :  { %3990 = vmatmul.mubr.bf16.vlgmr.msra.gmra.mrb[24].mxu1 %v1414_v54  ;;  %11742 = vmatprep.subr.bf16.mxu0 %v12802_v32 }
 0x24d   :  { %11721 = vmatpush3.bf16.msra.mxu1 %v12801_v41  ;;  %4069 = vmatprep.mubr.bf16.mxu1 %v1419_v45 }
 0x24e   :  { %4030 = vmatmul.mubr.bf16.vlgmr.msra.gmra.mrb[40].mxu0 %v1416_v24  ;;  %11722 = vmatprep.subr.bf16.mxu1 %v12805_v38 }
 0x24f   :  { %11743 = vmatpush3.bf16.msra.mxu0 %v12803_v8  ;;  %4109 = vmatprep.mubr.bf16.mxu0 %v1421_v57 }
 0x250   :  { %11744 = vmatprep.subr.bf16.mxu0 %v12807_v33 }
 0x251   :  { %11723 = vmatpush3.bf16.msra.mxu1 %v12806_v31 }
 0x252   :  { %11724 = vmatprep.subr.bf16.mxu1 %v12809_v56 }
 0x253   :  { %11745 = vmatpush3.bf16.msra.mxu0 %v12808_v49 }
 0x254   :  { %11746 = vmatprep.subr.bf16.mxu0 %v12811_v55 }
 0x255   :  { %11725 = vmatpush3.bf16.msra.mxu1 %v12810_v2 }
 0x256   :  { %11726 = vmatprep.subr.bf16.mxu1 %v12813_v18 }
 0x257   :  { %11747 = vmatpush3.bf16.msra.mxu0 %v12812_v29 }
 0x258   :  { %11748 = vmatprep.subr.bf16.mxu0 %v12815_v58 }
 0x259   :  { %11727 = vmatpush3.bf16.msra.mxu1 %v12814_v39 }
 0x25a   :  { %11728 = vmatprep.subr.bf16.mxu1 %v12817_v20 }
 0x25b   :  { %11749 = vmatpush3.bf16.msra.mxu0 %v12816_v35 }
 0x25c   :  { %11750 = vmatprep.subr.bf16.mxu0 %v12819_v36 }
 0x25d   :  { %11729 = vmatpush3.bf16.msra.mxu1 %v12818_v10 }
 0x25e   :  { %11730 = vmatprep.subr.bf16.mxu1 %v12821_v53 }
 0x25f   :  { %11751 = vmatpush3.bf16.msra.mxu0 %v12820_v26  ;;  %v11428_v61 = vpop.f32.mrb[0].mxu1 }
 0x260   :  { %v11429_v30 = vpop.f32.mrb[1].mxu1  ;;  %11752 = vmatprep.subr.bf16.mxu0 %v12823_v50 }
 0x261   :  { %v11430_v7 = vadd.f32 %v11429_v30, %v11428_v61  ;;  %11731 = vmatpush3.bf16.msra.mxu1 %v12822_v23  ;;  %v11431_v19 = vpop.f32.mrb[2].mxu1  ;;  %v11450_v52 = vpop.f32.mrb[16].mxu0 }
 0x262   :  { %v11432_v63 = vpop.f32.mrb[3].mxu1  ;;  %v11451_v0 = vpop.f32.mrb[17].mxu0  ;;  %11732 = vmatprep.subr.bf16.mxu1 %v12825_v4 }
 0x263   :  { %v3512_v16 = vadd.f32 %v11430_v7, %v10701_v46  ;;  %v11452_v3 = vadd.f32 %v11451_v0, %v11450_v52  ;;  %11753 = vmatpush3.bf16.msra.mxu0 %v12824_v17  ;;  %v11453_v28 = vpop.f32.mrb[18].mxu0  ;;  %v4174_v63 = vld [vmem:[%s17856_s7 + $0x80] sm:$0xff]  ;;  %v4160_v0 = vld [vmem:[%s17856_s7 + $0x10] sm:$0xff] }
 0x264   :  { %v11454_v22 = vpop.f32.mrb[19].mxu0  ;;  %11754 = vmatprep.subr.bf16.mxu0 %v12827_v6 }
 0x265   :  { %v3552_v51 = vadd.f32 %v11452_v3, %v3512_v16  ;;  %11733 = vmatpush3.bf16.msra.mxu1 %v12826_v44  ;;  %v4158_v44 = vld [vmem:[%s17856_s7] sm:$0xff] }
 0x266   :  { %11734 = vmatprep.subr.bf16.mxu1 %v12829_v1  ;;  %v12972_v1 = vmov 0   ;;  %v10960_v3 = vcombine.low %v4158_v44, %v4174_v63  ;;  %v10961_v28 = vcombine.high %v4158_v44, %v4174_v63  ;;  %v4190_v22 = vld [vmem:[%s17856_s7 + $0x100] sm:$0xff] }
 0x267   :  { %11755 = vmatpush3.bf16.msra.mxu0 %v12828_v47  ;;  %v4176_v47 = vld [vmem:[%s17856_s7 + $0x90] sm:$0xff] }
 0x268   :  { %11756 = vmatprep.subr.bf16.mxu0 %v12831_v43  ;;  %v4206_v43 = vld [vmem:[%s17856_s7 + $0x180] sm:$0xff] }
 0x269   :  { %11735 = vmatpush3.bf16.msra.mxu1 %v12830_v12 }
 0x26a   :  { %4714 = vmatprep.subr.bf16.mxu1 %v10961_v28 }
 0x26b   :  { %11757 = vmatpush3.bf16.msra.mxu0 %v12832_v13 }
 0x26c   :  { %4070 = vmatmul.mubr.bf16.vlgmr.msra.gmra.mrb[28].mxu1 %v1418_v59  ;;  %v10964_v59 = vcombine.low %v4160_v0, %v4176_v47 }
 0x26d   :  { %4746 = vmatprep.mubr.bf16.mxu1 %v12972_v1  ;;  %4715 = vmatpush1.bf16.msra.mxu1 %v10960_v3 }
 0x26e   :  { %4110 = vmatmul.mubr.bf16.vlgmr.msra.gmra.mrb[44].mxu0 %v1420_v37  ;;  %v10965_v37 = vcombine.high %v4160_v0, %v4176_v47 }
 0x26f   :  { %4828 = vmatprep.mubr.bf16.mxu0 %v12972_v1 }
 0x270   :  { %4796 = vmatprep.subr.bf16.mxu0 %v10965_v37 }
 0x271   :  { %4797 = vmatpush1.bf16.msra.mxu0 %v10964_v59 }
 0x27f   :  { %v11472_v11 = vpop.f32.mrb[4].mxu1 }
 0x280   :  { %v11473_v14 = vpop.f32.mrb[5].mxu1 }
 0x281   :  { %v11474_v5 = vadd.f32 %v11473_v14, %v11472_v11  ;;  %v11475_v40 = vpop.f32.mrb[6].mxu1  ;;  %v11494_v15 = vpop.f32.mrb[20].mxu0  ;;  %v4192_v11 = vld [vmem:[%s17856_s7 + $0x110] sm:$0xff] }
 0x282   :  { %v11476_v48 = vpop.f32.mrb[7].mxu1  ;;  %v11495_v21 = vpop.f32.mrb[21].mxu0  ;;  %v4208_v14 = vld [vmem:[%s17856_s7 + $0x190] sm:$0xff] }
 0x283   :  { %v3592_v27 = vadd.f32 %v11474_v5, %v3552_v51  ;;  %v11496_v60 = vadd.f32 %v11495_v21, %v11494_v15  ;;  %v11497_v62 = vpop.f32.mrb[22].mxu0  ;;  %v14974_v5 = vld [vmem:[%s17856_s7 + $0x8] sm:$0xff]  ;;  %v10992_v48 = vcombine.low %v4190_v22, %v4206_v43  ;;  %v10993_v21 = vcombine.high %v4190_v22, %v4206_v43 }
 0x284   :  { %v11498_v42 = vpop.f32.mrb[23].mxu0  ;;  %v14984_v62 = vld [vmem:[%s17856_s7 + $0x20] sm:$0xff] }
 0x285   :  { %v3632_v32 = vadd.f32 %v11496_v60, %v3592_v27  ;;  %v10997_v27 = vcombine.high %v4192_v11, %v4208_v14  ;;  %v14979_v60 = vld [vmem:[%s17856_s7 + $0x88] sm:$0xff]  ;;  %v14989_v42 = vld [vmem:[%s17856_s7 + $0xa0] sm:$0xff]  ;;  %4716 = vmatprep.subr.bf16.mxu1 %v10993_v21 }
 0x286   :  { %4717 = vmatpush1.bf16.msra.mxu1 %v10992_v48  ;;  %v10959_v48 = vld [vmem:[%s17858_s6] ss:$0 sm:$0xff] }
 0x287   :  { %4798 = vmatprep.subr.bf16.mxu0 %v10997_v27 }
 0x29f   :  { %v11516_v41 = vpop.f32.mrb[8].mxu1 }
 0x2a0   :  { %v11517_v25 = vpop.f32.mrb[9].mxu1 }
 0x2a1   :  { %v11518_v9 = vadd.f32 %v11517_v25, %v11516_v41  ;;  %v11519_v54 = vpop.f32.mrb[10].mxu1  ;;  %v11538_v38 = vpop.f32.mrb[24].mxu0 }
 0x2a2   :  { %v11520_v45 = vpop.f32.mrb[11].mxu1  ;;  %v11539_v34 = vpop.f32.mrb[25].mxu0 }
 0x2a3   :  { %v3672_v8 = vadd.f32 %v11518_v9, %v3632_v32  ;;  %v11540_v24 = vadd.f32 %v11539_v34, %v11538_v38  ;;  %v11541_v33 = vpop.f32.mrb[26].mxu0  ;;  %v10962_v9 = vcombine.low %v14974_v5, %v14979_v60  ;;  %v10996_v38 = vcombine.low %v4192_v11, %v4208_v14 }
 0x2a4   :  { %v11542_v57 = vpop.f32.mrb[27].mxu0  ;;  %v10963_v45 = vcombine.high %v14974_v5, %v14979_v60  ;;  %v10968_v34 = vcombine.low %v14984_v62, %v14989_v42  ;;  %v4209_v5 = vld [vmem:[%s17856_s7 + $0x198] sm:$0xff]  ;;  %v4196_v60 = vld [vmem:[%s17856_s7 + $0x130] sm:$0xff] }
 0x2a5   :  { %v3712_v31 = vadd.f32 %v11540_v24, %v3672_v8  ;;  %v10969_v24 = vcombine.high %v14984_v62, %v14989_v42  ;;  %4799 = vmatpush1.bf16.msra.mxu0 %v10996_v38  ;;  %v4212_v62 = vld [vmem:[%s17856_s7 + $0x1b0] sm:$0xff] }
 0x2a6   :  { %4755 = vmatprep.subr.bf16.mxu1 %v10963_v45 }
 0x2a7   :  { %4878 = vmatprep.subr.bf16.mxu0 %v10969_v24 }
 0x2bf   :  { %v11560_v56 = vpop.f32.mrb[12].mxu1 }
 0x2c0   :  { %v11561_v49 = vpop.f32.mrb[13].mxu1 }
 0x2c1   :  { %v11562_v55 = vadd.f32 %v11561_v49, %v11560_v56  ;;  %v11563_v2 = vpop.f32.mrb[14].mxu1  ;;  %v11582_v18 = vpop.f32.mrb[28].mxu0 }
 0x2c2   :  { %v11564_v29 = vpop.f32.mrb[15].mxu1  ;;  %v11583_v58 = vpop.f32.mrb[29].mxu0 }
 0x2c3   :  { %v3752_v39 = vadd.f32 %v11562_v55, %v3712_v31  ;;  %v11584_v20 = vadd.f32 %v11583_v58, %v11582_v18  ;;  %v11585_v35 = vpop.f32.mrb[30].mxu0 }
 0x2c4   :  { %v11586_v36 = vpop.f32.mrb[31].mxu0 }
 0x2c5   :  { %v3792_v10 = vadd.f32 %v11584_v20, %v3752_v39 }
 0x2df   :  { %v11604_v53 = vpop.f32.mrb[16].mxu1 }
 0x2e0   :  { %v11605_v26 = vpop.f32.mrb[17].mxu1 }
 0x2e1   :  { %v11606_v50 = vadd.f32 %v11605_v26, %v11604_v53  ;;  %v11607_v23 = vpop.f32.mrb[18].mxu1  ;;  %v11626_v4 = vpop.f32.mrb[32].mxu0 }
 0x2e2   :  { %v11608_v61 = vpop.f32.mrb[19].mxu1  ;;  %v11627_v17 = vpop.f32.mrb[33].mxu0 }
 0x2e3   :  { %v3832_v46 = vadd.f32 %v11606_v50, %v3792_v10  ;;  %v11628_v30 = vadd.f32 %v11627_v17, %v11626_v4  ;;  %v11629_v6 = vpop.f32.mrb[34].mxu0 }
 0x2e4   :  { %v11630_v7 = vpop.f32.mrb[35].mxu0 }
 0x2e5   :  { %v3872_v19 = vadd.f32 %v11628_v30, %v3832_v46 }
 0x2ff   :  { %v11648_v52 = vpop.f32.mrb[20].mxu1 }
 0x300   :  { %v11649_v16 = vpop.f32.mrb[21].mxu1 }
 0x301   :  { %v11650_v51 = vadd.f32 %v11649_v16, %v11648_v52  ;;  %v11651_v12 = vpop.f32.mrb[22].mxu1  ;;  %v11670_v13 = vpop.f32.mrb[36].mxu0 }
 0x302   :  { %v11652_v40 = vpop.f32.mrb[23].mxu1  ;;  %v11671_v15 = vpop.f32.mrb[37].mxu0 }
 0x303   :  { %v3912_v32 = vadd.f32 %v11650_v51, %v3872_v19  ;;  %v11672_v41 = vadd.f32 %v11671_v15, %v11670_v13  ;;  %v11673_v25 = vpop.f32.mrb[38].mxu0  ;;  %v10958_v40 = vld [vmem:[%s17857_s5] ss:$0 sm:$0xff] }
 0x304   :  { %v11674_v54 = vpop.f32.mrb[39].mxu0  ;;  %v4194_v25 = vld [vmem:[%s17856_s7 + $0x120] sm:$0xff] }
 0x305   :  { %v3952_v8 = vadd.f32 %v11672_v41, %v3912_v32  ;;  %v4191_v32 = vld [vmem:[%s17856_s7 + $0x108] sm:$0xff]  ;;  %v4210_v54 = vld [vmem:[%s17856_s7 + $0x1a0] sm:$0xff] }
 0x306   :  { %v4207_v41 = vld [vmem:[%s17856_s7 + $0x188] sm:$0xff]  ;;  %v11001_v24 = vcombine.high %v4194_v25, %v4210_v54 }
 0x31f   :  { %v11692_v33 = vpop.f32.mrb[24].mxu1 }
 0x320   :  { %v11693_v57 = vpop.f32.mrb[25].mxu1 }
 0x321   :  { %v11694_v31 = vadd.f32 %v11693_v57, %v11692_v33  ;;  %v11695_v56 = vpop.f32.mrb[26].mxu1  ;;  %v11714_v49 = vpop.f32.mrb[40].mxu0  ;;  %v4161_v33 = vld [vmem:[%s17856_s7 + $0x18] sm:$0xff] }
 0x322   :  { %v11696_v55 = vpop.f32.mrb[27].mxu1  ;;  %v11715_v2 = vpop.f32.mrb[41].mxu0  ;;  %v4177_v57 = vld [vmem:[%s17856_s7 + $0x98] sm:$0xff]  ;;  %v4180_v56 = vld [vmem:[%s17856_s7 + $0xb0] sm:$0xff] }
 0x323   :  { %v3992_v18 = vadd.f32 %v11694_v31, %v3952_v8  ;;  %v11716_v29 = vadd.f32 %v11715_v2, %v11714_v49  ;;  %v11717_v58 = vpop.f32.mrb[42].mxu0  ;;  %v10995_v8 = vcombine.high %v4191_v32, %v4207_v41  ;;  %v4164_v31 = vld [vmem:[%s17856_s7 + $0x30] sm:$0xff]  ;;  %v10994_v49 = vcombine.low %v4191_v32, %v4207_v41  ;;  %v4199_v41 = vld [vmem:[%s17856_s7 + $0x148] sm:$0xff] }
 0x324   :  { %v11718_v39 = vpop.f32.mrb[43].mxu0  ;;  %v11000_v55 = vcombine.low %v4194_v25, %v4210_v54  ;;  %v10967_v2 = vcombine.high %v4161_v33, %v4177_v57  ;;  %v10966_v42 = vcombine.low %v4161_v33, %v4177_v57  ;;  %v11005_v58 = vcombine.high %v4196_v60, %v4212_v62  ;;  %v4215_v25 = vld [vmem:[%s17856_s7 + $0x1c8] sm:$0xff]  ;;  %v4202_v54 = vld [vmem:[%s17856_s7 + $0x160] sm:$0xff] }
 0x325   :  { %v4032_v20 = vadd.f32 %v11716_v29, %v3992_v18  ;;  %v10973_v18 = vcombine.high %v4164_v31, %v4180_v56  ;;  %v4193_v29 = vld [vmem:[%s17856_s7 + $0x118] sm:$0xff]  ;;  %v4163_v39 = vld [vmem:[%s17856_s7 + $0x28] sm:$0xff]  ;;  %v11011_v33 = vcombine.high %v4199_v41, %v4215_v25 }
 0x33f   :  { %v11736_v35 = vpop.f32.mrb[28].mxu1 }
 0x340   :  { %v11737_v36 = vpop.f32.mrb[29].mxu1 }
 0x341   :  { %v11738_v10 = vadd.f32 %v11737_v36, %v11736_v35  ;;  %v11739_v53 = vpop.f32.mrb[30].mxu1  ;;  %v11758_v26 = vpop.f32.mrb[44].mxu0  ;;  %v4166_v35 = vld [vmem:[%s17856_s7 + $0x40] sm:$0xff] }
 0x342   :  { %v11740_v50 = vpop.f32.mrb[31].mxu1  ;;  %v11759_v23 = vpop.f32.mrb[45].mxu0  ;;  %v4182_v36 = vld [vmem:[%s17856_s7 + $0xc0] sm:$0xff]  ;;  %v11004_v53 = vcombine.low %v4196_v60, %v4212_v62  ;;  %v4201_v60 = vld [vmem:[%s17856_s7 + $0x158] sm:$0xff] }
 0x343   :  { %v4072_v4 = vadd.f32 %v11738_v10, %v4032_v20  ;;  %v11760_v61 = vadd.f32 %v11759_v23, %v11758_v26  ;;  %v11761_v17 = vpop.f32.mrb[46].mxu0  ;;  %v4179_v20 = vld [vmem:[%s17856_s7 + $0xa8] sm:$0xff]  ;;  %v10998_v10 = vcombine.low %v4193_v29, %v4209_v5  ;;  %v10977_v50 = vcombine.high %v4166_v35, %v4182_v36  ;;  %v4217_v62 = vld [vmem:[%s17856_s7 + $0x1d8] sm:$0xff] }
 0x344   :  { %v11762_v46 = vpop.f32.mrb[47].mxu0  ;;  %v10971_v26 = vcombine.high %v4163_v39, %v4179_v20  ;;  %v4195_v23 = vld [vmem:[%s17856_s7 + $0x128] sm:$0xff]  ;;  %v4214_v17 = vld [vmem:[%s17856_s7 + $0x1c0] sm:$0xff] }
 0x345   :  { %v4112_v30 = vadd.f32 %v11760_v61, %v4072_v4  ;;  %v4211_v4 = vld [vmem:[%s17856_s7 + $0x1a8] sm:$0xff]  ;;  %v4198_v61 = vld [vmem:[%s17856_s7 + $0x140] sm:$0xff]  ;;  %v10970_v46 = vcombine.low %v4163_v39, %v4179_v20  ;;  %v11015_v39 = vcombine.high %v4201_v60, %v4217_v62 }
 0x347   :  { %v4118_v6 = vsel %vm4117_vm8, %v4112_v30, 0.0 }
 0x348   :  { %v4119_v7 = vrot.slane %v4118_v6, 4 }
 0x34a   :  { %v4120_v19 = vadd.f32 %v4119_v7, %v4118_v6  ;;  %v11003_v6 = vcombine.high %v4195_v23, %v4211_v4  ;;  %v11009_v7 = vcombine.high %v4198_v61, %v4214_v17 }
 0x34c   :  { %v4121_v52 = vrot.slane %v4120_v19, 2 }
 0x34e   :  { %v4122_v44 = vadd.f32 %v4121_v52, %v4120_v19  ;;  %v4165_v19 = vld [vmem:[%s17856_s7 + $0x38] sm:$0xff] }
 0x34f   :  { %v4181_v52 = vld [vmem:[%s17856_s7 + $0xb8] sm:$0xff] }
 0x350   :  { %v4123_v63 = vrot.slane %v4122_v44, 1 }
 0x352   :  { %v4124_v0 = vadd.f32 %v4123_v63, %v4122_v44  ;;  %v4168_v44 = vld [vmem:[%s17856_s7 + $0x50] sm:$0xff] }
 0x353   :  { %v4184_v63 = vld [vmem:[%s17856_s7 + $0xd0] sm:$0xff] }
 0x354   :  { %v4126_v16 = vmul.f32 0.5, %v4124_v0  ;;  %v11002_v0 = vcombine.low %v4195_v23, %v4211_v4  ;;  %v4219_v23 = vld [vmem:[%s17856_s7 + $0x1e8] sm:$0xff] }
 0x356   :  { %v4127_v3 = vsub.f32 %v4112_v30, %v4126_v16  ;;  %v10976_v30 = vcombine.low %v4166_v35, %v4182_v36  ;;  %v11008_v16 = vcombine.low %v4198_v61, %v4214_v17  ;;  %v4171_v35 = vld [vmem:[%s17856_s7 + $0x68] sm:$0xff]  ;;  %v4173_v17 = vld [vmem:[%s17856_s7 + $0x78] sm:$0xff] }
 0x357   :  { %v4187_v36 = vld [vmem:[%s17856_s7 + $0xe8] sm:$0xff] }
 0x358   :  { %v4128_v28 = vmul.f32 %v4127_v3, %v4127_v3  ;;  %v10986_v4 = vcombine.low %v4171_v35, %v4187_v36 }
 0x35a   :  { %v4129_v47 = vsel %vm4117_vm8, %v4128_v28, 0.0  ;;  %v10981_v28 = vcombine.high %v4168_v44, %v4184_v63 }
 0x35b   :  { %v4130_v22 = vrot.slane %v4129_v47, 4 }
 0x35d   :  { %v4131_v43 = vadd.f32 %v4130_v22, %v4129_v47  ;;  %v4197_v47 = vld [vmem:[%s17856_s7 + $0x138] sm:$0xff] }
 0x35e   :  { %v4213_v22 = vld [vmem:[%s17856_s7 + $0x1b8] sm:$0xff] }
 0x35f   :  { %v4132_v51 = vrot.slane %v4131_v43, 2 }
 0x361   :  { %v4133_v12 = vadd.f32 %v4132_v51, %v4131_v43  ;;  %v4200_v43 = vld [vmem:[%s17856_s7 + $0x150] sm:$0xff] }
 0x362   :  { %v4216_v51 = vld [vmem:[%s17856_s7 + $0x1d0] sm:$0xff] }
 0x363   :  { %v4134_v13 = vrot.slane %v4133_v12, 1 }
 0x365   :  { %v4135_v59 = vadd.f32 %v4134_v13, %v4133_v12  ;;  %v10974_v12 = vcombine.low %v4165_v19, %v4181_v52  ;;  %v10980_v13 = vcombine.low %v4168_v44, %v4184_v63 }
 0x367   :  { %v4136_v37 = vmul.f32 0.5, %v4135_v59  ;;  %v11007_v59 = vcombine.high %v4197_v47, %v4213_v22 }
 0x369   :  { %v4137_v11 = vadd.f32 0.8, %v4136_v37  ;;  %v11013_v37 = vcombine.high %v4200_v43, %v4216_v51 }
 0x36b   :  { %12897 = vrsqrt.f32 %v4137_v11  ;;  %v4167_v11 = vld [vmem:[%s17856_s7 + $0x48] sm:$0xff] }
 0x375   :  { %v12898_v14 = vpop.eup %12897 }
 0x376   :  { %v4139_v15 = vmul.f32 %v12898_v14, %v4127_v3  ;;  %v10975_v3 = vcombine.high %v4165_v19, %v4181_v52  ;;  %v4183_v14 = vld [vmem:[%s17856_s7 + $0xc8] sm:$0xff]  ;;  %v4221_v19 = vld [vmem:[%s17856_s7 + $0x1f8] sm:$0xff] }
 0x378   :  { %v4147_v21 = vmul.f32 %v10958_v40, %v4139_v15  ;;  %v4170_v40 = vld [vmem:[%s17856_s7 + $0x60] sm:$0xff] }
 0x379   :  { %v4186_v15 = vld [vmem:[%s17856_s7 + $0xe0] sm:$0xff] }
 0x37a   :  { %v4155_v27 = vadd.f32 %v10959_v48, %v4147_v21  ;;  %v11006_v48 = vcombine.low %v4197_v47, %v4213_v22  ;;  %v11012_v21 = vcombine.low %v4200_v43, %v4216_v51  ;;  %v10985_v32 = vcombine.high %v4170_v40, %v4186_v15 }
 0x37c   :  { %v4156_v38 = vmax.f32 %v4155_v27, 0.0  ;;  %v10979_v27 = vcombine.high %v4167_v11, %v4183_v14 }
 0x37e   :  { %v15017_v45 = vpack.c.bf16 %v4156_v38, %v4156_v38  ;;  %v4218_v38 = vld [vmem:[%s17856_s7 + $0x1e0] sm:$0xff] }
 0x37f   :  { %v11017_v57 = vcombine.high %v4202_v54, %v4218_v38 }
 0x380   :  { %11024 = vmatmul.mubr.msk.bf16.vlgmr.msra.gmra.mrb[32].mxu1 %vm4710_vm9, %v15017_v45  ;;  %11026 = vmatmul.mubr.msk.bf16.vlgmr.msra.gmra.mrb[48].mxu0 %vm4710_vm9, %v15017_v45 }
 0x381   :  { %4756 = vmatpush1.bf16.msra.mxu1 %v10962_v9  ;;  %4879 = vmatpush1.bf16.msra.mxu0 %v10968_v34  ;;  %v10972_v9 = vcombine.low %v4164_v31, %v4180_v56  ;;  %v10999_v34 = vcombine.high %v4193_v29, %v4209_v5  ;;  %v4169_v31 = vld [vmem:[%s17856_s7 + $0x58] sm:$0xff] }
 0x382   :  { %4757 = vmatprep.subr.bf16.mxu1 %v10995_v8  ;;  %4880 = vmatprep.subr.bf16.mxu0 %v11001_v24  ;;  %v10978_v8 = vcombine.low %v4167_v11, %v4183_v14  ;;  %v10984_v24 = vcombine.low %v4170_v40, %v4186_v15  ;;  %v4185_v56 = vld [vmem:[%s17856_s7 + $0xd8] sm:$0xff]  ;;  %v15262_v40 = vld [vmem:[%s17859_s8 + $0x8] sm:$0xff] }
 0x383   :  { %4787 = vmatprep.mubr.bf16.mxu1 %v12972_v1  ;;  %4910 = vmatprep.mubr.bf16.mxu0 %v12972_v1  ;;  %v10983_v29 = vcombine.high %v4169_v31, %v4185_v56  ;;  %v15267_v15 = vld [vmem:[%s17860_s9 + $0x8] sm:$0xff] }
 0x385   :  { %4758 = vmatpush1.bf16.msra.mxu1 %v10994_v49  ;;  %4881 = vmatpush1.bf16.msra.mxu0 %v11000_v55  ;;  %v4172_v49 = vld [vmem:[%s17856_s7 + $0x70] sm:$0xff] }
 0x386   :  { %4837 = vmatprep.subr.bf16.mxu1 %v10967_v2  ;;  %4960 = vmatprep.subr.bf16.mxu0 %v10973_v18  ;;  %v4188_v55 = vld [vmem:[%s17856_s7 + $0xf0] sm:$0xff]  ;;  %v11010_v2 = vcombine.low %v4199_v41, %v4215_v25  ;;  %v11016_v18 = vcombine.low %v4202_v54, %v4218_v38  ;;  %v15281_v41 = vld [vmem:[%s17861_s10 + $0x8] sm:$0xff] }
 0x387   :  { %v10989_v5 = vcombine.high %v4172_v49, %v4188_v55 }
 0x388   :  { %11025 = vmatmul.mubr.msk.bf16.vlgmr.msra.gmra.mrb[36].mxu1 %vm4710_vm9, %v15017_v45  ;;  %11028 = vmatmul.mubr.msk.bf16.vlgmr.msra.gmra.mrb[52].mxu0 %vm4710_vm9, %v15017_v45 }
 0x389   :  { %4838 = vmatpush1.bf16.msra.mxu1 %v10966_v42  ;;  %4961 = vmatpush1.bf16.msra.mxu0 %v10972_v9  ;;  %v4204_v42 = vld [vmem:[%s17856_s7 + $0x170] sm:$0xff] }
 0x38a   :  { %4839 = vmatprep.subr.bf16.mxu1 %v10999_v34  ;;  %4962 = vmatprep.subr.bf16.mxu0 %v11005_v58  ;;  %v4220_v9 = vld [vmem:[%s17856_s7 + $0x1f0] sm:$0xff]  ;;  %v10982_v34 = vcombine.low %v4169_v31, %v4185_v56  ;;  %v10988_v58 = vcombine.low %v4172_v49, %v4188_v55 }
 0x38b   :  { %4869 = vmatprep.mubr.bf16.mxu1 %v12972_v1  ;;  %4992 = vmatprep.mubr.bf16.mxu0 %v12972_v1  ;;  %v11021_v20 = vcombine.high %v4204_v42, %v4220_v9 }
 0x38d   :  { %4840 = vmatpush1.bf16.msra.mxu1 %v10998_v10  ;;  %4963 = vmatpush1.bf16.msra.mxu0 %v11004_v53  ;;  %v11014_v10 = vcombine.low %v4201_v60, %v4217_v62  ;;  %v11020_v53 = vcombine.low %v4204_v42, %v4220_v9 }
 0x38e   :  { %4919 = vmatprep.subr.bf16.mxu1 %v10971_v26  ;;  %5042 = vmatprep.subr.bf16.mxu0 %v10977_v50  ;;  %v10987_v26 = vcombine.high %v4171_v35, %v4187_v36  ;;  %v4203_v50 = vld [vmem:[%s17856_s7 + $0x168] sm:$0xff] }
 0x38f   :  { %v11019_v61 = vcombine.high %v4203_v50, %v4219_v23 }
 0x390   :  { %11027 = vmatmul.mubr.msk.bf16.vlgmr.msra.gmra.mrb[40].mxu1 %vm4710_vm9, %v15017_v45  ;;  %11030 = vmatmul.mubr.msk.bf16.vlgmr.msra.gmra.mrb[56].mxu0 %vm4710_vm9, %v15017_v45 }
 0x391   :  { %4920 = vmatpush1.bf16.msra.mxu1 %v10970_v46  ;;  %5043 = vmatpush1.bf16.msra.mxu0 %v10976_v30  ;;  %v4189_v46 = vld [vmem:[%s17856_s7 + $0xf8] sm:$0xff]  ;;  %v11018_v30 = vcombine.low %v4203_v50, %v4219_v23 }
 0x392   :  { %4921 = vmatprep.subr.bf16.mxu1 %v11003_v6  ;;  %5044 = vmatprep.subr.bf16.mxu0 %v11009_v7  ;;  %v10991_v6 = vcombine.high %v4173_v17, %v4189_v46  ;;  %v4205_v7 = vld [vmem:[%s17856_s7 + $0x178] sm:$0xff]  ;;  %v10990_v52 = vcombine.low %v4173_v17, %v4189_v46 }
 0x393   :  { %4951 = vmatprep.mubr.bf16.mxu1 %v12972_v1  ;;  %5074 = vmatprep.mubr.bf16.mxu0 %v12972_v1  ;;  %v11023_v44 = vcombine.high %v4205_v7, %v4221_v19  ;;  %v11022_v63 = vcombine.low %v4205_v7, %v4221_v19 }
 0x395   :  { %4922 = vmatpush1.bf16.msra.mxu1 %v11002_v0  ;;  %5045 = vmatpush1.bf16.msra.mxu0 %v11008_v16  ;;  %v17973_v0 = vld [vmem:[#allocation4_spill] sm:$0xff] }
 0x396   :  { %5001 = vmatprep.subr.bf16.mxu1 %v10975_v3  ;;  %5124 = vmatprep.subr.bf16.mxu0 %v10981_v28  ;;  %v15216_v16 = vsub.s32 0, %v17973_v0  ;;  %v15219_v3 = vsub.s32 4, %v17973_v0  ;;  %v15224_v28 = vld [vmem:[%s17859_s8] sm:$0xff]  ;;  %v15237_v47 = vsub.s32 1, %v17973_v0  ;;  %v15240_v22 = vsub.s32 5, %v17973_v0 }
 0x397   :  { %v15243_v43 = vsub.s32 2, %v17973_v0  ;;  %v15284_v25 = vsub.s32 6, %v17973_v0 }
 0x398   :  { %11029 = vmatmul.mubr.msk.bf16.vlgmr.msra.gmra.mrb[44].mxu1 %vm4710_vm9, %v15017_v45  ;;  %11032 = vmatmul.mubr.msk.bf16.vlgmr.msra.gmra.mrb[60].mxu0 %vm4710_vm9, %v15017_v45  ;;  %v4233_v51 = vrot.slane %v15224_v28, %v15216_v16  ;;  %v4237_v14 = vrot.slane %v15224_v28, %v15237_v47  ;;  %v4265_v31 = vrot.slane %v15262_v40, %v15216_v16 }
 0x399   :  { %5002 = vmatpush1.bf16.msra.mxu1 %v10974_v12  ;;  %5125 = vmatpush1.bf16.msra.mxu0 %v10980_v13  ;;  %v4257_v42 = vrot.slane %v15224_v28, %v15284_v25 }
 0x39a   :  { %5003 = vmatprep.subr.bf16.mxu1 %v11007_v59  ;;  %5126 = vmatprep.subr.bf16.mxu0 %v11013_v37  ;;  %v4249_v59 = vrot.slane %v15224_v28, %v15219_v3 }
 0x39b   :  { %5033 = vmatprep.mubr.bf16.mxu1 %v12972_v1  ;;  %5156 = vmatprep.mubr.bf16.mxu0 %v12972_v1 }
 0x39d   :  { %5004 = vmatpush1.bf16.msra.mxu1 %v11006_v48  ;;  %5127 = vmatpush1.bf16.msra.mxu0 %v11012_v21  ;;  %v15270_v48 = vsub.s32 3, %v17973_v0 }
 0x39e   :  { %5083 = vmatprep.subr.bf16.mxu1 %v10979_v27  ;;  %5206 = vmatprep.subr.bf16.mxu0 %v10985_v32  ;;  %v4253_v32 = vrot.slane %v15224_v28, %v15240_v22 }
 0x39f   :  { %v4245_v55 = vrot.slane %v15224_v28, %v15270_v48 }
 0x3a0   :  { %11031 = vmatmul.mubr.msk.bf16.vlgmr.msra.gmra.mrb[48].mxu1 %vm4710_vm9, %v15017_v45  ;;  %11034 = vmatmul.mubr.msk.bf16.vlgmr.msra.gmra.mrb[64].mxu0 %vm4710_vm9, %v15017_v45 }
 0x3a1   :  { %5084 = vmatpush1.bf16.msra.mxu1 %v10978_v8  ;;  %5207 = vmatpush1.bf16.msra.mxu0 %v10984_v24  ;;  %v4241_v8 = vrot.slane %v15224_v28, %v15243_v43  ;;  %v15293_v24 = vsub.s32 7, %v17973_v0 }
 0x3a2   :  { %5085 = vmatprep.subr.bf16.mxu1 %v11011_v33  ;;  %5208 = vmatprep.subr.bf16.mxu0 %v11017_v57 }
 0x3a3   :  { %5115 = vmatprep.mubr.bf16.mxu1 %v12972_v1  ;;  %5238 = vmatprep.mubr.bf16.mxu0 %v12972_v1 }
 0x3a5   :  { %5086 = vmatpush1.bf16.msra.mxu1 %v11010_v2  ;;  %5209 = vmatpush1.bf16.msra.mxu0 %v11016_v18 }
 0x3a6   :  { %5165 = vmatprep.subr.bf16.mxu1 %v10983_v29  ;;  %5288 = vmatprep.subr.bf16.mxu0 %v10989_v5  ;;  %v15314_v29 = vld [vmem:[%s17859_s8 + $0x10] sm:$0xff]  ;;  %v4269_v5 = vrot.slane %v15262_v40, %v15237_v47 }
 0x3a8   :  { %11033 = vmatmul.mubr.msk.bf16.vlgmr.msra.gmra.mrb[52].mxu1 %vm4710_vm9, %v15017_v45  ;;  %11036 = vmatmul.mubr.msk.bf16.vlgmr.msra.gmra.mrb[68].mxu0 %vm4710_vm9, %v15017_v45 }
 0x3a9   :  { %5166 = vmatpush1.bf16.msra.mxu1 %v10982_v34  ;;  %5289 = vmatpush1.bf16.msra.mxu0 %v10988_v58  ;;  %v4281_v58 = vrot.slane %v15262_v40, %v15219_v3 }
 0x3aa   :  { %5167 = vmatprep.subr.bf16.mxu1 %v11015_v39  ;;  %5290 = vmatprep.subr.bf16.mxu0 %v11021_v20  ;;  %v4261_v39 = vrot.slane %v15224_v28, %v15293_v24 }
 0x3ab   :  { %5197 = vmatprep.mubr.bf16.mxu1 %v12972_v1  ;;  %5320 = vmatprep.mubr.bf16.mxu0 %v12972_v1 }
 0x3ad   :  { %5168 = vmatpush1.bf16.msra.mxu1 %v11014_v10  ;;  %5291 = vmatpush1.bf16.msra.mxu0 %v11020_v53 }
 0x3ae   :  { %5247 = vmatprep.subr.bf16.mxu1 %v10987_v26 }
 0x3b0   :  { %11035 = vmatmul.mubr.msk.bf16.vlgmr.msra.gmra.mrb[56].mxu1 %vm4710_vm9, %v15017_v45  ;;  %11038 = vmatmul.mubr.msk.bf16.vlgmr.msra.gmra.mrb[72].mxu0 %vm4710_vm9, %v15017_v45 }
 0x3b1   :  { %5248 = vmatpush1.bf16.msra.mxu1 %v10986_v4  ;;  %5279 = vmatprep.mubr.bf16.mxu1 %v12972_v1 }
 0x3b2   :  { %5249 = vmatprep.subr.bf16.mxu1 %v11019_v61 }
 0x3b5   :  { %5250 = vmatpush1.bf16.msra.mxu1 %v11018_v30 }
 0x3b6   :  { %5329 = vmatprep.subr.bf16.mxu1 %v10991_v6 }
 0x3b8   :  { %11037 = vmatmul.mubr.msk.bf16.vlgmr.msra.gmra.mrb[60].mxu1 %vm4710_vm9, %v15017_v45 }
 0x3b9   :  { %5330 = vmatpush1.bf16.msra.mxu1 %v10990_v52  ;;  %5361 = vmatprep.mubr.bf16.mxu1 %v12972_v1  ;;  %v15229_v1 = vld [vmem:[%s17860_s9] sm:$0xff] }
 0x3ba   :  { %5331 = vmatprep.subr.bf16.mxu1 %v11023_v44 }
 0x3bd   :  { %5332 = vmatpush1.bf16.msra.mxu1 %v11022_v63 }
 0x3c0   :  { %11039 = vmatmul.mubr.msk.bf16.vlgmr.msra.gmra.mrb[64].mxu1 %vm4710_vm9, %v15017_v45  ;;  %v15234_v45 = vld [vmem:[%s17861_s10] sm:$0xff] }
 0x453   :  { %v4748_v9 = vpop.f32.mrb[32].mxu1  ;;  %v4830_v34 = vpop.f32.mrb[48].mxu0 }
 0x454   :  { %v15332_v36 = vadd.f32 %v4748_v9, %v4233_v51  ;;  %v15334_v10 = vadd.f32 %v4830_v34, %v4249_v59  ;;  %v4750_v53 = vpop.f32.mrb[33].mxu1  ;;  %v4832_v26 = vpop.f32.mrb[49].mxu0 }
 0x455   :  { %v15340_v4 = vadd.f32 %v4750_v53, %v4237_v14  ;;  %v15342_v61 = vadd.f32 %v4832_v26, %v4253_v32  ;;  %v4752_v17 = vpop.f32.mrb[34].mxu1  ;;  %v4834_v46 = vpop.f32.mrb[50].mxu0 }
 0x456   :  { %v5370_v7 = vsel %vm153_vm1, %v15332_v36, 0.0  ;;  %v5398_v19 = vsel %vm153_vm1, %v15334_v10, 0.0  ;;  %v4753_v52 = vpop.f32.mrb[35].mxu1  ;;  %v4835_v44 = vpop.f32.mrb[51].mxu0 }
 0x457   :  { %v5371_v59 = vrot.slane %v5370_v7, 4  ;;  %v5399_v14 = vrot.slane %v5398_v19, 4  ;;  %v5377_v32 = vsel %vm153_vm1, %v15340_v4, 0.0  ;;  %v5405_v9 = vsel %vm153_vm1, %v15342_v61, 0.0 }
 0x458   :  { %v5378_v34 = vrot.slane %v5377_v32, 4  ;;  %v5406_v53 = vrot.slane %v5405_v9, 4 }
 0x459   :  { %v5372_v46 = vadd.f32 %v5371_v59, %v5370_v7  ;;  %v5400_v52 = vadd.f32 %v5399_v14, %v5398_v19 }
 0x45a   :  { %v5379_v30 = vadd.f32 %v5378_v34, %v5377_v32  ;;  %v5407_v62 = vadd.f32 %v5406_v53, %v5405_v9 }
 0x45b   :  { %v5373_v26 = vrot.slane %v5372_v46, 2  ;;  %v5401_v2 = vrot.slane %v5400_v52, 2  ;;  %v4789_v49 = vpop.f32.mrb[36].mxu1  ;;  %v4912_v57 = vpop.f32.mrb[52].mxu0 }
 0x45c   :  { %v5380_v59 = vrot.slane %v5379_v30, 2  ;;  %v5408_v14 = vrot.slane %v5407_v62, 2  ;;  %v15379_v32 = vadd.f32 %v4789_v49, %v4241_v8  ;;  %v15381_v9 = vadd.f32 %v4912_v57, %v4265_v31  ;;  %v4791_v34 = vpop.f32.mrb[37].mxu1  ;;  %v4914_v53 = vpop.f32.mrb[53].mxu0 }
 0x45d   :  { %v5374_v44 = vadd.f32 %v5373_v26, %v5372_v46  ;;  %v5402_v18 = vadd.f32 %v5401_v2, %v5400_v52  ;;  %v15383_v60 = vadd.f32 %v4791_v34, %v4245_v55  ;;  %v15385_v63 = vadd.f32 %v4914_v53, %v4269_v5  ;;  %v4793_v7 = vpop.f32.mrb[38].mxu1  ;;  %v4916_v17 = vpop.f32.mrb[54].mxu0 }
 0x45e   :  { %v5381_v19 = vadd.f32 %v5380_v59, %v5379_v30  ;;  %v5409_v51 = vadd.f32 %v5408_v14, %v5407_v62  ;;  %v5384_v56 = vsel %vm153_vm1, %v15379_v32, 0.0  ;;  %v5426_v8 = vsel %vm153_vm1, %v15381_v9, 0.0  ;;  %v4794_v57 = vpop.f32.mrb[39].mxu1  ;;  %v4917_v31 = vpop.f32.mrb[55].mxu0 }
 0x45f   :  { %v5375_v49 = vrot.slane %v5374_v44, 1  ;;  %v5403_v33 = vrot.slane %v5402_v18, 1  ;;  %v5385_v26 = vrot.slane %v5384_v56, 4  ;;  %v5427_v2 = vrot.slane %v5426_v8, 4 }
 0x460   :  { %v5382_v55 = vrot.slane %v5381_v19, 1  ;;  %v5410_v46 = vrot.slane %v5409_v51, 1  ;;  %v5391_v5 = vsel %vm153_vm1, %v15383_v60, 0.0  ;;  %v5433_v62 = vsel %vm153_vm1, %v15385_v63, 0.0 }
 0x461   :  { %v5376_v30 = vadd.f32 %v5375_v49, %v5374_v44  ;;  %v5404_v17 = vadd.f32 %v5403_v33, %v5402_v18  ;;  %v5386_v52 = vadd.f32 %v5385_v26, %v5384_v56  ;;  %v5428_v7 = vadd.f32 %v5427_v2, %v5426_v8 }
 0x462   :  { %v5383_v59 = vadd.f32 %v5382_v55, %v5381_v19  ;;  %v5411_v14 = vadd.f32 %v5410_v46, %v5409_v51  ;;  %v5392_v34 = vrot.slane %v5391_v5, 4  ;;  %v5434_v53 = vrot.slane %v5433_v62, 4 }
 0x463   :  { %v5594_v57 = vmul.f32 0.5, %v5376_v30  ;;  %v5598_v31 = vmul.f32 0.5, %v5404_v17  ;;  %v5387_v6 = vrot.slane %v5386_v52, 2  ;;  %v5429_v23 = vrot.slane %v5428_v7, 2  ;;  %v15395_v38 = vpop.f32.mrb[40].mxu1  ;;  %v15397_v27 = vpop.f32.mrb[56].mxu0 }
 0x464   :  { %v5595_v54 = vmul.f32 0.5, %v5383_v59  ;;  %v5599_v11 = vmul.f32 0.5, %v5411_v14  ;;  %v5393_v21 = vadd.f32 %v5392_v34, %v5391_v5  ;;  %v5435_v13 = vadd.f32 %v5434_v53, %v5433_v62  ;;  %v15399_v44 = vpop.f32.mrb[41].mxu1  ;;  %v15401_v33 = vpop.f32.mrb[57].mxu0 }
 0x465   :  { %v15404_v56 = vsub.f32 %v15332_v36, %v5594_v57  ;;  %v15407_v18 = vsub.f32 %v15334_v10, %v5598_v31  ;;  %v5388_v51 = vadd.f32 %v5387_v6, %v5386_v52  ;;  %v5430_v19 = vadd.f32 %v5429_v23, %v5428_v7  ;;  %v4875_v8 = vpop.f32.mrb[42].mxu1  ;;  %v4998_v49 = vpop.f32.mrb[58].mxu0 }
 0x466   :  { %v15410_v26 = vsub.f32 %v15340_v4, %v5595_v54  ;;  %v15413_v2 = vsub.f32 %v15342_v61, %v5599_v11  ;;  %v5394_v55 = vrot.slane %v5393_v21, 2  ;;  %v5436_v46 = vrot.slane %v5435_v13, 2  ;;  %v4876_v5 = vpop.f32.mrb[43].mxu1  ;;  %v4999_v62 = vpop.f32.mrb[59].mxu0 }
 0x467   :  { %v5658_v36 = vmul.f32 %v15404_v56, %v15404_v56  ;;  %v5662_v10 = vmul.f32 %v15407_v18, %v15407_v18  ;;  %v5389_v6 = vrot.slane %v5388_v51, 1  ;;  %v5431_v23 = vrot.slane %v5430_v19, 1 }
 0x468   :  { %v5659_v30 = vmul.f32 %v15410_v26, %v15410_v26  ;;  %v5663_v54 = vmul.f32 %v15413_v2, %v15413_v2  ;;  %v5395_v11 = vadd.f32 %v5394_v55, %v5393_v21  ;;  %v5437_v4 = vadd.f32 %v5436_v46, %v5435_v13 }
 0x469   :  { %v5690_v61 = vsel %vm153_vm1, %v5658_v36, 0.0  ;;  %v5718_v17 = vsel %vm153_vm1, %v5662_v10, 0.0  ;;  %v5390_v52 = vadd.f32 %v5389_v6, %v5388_v51  ;;  %v5432_v7 = vadd.f32 %v5431_v23, %v5430_v19 }
 0x46a   :  { %v5691_v59 = vrot.slane %v5690_v61, 4  ;;  %v5719_v14 = vrot.slane %v5718_v17, 4  ;;  %v5697_v34 = vsel %vm153_vm1, %v5659_v30, 0.0  ;;  %v5725_v53 = vsel %vm153_vm1, %v5663_v54, 0.0 }
 0x46b   :  { %v5698_v57 = vrot.slane %v5697_v34, 4  ;;  %v5726_v31 = vrot.slane %v5725_v53, 4  ;;  %v5596_v8 = vmul.f32 0.5, %v5390_v52  ;;  %v5602_v49 = vmul.f32 0.5, %v5432_v7  ;;  %v15427_v5 = vpop.f32.mrb[44].mxu1  ;;  %v15429_v21 = vpop.f32.mrb[60].mxu0 }
 0x46c   :  { %v5692_v13 = vadd.f32 %v5691_v59, %v5690_v61  ;;  %v5720_v55 = vadd.f32 %v5719_v14, %v5718_v17  ;;  %v5396_v46 = vrot.slane %v5395_v11, 1  ;;  %v5438_v62 = vrot.slane %v5437_v4, 1  ;;  %v15431_v51 = vpop.f32.mrb[45].mxu1  ;;  %v15433_v19 = vpop.f32.mrb[61].mxu0 }
 0x46d   :  { %v5699_v36 = vadd.f32 %v5698_v57, %v5697_v34  ;;  %v5727_v10 = vadd.f32 %v5726_v31, %v5725_v53  ;;  %v15436_v6 = vsub.f32 %v15379_v32, %v5596_v8  ;;  %v15439_v23 = vsub.f32 %v15381_v9, %v5602_v49  ;;  %v4957_v30 = vpop.f32.mrb[46].mxu1  ;;  %v5080_v54 = vpop.f32.mrb[62].mxu0 }
 0x46e   :  { %v5693_v52 = vrot.slane %v5692_v13, 2  ;;  %v5721_v7 = vrot.slane %v5720_v55, 2  ;;  %v5397_v61 = vadd.f32 %v5396_v46, %v5395_v11  ;;  %v5439_v17 = vadd.f32 %v5438_v62, %v5437_v4  ;;  %v4958_v59 = vpop.f32.mrb[47].mxu1  ;;  %v5081_v14 = vpop.f32.mrb[63].mxu0 }
 0x46f   :  { %v5700_v50 = vrot.slane %v5699_v36, 2  ;;  %v5728_v37 = vrot.slane %v5727_v10, 2  ;;  %v5660_v34 = vmul.f32 %v15436_v6, %v15436_v6  ;;  %v5666_v32 = vmul.f32 %v15439_v23, %v15439_v23 }
 0x470   :  { %v5694_v53 = vadd.f32 %v5693_v52, %v5692_v13  ;;  %v5722_v57 = vadd.f32 %v5721_v7, %v5720_v55  ;;  %v5597_v9 = vmul.f32 0.5, %v5397_v61  ;;  %v5603_v31 = vmul.f32 0.5, %v5439_v17 }
 0x471   :  { %v5701_v8 = vadd.f32 %v5700_v50, %v5699_v36  ;;  %v5729_v49 = vadd.f32 %v5728_v37, %v5727_v10  ;;  %v5704_v30 = vsel %vm153_vm1, %v5660_v34, 0.0  ;;  %v5746_v11 = vsel %vm153_vm1, %v5666_v32, 0.0 }
 0x472   :  { %v5695_v4 = vrot.slane %v5694_v53, 1  ;;  %v5723_v46 = vrot.slane %v5722_v57, 1  ;;  %v5705_v62 = vrot.slane %v5704_v30, 4  ;;  %v5747_v54 = vrot.slane %v5746_v11, 4 }
 0x473   :  { %v5702_v59 = vrot.slane %v5701_v8, 1  ;;  %v5730_v14 = vrot.slane %v5729_v49, 1  ;;  %v15448_v12 = vsub.f32 %v15383_v60, %v5597_v9  ;;  %v15451_v13 = vsub.f32 %v15385_v63, %v5603_v31  ;;  %v15453_v55 = vpop.f32.mrb[48].mxu1  ;;  %v15455_v50 = vpop.f32.mrb[64].mxu0 }
 0x474   :  { %v5696_v37 = vadd.f32 %v5695_v4, %v5694_v53  ;;  %v5724_v36 = vadd.f32 %v5723_v46, %v5722_v57  ;;  %v5706_v10 = vadd.f32 %v5705_v62, %v5704_v30  ;;  %v5748_v52 = vadd.f32 %v5747_v54, %v5746_v11  ;;  %v15457_v7 = vpop.f32.mrb[49].mxu1  ;;  %v15459_v61 = vpop.f32.mrb[65].mxu0 }
 0x475   :  { %v5703_v17 = vadd.f32 %v5702_v59, %v5701_v8  ;;  %v5661_v60 = vmul.f32 %v15448_v12, %v15448_v12  ;;  %v5667_v63 = vmul.f32 %v15451_v13, %v15451_v13  ;;  %v5039_v32 = vpop.f32.mrb[50].mxu1  ;;  %v5162_v9 = vpop.f32.mrb[66].mxu0  ;;  %v15476_v59 = vld [vmem:[%s17859_s8 + $0x18] sm:$0xff] }
 0x476   :  { %v5914_v53 = vmul.f32 0.5, %v5696_v37  ;;  %v5918_v57 = vmul.f32 0.5, %v5724_v36  ;;  %v5707_v31 = vrot.slane %v5706_v10, 2  ;;  %v5749_v30 = vrot.slane %v5748_v52, 2  ;;  %v5040_v11 = vpop.f32.mrb[51].mxu1  ;;  %v5163_v4 = vpop.f32.mrb[67].mxu0 }
 0x477   :  { %v5711_v46 = vsel %vm153_vm1, %v5661_v60, 0.0  ;;  %v5753_v8 = vsel %vm153_vm1, %v5667_v63, 0.0  ;;  %17974 = vst [vmem:[#allocation10_spill] sm:$0xff] %v15476_v59  ;;  %v5915_v36 = vmul.f32 0.5, %v5703_v17  ;;  %v5731_v32 = vadd.f32 %v5730_v14, %v5729_v49  ;;  %v15481_v60 = vld [vmem:[%s17860_s9 + $0x10] sm:$0xff] }
 0x478   :  { %v5946_v37 = vadd.f32 1e-05, %v5914_v53  ;;  %v5708_v9 = vadd.f32 %v5707_v31, %v5706_v10  ;;  %v5750_v63 = vadd.f32 %v5749_v30, %v5748_v52  ;;  %v5712_v11 = vrot.slane %v5711_v46, 4 }
 0x479   :  { %v5754_v4 = vrot.slane %v5753_v8, 4  ;;  %v5950_v62 = vadd.f32 1e-05, %v5918_v57  ;;  %v15489_v17 = vadd.f32 %v15395_v38, %v4257_v42  ;;  %v15497_v52 = vadd.f32 %v15397_v27, %v4281_v58  ;;  %v15504_v57 = vld [vmem:[%s17861_s10 + $0x10] sm:$0xff] }
 0x47a   :  { %v5709_v34 = vrot.slane %v5708_v9, 1  ;;  %v5713_v14 = vadd.f32 %v5712_v11, %v5711_v46  ;;  %12899 = vrsqrt.f32 %v5946_v37  ;;  %v5947_v31 = vadd.f32 1e-05, %v5915_v36 }
 0x47b   :  { %v5755_v10 = vadd.f32 %v5754_v4, %v5753_v8  ;;  %v15506_v38 = vpop.f32.mrb[52].mxu1  ;;  %v15508_v42 = vpop.f32.mrb[68].mxu0  ;;  %v5919_v30 = vmul.f32 0.5, %v5731_v32  ;;  %v5412_v46 = vsel %vm153_vm1, %v15489_v17, 0.0  ;;  %v5751_v8 = vrot.slane %v5750_v63, 1 }
 0x47c   :  { %17975 = vst [vmem:[#allocation11_spill] sm:$0xff] %v15506_v38  ;;  %17976 = vst [vmem:[#allocation12_spill] sm:$0xff] %v15508_v42  ;;  %v15512_v27 = vpop.f32.mrb[53].mxu1  ;;  %v15514_v58 = vpop.f32.mrb[69].mxu0  ;;  %v5714_v11 = vrot.slane %v5713_v14, 2  ;;  %v5413_v53 = vrot.slane %v5412_v46, 4  ;;  %12901 = vrsqrt.f32 %v5950_v62  ;;  %v5710_v35 = vadd.f32 %v5709_v34, %v5708_v9 }
 0x47d   :  { %17977 = vst [vmem:[#allocation13_spill] sm:$0xff] %v15512_v27  ;;  %17978 = vst [vmem:[#allocation6_spill] sm:$0xff] %v15514_v58  ;;  %v5756_v4 = vrot.slane %v5755_v10, 2  ;;  %v5121_v49 = vpop.f32.mrb[54].mxu1  ;;  %v5244_v54 = vpop.f32.mrb[70].mxu0  ;;  %v5454_v37 = vsel %vm153_vm1, %v15497_v52, 0.0  ;;  %v15522_v36 = vadd.f32 %v15399_v44, %v4261_v39  ;;  %v17979_v34 = vrot.slane %v15262_v40, %v15240_v22 }
 0x47e   :  { %v5122_v32 = vpop.f32.mrb[55].mxu1  ;;  %v5245_v20 = vpop.f32.mrb[71].mxu0  ;;  %v5715_v0 = vadd.f32 %v5714_v11, %v5713_v14  ;;  %v5414_v27 = vadd.f32 %v5413_v53, %v5412_v46  ;;  %v5455_v42 = vrot.slane %v5454_v37, 4  ;;  %v5951_v38 = vadd.f32 1e-05, %v5919_v30 }
 0x47f   :  { %v5757_v58 = vadd.f32 %v5756_v4, %v5755_v10  ;;  %v5419_v62 = vsel %vm153_vm1, %v15522_v36, 0.0  ;;  %v15530_v54 = vadd.f32 %v15401_v33, %v17979_v34  ;;  %12903 = vrsqrt.f32 %v5947_v31 }
 0x480   :  { %v5752_v39 = vadd.f32 %v5751_v8, %v5750_v63  ;;  %v5415_v20 = vrot.slane %v5414_v27, 2  ;;  %v5456_v44 = vadd.f32 %v5455_v42, %v5454_v37  ;;  %v5716_v9 = vrot.slane %v5715_v0, 1 }
 0x481   :  { %v5420_v49 = vrot.slane %v5419_v62, 4  ;;  %v5461_v14 = vsel %vm153_vm1, %v15530_v54, 0.0  ;;  %v5916_v53 = vmul.f32 0.5, %v5710_v35  ;;  %v5758_v30 = vrot.slane %v5757_v58, 1 }
 0x482   :  { %v5416_v46 = vadd.f32 %v5415_v20, %v5414_v27  ;;  %12905 = vrsqrt.f32 %v5951_v38  ;;  %v5457_v63 = vrot.slane %v5456_v44, 2  ;;  %v5462_v8 = vrot.slane %v5461_v14, 4 }
 0x483   :  { %v15540_v11 = vpop.f32.mrb[56].mxu1  ;;  %v15542_v31 = vpop.f32.mrb[72].mxu0  ;;  %v5421_v42 = vadd.f32 %v5420_v49, %v5419_v62  ;;  %v5922_v32 = vmul.f32 0.5, %v5752_v39  ;;  %v5717_v10 = vadd.f32 %v5716_v9, %v5715_v0  ;;  %v5759_v39 = vadd.f32 %v5758_v30, %v5757_v58 }
 0x484   :  { %17980 = vst [vmem:[#allocation7_spill] sm:$0xff] %v15540_v11  ;;  %17981 = vst [vmem:[#allocation8_spill] sm:$0xff] %v15542_v31  ;;  %v15544_v4 = vpop.f32.mrb[57].mxu1  ;;  %v15546_v37 = vpop.f32.mrb[73].mxu0  ;;  %v5417_v34 = vrot.slane %v5416_v46, 1  ;;  %v5458_v38 = vadd.f32 %v5457_v63, %v5456_v44  ;;  %v5463_v59 = vadd.f32 %v5462_v8, %v5461_v14  ;;  %v17984_v0 = vrot.slane %v15262_v40, %v15243_v43 }
 0x485   :  { %17982 = vst [vmem:[#allocation9_spill] sm:$0xff] %v15544_v4  ;;  %17983 = vst [vmem:[#allocation15_spill] sm:$0xff] %v15546_v37  ;;  %v5203_v20 = vpop.f32.mrb[58].mxu1  ;;  %v5326_v33 = vpop.f32.mrb[74].mxu0  ;;  %v5422_v31 = vrot.slane %v5421_v42, 2  ;;  %v5917_v63 = vmul.f32 0.5, %v5717_v10 }
 0x486   :  { %v12900_v28 = vpop.eup %12899  ;;  %v5204_v49 = vpop.f32.mrb[59].mxu1  ;;  %v5948_v37 = vadd.f32 1e-05, %v5916_v53  ;;  %v5418_v20 = vadd.f32 %v5417_v34, %v5416_v46  ;;  %v5459_v33 = vrot.slane %v5458_v38, 1  ;;  %v15562_v44 = vadd.f32 %v15427_v5, %v17984_v0 }
 0x487   :  { %v5327_v4 = vpop.f32.mrb[75].mxu0  ;;  %v12902_v27 = vpop.eup %12901  ;;  %v6010_v9 = vmul.f32 %v12900_v28, %v15404_v56  ;;  %v5954_v53 = vadd.f32 1e-05, %v5922_v32  ;;  %v5423_v58 = vadd.f32 %v5422_v31, %v5421_v42  ;;  %v5923_v34 = vmul.f32 0.5, %v5759_v39 }
 0x488   :  { %v5600_v4 = vmul.f32 0.5, %v5418_v20  ;;  %12907 = vrsqrt.f32 %v5948_v37  ;;  %v5460_v5 = vadd.f32 %v5459_v33, %v5458_v38  ;;  %v6014_v56 = vmul.f32 %v12902_v27, %v15407_v18 }
 0x489   :  { %v12904_v8 = vpop.eup %12903  ;;  %v5424_v49 = vrot.slane %v5423_v58, 1  ;;  %v5464_v10 = vrot.slane %v5463_v59, 2  ;;  %v5440_v31 = vsel %vm153_vm1, %v15562_v44, 0.0  ;;  %v17986_v32 = vrot.slane %v15229_v1, %v15216_v16 }
 0x48a   :  { %v15575_v28 = vsub.f32 %v15489_v17, %v5600_v4  ;;  %12909 = vrsqrt.f32 %v5954_v53  ;;  %v5606_v38 = vmul.f32 0.5, %v5460_v5  ;;  %v6011_v18 = vmul.f32 %v12904_v8, %v15410_v26 }
 0x48b   :  { %v15571_v0 = vpop.f32.mrb[60].mxu1  ;;  %v6210_v37 = vmul.f32 %v17986_v32, %v6010_v9  ;;  %v5425_v39 = vadd.f32 %v5424_v49, %v5423_v58  ;;  %v5949_v27 = vadd.f32 1e-05, %v5917_v63  ;;  %v5465_v4 = vadd.f32 %v5464_v10, %v5463_v59 }
 0x48c   :  { %v15579_v42 = vpop.f32.mrb[61].mxu1  ;;  %v12906_v33 = vpop.eup %12905  ;;  %v5664_v17 = vmul.f32 %v15575_v28, %v15575_v28  ;;  %v5955_v46 = vadd.f32 1e-05, %v5923_v34  ;;  %v15588_v35 = vsub.f32 %v15497_v52, %v5606_v38  ;;  %v5441_v62 = vrot.slane %v5440_v31, 4 }
 0x48d   :  { %17985 = vst [vmem:[#allocation17_spill] sm:$0xff] %v15579_v42  ;;  %v5285_v20 = vpop.f32.mrb[62].mxu1  ;;  %v5601_v11 = vmul.f32 0.5, %v5425_v39  ;;  %v17987_v9 = vrot.slane %v15229_v1, %v15219_v3  ;;  %v5466_v5 = vrot.slane %v5465_v4, 1  ;;  %v17988_v26 = vrot.slane %v15314_v29, %v15216_v16 }
 0x48e   :  { %v5286_v30 = vpop.f32.mrb[63].mxu1  ;;  %v5732_v58 = vsel %vm153_vm1, %v5664_v17, 0.0  ;;  %v6015_v59 = vmul.f32 %v12906_v33, %v15413_v2  ;;  %v5670_v52 = vmul.f32 %v15588_v35, %v15588_v35  ;;  %v17989_v34 = vrot.slane %v15234_v45, %v15216_v16 }
 0x48f   :  { %v6214_v53 = vmul.f32 %v17987_v9, %v6014_v56  ;;  %v15598_v63 = vadd.f32 %v15429_v21, %v17988_v26  ;;  %v5733_v30 = vrot.slane %v5732_v58, 4  ;;  %v15604_v8 = vsub.f32 %v15522_v36, %v5601_v11 }
 0x490   :  { %v15609_v49 = vadd.f32 %v17989_v34, %v6210_v37  ;;  %v17991_v56 = vrot.slane %v15229_v1, %v15237_v47  ;;  %v5467_v21 = vadd.f32 %v5466_v5, %v5465_v4  ;;  %v5442_v32 = vadd.f32 %v5441_v62, %v5440_v31 }
 0x491   :  { %12911 = vrsqrt.f32 %v5949_v27  ;;  %v5734_v2 = vadd.f32 %v5733_v30, %v5732_v58  ;;  %v5774_v38 = vsel %vm153_vm1, %v5670_v52, 0.0  ;;  %v5665_v39 = vmul.f32 %v15604_v8, %v15604_v8 }
 0x492   :  { %17990 = vst [vmem:[#allocation19_spill] sm:$0xff] %v15609_v49  ;;  %v6211_v10 = vmul.f32 %v17991_v56, %v6011_v18  ;;  %v17993_v11 = vrot.slane %v15234_v45, %v15219_v3  ;;  %v5775_v20 = vrot.slane %v5774_v38, 4  ;;  %v5607_v33 = vmul.f32 0.5, %v5467_v21  ;;  %v12908_v62 = vpop.eup %12907 }
 0x493   :  { %v15617_v36 = vpop.f32.mrb[64].mxu1  ;;  %v5482_v18 = vsel %vm153_vm1, %v15598_v63, 0.0  ;;  %v17995_v31 = vrot.slane %v15229_v1, %v15240_v22  ;;  %v5735_v17 = vrot.slane %v5734_v2, 2  ;;  %v5739_v4 = vsel %vm153_vm1, %v5665_v39, 0.0 }
 0x494   :  { %17992 = vst [vmem:[#allocation22_spill] sm:$0xff] %v15617_v36  ;;  %v15622_v37 = vadd.f32 %v17993_v11, %v6214_v53  ;;  %v5443_v9 = vrot.slane %v5442_v32, 2  ;;  %12913 = vrsqrt.f32 %v5955_v46  ;;  %v5776_v58 = vadd.f32 %v5775_v20, %v5774_v38  ;;  %v12910_v26 = vpop.eup %12909 }
 0x495   :  { %v6215_v27 = vmul.f32 %v17995_v31, %v6015_v59  ;;  %v5740_v5 = vrot.slane %v5739_v4, 4  ;;  %v15631_v53 = vsub.f32 %v15530_v54, %v5607_v33  ;;  %v5736_v52 = vadd.f32 %v5735_v17, %v5734_v2 }
 0x496   :  { %17994 = vst [vmem:[#allocation26_spill] sm:$0xff] %v15622_v37  ;;  %v5444_v34 = vadd.f32 %v5443_v9, %v5442_v32  ;;  %v5483_v56 = vrot.slane %v5482_v18, 4  ;;  %v17996_v21 = vrot.slane %v15234_v45, %v15237_v47  ;;  %v5777_v11 = vrot.slane %v5776_v58, 2 }
 0x497   :  { %v5741_v39 = vadd.f32 %v5740_v5, %v5739_v4  ;;  %v5671_v46 = vmul.f32 %v15631_v53, %v15631_v53  ;;  %v5737_v54 = vrot.slane %v5736_v52, 1  ;;  %v17997_v2 = vrot.slane %v15234_v45, %v15240_v22 }
 0x498   :  { %v15637_v59 = vadd.f32 %v17996_v21, %v6211_v10  ;;  %v5445_v20 = vrot.slane %v5444_v34, 1  ;;  %v5484_v33 = vadd.f32 %v5483_v56, %v5482_v18  ;;  %v5778_v31 = vadd.f32 %v5777_v11, %v5776_v58 }
 0x499   :  { %v15645_v32 = vadd.f32 %v17997_v2, %v6215_v27  ;;  %v5742_v17 = vrot.slane %v5741_v39, 2  ;;  %v5781_v10 = vsel %vm153_vm1, %v5671_v46, 0.0  ;;  %v6012_v9 = vmul.f32 %v12908_v62, %v15436_v6 }
 0x49a   :  { %v5738_v4 = vadd.f32 %v5737_v54, %v5736_v52  ;;  %v5782_v5 = vrot.slane %v5781_v10, 4  ;;  %v5446_v21 = vadd.f32 %v5445_v20, %v5444_v34  ;;  %v5779_v30 = vrot.slane %v5778_v31, 1  ;;  %v15664_v54 = vpop.f32.mrb[65].mxu1 }
 0x49b   :  { %v5743_v14 = vadd.f32 %v5742_v17, %v5741_v39  ;;  %v5485_v38 = vrot.slane %v5484_v33, 2  ;;  %v17998_v18 = vrot.slane %v15262_v40, %v15270_v48  ;;  %v12912_v27 = vpop.eup %12911  ;;  %v6018_v58 = vmul.f32 %v12910_v26, %v15439_v23  ;;  %18000 = vst [vmem:[#allocation24_spill] sm:$0xff] %v15664_v54 }
 0x49c   :  { %v5783_v11 = vadd.f32 %v5782_v5, %v5781_v10  ;;  %v5604_v2 = vmul.f32 0.5, %v5446_v21  ;;  %v17999_v6 = vrot.slane %v15314_v29, %v15237_v47  ;;  %v5920_v52 = vmul.f32 0.5, %v5738_v4 }
 0x49d   :  { %v15653_v56 = vadd.f32 %v15431_v51, %v17998_v18  ;;  %v5744_v34 = vrot.slane %v5743_v14, 1  ;;  %v5486_v39 = vadd.f32 %v5485_v38, %v5484_v33  ;;  %v18001_v51 = vrot.slane %v15229_v1, %v15243_v43 }
 0x49e   :  { %v15660_v62 = vadd.f32 %v15433_v19, %v17999_v6  ;;  %v5784_v26 = vrot.slane %v5783_v11, 2  ;;  %v15672_v20 = vsub.f32 %v15562_v44, %v5604_v2  ;;  %v5367_v19 = vpop.f32.mrb[66].mxu1  ;;  %v12914_v10 = vpop.eup %12913  ;;  %v5780_v4 = vadd.f32 %v5779_v30, %v5778_v31 }
 0x49f   :  { %v5447_v46 = vsel %vm153_vm1, %v15653_v56, 0.0  ;;  %v15669_v23 = vmul.f32 %v18001_v51, %v6012_v9  ;;  %v5745_v5 = vadd.f32 %v5744_v34, %v5743_v14  ;;  %v5487_v38 = vrot.slane %v5486_v39, 1  ;;  %v5368_v21 = vpop.f32.mrb[67].mxu1 }
 0x4a0   :  { %v5448_v17 = vrot.slane %v5447_v46, 4  ;;  %v5489_v33 = vsel %vm153_vm1, %v15660_v62, 0.0  ;;  %v18002_v18 = vrot.slane %v15267_v15, %v15216_v16  ;;  %v5785_v9 = vadd.f32 %v5784_v26, %v5783_v11 }
 0x4a1   :  { %v5668_v44 = vmul.f32 %v15672_v20, %v15672_v20  ;;  %v6013_v51 = vmul.f32 %v12912_v27, %v15448_v12  ;;  %v5952_v19 = vadd.f32 1e-05, %v5920_v52  ;;  %v5488_v30 = vadd.f32 %v5487_v38, %v5486_v39 }
 0x4a2   :  { %v15679_v6 = vmul.f32 %v18002_v18, %v6018_v58  ;;  %v5449_v2 = vadd.f32 %v5448_v17, %v5447_v46  ;;  %v5490_v14 = vrot.slane %v5489_v33, 4  ;;  %v5786_v31 = vrot.slane %v5785_v9, 1 }
 0x4a3   :  { %v5760_v34 = vsel %vm153_vm1, %v5668_v44, 0.0  ;;  %v18003_v21 = vrot.slane %v15262_v40, %v15284_v25  ;;  %v5926_v11 = vmul.f32 0.5, %v5780_v4  ;;  %v5921_v26 = vmul.f32 0.5, %v5745_v5 }
 0x4a4   :  { %v5450_v37 = vrot.slane %v5449_v2, 2  ;;  %v5761_v18 = vrot.slane %v5760_v34, 4  ;;  %v5610_v49 = vmul.f32 0.5, %v5488_v30  ;;  %v5787_v46 = vadd.f32 %v5786_v31, %v5785_v9 }
 0x4a5   :  { %v15689_v58 = vadd.f32 %v15453_v55, %v18003_v21  ;;  %v5491_v12 = vadd.f32 %v5490_v14, %v5489_v33  ;;  %12915 = vrsqrt.f32 %v5952_v19  ;;  %v18004_v4 = vrot.slane %v15314_v29, %v15219_v3 }
 0x4a6   :  { %v5451_v17 = vadd.f32 %v5450_v37, %v5449_v2  ;;  %v5762_v52 = vadd.f32 %v5761_v18, %v5760_v34  ;;  %v15694_v39 = vsub.f32 %v15598_v63, %v5610_v49  ;;  %v5927_v44 = vmul.f32 0.5, %v5787_v46 }
 0x4a7   :  { %v5468_v27 = vsel %vm153_vm1, %v15689_v58, 0.0  ;;  %v5492_v55 = vrot.slane %v5491_v12, 2  ;;  %v15700_v5 = vadd.f32 %v15455_v50, %v18004_v4  ;;  %v5958_v37 = vadd.f32 1e-05, %v5926_v11 }
 0x4a8   :  { %v5469_v38 = vrot.slane %v5468_v27, 4  ;;  %v5452_v54 = vrot.slane %v5451_v17, 1  ;;  %v5763_v33 = vrot.slane %v5762_v52, 2  ;;  %v5674_v9 = vmul.f32 %v15694_v39, %v15694_v39 }
 0x4a9   :  { %v5953_v19 = vadd.f32 1e-05, %v5921_v26  ;;  %v5493_v63 = vadd.f32 %v5492_v55, %v5491_v12  ;;  %v5510_v49 = vsel %vm153_vm1, %v15700_v5, 0.0  ;;  %v5959_v18 = vadd.f32 1e-05, %v5927_v44 }
 0x4aa   :  { %v5470_v2 = vadd.f32 %v5469_v38, %v5468_v27  ;;  %v5453_v30 = vadd.f32 %v5452_v54, %v5451_v17  ;;  %v5764_v14 = vadd.f32 %v5763_v33, %v5762_v52  ;;  %v5802_v31 = vsel %vm153_vm1, %v5674_v9, 0.0 }
 0x4ab   :  { %v5511_v21 = vrot.slane %v5510_v49, 4  ;;  %v5803_v50 = vrot.slane %v5802_v31, 4  ;;  %v5494_v11 = vrot.slane %v5493_v63, 1  ;;  %12917 = vrsqrt.f32 %v5958_v37 }
 0x4ac   :  { %v5471_v34 = vrot.slane %v5470_v2, 2  ;;  %v5605_v46 = vmul.f32 0.5, %v5453_v30  ;;  %v5765_v4 = vrot.slane %v5764_v14, 1  ;;  %12919 = vrsqrt.f32 %v5953_v19 }
 0x4ad   :  { %v5512_v42 = vadd.f32 %v5511_v21, %v5510_v49  ;;  %v5804_v26 = vadd.f32 %v5803_v50, %v5802_v31  ;;  %v5495_v17 = vadd.f32 %v5494_v11, %v5493_v63  ;;  %v6019_v12 = vmul.f32 %v12914_v10, %v15451_v13 }
 0x4ae   :  { %v5472_v36 = vadd.f32 %v5471_v34, %v5470_v2  ;;  %v15708_v54 = vsub.f32 %v15653_v56, %v5605_v46  ;;  %v5766_v27 = vadd.f32 %v5765_v4, %v5764_v14  ;;  %12921 = vrsqrt.f32 %v5959_v18 }
 0x4af   :  { %v5513_v38 = vrot.slane %v5512_v42, 2  ;;  %v5805_v44 = vrot.slane %v5804_v26, 2  ;;  %v5611_v37 = vmul.f32 0.5, %v5495_v17  ;;  %v12916_v33 = vpop.eup %12915  ;;  %v18005_v9 = vrot.slane %v15234_v45, %v15243_v43 }
 0x4b0   :  { %v5473_v52 = vrot.slane %v5472_v36, 1  ;;  %v5669_v55 = vmul.f32 %v15708_v54, %v15708_v54  ;;  %v5924_v56 = vmul.f32 0.5, %v5766_v27  ;;  %v18006_v13 = vrot.slane %v15281_v41, %v15216_v16 }
 0x4b1   :  { %v15717_v2 = vadd.f32 %v18005_v9, %v15669_v23  ;;  %v5514_v30 = vadd.f32 %v5513_v38, %v5512_v42  ;;  %v18007_v63 = vrot.slane %v15229_v1, %v15270_v48  ;;  %v5806_v14 = vadd.f32 %v5805_v44, %v5804_v26 }
 0x4b2   :  { %v5474_v19 = vadd.f32 %v5473_v52, %v5472_v36  ;;  %v15723_v10 = vadd.f32 %v18006_v13, %v15679_v6  ;;  %v5767_v31 = vsel %vm153_vm1, %v5669_v55, 0.0  ;;  %v15732_v42 = vsub.f32 %v15660_v62, %v5611_v37 }
 0x4b3   :  { %v6213_v49 = vmul.f32 %v18007_v63, %v6013_v51  ;;  %v5768_v21 = vrot.slane %v5767_v31, 4  ;;  %v18008_v36 = vrot.slane %v15267_v15, %v15237_v47  ;;  %v5807_v18 = vrot.slane %v5806_v14, 1 }
 0x4b4   :  { %v5608_v50 = vmul.f32 0.5, %v5474_v19  ;;  %v18009_v51 = vrot.slane %v15262_v40, %v15293_v24  ;;  %v5956_v11 = vadd.f32 1e-05, %v5924_v56  ;;  %v5675_v26 = vmul.f32 %v15732_v42, %v15732_v42 }
 0x4b5   :  { %v6219_v6 = vmul.f32 %v18008_v36, %v6019_v12  ;;  %v5769_v4 = vadd.f32 %v5768_v21, %v5767_v31  ;;  %v5515_v17 = vrot.slane %v5514_v30, 1  ;;  %v18010_v12 = vrot.slane %v15234_v45, %v15270_v48 }
 0x4b6   :  { %v15741_v46 = vadd.f32 %v15457_v7, %v18009_v51  ;;  %v15753_v40 = vsub.f32 %v15689_v58, %v5608_v50  ;;  %v12918_v7 = vpop.eup %12917  ;;  %v5808_v38 = vadd.f32 %v5807_v18, %v5806_v14  ;;  %v5809_v55 = vsel %vm153_vm1, %v5675_v26, 0.0 }
 0x4b7   :  { %v15750_v52 = vadd.f32 %v18010_v12, %v6213_v49  ;;  %v5770_v44 = vrot.slane %v5769_v4, 2  ;;  %v5516_v37 = vadd.f32 %v5515_v17, %v5514_v30  ;;  %v12920_v9 = vpop.eup %12919  ;;  %v18011_v56 = vrot.slane %v15281_v41, %v15237_v47 }
 0x4b8   :  { %v6016_v13 = vmul.f32 %v12916_v33, %v15575_v28  ;;  %v5810_v63 = vrot.slane %v5809_v55, 4  ;;  %v5672_v49 = vmul.f32 %v15753_v40, %v15753_v40  ;;  %12923 = vrsqrt.f32 %v5956_v11  ;;  %v12922_v21 = vpop.eup %12921 }
 0x4b9   :  { %v15759_v19 = vadd.f32 %v18011_v56, %v6219_v6  ;;  %v5771_v58 = vadd.f32 %v5770_v44, %v5769_v4  ;;  %v5614_v31 = vmul.f32 0.5, %v5516_v37  ;;  %v5475_v14 = vsel %vm153_vm1, %v15741_v46, 0.0 }
 0x4ba   :  { %v6022_v30 = vmul.f32 %v12918_v7, %v15588_v35  ;;  %v5811_v36 = vadd.f32 %v5810_v63, %v5809_v55  ;;  %v5788_v18 = vsel %vm153_vm1, %v5672_v49, 0.0  ;;  %v5476_v6 = vrot.slane %v5475_v14, 4 }
 0x4bb   :  { %v6017_v50 = vmul.f32 %v12920_v9, %v15604_v8  ;;  %v5930_v28 = vmul.f32 0.5, %v5808_v38  ;;  %v5789_v33 = vrot.slane %v5788_v18, 4  ;;  %v15770_v51 = vsub.f32 %v15700_v5, %v5614_v31 }
 0x4bc   :  { %v5772_v4 = vrot.slane %v5771_v58, 1  ;;  %v5812_v26 = vrot.slane %v5811_v36, 2  ;;  %v5477_v17 = vadd.f32 %v5476_v6, %v5475_v14  ;;  %v18012_v12 = vrot.slane %v15229_v1, %v15284_v25 }
 0x4bd   :  { %v6023_v7 = vmul.f32 %v12922_v21, %v15631_v53  ;;  %v5790_v44 = vadd.f32 %v5789_v33, %v5788_v18  ;;  %v5678_v8 = vmul.f32 %v15770_v51, %v15770_v51  ;;  %v18013_v38 = vrot.slane %v15267_v15, %v15219_v3 }
 0x4be   :  { %v6216_v35 = vmul.f32 %v18012_v12, %v6016_v13  ;;  %v5813_v55 = vadd.f32 %v5812_v26, %v5811_v36  ;;  %v5478_v37 = vrot.slane %v5477_v17, 2  ;;  %v18014_v9 = vrot.slane %v15314_v29, %v15240_v22 }
 0x4bf   :  { %v6222_v5 = vmul.f32 %v18013_v38, %v6022_v30  ;;  %v18015_v53 = vrot.slane %v15229_v1, %v15293_v24  ;;  %v5962_v49 = vadd.f32 1e-05, %v5930_v28  ;;  %v5830_v31 = vsel %vm153_vm1, %v5678_v8, 0.0 }
 0x4c0   :  { %v15786_v56 = vadd.f32 %v15459_v61, %v18014_v9  ;;  %v5773_v14 = vadd.f32 %v5772_v4, %v5771_v58  ;;  %v5791_v21 = vrot.slane %v5790_v44, 2  ;;  %v5831_v30 = vrot.slane %v5830_v31, 4 }
 0x4c1   :  { %v6217_v63 = vmul.f32 %v18015_v53, %v6017_v50  ;;  %v5479_v36 = vadd.f32 %v5478_v37, %v5477_v17  ;;  %v18016_v18 = vrot.slane %v15234_v45, %v15284_v25  ;;  %v18017_v61 = vrot.slane %v15267_v15, %v15240_v22  ;;  %v18021_v37 = vld [vmem:[#allocation11_spill] sm:$0xff] }
 0x4c2   :  { %v5517_v50 = vsel %vm153_vm1, %v15786_v56, 0.0  ;;  %v18018_v58 = vrot.slane %v15281_v41, %v15219_v3  ;;  %v5814_v4 = vrot.slane %v5813_v55, 1  ;;  %v5832_v26 = vadd.f32 %v5831_v30, %v5830_v31  ;;  %v12924_v12 = vpop.eup %12923 }
 0x4c3   :  { %v15796_v6 = vadd.f32 %v18016_v18, %v6216_v35  ;;  %v6223_v33 = vmul.f32 %v18017_v61, %v6023_v7  ;;  %v5480_v17 = vrot.slane %v5479_v36, 1  ;;  %v18019_v35 = vrot.slane %v15234_v45, %v15293_v24 }
 0x4c4   :  { %v15808_v28 = vadd.f32 %v18018_v58, %v6222_v5  ;;  %12925 = vrsqrt.f32 %v5962_v49  ;;  %v5518_v7 = vrot.slane %v5517_v50, 4  ;;  %v18020_v38 = vrot.slane %v15314_v29, %v15243_v43 }
 0x4c5   :  { %v15813_v8 = vadd.f32 %v18019_v35, %v6217_v63  ;;  %v5925_v53 = vmul.f32 0.5, %v5773_v14  ;;  %v5792_v5 = vadd.f32 %v5791_v21, %v5790_v44  ;;  %v5833_v18 = vrot.slane %v5832_v26, 2 }
 0x4c6   :  { %v15819_v9 = vadd.f32 %v18021_v37, %v18020_v38  ;;  %v5481_v61 = vadd.f32 %v5480_v17, %v5479_v36  ;;  %v18022_v30 = vrot.slane %v15281_v41, %v15240_v22  ;;  %v5519_v63 = vadd.f32 %v5518_v7, %v5517_v50  ;;  %v15838_v50 = vld [vmem:[%s17860_s9 + $0x8] sm:$0xff] }
 0x4c7   :  { %v6020_v35 = vmul.f32 %v12924_v12, %v15672_v20  ;;  %v5815_v38 = vadd.f32 %v5814_v4, %v5813_v55  ;;  %v5834_v21 = vadd.f32 %v5833_v18, %v5832_v26  ;;  %v5957_v37 = vadd.f32 1e-05, %v5925_v53  ;;  %v15846_v4 = vld [vmem:[%s17861_s10 + $0x8] sm:$0xff]  ;;  %v18026_v55 = vld [vmem:[#allocation12_spill] sm:$0xff] }
 0x4c8   :  { %v15825_v45 = vadd.f32 %v18022_v30, %v6223_v33  ;;  %v5496_v49 = vsel %vm153_vm1, %v15819_v9, 0.0  ;;  %v5609_v14 = vmul.f32 0.5, %v5481_v61  ;;  %v5520_v36 = vrot.slane %v5519_v63, 2  ;;  %v18024_v30 = vld [vmem:[#allocation10_spill] sm:$0xff] }
 0x4c9   :  { %v5497_v17 = vrot.slane %v5496_v49, 4  ;;  %v5793_v31 = vrot.slane %v5792_v5, 1  ;;  %v18023_v7 = vrot.slane %v15267_v15, %v15243_v43  ;;  %v5931_v18 = vmul.f32 0.5, %v5815_v38 }
 0x4ca   :  { %v15833_v33 = vsub.f32 %v15741_v46, %v5609_v14  ;;  %v5521_v46 = vadd.f32 %v5520_v36, %v5519_v63  ;;  %v18025_v14 = vrot.slane %v18024_v30, %v15216_v16  ;;  %v5835_v44 = vrot.slane %v5834_v21, 1 }
 0x4cb   :  { %v5498_v12 = vadd.f32 %v5497_v17, %v5496_v49  ;;  %v6220_v53 = vmul.f32 %v18023_v7, %v6020_v35  ;;  %12927 = vrsqrt.f32 %v5957_v37  ;;  %v5794_v36 = vadd.f32 %v5793_v31, %v5792_v5  ;;  %v18029_v31 = vld [vmem:[#allocation13_spill] sm:$0xff] }
 0x4cc   :  { %v5673_v61 = vmul.f32 %v15833_v33, %v15833_v33  ;;  %v15859_v58 = vadd.f32 %v18026_v55, %v18025_v14  ;;  %v5522_v13 = vrot.slane %v5521_v46, 1  ;;  %v18027_v11 = vrot.slane %v15281_v41, %v15243_v43 }
 0x4cd   :  { %v5499_v49 = vrot.slane %v5498_v12, 2  ;;  %v5963_v23 = vadd.f32 1e-05, %v5931_v18  ;;  %v18028_v5 = vrot.slane %v15314_v29, %v15270_v48  ;;  %v5836_v34 = vadd.f32 %v5835_v44, %v5834_v21 }
 0x4ce   :  { %v5795_v35 = vsel %vm153_vm1, %v5673_v61, 0.0  ;;  %v5538_v38 = vsel %vm153_vm1, %v15859_v58, 0.0  ;;  %v12926_v17 = vpop.eup %12925  ;;  %v5523_v27 = vadd.f32 %v5522_v13, %v5521_v46  ;;  %v15871_v62 = vadd.f32 %v18027_v11, %v6220_v53 }
 0x4cf   :  { %v5796_v7 = vrot.slane %v5795_v35, 4  ;;  %v5500_v14 = vadd.f32 %v5499_v49, %v5498_v12  ;;  %v5539_v37 = vrot.slane %v5538_v38, 4  ;;  %v15877_v61 = vadd.f32 %v18029_v31, %v18028_v5  ;;  %v15924_v31 = vld [vmem:[%s17861_s10 + $0x18] sm:$0xff] }
 0x4d0   :  { %v5615_v13 = vmul.f32 0.5, %v5523_v27  ;;  %v6026_v55 = vmul.f32 %v12926_v17, %v15694_v39  ;;  %v5928_v12 = vmul.f32 0.5, %v5794_v36  ;;  %12929 = vrsqrt.f32 %v5963_v23  ;;  %v18031_v39 = vld [vmem:[#allocation6_spill] sm:$0xff] }
 0x4d1   :  { %v5797_v63 = vadd.f32 %v5796_v7, %v5795_v35  ;;  %v5501_v46 = vrot.slane %v5500_v14, 1  ;;  %v5540_v49 = vadd.f32 %v5539_v37, %v5538_v38  ;;  %v5503_v11 = vsel %vm153_vm1, %v15877_v61, 0.0 }
 0x4d2   :  { %v15883_v18 = vsub.f32 %v15786_v56, %v5615_v13  ;;  %v5504_v20 = vrot.slane %v5503_v11, 4  ;;  %v18030_v27 = vrot.slane %v18024_v30, %v15237_v47  ;;  %v5934_v35 = vmul.f32 0.5, %v5836_v34 }
 0x4d3   :  { %v5798_v53 = vrot.slane %v5797_v63, 2  ;;  %v5502_v26 = vadd.f32 %v5501_v46, %v5500_v14  ;;  %v5541_v21 = vrot.slane %v5540_v49, 2  ;;  %v18032_v7 = vrot.slane %v15481_v60, %v15216_v16 }
 0x4d4   :  { %v15891_v36 = vadd.f32 %v18031_v39, %v18030_v27  ;;  %v5679_v17 = vmul.f32 %v15883_v18, %v15883_v18  ;;  %v5505_v37 = vadd.f32 %v5504_v20, %v5503_v11  ;;  %v5960_v13 = vadd.f32 1e-05, %v5928_v12 }
 0x4d5   :  { %v5799_v38 = vadd.f32 %v5798_v53, %v5797_v63  ;;  %v5612_v56 = vmul.f32 0.5, %v5502_v26  ;;  %v6226_v23 = vmul.f32 %v18032_v7, %v6026_v55  ;;  %v5542_v14 = vadd.f32 %v5541_v21, %v5540_v49  ;;  %v12928_v63 = vpop.eup %12927 }
 0x4d6   :  { %v5545_v5 = vsel %vm153_vm1, %v15891_v36, 0.0  ;;  %v5837_v46 = vsel %vm153_vm1, %v5679_v17, 0.0  ;;  %v5506_v39 = vrot.slane %v5505_v37, 2  ;;  %v5966_v44 = vadd.f32 1e-05, %v5934_v35  ;;  %v15917_v17 = vld [vmem:[%s17860_s9 + $0x18] sm:$0xff] }
 0x4d7   :  { %v15903_v34 = vsub.f32 %v15819_v9, %v5612_v56  ;;  %v5800_v53 = vrot.slane %v5799_v38, 1  ;;  %v5838_v26 = vrot.slane %v5837_v46, 4  ;;  %v5543_v27 = vrot.slane %v5542_v14, 1 }
 0x4d8   :  { %v5546_v49 = vrot.slane %v5545_v5, 4  ;;  %v18033_v12 = vrot.slane %v15504_v57, %v15216_v16  ;;  %v5507_v35 = vadd.f32 %v5506_v39, %v5505_v37  ;;  %v6021_v56 = vmul.f32 %v12928_v63, %v15708_v54 }
 0x4d9   :  { %v5676_v20 = vmul.f32 %v15903_v34, %v15903_v34  ;;  %v5839_v9 = vadd.f32 %v5838_v26, %v5837_v46  ;;  %v5544_v21 = vadd.f32 %v5543_v27, %v5542_v14  ;;  %12931 = vrsqrt.f32 %v5960_v13 }
 0x4da   :  { %v15912_v11 = vadd.f32 %v18033_v12, %v6226_v23  ;;  %v5547_v23 = vadd.f32 %v5546_v49, %v5545_v5  ;;  %v5801_v12 = vadd.f32 %v5800_v53, %v5799_v38  ;;  %12933 = vrsqrt.f32 %v5966_v44  ;;  %v12930_v54 = vpop.eup %12929 }
 0x4db   :  { %v5816_v7 = vsel %vm153_vm1, %v5676_v20, 0.0  ;;  %v5840_v46 = vrot.slane %v5839_v9, 2  ;;  %v5618_v26 = vmul.f32 0.5, %v5544_v21  ;;  %v5508_v37 = vrot.slane %v5507_v35, 1 }
 0x4dc   :  { %18034 = vst [vmem:[#allocation25_spill] sm:$0xff] %v15912_v11  ;;  %v5817_v14 = vrot.slane %v5816_v7, 4  ;;  %v5548_v39 = vrot.slane %v5547_v23, 2  ;;  %v18035_v5 = vrot.slane %v15267_v15, %v15270_v48  ;;  %v5929_v21 = vmul.f32 0.5, %v5801_v12 }
 0x4dd   :  { %v5841_v13 = vadd.f32 %v5840_v46, %v5839_v9  ;;  %v15929_v20 = vsub.f32 %v15859_v58, %v5618_v26  ;;  %v5509_v53 = vadd.f32 %v5508_v37, %v5507_v35  ;;  %v6027_v58 = vmul.f32 %v12930_v54, %v15732_v42 }
 0x4de   :  { %v5818_v63 = vadd.f32 %v5817_v14, %v5816_v7  ;;  %v6221_v44 = vmul.f32 %v18035_v5, %v6021_v56  ;;  %v5549_v49 = vadd.f32 %v5548_v39, %v5547_v23  ;;  %v18036_v35 = vrot.slane %v15314_v29, %v15284_v25  ;;  %v18037_v56 = vld [vmem:[#allocation7_spill] sm:$0xff] }
 0x4df   :  { %v5842_v27 = vrot.slane %v5841_v13, 1  ;;  %v5682_v9 = vmul.f32 %v15929_v20, %v15929_v20  ;;  %v5613_v7 = vmul.f32 0.5, %v5509_v53  ;;  %v18038_v12 = vrot.slane %v15281_v41, %v15270_v48 }
 0x4e0   :  { %v5819_v1 = vrot.slane %v5818_v63, 2  ;;  %v5550_v14 = vrot.slane %v5549_v49, 1  ;;  %v15947_v23 = vadd.f32 %v18037_v56, %v18036_v35 }
 0x4e1   :  { %v5843_v26 = vadd.f32 %v5842_v27, %v5841_v13  ;;  %v5858_v55 = vsel %vm153_vm1, %v5682_v9, 0.0  ;;  %v15952_v37 = vadd.f32 %v18038_v12, %v6221_v44  ;;  %v15955_v39 = vsub.f32 %v15877_v61, %v5613_v7 }
 0x4e2   :  { %v5820_v38 = vadd.f32 %v5819_v1, %v5818_v63  ;;  %v5859_v42 = vrot.slane %v5858_v55, 4  ;;  %v5551_v54 = vadd.f32 %v5550_v14, %v5549_v49  ;;  %v5961_v27 = vadd.f32 1e-05, %v5929_v21 }
 0x4e3   :  { %v5935_v1 = vmul.f32 0.5, %v5843_v26  ;;  %v5524_v63 = vsel %vm153_vm1, %v15947_v23, 0.0  ;;  %v12932_v29 = vpop.eup %12931  ;;  %v5677_v53 = vmul.f32 %v15955_v39, %v15955_v39  ;;  %v18039_v44 = vrot.slane %v15481_v60, %v15237_v47 }
 0x4e4   :  { %v5821_v13 = vrot.slane %v5820_v38, 1  ;;  %v5860_v5 = vadd.f32 %v5859_v42, %v5858_v55  ;;  %v5619_v9 = vmul.f32 0.5, %v5551_v54  ;;  %v5525_v35 = vrot.slane %v5524_v63, 4  ;;  %v12934_v7 = vpop.eup %12933 }
 0x4e5   :  { %v6227_v56 = vmul.f32 %v18039_v44, %v6027_v58  ;;  %v4345_v21 = vrot.slane %v18024_v30, %v15219_v3  ;;  %v5823_v55 = vsel %vm153_vm1, %v5677_v53, 0.0  ;;  %v6024_v42 = vmul.f32 %v12932_v29, %v15753_v40  ;;  %v18040_v58 = vld [vmem:[#allocation8_spill] sm:$0xff] }
 0x4e6   :  { %v5822_v61 = vadd.f32 %v5821_v13, %v5820_v38  ;;  %v5861_v14 = vrot.slane %v5860_v5, 2  ;;  %v15970_v26 = vsub.f32 %v15891_v36, %v5619_v9  ;;  %v5526_v12 = vadd.f32 %v5525_v35, %v5524_v63 }
 0x4e7   :  { %12935 = vrsqrt.f32 %v5961_v27  ;;  %v5824_v54 = vrot.slane %v5823_v55, 4  ;;  %v15974_v38 = vadd.f32 %v18040_v58, %v4345_v21  ;;  %v5967_v13 = vadd.f32 1e-05, %v5935_v1 }
 0x4e8   :  { %v5862_v44 = vadd.f32 %v5861_v14, %v5860_v5  ;;  %v5683_v30 = vmul.f32 %v15970_v26, %v15970_v26  ;;  %v5527_v49 = vrot.slane %v5526_v12, 2  ;;  %v6030_v46 = vmul.f32 %v12934_v7, %v15770_v51 }
 0x4e9   :  { %v5932_v53 = vmul.f32 0.5, %v5822_v61  ;;  %v5825_v11 = vadd.f32 %v5824_v54, %v5823_v55  ;;  %v5566_v36 = vsel %vm153_vm1, %v15974_v38, 0.0  ;;  %v18041_v1 = vrot.slane %v15504_v57, %v15237_v47 }
 0x4ea   :  { %v5863_v63 = vrot.slane %v5862_v44, 1  ;;  %v5865_v40 = vsel %vm153_vm1, %v5683_v30, 0.0  ;;  %v5528_v27 = vadd.f32 %v5527_v49, %v5526_v12  ;;  %v5567_v29 = vrot.slane %v5566_v36, 4  ;;  %v12965_v49 = vld [vmem:[%s17859_s8 + $0x10] sm:$0xff] }
 0x4eb   :  { %v15985_v5 = vadd.f32 %v18041_v1, %v6227_v56  ;;  %v18042_v9 = vrot.slane %v15267_v15, %v15284_v25  ;;  %v5826_v51 = vrot.slane %v5825_v11, 2  ;;  %v5866_v61 = vrot.slane %v5865_v40, 4 }
 0x4ec   :  { %12937 = vrsqrt.f32 %v5967_v13  ;;  %v5864_v21 = vadd.f32 %v5863_v63, %v5862_v44  ;;  %v5529_v7 = vrot.slane %v5528_v27, 1  ;;  %v5568_v14 = vadd.f32 %v5567_v29, %v5566_v36  ;;  %v18045_v36 = vld [vmem:[#allocation9_spill] sm:$0xff] }
 0x4ed   :  { %v6224_v35 = vmul.f32 %v18042_v9, %v6024_v42  ;;  %v5964_v55 = vadd.f32 1e-05, %v5932_v53  ;;  %v5827_v54 = vadd.f32 %v5826_v51, %v5825_v11  ;;  %v5867_v58 = vadd.f32 %v5866_v61, %v5865_v40 }
 0x4ee   :  { %v4325_v56 = vrot.slane %v12965_v49, %v15293_v24  ;;  %v18043_v12 = vrot.slane %v15481_v60, %v15219_v3  ;;  %v5938_v42 = vmul.f32 0.5, %v5864_v21  ;;  %v5530_v30 = vadd.f32 %v5529_v7, %v5528_v27 }
 0x4ef   :  { %v5569_v1 = vrot.slane %v5568_v14, 2  ;;  %v18044_v13 = vrot.slane %v15281_v41, %v15284_v25  ;;  %v5828_v11 = vrot.slane %v5827_v54, 1  ;;  %v5868_v53 = vrot.slane %v5867_v58, 2  ;;  %v16011_v41 = vld [vmem:[%s17859_s8 + $0x18] sm:$0xff] }
 0x4f0   :  { %v6230_v15 = vmul.f32 %v18043_v12, %v6030_v46  ;;  %v16003_v63 = vadd.f32 %v18045_v36, %v4325_v56  ;;  %v5970_v29 = vadd.f32 1e-05, %v5938_v42  ;;  %v5616_v9 = vmul.f32 0.5, %v5530_v30  ;;  %v18048_v42 = vld [vmem:[#allocation15_spill] sm:$0xff] }
 0x4f1   :  { %v16000_v44 = vadd.f32 %v18044_v13, %v6224_v35  ;;  %v5570_v51 = vadd.f32 %v5569_v1, %v5568_v14  ;;  %v12936_v61 = vpop.eup %12935  ;;  %12939 = vrsqrt.f32 %v5964_v55  ;;  %v5869_v46 = vadd.f32 %v5868_v53, %v5867_v58 }
 0x4f2   :  { %v5531_v27 = vsel %vm153_vm1, %v16003_v63, 0.0  ;;  %v4349_v35 = vrot.slane %v16011_v41, %v15240_v22  ;;  %v18046_v7 = vrot.slane %v15504_v57, %v15219_v3  ;;  %v16022_v55 = vsub.f32 %v15947_v23, %v5616_v9 }
 0x4f3   :  { %v5571_v58 = vrot.slane %v5570_v51, 1  ;;  %v5829_v56 = vadd.f32 %v5828_v11, %v5827_v54  ;;  %v5532_v12 = vrot.slane %v5531_v27, 4  ;;  %v6025_v1 = vmul.f32 %v12936_v61, %v15833_v33 }
 0x4f4   :  { %v16019_v14 = vadd.f32 %v18046_v7, %v6230_v15  ;;  %v16026_v30 = vadd.f32 %v18048_v42, %v4349_v35  ;;  %12941 = vrsqrt.f32 %v5970_v29  ;;  %v5680_v13 = vmul.f32 %v16022_v55, %v16022_v55 }
 0x4f5   :  { %v5572_v53 = vadd.f32 %v5571_v58, %v5570_v51  ;;  %v5870_v15 = vrot.slane %v5869_v46, 1  ;;  %v5533_v36 = vadd.f32 %v5532_v12, %v5531_v27  ;;  %v5933_v61 = vmul.f32 0.5, %v5829_v56  ;;  %v16042_v51 = vld [vmem:[%s17860_s9 + $0x10] sm:$0xff] }
 0x4f6   :  { %18047 = vst [vmem:[#allocation14_spill] sm:$0xff] %v16019_v14  ;;  %v5573_v9 = vsel %vm153_vm1, %v16026_v30, 0.0  ;;  %v12938_v54 = vpop.eup %12937  ;;  %v5844_v33 = vsel %vm153_vm1, %v5680_v13, 0.0  ;;  %v18049_v12 = vrot.slane %v15838_v50, %v15293_v24  ;;  %v16052_v13 = vld [vmem:[%s17861_s10 + $0x10] sm:$0xff]  ;;  %v4337_v35 = vrot.slane %v16011_v41, %v15243_v43 }
 0x4f7   :  { %v5622_v29 = vmul.f32 0.5, %v5572_v53  ;;  %v5845_v7 = vrot.slane %v5844_v33, 4  ;;  %v5534_v58 = vrot.slane %v5533_v36, 2  ;;  %v5574_v11 = vrot.slane %v5573_v9, 4 }
 0x4f8   :  { %v6225_v42 = vmul.f32 %v18049_v12, %v6025_v1  ;;  %v6031_v49 = vmul.f32 %v12938_v54, %v15883_v18  ;;  %v5871_v21 = vadd.f32 %v5870_v15, %v5869_v46  ;;  %v5965_v23 = vadd.f32 1e-05, %v5933_v61 }
 0x4f9   :  { %v16057_v53 = vsub.f32 %v15974_v38, %v5622_v29  ;;  %v5846_v40 = vadd.f32 %v5845_v7, %v5844_v33  ;;  %v5535_v27 = vadd.f32 %v5534_v58, %v5533_v36  ;;  %v5575_v12 = vadd.f32 %v5574_v11, %v5573_v9 }
 0x4fa   :  { %v18050_v46 = vrot.slane %v15846_v4, %v15293_v24  ;;  %v16075_v9 = vadd.f32 %v15571_v0, %v4337_v35  ;;  %v18051_v11 = vrot.slane %v15481_v60, %v15240_v22  ;;  %v5939_v61 = vmul.f32 0.5, %v5871_v21 }
 0x4fb   :  { %v5686_v50 = vmul.f32 %v16057_v53, %v16057_v53  ;;  %v12940_v56 = vpop.eup %12939  ;;  %v5847_v38 = vrot.slane %v5846_v40, 2  ;;  %v5536_v18 = vrot.slane %v5535_v27, 1  ;;  %v5576_v54 = vrot.slane %v5575_v12, 2 }
 0x4fc   :  { %v16071_v15 = vadd.f32 %v18050_v46, %v6225_v42  ;;  %v6231_v33 = vmul.f32 %v18051_v11, %v6031_v49  ;;  %v6028_v1 = vmul.f32 %v12940_v56, %v15903_v34  ;;  %v5552_v4 = vsel %vm153_vm1, %v16075_v9, 0.0 }
 0x4fd   :  { %v5886_v36 = vsel %vm153_vm1, %v5686_v50, 0.0  ;;  %v5537_v58 = vadd.f32 %v5536_v18, %v5535_v27  ;;  %v5577_v14 = vadd.f32 %v5576_v54, %v5575_v12  ;;  %v4341_v42 = vrot.slane %v16011_v41, %v15270_v48  ;;  %v18052_v27 = vld [vmem:[#allocation17_spill] sm:$0xff] }
 0x4fe   :  { %v5887_v7 = vrot.slane %v5886_v36, 4  ;;  %v12942_v29 = vpop.eup %12941  ;;  %12943 = vrsqrt.f32 %v5965_v23  ;;  %v5848_v0 = vadd.f32 %v5847_v38, %v5846_v40  ;;  %v5553_v46 = vrot.slane %v5552_v4, 4 }
 0x4ff   :  { %v5617_v35 = vmul.f32 0.5, %v5537_v58  ;;  %v5578_v21 = vrot.slane %v5577_v14, 1  ;;  %v16088_v18 = vadd.f32 %v18052_v27, %v4341_v42  ;;  %v18053_v34 = vrot.slane %v15504_v57, %v15240_v22 }
 0x500   :  { %v5888_v49 = vadd.f32 %v5887_v7, %v5886_v36  ;;  %v6034_v12 = vmul.f32 %v12942_v29, %v15929_v20  ;;  %v5971_v54 = vadd.f32 1e-05, %v5939_v61  ;;  %v18054_v23 = vrot.slane %v15481_v60, %v15243_v43  ;;  %v18060_v20 = vld [vmem:[#allocation22_spill] sm:$0xff] }
 0x501   :  { %v16093_v56 = vadd.f32 %v18053_v34, %v6231_v33  ;;  %v16097_v40 = vsub.f32 %v16003_v63, %v5617_v35  ;;  %v5579_v36 = vadd.f32 %v5578_v21, %v5577_v14  ;;  %v5554_v11 = vadd.f32 %v5553_v46, %v5552_v4 }
 0x502   :  { %v6228_v38 = vmul.f32 %v18054_v23, %v6028_v1  ;;  %v5559_v7 = vsel %vm153_vm1, %v16088_v18, 0.0  ;;  %v5849_v42 = vrot.slane %v5848_v0, 1  ;;  %v5889_v63 = vrot.slane %v5888_v49, 2 }
 0x503   :  { %v5681_v33 = vmul.f32 %v16097_v40, %v16097_v40  ;;  %v5623_v29 = vmul.f32 0.5, %v5579_v36  ;;  %v5555_v61 = vrot.slane %v5554_v11, 2  ;;  %v5560_v35 = vrot.slane %v5559_v7, 4 }
 0x504   :  { %v18055_v14 = vrot.slane %v15917_v17, %v15216_v16  ;;  %12945 = vrsqrt.f32 %v5971_v54  ;;  %v18056_v27 = vrot.slane %v15504_v57, %v15243_v43  ;;  %v5850_v58 = vadd.f32 %v5849_v42, %v5848_v0 }
 0x505   :  { %v5851_v4 = vsel %vm153_vm1, %v5681_v33, 0.0  ;;  %v16122_v36 = vsub.f32 %v16026_v30, %v5623_v29  ;;  %v5556_v54 = vadd.f32 %v5555_v61, %v5554_v11  ;;  %v5561_v33 = vadd.f32 %v5560_v35, %v5559_v7 }
 0x506   :  { %v6234_v1 = vmul.f32 %v18055_v14, %v6034_v12  ;;  %v16119_v34 = vadd.f32 %v18056_v27, %v6228_v38  ;;  %v5852_v23 = vrot.slane %v5851_v4, 4  ;;  %v16126_v14 = vadd.f32 %v5889_v63, %v5888_v49 }
 0x507   :  { %v5687_v46 = vmul.f32 %v16122_v36, %v16122_v36  ;;  %v18058_v30 = vrot.slane %v15924_v31, %v15216_v16  ;;  %v5557_v0 = vrot.slane %v5556_v54, 1  ;;  %v5562_v42 = vrot.slane %v5561_v33, 2 }
 0x508   :  { %18057 = vst [vmem:[#allocation16_spill] sm:$0xff] %v16119_v34  ;;  %v5853_v21 = vadd.f32 %v5852_v23, %v5851_v4  ;;  %v12944_v27 = vpop.eup %12943  ;;  %v4353_v11 = vrot.slane %v16011_v41, %v15284_v25  ;;  %v5936_v35 = vmul.f32 0.5, %v5850_v58 }
 0x509   :  { %v16135_v29 = vadd.f32 %v18058_v30, %v6234_v1  ;;  %v5893_v63 = vsel %vm153_vm1, %v5687_v46, 0.0  ;;  %v5558_v23 = vadd.f32 %v5557_v0, %v5556_v54  ;;  %v5563_v12 = vadd.f32 %v5562_v42, %v5561_v33 }
 0x50a   :  { %v5854_v7 = vrot.slane %v5853_v21, 2  ;;  %v5894_v4 = vrot.slane %v5893_v63, 4  ;;  %v5891_v1 = vrot.slane %v16126_v14, 1  ;;  %v16149_v50 = vadd.f32 %v18060_v20, %v4353_v11 }
 0x50b   :  { %18059 = vst [vmem:[#allocation18_spill] sm:$0xff] %v16135_v29  ;;  %v6029_v46 = vmul.f32 %v12944_v27, %v15955_v39  ;;  %v5620_v34 = vmul.f32 0.5, %v5558_v23  ;;  %v5564_v61 = vrot.slane %v5563_v12, 1  ;;  %v5968_v33 = vadd.f32 1e-05, %v5936_v35 }
 0x50c   :  { %v16144_v30 = vadd.f32 %v5854_v7, %v5853_v21  ;;  %v16153_v58 = vadd.f32 %v5894_v4, %v5893_v63  ;;  %v5580_v54 = vsel %vm153_vm1, %v16149_v50, 0.0  ;;  %v12973_v11 = vmov 0.0  }
 0x50d   :  { %v16158_v0 = vsub.f32 %v16075_v9, %v5620_v34  ;;  %v5565_v42 = vadd.f32 %v5564_v61, %v5563_v12  ;;  %v5581_v20 = vrot.slane %v5580_v54, 4  ;;  %6477 = vst.msk [vmem:[#allocation3 + $0x10] sm:$0xff] %vm6474_vm10, %v12973_v11  ;;  %6475 = vst.msk [vmem:[#allocation3] sm:$0xff] %vm6474_vm10, %v12973_v11  ;;  %v5892_v39 = vadd.f32 %v5891_v1, %v16126_v14  ;;  %v18062_v1 = vld [vmem:[#allocation24_spill] sm:$0xff] }
 0x50e   :  { %v12946_v21 = vpop.eup %12945  ;;  %6476 = vst.msk [vmem:[#allocation3 + $0x8] sm:$0x3] %vm300_vm6, %v12973_v11  ;;  %6478 = vst.msk [vmem:[#allocation3 + $0x18] sm:$0x3] %vm300_vm6, %v12973_v11  ;;  %v5856_v9 = vrot.slane %v16144_v30, 1  ;;  %v4357_v34 = vrot.slane %v16011_v41, %v15293_v24  ;;  %v18061_v12 = vrot.slane %v15481_v60, %v15270_v48  ;;  %v5896_v4 = vrot.slane %v16153_v58, 2 }
 0x50f   :  { %6479 = vst.msk [vmem:[#allocation3 + $0x20] sm:$0xff] %vm6474_vm10, %v12973_v11  ;;  %6481 = vst.msk [vmem:[#allocation3 + $0x30] sm:$0xff] %vm6474_vm10, %v12973_v11  ;;  %v5684_v7 = vmul.f32 %v16158_v0, %v16158_v0  ;;  %v5621_v63 = vmul.f32 0.5, %v5565_v42  ;;  %v5582_v61 = vadd.f32 %v5581_v20, %v5580_v54  ;;  %v6035_v35 = vmul.f32 %v12946_v21, %v15970_v26 }
 0x510   :  { %6480 = vst.msk [vmem:[#allocation3 + $0x28] sm:$0x3] %vm300_vm6, %v12973_v11  ;;  %6482 = vst.msk [vmem:[#allocation3 + $0x38] sm:$0x3] %vm300_vm6, %v12973_v11  ;;  %v6229_v27 = vmul.f32 %v18061_v12, %v6029_v46  ;;  %v12974_v23 = vmov 1966171168   ;;  %12947 = vrsqrt.f32 %v5968_v33  ;;  %v5857_v42 = vadd.f32 %v5856_v9, %v16144_v30 }
 0x511   :  { %6483 = vst.msk [vmem:[#allocation3 + $0x40] sm:$0xff] %vm6474_vm10, %v12973_v11  ;;  %6485 = vst.msk [vmem:[#allocation3 + $0x50] sm:$0xff] %vm6474_vm10, %v12973_v11  ;;  %v6517_v14 = vunpack.c.l.s4 %v12974_v23  ;;  %v5872_v41 = vsel %vm153_vm1, %v5684_v7, 0.0  ;;  %v16216_v60 = vsub.f32 %v16088_v18, %v5621_v63  ;;  %v5583_v46 = vrot.slane %v5582_v61, 2 }
 0x512   :  { %6484 = vst.msk [vmem:[#allocation3 + $0x48] sm:$0x3] %vm300_vm6, %v12973_v11  ;;  %6486 = vst.msk [vmem:[#allocation3 + $0x58] sm:$0x3] %vm300_vm6, %v12973_v11  ;;  %v5942_v12 = vmul.f32 0.5, %v5892_v39  ;;  %v5873_v54 = vrot.slane %v5872_v41, 4  ;;  %v18063_v26 = vrot.slane %v15504_v57, %v15270_v48  ;;  %v5897_v18 = vadd.f32 %v5896_v4, %v16153_v58 }
 0x513   :  { %6487 = vst.msk [vmem:[#allocation3 + $0x60] sm:$0xff] %vm6474_vm10, %v12973_v11  ;;  %6489 = vst.msk [vmem:[#allocation3 + $0x70] sm:$0xff] %vm6474_vm10, %v12973_v11  ;;  %v6518_v20 = vunpack.c.0.s8 %v6517_v14  ;;  %v5584_v33 = vadd.f32 %v5583_v46, %v5582_v61  ;;  %v18064_v39 = vld [vmem:[#allocation4_spill] sm:$0xff]  ;;  %v18065_v57 = vrot.slane %v15917_v17, %v15237_v47  ;;  %v5937_v46 = vmul.f32 0.5, %v5857_v42 }
 0x514   :  { %6488 = vst.msk [vmem:[#allocation3 + $0x68] sm:$0x3] %vm300_vm6, %v12973_v11  ;;  %6490 = vst.msk [vmem:[#allocation3 + $0x78] sm:$0x3] %vm300_vm6, %v12973_v11  ;;  %v16222_v21 = vadd.f32 %v18063_v26, %v6229_v27  ;;  %v5874_v63 = vadd.f32 %v5873_v54, %v5872_v41  ;;  %v18066_v41 = vld [vmem:[#allocation19_spill] sm:$0xff]  ;;  %v5898_v30 = vrot.slane %v5897_v18, 1 }
 0x515   :  { %6491 = vst.msk [vmem:[#allocation3 + $0x80] sm:$0xff] %vm6474_vm10, %v12973_v11  ;;  %6493 = vst.msk [vmem:[#allocation3 + $0x90] sm:$0xff] %vm6474_vm10, %v12973_v11  ;;  %v16232_v9 = vsub.s32 %v6518_v20, %v18064_v39  ;;  %v6235_v27 = vmul.f32 %v18065_v57, %v6035_v35  ;;  %v5585_v14 = vrot.slane %v5584_v33, 1  ;;  %v18067_v54 = vmax.f32 %v18066_v41, 0.0 }
 0x516   :  { %6492 = vst.msk [vmem:[#allocation3 + $0x88] sm:$0x3] %vm300_vm6, %v12973_v11  ;;  %6494 = vst.msk [vmem:[#allocation3 + $0x98] sm:$0x3] %vm300_vm6, %v12973_v11  ;;  %v5875_v26 = vrot.slane %v5874_v63, 2  ;;  %v18068_v35 = vrot.slane %v15924_v31, %v15237_v47  ;;  %v18069_v47 = vmax.f32 %v15637_v59, 0.0 }
 0x517   :  { %6495 = vst.msk [vmem:[#allocation3 + $0xa0] sm:$0xff] %vm6474_vm10, %v12973_v11  ;;  %6497 = vst.msk [vmem:[#allocation3 + $0xb0] sm:$0xff] %vm6474_vm10, %v12973_v11  ;;  %v5586_v4 = vadd.f32 %v5585_v14, %v5584_v33  ;;  %v6522_v20 = vrot.slane %v18067_v54, %v16232_v9  ;;  %v5969_v33 = vadd.f32 1e-05, %v5937_v46 }
 0x518   :  { %6496 = vst.msk [vmem:[#allocation3 + $0xa8] sm:$0x3] %vm300_vm6, %v12973_v11  ;;  %6498 = vst.msk [vmem:[#allocation3 + $0xb8] sm:$0x3] %vm300_vm6, %v12973_v11  ;;  %v5876_v38 = vadd.f32 %v5875_v26, %v5874_v63 }
 0x519   :  { %6499 = vst.msk [vmem:[#allocation3 + $0xc0] sm:$0xff] %vm6474_vm10, %v12973_v11  ;;  %6501 = vst.msk [vmem:[#allocation3 + $0xd0] sm:$0xff] %vm6474_vm10, %v12973_v11  ;;  %v6530_v42 = vrot.slane %v6522_v20, %v16232_v9 }
 0x51a   :  { %6500 = vst.msk [vmem:[#allocation3 + $0xc8] sm:$0x3] %vm300_vm6, %v12973_v11  ;;  %6502 = vst.msk [vmem:[#allocation3 + $0xd8] sm:$0x3] %vm300_vm6, %v12973_v11  ;;  %v5877_v14 = vrot.slane %v5876_v38, 1  ;;  %v12948_v41 = vpop.eup %12947 }
 0x51b   :  { %6503 = vst.msk [vmem:[#allocation3 + $0xe0] sm:$0xff] %vm6474_vm10, %v12973_v11  ;;  %6505 = vst.msk [vmem:[#allocation3 + $0xf0] sm:$0xff] %vm6474_vm10, %v12973_v11 }
 0x51c   :  { %6504 = vst.msk [vmem:[#allocation3 + $0xe8] sm:$0x3] %vm300_vm6, %v12973_v11  ;;  %6506 = vst.msk [vmem:[#allocation3 + $0xf8] sm:$0x3] %vm300_vm6, %v12973_v11 }
 0x51d   :  { %6507 = vst.msk [vmem:[#allocation3 + $0x100] sm:$0xff] %vm6474_vm10, %v12973_v11  ;;  %6509 = vst.msk [vmem:[#allocation3 + $0x110] sm:$0xff] %vm6474_vm10, %v12973_v11 }
 0x51e   :  { %6508 = vst.msk [vmem:[#allocation3 + $0x108] sm:$0x3] %vm300_vm6, %v12973_v11  ;;  %6510 = vst.msk [vmem:[#allocation3 + $0x118] sm:$0x3] %vm300_vm6, %v12973_v11 }
 0x51f   :  { %6511 = vst.msk [vmem:[#allocation3 + $0x120] sm:$0xff] %vm6474_vm10, %v12973_v11  ;;  %6513 = vst.msk [vmem:[#allocation3 + $0x130] sm:$0xff] %vm6474_vm10, %v12973_v11 }
 0x520   :  { %6512 = vst.msk [vmem:[#allocation3 + $0x128] sm:$0x3] %vm300_vm6, %v12973_v11  ;;  %6514 = vst.msk [vmem:[#allocation3 + $0x138] sm:$0x3] %vm300_vm6, %v12973_v11  ;;  %v16212_v11 = vadd.f32 %v18062_v1, %v4357_v34  ;;  %v5685_v34 = vmul.f32 %v16216_v60, %v16216_v60  ;;  %v5974_v1 = vadd.f32 1e-05, %v5942_v12 }
 0x521   :  { %v5624_v12 = vmul.f32 0.5, %v5586_v4  ;;  %6542 = vst.msk [vmem:[#allocation3 + $0x11] sm:$0x1] %vm6541_vm11, %v6530_v42 }
 0x522   :  { %v5587_v7 = vsel %vm153_vm1, %v16212_v11, 0.0  ;;  %v5879_v23 = vsel %vm153_vm1, %v5685_v34, 0.0  ;;  %v16245_v34 = vadd.f32 %v18068_v35, %v6235_v27  ;;  %12949 = vrsqrt.f32 %v5974_v1  ;;  %v18070_v1 = vld [vmem:[#allocation26_spill] sm:$0xff] }
 0x523   :  { %v5588_v61 = vrot.slane %v5587_v7, 4  ;;  %v5880_v49 = vrot.slane %v5879_v23, 4  ;;  %v6567_v27 = vrot.slane %v18069_v47, %v16232_v9  ;;  %v18071_v46 = vmax.f32 %v18070_v1, 0.0 }
 0x524   :  { %12951 = vrsqrt.f32 %v5969_v33 }
 0x525   :  { %v5589_v39 = vadd.f32 %v5588_v61, %v5587_v7  ;;  %v5881_v29 = vadd.f32 %v5880_v49, %v5879_v23  ;;  %v16249_v7 = vsub.f32 %v16149_v50, %v5624_v12  ;;  %v6547_v49 = vrot.slane %v6530_v42, %v15216_v16 }
 0x526   :  { %v5899_v23 = vadd.f32 %v5898_v30, %v5897_v18  ;;  %v5878_v61 = vadd.f32 %v5877_v14, %v5876_v38  ;;  %v6696_v4 = vrot.slane %v18071_v46, %v16232_v9  ;;  %v6575_v35 = vrot.slane %v6567_v27, %v16232_v9 }
 0x527   :  { %v5590_v57 = vrot.slane %v5589_v39, 2  ;;  %v5882_v58 = vrot.slane %v5881_v29, 2  ;;  %v5688_v50 = vmul.f32 %v16249_v7, %v16249_v7  ;;  %6552 = vrot.lane.b32.xlu0 %v6547_v49, %s12971_s26  ;;  %v6032_v30 = vmul.f32 %v12948_v41, %v16022_v55 }
 0x528   :  { %v5940_v12 = vmul.f32 0.5, %v5878_v61  ;;  %v6704_v38 = vrot.slane %v6696_v4, %v16232_v9  ;;  %6585 = vst.msk [vmem:[#allocation3 + $0x13] sm:$0x1] %vm6541_vm11, %v6575_v35  ;;  %v5943_v47 = vmul.f32 0.5, %v5899_v23  ;;  %v6568_v33 = vcombine.high %v6567_v27, %v6567_v27 }
 0x529   :  { %v5591_v63 = vadd.f32 %v5590_v57, %v5589_v39  ;;  %v5883_v26 = vadd.f32 %v5882_v58, %v5881_v29  ;;  %v18072_v39 = vmax.f32 %v15645_v32, 0.0  ;;  %v6523_v29 = vcombine.high %v6522_v20, %v6522_v20 }
 0x52a   :  { %v5900_v58 = vsel %vm153_vm1, %v5688_v50, 0.0  ;;  %v6590_v57 = vrot.slane %v6575_v35, %v15216_v16  ;;  %6715 = vst.msk [vmem:[#allocation3 + $0x21] sm:$0x1] %vm6541_vm11, %v6704_v38  ;;  %v6720_v32 = vrot.slane %v6704_v38, %v15216_v16  ;;  %v5972_v41 = vadd.f32 1e-05, %v5940_v12 }
 0x52b   :  { %v5592_v54 = vrot.slane %v5591_v63, 1  ;;  %v6740_v59 = vrot.slane %v18072_v39, %v16232_v9  ;;  %v5884_v18 = vrot.slane %v5883_v26, 1  ;;  %v5901_v49 = vrot.slane %v5900_v58, 4 }
 0x52c   :  { %6595 = vrot.lane.b32.xlu1 %v6590_v57, %s12971_s26  ;;  %v6537_v20 = vrot.slane %v6523_v29, %v16232_v9  ;;  %6725 = vrot.lane.b32.xlu0 %v6720_v32, %s12971_s26  ;;  %v6173_v46 = vrot.slane %v15917_v17, %v15284_v25  ;;  %v6582_v27 = vrot.slane %v6568_v33, %v16232_v9  ;;  %12953 = vrsqrt.f32 %v5972_v41 }
 0x52d   :  { %v5593_v42 = vadd.f32 %v5592_v54, %v5591_v63  ;;  %v5885_v14 = vadd.f32 %v5884_v18, %v5883_v26  ;;  %v6748_v55 = vrot.slane %v6740_v59, %v16232_v9  ;;  %v5902_v1 = vadd.f32 %v5901_v49, %v5900_v58  ;;  %v12950_v54 = vpop.eup %12949 }
 0x52e   :  { %v6467_v26 = vmax.f32 %v16245_v34, 0.0  ;;  %6543 = vst.msk [vmem:[#allocation3 + $0xb1] sm:$0x1] %vm6541_vm11, %v6537_v20  ;;  %v6551_v12 = vrot.slane %v6537_v20, %v15216_v16  ;;  %v5975_v18 = vadd.f32 1e-05, %v5943_v47  ;;  %v6741_v29 = vcombine.high %v6740_v59, %v6740_v59  ;;  %v12952_v33 = vpop.eup %12951 }
 0x52f   :  { %v5625_v61 = vmul.f32 0.5, %v5593_v42  ;;  %v5941_v63 = vmul.f32 0.5, %v5885_v14  ;;  %6758 = vst.msk [vmem:[#allocation3 + $0x23] sm:$0x1] %vm6541_vm11, %v6748_v55  ;;  %v6763_v50 = vrot.slane %v6748_v55, %v15216_v16  ;;  %v5903_v39 = vrot.slane %v5902_v1, 2 }
 0x530   :  { %v18073_v58 = vrot.slane %v16042_v51, %v15284_v25  ;;  %6554 = vrot.lane.b32.xlu0 %v6551_v12, %s12971_s26  ;;  %v6594_v14 = vrot.slane %v6582_v27, %v15216_v16  ;;  %6586 = vst.msk [vmem:[#allocation3 + $0xb3] sm:$0x1] %vm6541_vm11, %v6582_v27  ;;  %v6755_v47 = vrot.slane %v6741_v29, %v16232_v9  ;;  %v18075_v55 = vmax.f32 %v15750_v52, 0.0 }
 0x531   :  { %v16281_v23 = vsub.f32 %v16212_v11, %v5625_v61  ;;  %v5973_v35 = vadd.f32 1e-05, %v5941_v63  ;;  %6768 = vrot.lane.b32.xlu1 %v6763_v50, %s12971_s26  ;;  %v6697_v11 = vcombine.high %v6696_v4, %v6696_v4  ;;  %v5904_v57 = vadd.f32 %v5903_v39, %v5902_v1 }
 0x532   :  { %v6232_v42 = vmul.f32 %v18073_v58, %v6032_v30  ;;  %v18074_v4 = vmax.f32 %v15717_v2, 0.0  ;;  %v6653_v20 = vrot.slane %v18075_v55, %v16232_v9  ;;  %6759 = vst.msk [vmem:[#allocation3 + $0xc3] sm:$0x1] %vm6541_vm11, %v6755_v47  ;;  %v18076_v2 = vmax.f32 %v15723_v10, 0.0 }
 0x533   :  { %v5689_v38 = vmul.f32 %v16281_v23, %v16281_v23  ;;  %v6711_v32 = vrot.slane %v6697_v11, %v16232_v9  ;;  %12955 = vrsqrt.f32 %v5973_v35  ;;  %v5905_v30 = vrot.slane %v5904_v57, 1 }
 0x534   :  { %v6610_v59 = vrot.slane %v18074_v4, %v16232_v9  ;;  %12957 = vrsqrt.f32 %v5975_v18  ;;  %v6869_v1 = vrot.slane %v18076_v2, %v16232_v9  ;;  %v6038_v50 = vmul.f32 %v12950_v54, %v16057_v53 }
 0x535   :  { %v5907_v49 = vsel %vm153_vm1, %v5689_v38, 0.0  ;;  %6597 = vrot.lane.b32.xlu1 %v6594_v14, %s12971_s26  ;;  %6716 = vst.msk [vmem:[#allocation3 + $0xc1] sm:$0x1] %vm6541_vm11, %v6711_v32  ;;  %v6724_v41 = vrot.slane %v6711_v32, %v15216_v16  ;;  %v5906_v52 = vadd.f32 %v5905_v30, %v5904_v57  ;;  %v6661_v39 = vrot.slane %v6653_v20, %v16232_v9 }
 0x536   :  { %v5908_v61 = vrot.slane %v5907_v49, 4  ;;  %v6618_v63 = vrot.slane %v6610_v59, %v16232_v9  ;;  %v6767_v12 = vrot.slane %v6755_v47, %v15216_v16  ;;  %v6877_v27 = vrot.slane %v6869_v1, %v16232_v9 }
 0x537   :  { %6727 = vrot.lane.b32.xlu0 %v6724_v41, %s12971_s26  ;;  %v18077_v18 = vmax.f32 %v15759_v19, 0.0  ;;  %v6611_v38 = vcombine.high %v6610_v59, %v6610_v59  ;;  %v18078_v53 = vrot.slane %v16052_v13, %v15284_v25  ;;  %v5944_v11 = vmul.f32 0.5, %v5906_v52  ;;  %6671 = vst.msk [vmem:[#allocation3 + $0x17] sm:$0x1] %vm6541_vm11, %v6661_v39 }
 0x538   :  { %v5909_v35 = vadd.f32 %v5908_v61, %v5907_v49  ;;  %6628 = vst.msk [vmem:[#allocation3 + $0x15] sm:$0x1] %vm6541_vm11, %v6618_v63  ;;  %v6654_v58 = vcombine.high %v6653_v20, %v6653_v20  ;;  %v6033_v57 = vmul.f32 %v12952_v33, %v16097_v40  ;;  %v6633_v14 = vrot.slane %v6618_v63, %v15216_v16  ;;  %v12954_v20 = vpop.eup %12953 }
 0x539   :  { %v6913_v10 = vrot.slane %v18077_v18, %v16232_v9  ;;  %v16326_v54 = vadd.f32 %v18078_v53, %v6232_v42  ;;  %6770 = vrot.lane.b32.xlu1 %v6767_v12, %s12971_s26  ;;  %6888 = vst.msk [vmem:[#allocation3 + $0x31] sm:$0x1] %vm6541_vm11, %v6877_v27  ;;  %v6625_v49 = vrot.slane %v6611_v38, %v16232_v9  ;;  %v5976_v32 = vadd.f32 1e-05, %v5944_v11 }
 0x53a   :  { %v5910_v29 = vrot.slane %v5909_v35, 2  ;;  %v6668_v47 = vrot.slane %v6654_v58, %v16232_v9  ;;  %v6870_v4 = vcombine.high %v6869_v1, %v6869_v1  ;;  %v18079_v59 = vrot.slane %v15917_v17, %v15219_v3 }
 0x53b   :  { %v6921_v19 = vrot.slane %v6913_v10, %v16232_v9  ;;  %v6373_v40 = vrot.slane %v15924_v31, %v15284_v25  ;;  %6638 = vrot.lane.b32.xlu0 %v6633_v14, %s12971_s26  ;;  %v6676_v61 = vrot.slane %v6661_v39, %v15216_v16  ;;  %6629 = vst.msk [vmem:[#allocation3 + $0xb5] sm:$0x1] %vm6541_vm11, %v6625_v49  ;;  %v6464_v41 = vmax.f32 %v16326_v54, 0.0 }
 0x53c   :  { %v5911_v42 = vadd.f32 %v5910_v29, %v5909_v35  ;;  %v6238_v30 = vmul.f32 %v18079_v59, %v6038_v50  ;;  %v6914_v55 = vcombine.high %v6913_v10, %v6913_v10  ;;  %12959 = vrsqrt.f32 %v5976_v32  ;;  %6672 = vst.msk [vmem:[#allocation3 + $0xb7] sm:$0x1] %vm6541_vm11, %v6668_v47 }
 0x53d   :  { %6931 = vst.msk [vmem:[#allocation3 + $0x33] sm:$0x1] %vm6541_vm11, %v6921_v19  ;;  %v6884_v2 = vrot.slane %v6870_v4, %v16232_v9  ;;  %v6177_v1 = vrot.slane %v15917_v17, %v15293_v24  ;;  %6681 = vrot.lane.b32.xlu1 %v6676_v61, %s12971_s26  ;;  %v6893_v33 = vrot.slane %v6877_v27, %v15216_v16  ;;  %v18080_v52 = vmax.f32 %v15796_v6, 0.0  ;;  %v12956_v39 = vpop.eup %12955 }
 0x53e   :  { %v5912_v63 = vrot.slane %v5911_v42, 1  ;;  %v16353_v50 = vrot.slane %v6914_v55, %v16232_v9  ;;  %v18081_v12 = vrot.slane %v16042_v51, %v15293_v24  ;;  %v18082_v38 = vmax.f32 %v15813_v8, 0.0  ;;  %v12958_v29 = vpop.eup %12957 }
 0x53f   :  { %v6783_v35 = vrot.slane %v18080_v52, %v16232_v9  ;;  %6889 = vst.msk [vmem:[#allocation3 + $0xd1] sm:$0x1] %vm6541_vm11, %v6884_v2  ;;  %v18083_v27 = vmax.f32 %v15808_v28, 0.0  ;;  %v18084_v6 = vrot.slane %v15924_v31, %v15219_v3  ;;  %v6036_v51 = vmul.f32 %v12954_v20, %v16158_v0  ;;  %6898 = vrot.lane.b32.xlu0 %v6893_v33, %s12971_s26 }
 0x540   :  { %v6233_v18 = vmul.f32 %v18081_v12, %v6033_v57  ;;  %v5913_v10 = vadd.f32 %v5912_v63, %v5911_v42  ;;  %v6826_v53 = vrot.slane %v18082_v38, %v16232_v9  ;;  %v6936_v57 = vrot.slane %v6921_v19, %v15216_v16  ;;  %6932 = vst.msk [vmem:[#allocation3 + $0xd3] sm:$0x1] %vm6541_vm11, %v16353_v50 }
 0x541   :  { %v7042_v11 = vrot.slane %v18083_v27, %v16232_v9  ;;  %v16371_v58 = vadd.f32 %v18084_v6, %v6238_v30  ;;  %v16379_v8 = vrot.slane %v6783_v35, %v16232_v9  ;;  %v18085_v0 = vmax.f32 %v15825_v45, 0.0 }
 0x542   :  { %v5945_v28 = vmul.f32 0.5, %v5913_v10  ;;  %v16382_v14 = vrot.slane %v6826_v53, %v16232_v9  ;;  %v6037_v42 = vmul.f32 %v12956_v39, %v16216_v60  ;;  %6941 = vrot.lane.b32.xlu1 %v6936_v57, %s12971_s26  ;;  %v6637_v19 = vrot.slane %v6625_v49, %v15216_v16 }
 0x543   :  { %v16385_v3 = vrot.slane %v7042_v11, %v16232_v9  ;;  %v7086_v32 = vrot.slane %v18085_v0, %v16232_v9  ;;  %6801 = vst.msk [vmem:[#allocation3 + $0x25] sm:$0x1] %vm6541_vm11, %v16379_v8  ;;  %v6784_v4 = vcombine.high %v6783_v35, %v6783_v35  ;;  %v6827_v59 = vcombine.high %v6826_v53, %v6826_v53 }
 0x544   :  { %v18086_v30 = vrot.slane %v16052_v13, %v15293_v24  ;;  %v6039_v55 = vmul.f32 %v12958_v29, %v16122_v36  ;;  %v5977_v45 = vadd.f32 1e-05, %v5945_v28  ;;  %6844 = vst.msk [vmem:[#allocation3 + $0x27] sm:$0x1] %vm6541_vm11, %v16382_v14  ;;  %6640 = vrot.lane.b32.xlu0 %v6637_v19, %s12971_s26  ;;  %v6680_v49 = vrot.slane %v6668_v47, %v15216_v16 }
 0x545   :  { %7061 = vst.msk [vmem:[#allocation3 + $0x41] sm:$0x1] %vm6541_vm11, %v16385_v3  ;;  %v16406_v60 = vrot.slane %v7086_v32, %v16232_v9  ;;  %v16411_v13 = vrot.slane %v6784_v4, %v16232_v9  ;;  %v16414_v20 = vrot.slane %v6827_v59, %v16232_v9  ;;  %v7043_v36 = vcombine.high %v7042_v11, %v7042_v11 }
 0x546   :  { %v16398_v61 = vadd.f32 %v18086_v30, %v6233_v18  ;;  %v18087_v63 = vrot.slane %v15917_v17, %v15243_v43  ;;  %12961 = vrsqrt.f32 %v5977_v45  ;;  %v7087_v52 = vcombine.high %v7086_v32, %v7086_v32  ;;  %6683 = vrot.lane.b32.xlu1 %v6680_v49, %s12971_s26  ;;  %v12960_v53 = vpop.eup %12959  ;;  %v12833_v49 = vld [vmem:[%s17862_s11 + $0x20] sm:$0xff]  }
 0x547   :  { %7104 = vst.msk [vmem:[#allocation3 + $0x43] sm:$0x1] %vm6541_vm11, %v16406_v60  ;;  %v18088_v35 = vmax.f32 %v15871_v62, 0.0  ;;  %v18089_v39 = vrot.slane %v15917_v17, %v15270_v48  ;;  %v6897_v18 = vrot.slane %v6884_v2, %v15216_v16  ;;  %6802 = vst.msk [vmem:[#allocation3 + $0xc5] sm:$0x1] %vm6541_vm11, %v16411_v13  ;;  %v16434_v10 = vrot.slane %v7043_v36, %v16232_v9  ;;  %v18091_v2 = vld [vmem:[#allocation25_spill] sm:$0xff] }
 0x548   :  { %v6236_v33 = vmul.f32 %v18087_v63, %v6036_v51  ;;  %6845 = vst.msk [vmem:[#allocation3 + $0xc7] sm:$0x1] %vm6541_vm11, %v16414_v20  ;;  %v18090_v62 = vmax.f32 %v15952_v37, 0.0  ;;  %v16440_v27 = vrot.slane %v7087_v52, %v16232_v9  ;;  %v18092_v29 = vmax.f32 %v18091_v2, 0.0  ;;  %11978 = vmatprep.subr.bf16.mxu0 %v12833_v49 }
 0x549   :  { %v6956_v47 = vrot.slane %v18088_v35, %v16232_v9  ;;  %v6237_v12 = vmul.f32 %v18089_v39, %v6037_v42  ;;  %v18093_v51 = vmax.f32 %v15985_v5, 0.0  ;;  %v6040_v28 = vmul.f32 %v12960_v53, %v16249_v7  ;;  %6900 = vrot.lane.b32.xlu0 %v6897_v18, %s12971_s26  ;;  %7062 = vst.msk [vmem:[#allocation3 + $0xe1] sm:$0x1] %vm6541_vm11, %v16434_v10  ;;  %v12834_v35 = vld [vmem:[%s17862_s11 + $0xa0] sm:$0xff]  }
 0x54a   :  { %v6999_v38 = vrot.slane %v18090_v62, %v16232_v9  ;;  %v7215_v6 = vrot.slane %v18092_v29, %v16232_v9  ;;  %v6940_v37 = vrot.slane %v16353_v50, %v15216_v16  ;;  %v6470_v42 = vmax.f32 %v16371_v58, 0.0  ;;  %7105 = vst.msk [vmem:[#allocation3 + $0xe3] sm:$0x1] %vm6541_vm11, %v16440_v27  ;;  %12074 = vmatprep.subr.bf16.mxu1 %v12834_v35 }
 0x54b   :  { %v16443_v11 = vrot.slane %v6956_v47, %v16232_v9  ;;  %v7259_v57 = vrot.slane %v18093_v51, %v16232_v9  ;;  %v6957_v32 = vcombine.high %v6956_v47, %v6956_v47  ;;  %v6465_v19 = vmax.f32 %v16398_v61, 0.0  ;;  %11979 = vmatpush3.bf16.msra.mxu0 %v12833_v49  ;;  %12075 = vmatpush3.bf16.msra.mxu1 %v12834_v35 }
 0x54c   :  { %v16458_v0 = vrot.slane %v6999_v38, %v16232_v9  ;;  %v16467_v5 = vrot.slane %v7215_v6, %v16232_v9  ;;  %v18094_v50 = vrot.slane %v15924_v31, %v15243_v43  ;;  %6943 = vrot.lane.b32.xlu1 %v6940_v37, %s12971_s26  ;;  %v6806_v59 = vrot.slane %v16379_v8, %v15216_v16 }
 0x54d   :  { %6974 = vst.msk [vmem:[#allocation3 + $0x35] sm:$0x1] %vm6541_vm11, %v16443_v11  ;;  %v16470_v7 = vrot.slane %v7259_v57, %v16232_v9  ;;  %v16483_v30 = vrot.slane %v6957_v32, %v16232_v9  ;;  %v7000_v45 = vcombine.high %v6999_v38, %v6999_v38  ;;  %v18095_v43 = vrot.slane %v15917_v17, %v15240_v22  ;;  %v18099_v38 = vld [vmem:[#allocation14_spill] sm:$0xff]  ;;  %v12969_v32 = vld [vmem:[%s17861_s10 + $0x18] sm:$0xff] }
 0x54e   :  { %v16475_v4 = vadd.f32 %v18094_v50, %v6236_v33  ;;  %7017 = vst.msk [vmem:[#allocation3 + $0x37] sm:$0x1] %vm6541_vm11, %v16458_v0  ;;  %v18096_v63 = vrot.slane %v15924_v31, %v15270_v48  ;;  %7234 = vst.msk [vmem:[#allocation3 + $0x51] sm:$0x1] %vm6541_vm11, %v16467_v5  ;;  %v7216_v8 = vcombine.high %v7215_v6, %v7215_v6  ;;  %6811 = vrot.lane.b32.xlu0 %v6806_v59, %s12971_s26  ;;  %v18106_v17 = vld [vmem:[#allocation18_spill] sm:$0xff] }
 0x54f   :  { %v6239_v36 = vmul.f32 %v18095_v43, %v6039_v55  ;;  %7277 = vst.msk [vmem:[#allocation3 + $0x53] sm:$0x1] %vm6541_vm11, %v16470_v7  ;;  %v7260_v52 = vcombine.high %v7259_v57, %v7259_v57  ;;  %v6240_v55 = vmul.f32 %v6173_v46, %v6040_v28  ;;  %v6849_v48 = vrot.slane %v16382_v14, %v15216_v16  ;;  %v12835_v57 = vld [vmem:[%s17862_s11 + $0x28] sm:$0xff]  }
 0x550   :  { %v16494_v33 = vadd.f32 %v18096_v63, %v6237_v12  ;;  %6975 = vst.msk [vmem:[#allocation3 + $0xd5] sm:$0x1] %vm6541_vm11, %v16483_v30  ;;  %v16512_v47 = vrot.slane %v7000_v45, %v16232_v9  ;;  %v18097_v39 = vmax.f32 %v16000_v44, 0.0  ;;  %v16518_v18 = vrot.slane %v7216_v8, %v16232_v9  ;;  %v12962_v28 = vpop.eup %12961  ;;  %11980 = vmatprep.subr.bf16.mxu0 %v12835_v57 }
 0x551   :  { %v16521_v46 = vrot.slane %v7260_v52, %v16232_v9  ;;  %v18098_v62 = vmax.f32 %v16071_v15, 0.0  ;;  %v18100_v53 = vmax.f32 %v18099_v38, 0.0  ;;  %v6468_v29 = vmax.f32 %v16475_v4, 0.0  ;;  %6854 = vrot.lane.b32.xlu1 %v6849_v48, %s12971_s26  ;;  %11981 = vmatpush3.bf16.msra.mxu0 %v12835_v57 }
 0x552   :  { %v7129_v12 = vrot.slane %v18097_v39, %v16232_v9  ;;  %v7066_v44 = vrot.slane %v16385_v3, %v15216_v16  ;;  %7018 = vst.msk [vmem:[#allocation3 + $0xd7] sm:$0x1] %vm6541_vm11, %v16512_v47  ;;  %v18101_v15 = vmax.f32 %v16093_v56, 0.0  ;;  %v18102_v3 = vrot.slane %v15924_v31, %v15240_v22  ;;  %7235 = vst.msk [vmem:[#allocation3 + $0xf1] sm:$0x1] %vm6541_vm11, %v16518_v18 }
 0x553   :  { %v7172_v14 = vrot.slane %v18098_v62, %v16232_v9  ;;  %v16529_v2 = vrot.slane %v18100_v53, %v16232_v9  ;;  %v6377_v50 = vrot.slane %v12969_v32, %v15293_v24  ;;  %7278 = vst.msk [vmem:[#allocation3 + $0xf3] sm:$0x1] %vm6541_vm11, %v16521_v46  ;;  %v6041_v59 = vmul.f32 %v12962_v28, %v16281_v23  ;;  %v12837_v53 = vld [vmem:[%s17862_s11 + $0x30] sm:$0xff]  }
 0x554   :  { %v16538_v6 = vrot.slane %v7129_v12, %v16232_v9  ;;  %v16543_v51 = vrot.slane %v18101_v15, %v16232_v9  ;;  %v16551_v37 = vadd.f32 %v18102_v3, %v6239_v36  ;;  %7071 = vrot.lane.b32.xlu0 %v7066_v44, %s12971_s26  ;;  %v7109_v45 = vrot.slane %v16406_v60, %v15216_v16  ;;  %v18103_v60 = vld [vmem:[#allocation16_spill] sm:$0xff]  ;;  %v12838_v32 = vld [vmem:[%s17862_s11 + $0xb0] sm:$0xff]  }
 0x555   :  { %v16562_v56 = vrot.slane %v7172_v14, %v16232_v9  ;;  %v16566_v22 = vrot.slane %v16529_v2, %v16232_v9  ;;  %v7130_v36 = vcombine.high %v7129_v12, %v7129_v12  ;;  %v6469_v63 = vmax.f32 %v16494_v33, 0.0  ;;  %v12836_v33 = vld [vmem:[%s17862_s11 + $0xa8] sm:$0xff]   ;;  %11982 = vmatprep.subr.bf16.mxu0 %v12837_v53 }
 0x556   :  { %7147 = vst.msk [vmem:[#allocation3 + $0x45] sm:$0x1] %vm6541_vm11, %v16538_v6  ;;  %v16576_v43 = vrot.slane %v16543_v51, %v16232_v9  ;;  %v16582_v49 = vadd.f32 %v6373_v40, %v6240_v55  ;;  %v7173_v23 = vcombine.high %v7172_v14, %v7172_v14  ;;  %v18104_v8 = vmax.f32 %v18103_v60, 0.0  ;;  %7114 = vrot.lane.b32.xlu1 %v7109_v45, %s12971_s26 }
 0x557   :  { %7190 = vst.msk [vmem:[#allocation3 + $0x47] sm:$0x1] %vm6541_vm11, %v16562_v56  ;;  %7407 = vst.msk [vmem:[#allocation3 + $0x61] sm:$0x1] %vm6541_vm11, %v16566_v22  ;;  %v6241_v25 = vmul.f32 %v6177_v1, %v6041_v59  ;;  %v6810_v31 = vrot.slane %v16411_v13, %v15216_v16  ;;  %v16603_v40 = vrot.slane %v7130_v36, %v16232_v9  ;;  %v18105_v35 = vmax.f32 %v16222_v21, 0.0 }
 0x558   :  { %v7302_v52 = vrot.slane %v18104_v8, %v16232_v9  ;;  %7450 = vst.msk [vmem:[#allocation3 + $0x63] sm:$0x1] %vm6541_vm11, %v16576_v43  ;;  %v16609_v48 = vrot.slane %v7173_v23, %v16232_v9  ;;  %v18107_v1 = vmax.f32 %v18106_v17, 0.0  ;;  %v16622_v39 = vrot.slane %v6467_v26, %v16232_v9  ;;  %12076 = vmatprep.subr.bf16.mxu1 %v12836_v33 }
 0x559   :  { %v7345_v55 = vrot.slane %v18105_v35, %v16232_v9  ;;  %v16624_v12 = vadd.f32 %v6377_v50, %v6241_v25  ;;  %6813 = vrot.lane.b32.xlu0 %v6810_v31, %s12971_s26  ;;  %v6853_v21 = vrot.slane %v16414_v20, %v15216_v16  ;;  %7148 = vst.msk [vmem:[#allocation3 + $0xe5] sm:$0x1] %vm6541_vm11, %v16603_v40  ;;  %v6471_v38 = vmax.f32 %v16551_v37, 0.0 }
 0x55a   :  { %v16612_v24 = vrot.slane %v7302_v52, %v16232_v9  ;;  %v16617_v13 = vrot.slane %v18107_v1, %v16232_v9  ;;  %v7303_v14 = vcombine.high %v7302_v52, %v7302_v52  ;;  %v6472_v34 = vmax.f32 %v16582_v49, 0.0  ;;  %7191 = vst.msk [vmem:[#allocation3 + $0xe7] sm:$0x1] %vm6541_vm11, %v16609_v48  ;;  %12077 = vmatpush3.bf16.msra.mxu1 %v12836_v33  ;;  %v12840_v33 = vld [vmem:[%s17862_s11 + $0xb8] sm:$0xff]  }
 0x55b   :  { %v16632_v62 = vrot.slane %v7345_v55, %v16232_v9  ;;  %v16646_v20 = vrot.slane %v16622_v39, %v16232_v9  ;;  %v6473_v44 = vmax.f32 %v16624_v12, 0.0  ;;  %6856 = vrot.lane.b32.xlu1 %v6853_v21, %s12971_s26  ;;  %v7070_v15 = vrot.slane %v16434_v10, %v15216_v16  ;;  %12078 = vmatprep.subr.bf16.mxu1 %v12838_v32 }
 0x55c   :  { %7320 = vst.msk [vmem:[#allocation3 + $0x55] sm:$0x1] %vm6541_vm11, %v16612_v24  ;;  %v16642_v26 = vrot.slane %v16617_v13, %v16232_v9  ;;  %v16658_v28 = vrot.slane %v7303_v14, %v16232_v9  ;;  %v7346_v3 = vcombine.high %v7345_v55, %v7345_v55  ;;  %v7475_v10 = vrot.slane %v6464_v41, %v16232_v9 }
 0x55d   :  { %7363 = vst.msk [vmem:[#allocation3 + $0x57] sm:$0x1] %vm6541_vm11, %v16632_v62  ;;  %7623 = vst.msk [vmem:[#allocation3 + $0x73] sm:$0x1] %vm6541_vm11, %v16646_v20  ;;  %v7518_v50 = vrot.slane %v6465_v19, %v16232_v9  ;;  %7073 = vrot.lane.b32.xlu0 %v7070_v15, %s12971_s26  ;;  %v7113_v57 = vrot.slane %v16440_v27, %v15216_v16  ;;  %v7648_v54 = vrot.slane %v6468_v29, %v16232_v9 }
 0x55e   :  { %7580 = vst.msk [vmem:[#allocation3 + $0x71] sm:$0x1] %vm6541_vm11, %v16642_v26  ;;  %7321 = vst.msk [vmem:[#allocation3 + $0xf5] sm:$0x1] %vm6541_vm11, %v16658_v28  ;;  %v16679_v59 = vrot.slane %v7346_v3, %v16232_v9  ;;  %v7691_v41 = vrot.slane %v6469_v63, %v16232_v9  ;;  %v16686_v61 = vrot.slane %v7475_v10, %v16232_v9  ;;  %11983 = vmatpush3.bf16.msra.mxu0 %v12837_v53 }
 0x55f   :  { %v16689_v19 = vrot.slane %v7518_v50, %v16232_v9  ;;  %v7389_v27 = vcombine.high %v16529_v2, %v16529_v2  ;;  %v7433_v45 = vcombine.high %v16543_v51, %v16543_v51  ;;  %7116 = vrot.lane.b32.xlu1 %v7113_v57, %s12971_s26  ;;  %v6979_v4 = vrot.slane %v16443_v11, %v15216_v16  ;;  %v12839_v51 = vld [vmem:[%s17862_s11 + $0x38] sm:$0xff]  }
 0x560   :  { %7364 = vst.msk [vmem:[#allocation3 + $0xf7] sm:$0x1] %vm6541_vm11, %v16679_v59  ;;  %v16701_v29 = vrot.slane %v7648_v54, %v16232_v9  ;;  %v16704_v36 = vrot.slane %v7691_v41, %v16232_v9  ;;  %v7476_v63 = vcombine.high %v7475_v10, %v7475_v10  ;;  %7493 = vst.msk [vmem:[#allocation3 + $0x65] sm:$0x1] %vm6541_vm11, %v16686_v61  ;;  %12079 = vmatpush3.bf16.msra.mxu1 %v12838_v32 }
 0x561   :  { %7536 = vst.msk [vmem:[#allocation3 + $0x67] sm:$0x1] %vm6541_vm11, %v16689_v19  ;;  %v16711_v2 = vrot.slane %v7389_v27, %v16232_v9  ;;  %v16714_v11 = vrot.slane %v7433_v45, %v16232_v9  ;;  %6984 = vrot.lane.b32.xlu0 %v6979_v4, %s12971_s26  ;;  %v7022_v23 = vrot.slane %v16458_v0, %v15216_v16 }
 0x562   :  { %7666 = vst.msk [vmem:[#allocation3 + $0x75] sm:$0x1] %vm6541_vm11, %v16701_v29  ;;  %7709 = vst.msk [vmem:[#allocation3 + $0x77] sm:$0x1] %vm6541_vm11, %v16704_v36  ;;  %v16727_v60 = vrot.slane %v7476_v63, %v16232_v9  ;;  %v7519_v8 = vcombine.high %v7518_v50, %v7518_v50  ;;  %v7562_v52 = vcombine.high %v16617_v13, %v16617_v13  ;;  %11984 = vmatprep.subr.bf16.mxu0 %v12839_v51 }
 0x563   :  { %7408 = vst.msk [vmem:[#allocation3 + $0x101] sm:$0x1] %vm6541_vm11, %v16711_v2  ;;  %7451 = vst.msk [vmem:[#allocation3 + $0x103] sm:$0x1] %vm6541_vm11, %v16714_v11  ;;  %v7606_v0 = vcombine.high %v16622_v39, %v16622_v39  ;;  %7027 = vrot.lane.b32.xlu1 %v7022_v23, %s12971_s26  ;;  %v7239_v25 = vrot.slane %v16467_v5, %v15216_v16  ;;  %v7649_v35 = vcombine.high %v7648_v54, %v7648_v54 }
 0x564   :  { %7494 = vst.msk [vmem:[#allocation3 + $0x105] sm:$0x1] %vm6541_vm11, %v16727_v60  ;;  %v16746_v31 = vrot.slane %v7519_v8, %v16232_v9  ;;  %v7692_v55 = vcombine.high %v7691_v41, %v7691_v41  ;;  %v16749_v17 = vrot.slane %v7562_v52, %v16232_v9  ;;  %v7734_v13 = vrot.slane %v6470_v42, %v16232_v9  ;;  %v16870_v41 = vld [vmem:[%s17862_s11] sm:$0xff]  }
 0x565   :  { %v16752_v1 = vrot.slane %v7606_v0, %v16232_v9  ;;  %v7778_v5 = vrot.slane %v6471_v38, %v16232_v9  ;;  %7244 = vrot.lane.b32.xlu0 %v7239_v25, %s12971_s26  ;;  %v7282_v39 = vrot.slane %v16470_v7, %v15216_v16  ;;  %v16766_v21 = vrot.slane %v7649_v35, %v16232_v9 }
 0x566   :  { %7537 = vst.msk [vmem:[#allocation3 + $0x107] sm:$0x1] %vm6541_vm11, %v16746_v31  ;;  %v16769_v14 = vrot.slane %v7692_v55, %v16232_v9  ;;  %v7821_v58 = vrot.slane %v6472_v34, %v16232_v9  ;;  %7581 = vst.msk [vmem:[#allocation3 + $0x111] sm:$0x1] %vm6541_vm11, %v16749_v17  ;;  %v16779_v42 = vrot.slane %v7734_v13, %v16232_v9  ;;  %12080 = vmatprep.subr.bf16.mxu1 %v12840_v33 }
 0x567   :  { %7624 = vst.msk [vmem:[#allocation3 + $0x113] sm:$0x1] %vm6541_vm11, %v16752_v1  ;;  %v16782_v7 = vrot.slane %v7778_v5, %v16232_v9  ;;  %7287 = vrot.lane.b32.xlu1 %v7282_v39, %s12971_s26  ;;  %v6983_v37 = vrot.slane %v16483_v30, %v15216_v16  ;;  %7667 = vst.msk [vmem:[#allocation3 + $0x115] sm:$0x1] %vm6541_vm11, %v16766_v21  ;;  %v7864_v38 = vrot.slane %v6473_v44, %v16232_v9 }
 0x568   :  { %7710 = vst.msk [vmem:[#allocation3 + $0x117] sm:$0x1] %vm6541_vm11, %v16769_v14  ;;  %v16792_v49 = vrot.slane %v7821_v58, %v16232_v9  ;;  %7753 = vst.msk [vmem:[#allocation3 + $0x81] sm:$0x1] %vm6541_vm11, %v16779_v42  ;;  %v7735_v30 = vcombine.high %v7734_v13, %v7734_v13  ;;  %v7779_v34 = vcombine.high %v7778_v5, %v7778_v5  ;;  %11985 = vmatpush3.bf16.msra.mxu0 %v12839_v51 }
 0x569   :  { %7796 = vst.msk [vmem:[#allocation3 + $0x83] sm:$0x1] %vm6541_vm11, %v16782_v7  ;;  %6986 = vrot.lane.b32.xlu0 %v6983_v37, %s12971_s26  ;;  %v7026_v53 = vrot.slane %v16512_v47, %v15216_v16  ;;  %v16807_v12 = vrot.slane %v7864_v38, %v16232_v9  ;;  %v7822_v44 = vcombine.high %v7821_v58, %v7821_v58 }
 0x56a   :  { %7839 = vst.msk [vmem:[#allocation3 + $0x85] sm:$0x1] %vm6541_vm11, %v16792_v49  ;;  %v7865_v15 = vcombine.high %v7864_v38, %v7864_v38  ;;  %v16810_v3 = vrot.slane %v7735_v30, %v16232_v9  ;;  %v16813_v32 = vrot.slane %v7779_v34, %v16232_v9  ;;  %12081 = vmatpush3.bf16.msra.mxu1 %v12840_v33 }
 0x56b   :  { %7029 = vrot.lane.b32.xlu1 %v7026_v53, %s12971_s26  ;;  %v7243_v47 = vrot.slane %v16518_v18, %v15216_v16  ;;  %7882 = vst.msk [vmem:[#allocation3 + $0x87] sm:$0x1] %vm6541_vm11, %v16807_v12  ;;  %v16821_v10 = vrot.slane %v7822_v44, %v16232_v9  ;;  %v7286_v18 = vrot.slane %v16521_v46, %v15216_v16 }
 0x56c   :  { %v16824_v50 = vrot.slane %v7865_v15, %v16232_v9  ;;  %7754 = vst.msk [vmem:[#allocation3 + $0x121] sm:$0x1] %vm6541_vm11, %v16810_v3  ;;  %7797 = vst.msk [vmem:[#allocation3 + $0x123] sm:$0x1] %vm6541_vm11, %v16813_v32  ;;  %v7152_v9 = vrot.slane %v16538_v6, %v15216_v16  ;;  %v7195_v57 = vrot.slane %v16562_v56, %v15216_v16  ;;  %12002 = vmatprep.subr.bf16.mxu0 %v16870_v41 }
 0x56d   :  { %7246 = vrot.lane.b32.xlu0 %v7243_v47, %s12971_s26  ;;  %7840 = vst.msk [vmem:[#allocation3 + $0x125] sm:$0x1] %vm6541_vm11, %v16821_v10  ;;  %v7412_v46 = vrot.slane %v16566_v22, %v15216_v16  ;;  %v7455_v54 = vrot.slane %v16576_v43, %v15216_v16  ;;  %v7156_v6 = vrot.slane %v16603_v40, %v15216_v16 }
 0x56e   :  { %7883 = vst.msk [vmem:[#allocation3 + $0x127] sm:$0x1] %vm6541_vm11, %v16824_v50  ;;  %v7199_v56 = vrot.slane %v16609_v48, %v15216_v16  ;;  %v7325_v22 = vrot.slane %v16612_v24, %v15216_v16  ;;  %v7368_v43 = vrot.slane %v16632_v62, %v15216_v16  ;;  %v7585_v40 = vrot.slane %v16642_v26, %v15216_v16  ;;  %v16875_v24 = vld [vmem:[%s17862_s11 + $0x80] sm:$0xff]  }
 0x56f   :  { %7289 = vrot.lane.b32.xlu1 %v7286_v18, %s12971_s26  ;;  %v7628_v48 = vrot.slane %v16646_v20, %v15216_v16  ;;  %v7329_v62 = vrot.slane %v16658_v28, %v15216_v16  ;;  %12098 = vmatprep.subr.bf16.mxu1 %v16875_v24  ;;  %v7372_v26 = vrot.slane %v16679_v59, %v15216_v16 }
 0x570   :  { %v7498_v20 = vrot.slane %v16686_v61, %v15216_v16  ;;  %v7541_v27 = vrot.slane %v16689_v19, %v15216_v16  ;;  %v7671_v28 = vrot.slane %v16701_v29, %v15216_v16  ;;  %v7714_v59 = vrot.slane %v16704_v36, %v15216_v16 }
 0x571   :  { %7157 = vrot.lane.b32.xlu0 %v7152_v9, %s12971_s26  ;;  %v7416_v61 = vrot.slane %v16711_v2, %v15216_v16  ;;  %v7459_v19 = vrot.slane %v16714_v11, %v15216_v16  ;;  %v7502_v45 = vrot.slane %v16727_v60, %v15216_v16  ;;  %v7545_v4 = vrot.slane %v16746_v31, %v15216_v16 }
 0x572   :  { %v7589_v29 = vrot.slane %v16749_v17, %v15216_v16  ;;  %v7632_v36 = vrot.slane %v16752_v1, %v15216_v16  ;;  %v7675_v63 = vrot.slane %v16766_v21, %v15216_v16  ;;  %v7718_v2 = vrot.slane %v16769_v14, %v15216_v16 }
 0x573   :  { %7200 = vrot.lane.b32.xlu1 %v7195_v57, %s12971_s26  ;;  %v7758_v11 = vrot.slane %v16779_v42, %v15216_v16  ;;  %v7801_v51 = vrot.slane %v16782_v7, %v15216_v16  ;;  %v7844_v60 = vrot.slane %v16792_v49, %v15216_v16  ;;  %v7887_v52 = vrot.slane %v16807_v12, %v15216_v16  ;;  %v7924_v42 = vld [vmem:[#allocation3 + $0x1] sm:$0xff] }
 0x574   :  { %v7762_v33 = vrot.slane %v16810_v3, %v15216_v16  ;;  %v7805_v31 = vrot.slane %v16813_v32, %v15216_v16  ;;  %v7848_v55 = vrot.slane %v16821_v10, %v15216_v16  ;;  %v7891_v1 = vrot.slane %v16824_v50, %v15216_v16  ;;  %v7948_v7 = vld [vmem:[#allocation3 + $0x2] sm:$0xff] }
 0x575   :  { %7417 = vrot.lane.b32.xlu0 %v7412_v46, %s12971_s26 }
 0x577   :  { %7460 = vrot.lane.b32.xlu1 %v7455_v54, %s12971_s26 }
 0x579   :  { %7159 = vrot.lane.b32.xlu0 %v7156_v6, %s12971_s26 }
 0x57b   :  { %7202 = vrot.lane.b32.xlu1 %v7199_v56, %s12971_s26 }
 0x57d   :  { %7330 = vrot.lane.b32.xlu0 %v7325_v22, %s12971_s26 }
 0x57f   :  { %7373 = vrot.lane.b32.xlu1 %v7368_v43, %s12971_s26 }
 0x581   :  { %7590 = vrot.lane.b32.xlu0 %v7585_v40, %s12971_s26 }
 0x583   :  { %7633 = vrot.lane.b32.xlu1 %v7628_v48, %s12971_s26 }
 0x585   :  { %7332 = vrot.lane.b32.xlu0 %v7329_v62, %s12971_s26 }
 0x587   :  { %7375 = vrot.lane.b32.xlu1 %v7372_v26, %s12971_s26 }
 0x589   :  { %7503 = vrot.lane.b32.xlu0 %v7498_v20, %s12971_s26 }
 0x58b   :  { %7546 = vrot.lane.b32.xlu1 %v7541_v27, %s12971_s26 }
 0x58d   :  { %7676 = vrot.lane.b32.xlu0 %v7671_v28, %s12971_s26 }
 0x58f   :  { %7719 = vrot.lane.b32.xlu1 %v7714_v59, %s12971_s26 }
 0x591   :  { %7419 = vrot.lane.b32.xlu0 %v7416_v61, %s12971_s26 }
 0x593   :  { %7462 = vrot.lane.b32.xlu1 %v7459_v19, %s12971_s26  ;;  %v12843_v19 = vld [vmem:[%s17862_s11 + $0x8] sm:$0xff]  }
 0x595   :  { %7505 = vrot.lane.b32.xlu0 %v7502_v45, %s12971_s26  ;;  %v12844_v45 = vld [vmem:[%s17862_s11 + $0x88] sm:$0xff]  }
 0x597   :  { %7548 = vrot.lane.b32.xlu1 %v7545_v4, %s12971_s26 }
 0x599   :  { %7592 = vrot.lane.b32.xlu0 %v7589_v29, %s12971_s26  ;;  %v6553_v23 = vpop.permute.xlu0 %6552 }
 0x59a   :  { %6558 = vst.msk [vmem:[#allocation3 + $0x12] sm:$0x1] %vm6541_vm11, %v6553_v23 }
 0x59b   :  { %7635 = vrot.lane.b32.xlu1 %v7632_v36, %s12971_s26  ;;  %v12845_v36 = vld [vmem:[%s17862_s11 + $0x10] sm:$0xff]  }
 0x59d   :  { %7678 = vrot.lane.b32.xlu0 %v7675_v63, %s12971_s26  ;;  %v12846_v63 = vld [vmem:[%s17862_s11 + $0x90] sm:$0xff]  }
 0x59e   :  { %v6596_v8 = vpop.permute.xlu1 %6595  ;;  %v6726_v0 = vpop.permute.xlu0 %6725 }
 0x59f   :  { %7721 = vrot.lane.b32.xlu1 %v7718_v2, %s12971_s26  ;;  %6601 = vst.msk [vmem:[#allocation3 + $0x14] sm:$0x1] %vm6541_vm11, %v6596_v8  ;;  %6731 = vst.msk [vmem:[#allocation3 + $0x22] sm:$0x1] %vm6541_vm11, %v6726_v0  ;;  %v17032_v8 = vld [vmem:[%s17862_s11 + $0xc0] sm:$0xff]  }
 0x5a1   :  { %7763 = vrot.lane.b32.xlu0 %v7758_v11, %s12971_s26 }
 0x5a2   :  { %v6555_v35 = vpop.permute.xlu0 %6554 }
 0x5a3   :  { %7806 = vrot.lane.b32.xlu1 %v7801_v51, %s12971_s26  ;;  %v6769_v25 = vpop.permute.xlu1 %6768  ;;  %6559 = vst.msk [vmem:[#allocation3 + $0xb2] sm:$0x1] %vm6541_vm11, %v6555_v35 }
 0x5a4   :  { %6774 = vst.msk [vmem:[#allocation3 + $0x24] sm:$0x1] %vm6541_vm11, %v6769_v25 }
 0x5a5   :  { %7849 = vrot.lane.b32.xlu0 %v7844_v60, %s12971_s26  ;;  %v17027_v60 = vld [vmem:[%s17862_s11 + $0x40] sm:$0xff]  }
 0x5a7   :  { %7892 = vrot.lane.b32.xlu1 %v7887_v52, %s12971_s26  ;;  %v6598_v17 = vpop.permute.xlu1 %6597 }
 0x5a8   :  { %6602 = vst.msk [vmem:[#allocation3 + $0xb4] sm:$0x1] %vm6541_vm11, %v6598_v17 }
 0x5a9   :  { %7765 = vrot.lane.b32.xlu0 %v7762_v33, %s12971_s26  ;;  %v6728_v13 = vpop.permute.xlu0 %6727 }
 0x5aa   :  { %6732 = vst.msk [vmem:[#allocation3 + $0xc2] sm:$0x1] %vm6541_vm11, %v6728_v13 }
 0x5ab   :  { %7808 = vrot.lane.b32.xlu1 %v7805_v31, %s12971_s26  ;;  %v6771_v5 = vpop.permute.xlu1 %6770 }
 0x5ac   :  { %6775 = vst.msk [vmem:[#allocation3 + $0xc4] sm:$0x1] %vm6541_vm11, %v6771_v5 }
 0x5ad   :  { %7851 = vrot.lane.b32.xlu0 %v7848_v55, %s12971_s26  ;;  %v6639_v39 = vpop.permute.xlu0 %6638 }
 0x5ae   :  { %6644 = vst.msk [vmem:[#allocation3 + $0x16] sm:$0x1] %vm6541_vm11, %v6639_v39 }
 0x5af   :  { %7894 = vrot.lane.b32.xlu1 %v7891_v1, %s12971_s26  ;;  %v6682_v21 = vpop.permute.xlu1 %6681 }
 0x5b0   :  { %6687 = vst.msk [vmem:[#allocation3 + $0x18] sm:$0x1] %vm6541_vm11, %v6682_v21 }
 0x5b1   :  { %v6899_v14 = vpop.permute.xlu0 %6898 }
 0x5b2   :  { %6904 = vst.msk [vmem:[#allocation3 + $0x32] sm:$0x1] %vm6541_vm11, %v6899_v14 }
 0x5b4   :  { %v6942_v16 = vpop.permute.xlu1 %6941 }
 0x5b5   :  { %6947 = vst.msk [vmem:[#allocation3 + $0x34] sm:$0x1] %vm6541_vm11, %v6942_v16 }
 0x5b6   :  { %v6641_v58 = vpop.permute.xlu0 %6640 }
 0x5b7   :  { %6645 = vst.msk [vmem:[#allocation3 + $0xb6] sm:$0x1] %vm6541_vm11, %v6641_v58  ;;  %v7925_v49 = vld [vmem:[#allocation3 + $0x11] sm:$0xff] }
 0x5b8   :  { %v6684_v37 = vpop.permute.xlu1 %6683  ;;  %v7949_v38 = vld [vmem:[#allocation3 + $0x12] sm:$0xff]  ;;  %v16960_v30 = vpack.c.bf16 %v7925_v49, %v7924_v42 }
 0x5b9   :  { %6688 = vst.msk [vmem:[#allocation3 + $0xb8] sm:$0x1] %vm6541_vm11, %v6684_v37  ;;  %v7964_v34 = vpack.c.bf16 %v7949_v38, %v7948_v7 }
 0x5ba   :  { %11986 = vmatprep.mubr.msk.bf16.mxu0 %vm6474_vm10, %v16960_v30 }
 0x5bb   :  { %v6901_v53 = vpop.permute.xlu0 %6900  ;;  %12082 = vmatprep.mubr.msk.bf16.mxu1 %vm6474_vm10, %v7964_v34 }
 0x5bc   :  { %6905 = vst.msk [vmem:[#allocation3 + $0xd2] sm:$0x1] %vm6541_vm11, %v6901_v53 }
 0x5be   :  { %v6944_v12 = vpop.permute.xlu1 %6943 }
 0x5bf   :  { %6948 = vst.msk [vmem:[#allocation3 + $0xd4] sm:$0x1] %vm6541_vm11, %v6944_v12 }
 0x5c0   :  { %v6812_v44 = vpop.permute.xlu0 %6811  ;;  %v16980_v22 = vld [vmem:[#allocation3 + $0xb2] sm:$0xff] }
 0x5c1   :  { %6817 = vst.msk [vmem:[#allocation3 + $0x26] sm:$0x1] %vm6541_vm11, %v6812_v44 }
 0x5c3   :  { %v6855_v15 = vpop.permute.xlu1 %6854 }
 0x5c4   :  { %6860 = vst.msk [vmem:[#allocation3 + $0x28] sm:$0x1] %vm6541_vm11, %v6855_v15 }
 0x5c6   :  { %v7072_v3 = vpop.permute.xlu0 %7071 }
 0x5c7   :  { %7077 = vst.msk [vmem:[#allocation3 + $0x42] sm:$0x1] %vm6541_vm11, %v7072_v3 }
 0x5c8   :  { %v7115_v32 = vpop.permute.xlu1 %7114 }
 0x5c9   :  { %7120 = vst.msk [vmem:[#allocation3 + $0x44] sm:$0x1] %vm6541_vm11, %v7115_v32 }
 0x5cb   :  { %v6814_v47 = vpop.permute.xlu0 %6813  ;;  %v7926_v50 = vld [vmem:[#allocation3 + $0x21] sm:$0xff] }
 0x5cc   :  { %6818 = vst.msk [vmem:[#allocation3 + $0xc6] sm:$0x1] %vm6541_vm11, %v6814_v47  ;;  %v7950_v18 = vld [vmem:[#allocation3 + $0x22] sm:$0xff]  ;;  %v16973_v9 = vpack.c.bf16 %v7926_v50, %v7925_v49 }
 0x5cd   :  { %v6857_v10 = vpop.permute.xlu1 %6856  ;;  %v16975_v57 = vpack.c.bf16 %v7950_v18, %v7949_v38  ;;  %v7932_v47 = vld [vmem:[#allocation3 + $0xa1] sm:$0xff] }
 0x5ce   :  { %6861 = vst.msk [vmem:[#allocation3 + $0xc8] sm:$0x1] %vm6541_vm11, %v6857_v10  ;;  %v17073_v10 = vld [vmem:[#allocation3 + $0xb1] sm:$0xff] }
 0x5cf   :  { %v7074_v46 = vpop.permute.xlu0 %7073 }
 0x5d0   :  { %7078 = vst.msk [vmem:[#allocation3 + $0xe2] sm:$0x1] %vm6541_vm11, %v7074_v46 }
 0x5d1   :  { %v7117_v54 = vpop.permute.xlu1 %7116 }
 0x5d2   :  { %7121 = vst.msk [vmem:[#allocation3 + $0xe4] sm:$0x1] %vm6541_vm11, %v7117_v54 }
 0x5d3   :  { %v6985_v6 = vpop.permute.xlu0 %6984 }
 0x5d4   :  { %6990 = vst.msk [vmem:[#allocation3 + $0x36] sm:$0x1] %vm6541_vm11, %v6985_v6 }
 0x5d5   :  { %v7028_v56 = vpop.permute.xlu1 %7027  ;;  %v16982_v43 = vld [vmem:[#allocation3 + $0xc2] sm:$0xff] }
 0x5d6   :  { %7033 = vst.msk [vmem:[#allocation3 + $0x38] sm:$0x1] %vm6541_vm11, %v7028_v56  ;;  %v16987_v40 = vpack.c.bf16 %v16982_v43, %v16980_v22 }
 0x5d7   :  { %v7245_v48 = vpop.permute.xlu0 %7244 }
 0x5d8   :  { %7250 = vst.msk [vmem:[#allocation3 + $0x52] sm:$0x1] %vm6541_vm11, %v7245_v48 }
 0x5d9   :  { %v7288_v62 = vpop.permute.xlu1 %7287 }
 0x5da   :  { %7293 = vst.msk [vmem:[#allocation3 + $0x54] sm:$0x1] %vm6541_vm11, %v7288_v62 }
 0x5db   :  { %v6987_v26 = vpop.permute.xlu0 %6986 }
 0x5dc   :  { %6991 = vst.msk [vmem:[#allocation3 + $0xd6] sm:$0x1] %vm6541_vm11, %v6987_v26  ;;  %v17088_v26 = vpack.c.bf16 %v17073_v10, %v7932_v47 }
 0x5dd   :  { %v7030_v20 = vpop.permute.xlu1 %7029  ;;  %v7927_v27 = vld [vmem:[#allocation3 + $0x31] sm:$0xff] }
 0x5de   :  { %v7951_v28 = vld [vmem:[#allocation3 + $0x32] sm:$0xff]  ;;  %7034 = vst.msk [vmem:[#allocation3 + $0xd8] sm:$0x1] %vm6541_vm11, %v7030_v20  ;;  %v16993_v59 = vpack.c.bf16 %v7927_v27, %v7926_v50  ;;  %v7956_v50 = vld [vmem:[#allocation3 + $0xa2] sm:$0xff] }
 0x5df   :  { %v7965_v61 = vpack.c.bf16 %v7951_v28, %v7950_v18  ;;  %v7247_v4 = vpop.permute.xlu0 %7246  ;;  %v7968_v20 = vpack.c.bf16 %v16980_v22, %v7956_v50 }
 0x5e0   :  { %11987 = vmatmul.mubr.msk.bf16.vlgmr.msra.gmra.mrb[76].mxu0 %vm6474_vm10, %v16993_v59  ;;  %7251 = vst.msk [vmem:[#allocation3 + $0xf2] sm:$0x1] %vm6541_vm11, %v7247_v4  ;;  %v17104_v4 = vld [vmem:[#allocation3 + $0xc1] sm:$0xff] }
 0x5e1   :  { %12083 = vmatmul.mubr.msk.bf16.vlgmr.msra.gmra.mrb[68].mxu1 %vm6474_vm10, %v7965_v61  ;;  %v7290_v29 = vpop.permute.xlu1 %7289  ;;  %12003 = vmatpush3.bf16.msra.mxu0 %v16870_v41  ;;  %v12847_v41 = vld [vmem:[%s17862_s11 + $0x18] sm:$0xff]  }
 0x5e2   :  { %12099 = vmatpush3.bf16.msra.mxu1 %v16875_v24  ;;  %7294 = vst.msk [vmem:[#allocation3 + $0xf4] sm:$0x1] %vm6541_vm11, %v7290_v29  ;;  %12004 = vmatprep.subr.bf16.mxu0 %v12843_v19  ;;  %v12848_v24 = vld [vmem:[%s17862_s11 + $0x98] sm:$0xff]  }
 0x5e3   :  { %12100 = vmatprep.subr.bf16.mxu1 %v12844_v45  ;;  %v7158_v2 = vpop.permute.xlu0 %7157 }
 0x5e4   :  { %7163 = vst.msk [vmem:[#allocation3 + $0x46] sm:$0x1] %vm6541_vm11, %v7158_v2 }
 0x5e5   :  { %v7201_v11 = vpop.permute.xlu1 %7200  ;;  %12005 = vmatpush3.bf16.msra.mxu0 %v12843_v19  ;;  %v17045_v5 = vld [vmem:[#allocation3 + $0xd2] sm:$0xff] }
 0x5e6   :  { %12101 = vmatpush3.bf16.msra.mxu1 %v12844_v45  ;;  %7206 = vst.msk [vmem:[#allocation3 + $0x48] sm:$0x1] %vm6541_vm11, %v7201_v11  ;;  %12006 = vmatprep.subr.bf16.mxu0 %v12845_v36  ;;  %v17099_v61 = vld [vmem:[#allocation3 + $0xd1] sm:$0xff] }
 0x5e7   :  { %12102 = vmatprep.subr.bf16.mxu1 %v12846_v63  ;;  %v7418_v51 = vpop.permute.xlu0 %7417 }
 0x5e8   :  { %7423 = vst.msk [vmem:[#allocation3 + $0x62] sm:$0x1] %vm6541_vm11, %v7418_v51 }
 0x5e9   :  { %v7461_v23 = vpop.permute.xlu1 %7460  ;;  %12007 = vmatpush3.bf16.msra.mxu0 %v12845_v36  ;;  %v7969_v36 = vpack.c.bf16 %v17045_v5, %v16982_v43 }
 0x5ea   :  { %12103 = vmatpush3.bf16.msra.mxu1 %v12846_v63  ;;  %7466 = vst.msk [vmem:[#allocation3 + $0x64] sm:$0x1] %vm6541_vm11, %v7461_v23  ;;  %12008 = vmatprep.subr.bf16.mxu0 %v12847_v41  ;;  %v17111_v63 = vpack.c.bf16 %v17099_v61, %v17104_v4 }
 0x5eb   :  { %12104 = vmatprep.subr.bf16.mxu1 %v12848_v24  ;;  %v7160_v52 = vpop.permute.xlu0 %7159 }
 0x5ec   :  { %7164 = vst.msk [vmem:[#allocation3 + $0xe6] sm:$0x1] %vm6541_vm11, %v7160_v52  ;;  %v7900_v52 = vld [vmem:[#allocation3] sm:$0xff] }
 0x5ed   :  { %v7203_v0 = vpop.permute.xlu1 %7202  ;;  %v7928_v33 = vld [vmem:[#allocation3 + $0x41] sm:$0xff]  ;;  %12009 = vmatpush3.bf16.msra.mxu0 %v12847_v41 }
 0x5ee   :  { %v7952_v25 = vld [vmem:[#allocation3 + $0x42] sm:$0xff]  ;;  %12105 = vmatpush3.bf16.msra.mxu1 %v12848_v24  ;;  %7207 = vst.msk [vmem:[#allocation3 + $0xe8] sm:$0x1] %vm6541_vm11, %v7203_v0  ;;  %12026 = vmatprep.subr.bf16.mxu0 %v17027_v60  ;;  %v17038_v31 = vpack.c.bf16 %v7928_v33, %v7927_v27  ;;  %v17131_v0 = vld [vmem:[#allocation3 + $0x10] sm:$0xff] }
 0x5ef   :  { %12122 = vmatprep.subr.bf16.mxu1 %v17032_v8  ;;  %v17040_v35 = vpack.c.bf16 %v7952_v25, %v7951_v28  ;;  %v7331_v55 = vpop.permute.xlu0 %7330 }
 0x5f0   :  { %7336 = vst.msk [vmem:[#allocation3 + $0x56] sm:$0x1] %vm6541_vm11, %v7331_v55 }
 0x5f1   :  { %v7374_v17 = vpop.permute.xlu1 %7373 }
 0x5f2   :  { %7379 = vst.msk [vmem:[#allocation3 + $0x58] sm:$0x1] %vm6541_vm11, %v7374_v17 }
 0x5f3   :  { %v7591_v1 = vpop.permute.xlu0 %7590 }
 0x5f4   :  { %7596 = vst.msk [vmem:[#allocation3 + $0x72] sm:$0x1] %vm6541_vm11, %v7591_v1 }
 0x5f5   :  { %v7634_v13 = vpop.permute.xlu1 %7633  ;;  %v17047_v39 = vld [vmem:[#allocation3 + $0xe2] sm:$0xff] }
 0x5f6   :  { %7639 = vst.msk [vmem:[#allocation3 + $0x74] sm:$0x1] %vm6541_vm11, %v7634_v13  ;;  %v17052_v21 = vpack.c.bf16 %v17047_v39, %v17045_v5  ;;  %v17113_v2 = vld [vmem:[#allocation3 + $0xe1] sm:$0xff] }
 0x5f7   :  { %v7333_v14 = vpop.permute.xlu0 %7332 }
 0x5f8   :  { %7337 = vst.msk [vmem:[#allocation3 + $0xf6] sm:$0x1] %vm6541_vm11, %v7333_v14 }
 0x5f9   :  { %v7376_v16 = vpop.permute.xlu1 %7375  ;;  %v17055_v58 = vld [vmem:[#allocation3 + $0x51] sm:$0xff] }
 0x5fa   :  { %v7953_v42 = vld [vmem:[#allocation3 + $0x52] sm:$0xff]  ;;  %7380 = vst.msk [vmem:[#allocation3 + $0xf8] sm:$0x1] %vm6541_vm11, %v7376_v16  ;;  %v17059_v7 = vpack.c.bf16 %v17055_v58, %v7928_v33 }
 0x5fb   :  { %v7966_v37 = vpack.c.bf16 %v7953_v42, %v7952_v25  ;;  %v7504_v49 = vpop.permute.xlu0 %7503 }
 0x5fc   :  { %11990 = vmatprep.mubr.msk.bf16.mxu0 %vm6474_vm10, %v17059_v7  ;;  %7509 = vst.msk [vmem:[#allocation3 + $0x66] sm:$0x1] %vm6541_vm11, %v7504_v49  ;;  %v7902_v49 = vld [vmem:[#allocation3 + $0x20] sm:$0xff] }
 0x5fd   :  { %12086 = vmatprep.mubr.msk.bf16.mxu1 %vm6474_vm10, %v7966_v37  ;;  %v7547_v38 = vpop.permute.xlu1 %7546 }
 0x5fe   :  { %7552 = vst.msk [vmem:[#allocation3 + $0x68] sm:$0x1] %vm6541_vm11, %v7547_v38  ;;  %v17157_v38 = vld [vmem:[#allocation3 + $0x50] sm:$0xff] }
 0x5ff   :  { %v7677_v34 = vpop.permute.xlu0 %7676 }
 0x600   :  { %7682 = vst.msk [vmem:[#allocation3 + $0x76] sm:$0x1] %vm6541_vm11, %v7677_v34 }
 0x601   :  { %v7720_v53 = vpop.permute.xlu1 %7719  ;;  %v17102_v22 = vld [vmem:[#allocation3 + $0xf1] sm:$0xff] }
 0x602   :  { %7725 = vst.msk [vmem:[#allocation3 + $0x78] sm:$0x1] %vm6541_vm11, %v7720_v53  ;;  %v7961_v19 = vld [vmem:[#allocation3 + $0xf2] sm:$0xff]  ;;  %v17119_v24 = vpack.c.bf16 %v17102_v22, %v17113_v2  ;;  %v7904_v53 = vld [vmem:[#allocation3 + $0x40] sm:$0xff] }
 0x603   :  { %v7420_v12 = vpop.permute.xlu0 %7419  ;;  %v7970_v51 = vpack.c.bf16 %v7961_v19, %v17047_v39  ;;  %v7916_v39 = vpack.c.bf16 %v17131_v0, %v7900_v52  ;;  %v7906_v47 = vld [vmem:[#allocation3 + $0x60] sm:$0xff]  ;;  %v12859_v52 = vld [vmem:[%s17862_s11 + $0x68] sm:$0xff]  }
 0x604   :  { %7424 = vst.msk [vmem:[#allocation3 + $0x102] sm:$0x1] %vm6541_vm11, %v7420_v12  ;;  %v12852_v12 = vld [vmem:[%s17862_s11 + $0xc8] sm:$0xff]  }
 0x605   :  { %v7463_v44 = vpop.permute.xlu1 %7462  ;;  %v7954_v15 = vld [vmem:[#allocation3 + $0x62] sm:$0xff] }
 0x606   :  { %7467 = vst.msk [vmem:[#allocation3 + $0x104] sm:$0x1] %vm6541_vm11, %v7463_v44  ;;  %v17070_v3 = vpack.c.bf16 %v7954_v15, %v7953_v42  ;;  %v17075_v46 = vld [vmem:[#allocation3 + $0x61] sm:$0xff]  ;;  %v17154_v42 = vld [vmem:[#allocation3 + $0x30] sm:$0xff]  ;;  %v17174_v44 = vpack.c.bf16 %v17157_v38, %v7904_v53 }
 0x607   :  { %v7506_v32 = vpop.permute.xlu0 %7505  ;;  %v17161_v34 = vpack.c.bf16 %v17154_v42, %v7902_v49 }
 0x608   :  { %7510 = vst.msk [vmem:[#allocation3 + $0x106] sm:$0x1] %vm6541_vm11, %v7506_v32  ;;  %v17188_v32 = vld [vmem:[#allocation3 + $0x70] sm:$0xff] }
 0x609   :  { %v7549_v18 = vpop.permute.xlu1 %7548  ;;  %v17077_v54 = vld [vmem:[#allocation3 + $0x71] sm:$0xff] }
 0x60a   :  { %v17079_v6 = vld [vmem:[#allocation3 + $0x72] sm:$0xff]  ;;  %7553 = vst.msk [vmem:[#allocation3 + $0x108] sm:$0x1] %vm6541_vm11, %v7549_v18  ;;  %v17084_v56 = vpack.c.bf16 %v17077_v54, %v17075_v46 }
 0x60b   :  { %v7967_v48 = vpack.c.bf16 %v17079_v6, %v7954_v15  ;;  %v7593_v62 = vpop.permute.xlu0 %7592  ;;  %v12853_v15 = vld [vmem:[%s17862_s11 + $0x50] sm:$0xff]   ;;  %v12855_v18 = vld [vmem:[%s17862_s11 + $0x58] sm:$0xff]  }
 0x60c   :  { %11991 = vmatmul.mubr.msk.bf16.gmra.mrb[80].mxu0 %vm6474_vm10, %v17084_v56  ;;  %7597 = vst.msk [vmem:[#allocation3 + $0x112] sm:$0x1] %vm6541_vm11, %v7593_v62  ;;  %v17209_v62 = vld [vmem:[#allocation3 + $0xd0] sm:$0xff] }
 0x60d   :  { %12087 = vmatmul.mubr.msk.bf16.gmra.mrb[72].mxu1 %vm6474_vm10, %v7967_v48  ;;  %v7636_v27 = vpop.permute.xlu1 %7635  ;;  %11994 = vmatprep.mubr.msk.bf16.mxu0 %vm6474_vm10, %v17088_v26  ;;  %v12856_v48 = vld [vmem:[%s17862_s11 + $0xd8] sm:$0xff]  }
 0x60e   :  { %12090 = vmatprep.mubr.msk.bf16.mxu1 %vm6474_vm10, %v7968_v20  ;;  %7640 = vst.msk [vmem:[#allocation3 + $0x114] sm:$0x1] %vm6541_vm11, %v7636_v27  ;;  %v12857_v20 = vld [vmem:[%s17862_s11 + $0x60] sm:$0xff]  }
 0x60f   :  { %v7679_v28 = vpop.permute.xlu0 %7678  ;;  %v12858_v27 = vld [vmem:[%s17862_s11 + $0xe0] sm:$0xff]  }
 0x610   :  { %7683 = vst.msk [vmem:[#allocation3 + $0x116] sm:$0x1] %vm6541_vm11, %v7679_v28  ;;  %v7913_v28 = vld [vmem:[#allocation3 + $0xf0] sm:$0xff] }
 0x611   :  { %v7722_v45 = vpop.permute.xlu1 %7721  ;;  %v7962_v29 = vld [vmem:[#allocation3 + $0x102] sm:$0xff] }
 0x612   :  { %7726 = vst.msk [vmem:[#allocation3 + $0x118] sm:$0x1] %vm6541_vm11, %v7722_v45  ;;  %v17115_v11 = vpack.c.bf16 %v7962_v29, %v7961_v19  ;;  %v17135_v55 = vld [vmem:[#allocation3 + $0x101] sm:$0xff] }
 0x613   :  { %v7764_v41 = vpop.permute.xlu0 %7763  ;;  %v7910_v19 = vld [vmem:[#allocation3 + $0xc0] sm:$0xff] }
 0x614   :  { %7769 = vst.msk [vmem:[#allocation3 + $0x82] sm:$0x1] %vm6541_vm11, %v7764_v41  ;;  %11995 = vmatmul.mubr.msk.bf16.gmra.mrb[84].mxu0 %vm6474_vm10, %v17111_v63  ;;  %v17218_v45 = vpack.c.bf16 %v17209_v62, %v7910_v19  ;;  %v7914_v41 = vld [vmem:[#allocation3 + $0x100] sm:$0xff] }
 0x615   :  { %12091 = vmatmul.mubr.msk.bf16.gmra.mrb[76].mxu1 %vm6474_vm10, %v7969_v36  ;;  %v7807_v43 = vpop.permute.xlu1 %7806  ;;  %11998 = vmatprep.mubr.msk.bf16.mxu0 %vm6474_vm10, %v17119_v24 }
 0x616   :  { %12094 = vmatprep.mubr.msk.bf16.mxu1 %vm6474_vm10, %v7970_v51  ;;  %7812 = vst.msk [vmem:[#allocation3 + $0x84] sm:$0x1] %vm6541_vm11, %v7807_v43  ;;  %v17233_v43 = vpack.c.bf16 %v7902_v49, %v17131_v0  ;;  %v12860_v0 = vld [vmem:[%s17862_s11 + $0xe8] sm:$0xff]   ;;  %v12863_v49 = vld [vmem:[%s17862_s11 + $0x78] sm:$0xff]  }
 0x617   :  { %v7850_v23 = vpop.permute.xlu0 %7849  ;;  %v7915_v36 = vld [vmem:[#allocation3 + $0x110] sm:$0xff] }
 0x618   :  { %7855 = vst.msk [vmem:[#allocation3 + $0x86] sm:$0x1] %vm6541_vm11, %v7850_v23  ;;  %v17230_v51 = vpack.c.bf16 %v7915_v36, %v7914_v41  ;;  %v17244_v23 = vpack.c.bf16 %v7904_v53, %v17154_v42  ;;  %v17317_v53 = vpack.c.bf16 %v17113_v2, %v17099_v61 }
 0x619   :  { %v7893_v33 = vpop.permute.xlu1 %7892  ;;  %v17133_v25 = vld [vmem:[#allocation3 + $0x112] sm:$0xff] }
 0x61a   :  { %v17137_v17 = vld [vmem:[#allocation3 + $0x111] sm:$0xff]  ;;  %7898 = vst.msk [vmem:[#allocation3 + $0x88] sm:$0x1] %vm6541_vm11, %v7893_v33  ;;  %v7971_v1 = vpack.c.bf16 %v17133_v25, %v7962_v29  ;;  %v17257_v33 = vpack.c.bf16 %v7906_v47, %v17157_v38 }
 0x61b   :  { %v17143_v13 = vpack.c.bf16 %v17137_v17, %v17135_v55  ;;  %v7766_v5 = vpop.permute.xlu0 %7765  ;;  %v12864_v38 = vld [vmem:[%s17862_s11 + $0xf8] sm:$0xff]  }
 0x61c   :  { %7770 = vst.msk [vmem:[#allocation3 + $0x122] sm:$0x1] %vm6541_vm11, %v7766_v5  ;;  %v12861_v5 = vld [vmem:[%s17862_s11 + $0x70] sm:$0xff]  }
 0x61d   :  { %12095 = vmatmul.mubr.msk.bf16.gmra.mrb[80].mxu1 %vm6474_vm10, %v7971_v1  ;;  %11999 = vmatmul.mubr.msk.bf16.gmra.mrb[88].mxu0 %vm6474_vm10, %v17143_v13  ;;  %v7809_v14 = vpop.permute.xlu1 %7808  ;;  %v17261_v1 = vpack.c.bf16 %v17075_v46, %v17055_v58 }
 0x61e   :  { %12010 = vmatprep.mubr.msk.bf16.mxu0 %vm6474_vm10, %v7916_v39  ;;  %12106 = vmatprep.mubr.msk.bf16.mxu1 %vm6474_vm10, %v16960_v30  ;;  %7813 = vst.msk [vmem:[#allocation3 + $0x124] sm:$0x1] %vm6541_vm11, %v7809_v14  ;;  %v12851_v30 = vld [vmem:[%s17862_s11 + $0x48] sm:$0xff]   ;;  %v12862_v39 = vld [vmem:[%s17862_s11 + $0xf0] sm:$0xff]  }
 0x61f   :  { %v7852_v16 = vpop.permute.xlu0 %7851  ;;  %v17273_v58 = vld [vmem:[#allocation3 + $0x80] sm:$0xff] }
 0x620   :  { %7856 = vst.msk [vmem:[#allocation3 + $0x126] sm:$0x1] %vm6541_vm11, %v7852_v16  ;;  %v17279_v14 = vpack.c.bf16 %v17273_v58, %v17188_v32 }
 0x621   :  { %v7895_v37 = vpop.permute.xlu1 %7894  ;;  %v17275_v46 = vld [vmem:[#allocation3 + $0x81] sm:$0xff] }
 0x622   :  { %7899 = vst.msk [vmem:[#allocation3 + $0x128] sm:$0x1] %vm6541_vm11, %v7895_v37  ;;  %v17283_v16 = vpack.c.bf16 %v17275_v46, %v17077_v54  ;;  %v17290_v37 = vpack.c.bf16 %v17104_v4, %v17073_v10  ;;  %v12865_v10 = vld [vmem:[%s17862_s11 + $0x120] sm:$0xff]  }
 0x623   :  { %v12866_v54 = vld [vmem:[%s17862_s11 + $0x1a0] sm:$0xff]  }
 0x625   :  { %12011 = vmatmul.mubr.msk.bf16.vlgmr.msra.gmra.mrb[76].mxu0 %vm6474_vm10, %v17161_v34  ;;  %12107 = vmatmul.mubr.msk.bf16.vlgmr.msra.gmra.mrb[68].mxu1 %vm6474_vm10, %v16993_v59  ;;  %v12854_v59 = vld [vmem:[%s17862_s11 + $0xd0] sm:$0xff]  }
 0x626   :  { %12027 = vmatpush3.bf16.msra.mxu0 %v17027_v60  ;;  %12123 = vmatpush3.bf16.msra.mxu1 %v17032_v8  ;;  %v7908_v60 = vld [vmem:[#allocation3 + $0xa0] sm:$0xff]  ;;  %v17190_v8 = vld [vmem:[#allocation3 + $0xb0] sm:$0xff] }
 0x627   :  { %12014 = vmatprep.mubr.msk.bf16.mxu0 %vm6474_vm10, %v17174_v44  ;;  %12110 = vmatprep.mubr.msk.bf16.mxu1 %vm6474_vm10, %v17059_v7  ;;  %v17193_v7 = vpack.c.bf16 %v17188_v32, %v7906_v47  ;;  %v7920_v50 = vpack.c.bf16 %v17190_v8, %v7908_v60  ;;  %v17286_v42 = vpack.c.bf16 %v7910_v19, %v17190_v8  ;;  %v17333_v61 = vld [vmem:[#allocation3 + $0x120] sm:$0xff]  ;;  %v12870_v32 = vld [vmem:[%s17862_s11 + $0x1b0] sm:$0xff]   ;;  %v12871_v47 = vld [vmem:[%s17862_s11 + $0x138] sm:$0xff]  }
 0x628   :  { %12028 = vmatprep.subr.bf16.mxu0 %v12851_v30  ;;  %12124 = vmatprep.subr.bf16.mxu1 %v12852_v12  ;;  %v17372_v60 = vld [vmem:[#allocation3 + $0x82] sm:$0xff] }
 0x629   :  { %v17335_v2 = vld [vmem:[#allocation3 + $0x121] sm:$0xff]  ;;  %v8039_v8 = vpack.c.bf16 %v17372_v60, %v17079_v6 }
 0x62a   :  { %12029 = vmatpush3.bf16.msra.mxu0 %v12851_v30  ;;  %12125 = vmatpush3.bf16.msra.mxu1 %v12852_v12  ;;  %v17319_v30 = vpack.c.bf16 %v7914_v41, %v7913_v28  ;;  %v17323_v12 = vpack.c.bf16 %v17135_v55, %v17102_v22  ;;  %v17338_v22 = vpack.c.bf16 %v17333_v61, %v7915_v36  ;;  %v12873_v6 = vld [vmem:[%s17862_s11 + $0x100] sm:$0xff]  }
 0x62b   :  { %12030 = vmatprep.subr.bf16.mxu0 %v12853_v15  ;;  %12126 = vmatprep.subr.bf16.mxu1 %v12854_v59  ;;  %v17342_v55 = vpack.c.bf16 %v17335_v2, %v17137_v17  ;;  %v12868_v17 = vld [vmem:[%s17862_s11 + $0x1a8] sm:$0xff]   ;;  %v12882_v19 = vld [vmem:[%s17862_s11 + $0x1c0] sm:$0xff]  }
 0x62c   :  { %v12889_v36 = vld [vmem:[%s17862_s11 + $0x160] sm:$0xff]  }
 0x62d   :  { %12015 = vmatmul.mubr.msk.bf16.gmra.mrb[80].mxu0 %vm6474_vm10, %v17193_v7  ;;  %12111 = vmatmul.mubr.msk.bf16.gmra.mrb[72].mxu1 %vm6474_vm10, %v17084_v56  ;;  %v12890_v41 = vld [vmem:[%s17862_s11 + $0x1e0] sm:$0xff]  }
 0x62e   :  { %12018 = vmatprep.mubr.msk.bf16.mxu0 %vm6474_vm10, %v7920_v50  ;;  %12114 = vmatprep.mubr.msk.bf16.mxu1 %vm6474_vm10, %v17088_v26  ;;  %v7912_v26 = vld [vmem:[#allocation3 + $0xe0] sm:$0xff]  ;;  %v12872_v50 = vld [vmem:[%s17862_s11 + $0x1b8] sm:$0xff]  }
 0x62f   :  { %12031 = vmatpush3.bf16.msra.mxu0 %v12853_v15  ;;  %12127 = vmatpush3.bf16.msra.mxu1 %v12854_v59  ;;  %v17220_v29 = vpack.c.bf16 %v7913_v28, %v7912_v26  ;;  %v17313_v4 = vpack.c.bf16 %v7912_v26, %v17209_v62  ;;  %v12867_v15 = vld [vmem:[%s17862_s11 + $0x128] sm:$0xff]   ;;  %v12869_v59 = vld [vmem:[%s17862_s11 + $0x130] sm:$0xff]   ;;  %v12881_v28 = vld [vmem:[%s17862_s11 + $0x140] sm:$0xff]  }
 0x630   :  { %12032 = vmatprep.subr.bf16.mxu0 %v12855_v18  ;;  %12128 = vmatprep.subr.bf16.mxu1 %v12856_v48  ;;  %v12888_v26 = vld [vmem:[%s17862_s11 + $0x1d8] sm:$0xff]  }
 0x633   :  { %12033 = vmatpush3.bf16.msra.mxu0 %v12855_v18  ;;  %12129 = vmatpush3.bf16.msra.mxu1 %v12856_v48  ;;  %v12874_v18 = vld [vmem:[%s17862_s11 + $0x180] sm:$0xff]  }
 0x634   :  { %12050 = vmatprep.subr.bf16.mxu0 %v12857_v20  ;;  %12146 = vmatprep.subr.bf16.mxu1 %v12858_v27  ;;  %v17403_v48 = vld [vmem:[#allocation3 + $0x122] sm:$0xff] }
 0x635   :  { %12019 = vmatmul.mubr.msk.bf16.gmra.mrb[84].mxu0 %vm6474_vm10, %v17218_v45  ;;  %12115 = vmatmul.mubr.msk.bf16.gmra.mrb[76].mxu1 %vm6474_vm10, %v17111_v63  ;;  %v8043_v62 = vpack.c.bf16 %v17403_v48, %v17133_v25  ;;  %v12878_v25 = vld [vmem:[%s17862_s11 + $0x190] sm:$0xff]  }
 0x636   :  { %12022 = vmatprep.mubr.msk.bf16.mxu0 %vm6474_vm10, %v17220_v29  ;;  %12118 = vmatprep.mubr.msk.bf16.mxu1 %vm6474_vm10, %v17119_v24 }
 0x63d   :  { %12023 = vmatmul.mubr.msk.bf16.gmra.mrb[88].mxu0 %vm6474_vm10, %v17230_v51  ;;  %12119 = vmatmul.mubr.msk.bf16.gmra.mrb[80].mxu1 %vm6474_vm10, %v17143_v13 }
 0x63e   :  { %12034 = vmatprep.mubr.msk.bf16.mxu0 %vm6474_vm10, %v17233_v43  ;;  %12130 = vmatprep.mubr.msk.bf16.mxu1 %vm6474_vm10, %v16973_v9 }
 0x645   :  { %12035 = vmatmul.mubr.msk.bf16.vlgmr.msra.gmra.mrb[76].mxu0 %vm6474_vm10, %v17244_v23  ;;  %12131 = vmatmul.mubr.msk.bf16.vlgmr.msra.gmra.mrb[68].mxu1 %vm6474_vm10, %v17038_v31 }
 0x646   :  { %12051 = vmatpush3.bf16.msra.mxu0 %v12857_v20  ;;  %12147 = vmatpush3.bf16.msra.mxu1 %v12858_v27  ;;  %v12875_v20 = vld [vmem:[%s17862_s11 + $0x108] sm:$0xff]  }
 0x647   :  { %12038 = vmatprep.mubr.msk.bf16.mxu0 %vm6474_vm10, %v17257_v33  ;;  %12134 = vmatprep.mubr.msk.bf16.mxu1 %vm6474_vm10, %v17261_v1  ;;  %v12876_v27 = vld [vmem:[%s17862_s11 + $0x188] sm:$0xff]  }
 0x648   :  { %12052 = vmatprep.subr.bf16.mxu0 %v12859_v52  ;;  %12148 = vmatprep.subr.bf16.mxu1 %v12860_v0 }
 0x64a   :  { %12053 = vmatpush3.bf16.msra.mxu0 %v12859_v52  ;;  %12149 = vmatpush3.bf16.msra.mxu1 %v12860_v0  ;;  %v8071_v0 = vld [vmem:[#allocation3 + $0x51] sm:$0xff] }
 0x64b   :  { %12054 = vmatprep.subr.bf16.mxu0 %v12861_v5  ;;  %12150 = vmatprep.subr.bf16.mxu1 %v12862_v39 }
 0x64d   :  { %12039 = vmatmul.mubr.msk.bf16.gmra.mrb[80].mxu0 %vm6474_vm10, %v17279_v14  ;;  %12135 = vmatmul.mubr.msk.bf16.gmra.mrb[72].mxu1 %vm6474_vm10, %v17283_v16 }
 0x64e   :  { %12042 = vmatprep.mubr.msk.bf16.mxu0 %vm6474_vm10, %v17286_v42  ;;  %12138 = vmatprep.mubr.msk.bf16.mxu1 %vm6474_vm10, %v17290_v37 }
 0x64f   :  { %12055 = vmatpush3.bf16.msra.mxu0 %v12861_v5  ;;  %12151 = vmatpush3.bf16.msra.mxu1 %v12862_v39  ;;  %v12891_v5 = vld [vmem:[%s17862_s11 + $0x168] sm:$0xff]  }
 0x650   :  { %12056 = vmatprep.subr.bf16.mxu0 %v12863_v49  ;;  %12152 = vmatprep.subr.bf16.mxu1 %v12864_v38  ;;  %v12892_v39 = vld [vmem:[%s17862_s11 + $0x1e8] sm:$0xff]  }
 0x653   :  { %12057 = vmatpush3.bf16.msra.mxu0 %v12863_v49  ;;  %12153 = vmatpush3.bf16.msra.mxu1 %v12864_v38  ;;  %v12896_v49 = vld [vmem:[%s17862_s11 + $0x1f8] sm:$0xff]  }
 0x654   :  { %12170 = vmatprep.subr.bf16.mxu0 %v12865_v10  ;;  %12266 = vmatprep.subr.bf16.mxu1 %v12866_v54 }
 0x655   :  { %12043 = vmatmul.mubr.msk.bf16.gmra.mrb[84].mxu0 %vm6474_vm10, %v17313_v4  ;;  %12139 = vmatmul.mubr.msk.bf16.gmra.mrb[76].mxu1 %vm6474_vm10, %v17317_v53 }
 0x656   :  { %12046 = vmatprep.mubr.msk.bf16.mxu0 %vm6474_vm10, %v17319_v30  ;;  %12142 = vmatprep.mubr.msk.bf16.mxu1 %vm6474_vm10, %v17323_v12 }
 0x65d   :  { %12047 = vmatmul.mubr.msk.bf16.gmra.mrb[88].mxu0 %vm6474_vm10, %v17338_v22  ;;  %12143 = vmatmul.mubr.msk.bf16.gmra.mrb[80].mxu1 %vm6474_vm10, %v17342_v55 }
 0x65e   :  { %12058 = vmatprep.mubr.msk.bf16.mxu0 %vm6474_vm10, %v16973_v9  ;;  %12154 = vmatprep.mubr.msk.bf16.mxu1 %vm6474_vm10, %v16975_v57 }
 0x665   :  { %12059 = vmatmul.mubr.msk.bf16.vlgmr.msra.gmra.mrb[76].mxu0 %vm6474_vm10, %v17038_v31  ;;  %12155 = vmatmul.mubr.msk.bf16.vlgmr.msra.gmra.mrb[68].mxu1 %vm6474_vm10, %v17040_v35 }
 0x666   :  { %12171 = vmatpush3.bf16.msra.mxu0 %v12865_v10  ;;  %12267 = vmatpush3.bf16.msra.mxu1 %v12866_v54  ;;  %v8092_v54 = vld [vmem:[#allocation3 + $0x22] sm:$0xff] }
 0x667   :  { %12062 = vmatprep.mubr.msk.bf16.mxu0 %vm6474_vm10, %v17261_v1  ;;  %12158 = vmatprep.mubr.msk.bf16.mxu1 %vm6474_vm10, %v17070_v3 }
 0x668   :  { %12172 = vmatprep.subr.bf16.mxu0 %v12867_v15  ;;  %12268 = vmatprep.subr.bf16.mxu1 %v12868_v17 }
 0x66a   :  { %12173 = vmatpush3.bf16.msra.mxu0 %v12867_v15  ;;  %12269 = vmatpush3.bf16.msra.mxu1 %v12868_v17  ;;  %v8100_v15 = vld [vmem:[#allocation3 + $0xc2] sm:$0xff] }
 0x66b   :  { %12174 = vmatprep.subr.bf16.mxu0 %v12869_v59  ;;  %12270 = vmatprep.subr.bf16.mxu1 %v12870_v32 }
 0x66d   :  { %12063 = vmatmul.mubr.msk.bf16.gmra.mrb[80].mxu0 %vm6474_vm10, %v17283_v16  ;;  %12159 = vmatmul.mubr.msk.bf16.gmra.mrb[72].mxu1 %vm6474_vm10, %v8039_v8 }
 0x66e   :  { %12066 = vmatprep.mubr.msk.bf16.mxu0 %vm6474_vm10, %v17290_v37  ;;  %12162 = vmatprep.mubr.msk.bf16.mxu1 %vm6474_vm10, %v16987_v40 }
 0x66f   :  { %12175 = vmatpush3.bf16.msra.mxu0 %v12869_v59  ;;  %12271 = vmatpush3.bf16.msra.mxu1 %v12870_v32  ;;  %v8103_v59 = vld [vmem:[#allocation3 + $0xf2] sm:$0xff] }
 0x670   :  { %12176 = vmatprep.subr.bf16.mxu0 %v12871_v47  ;;  %12272 = vmatprep.subr.bf16.mxu1 %v12872_v50  ;;  %v8105_v32 = vld [vmem:[#allocation3 + $0x112] sm:$0xff] }
 0x673   :  { %12177 = vmatpush3.bf16.msra.mxu0 %v12871_v47  ;;  %12273 = vmatpush3.bf16.msra.mxu1 %v12872_v50  ;;  %v8104_v47 = vld [vmem:[#allocation3 + $0x102] sm:$0xff] }
 0x674   :  { %12194 = vmatprep.subr.bf16.mxu0 %v12873_v6  ;;  %12290 = vmatprep.subr.bf16.mxu1 %v12874_v18  ;;  %v8114_v50 = vpack.c.bf16 %v8105_v32, %v8104_v47 }
 0x675   :  { %12067 = vmatmul.mubr.msk.bf16.gmra.mrb[84].mxu0 %vm6474_vm10, %v17317_v53  ;;  %12163 = vmatmul.mubr.msk.bf16.gmra.mrb[76].mxu1 %vm6474_vm10, %v17052_v21 }
 0x676   :  { %12070 = vmatprep.mubr.msk.bf16.mxu0 %vm6474_vm10, %v17323_v12  ;;  %12166 = vmatprep.mubr.msk.bf16.mxu1 %vm6474_vm10, %v17115_v11 }
 0x67d   :  { %12071 = vmatmul.mubr.msk.bf16.gmra.mrb[88].mxu0 %vm6474_vm10, %v17342_v55  ;;  %12167 = vmatmul.mubr.msk.bf16.gmra.mrb[80].mxu1 %vm6474_vm10, %v8043_v62 }
 0x67e   :  { %12178 = vmatprep.mubr.msk.bf16.mxu0 %vm6474_vm10, %v16973_v9  ;;  %12274 = vmatprep.mubr.msk.bf16.mxu1 %vm6474_vm10, %v16975_v57  ;;  %v12877_v57 = vld [vmem:[%s17862_s11 + $0x110] sm:$0xff]  }
 0x685   :  { %12179 = vmatmul.mubr.msk.bf16.vlgmr.msra.gmra.mrb[92].mxu0 %vm6474_vm10, %v17038_v31  ;;  %12275 = vmatmul.mubr.msk.bf16.vlgmr.msra.gmra.mrb[84].mxu1 %vm6474_vm10, %v17040_v35  ;;  %v12879_v35 = vld [vmem:[%s17862_s11 + $0x118] sm:$0xff]  }
 0x686   :  { %12195 = vmatpush3.bf16.msra.mxu0 %v12873_v6  ;;  %12291 = vmatpush3.bf16.msra.mxu1 %v12874_v18  ;;  %v17593_v6 = vld [vmem:[%s17863_s12] ss:$0 sm:$0xff] }
 0x687   :  { %12182 = vmatprep.mubr.msk.bf16.mxu0 %vm6474_vm10, %v17261_v1  ;;  %12278 = vmatprep.mubr.msk.bf16.mxu1 %vm6474_vm10, %v17070_v3  ;;  %v12880_v3 = vld [vmem:[%s17862_s11 + $0x198] sm:$0xff]  }
 0x688   :  { %12196 = vmatprep.subr.bf16.mxu0 %v12875_v20  ;;  %12292 = vmatprep.subr.bf16.mxu1 %v12876_v27 }
 0x68a   :  { %12197 = vmatpush3.bf16.msra.mxu0 %v12875_v20  ;;  %12293 = vmatpush3.bf16.msra.mxu1 %v12876_v27 }
 0x68b   :  { %12198 = vmatprep.subr.bf16.mxu0 %v12877_v57  ;;  %12294 = vmatprep.subr.bf16.mxu1 %v12878_v25 }
 0x68d   :  { %12183 = vmatmul.mubr.msk.bf16.gmra.mrb[96].mxu0 %vm6474_vm10, %v17283_v16  ;;  %12279 = vmatmul.mubr.msk.bf16.gmra.mrb[88].mxu1 %vm6474_vm10, %v8039_v8 }
 0x68e   :  { %12186 = vmatprep.mubr.msk.bf16.mxu0 %vm6474_vm10, %v17290_v37  ;;  %12282 = vmatprep.mubr.msk.bf16.mxu1 %vm6474_vm10, %v16987_v40  ;;  %v12883_v40 = vld [vmem:[%s17862_s11 + $0x148] sm:$0xff]  }
 0x68f   :  { %12199 = vmatpush3.bf16.msra.mxu0 %v12877_v57  ;;  %12295 = vmatpush3.bf16.msra.mxu1 %v12878_v25 }
 0x690   :  { %12200 = vmatprep.subr.bf16.mxu0 %v12879_v35  ;;  %12296 = vmatprep.subr.bf16.mxu1 %v12880_v3 }
 0x693   :  { %12201 = vmatpush3.bf16.msra.mxu0 %v12879_v35  ;;  %12297 = vmatpush3.bf16.msra.mxu1 %v12880_v3 }
 0x694   :  { %12218 = vmatprep.subr.bf16.mxu0 %v12881_v28  ;;  %12314 = vmatprep.subr.bf16.mxu1 %v12882_v19 }
 0x695   :  { %12187 = vmatmul.mubr.msk.bf16.gmra.mrb[100].mxu0 %vm6474_vm10, %v17317_v53  ;;  %12283 = vmatmul.mubr.msk.bf16.gmra.mrb[92].mxu1 %vm6474_vm10, %v17052_v21  ;;  %v12884_v21 = vld [vmem:[%s17862_s11 + $0x1c8] sm:$0xff]  }
 0x696   :  { %12190 = vmatprep.mubr.msk.bf16.mxu0 %vm6474_vm10, %v17323_v12  ;;  %12286 = vmatprep.mubr.msk.bf16.mxu1 %vm6474_vm10, %v17115_v11  ;;  %v12886_v11 = vld [vmem:[%s17862_s11 + $0x1d0] sm:$0xff]  }
 0x69d   :  { %12191 = vmatmul.mubr.msk.bf16.gmra.mrb[104].mxu0 %vm6474_vm10, %v17342_v55  ;;  %12287 = vmatmul.mubr.msk.bf16.gmra.mrb[96].mxu1 %vm6474_vm10, %v8043_v62 }
 0x69e   :  { %12202 = vmatprep.mubr.msk.bf16.mxu0 %vm6474_vm10, %v17233_v43  ;;  %12298 = vmatprep.mubr.msk.bf16.mxu1 %vm6474_vm10, %v16973_v9  ;;  %v12885_v9 = vld [vmem:[%s17862_s11 + $0x150] sm:$0xff]  }
 0x69f   :  { %v8069_v43 = vld [vmem:[#allocation3 + $0x31] sm:$0xff] }
 0x6a5   :  { %12203 = vmatmul.mubr.msk.bf16.vlgmr.msra.gmra.mrb[92].mxu0 %vm6474_vm10, %v17244_v23  ;;  %12299 = vmatmul.mubr.msk.bf16.vlgmr.msra.gmra.mrb[84].mxu1 %vm6474_vm10, %v17038_v31  ;;  %v12887_v31 = vld [vmem:[%s17862_s11 + $0x158] sm:$0xff]   ;;  %v8068_v23 = vld [vmem:[#allocation3 + $0x21] sm:$0xff] }
 0x6a6   :  { %12219 = vmatpush3.bf16.msra.mxu0 %v12881_v28  ;;  %12315 = vmatpush3.bf16.msra.mxu1 %v12882_v19  ;;  %v8084_v52 = vpack.c.bf16 %v8069_v43, %v8068_v23 }
 0x6a7   :  { %12206 = vmatprep.mubr.msk.bf16.mxu0 %vm6474_vm10, %v17257_v33  ;;  %12302 = vmatprep.mubr.msk.bf16.mxu1 %vm6474_vm10, %v17261_v1  ;;  %v8070_v33 = vld [vmem:[#allocation3 + $0x41] sm:$0xff] }
 0x6a8   :  { %12220 = vmatprep.subr.bf16.mxu0 %v12883_v40  ;;  %12316 = vmatprep.subr.bf16.mxu1 %v12884_v21  ;;  %v8085_v1 = vpack.c.bf16 %v8071_v0, %v8070_v33 }
 0x6aa   :  { %12221 = vmatpush3.bf16.msra.mxu0 %v12883_v40  ;;  %12317 = vmatpush3.bf16.msra.mxu1 %v12884_v21 }
 0x6ab   :  { %12222 = vmatprep.subr.bf16.mxu0 %v12885_v9  ;;  %12318 = vmatprep.subr.bf16.mxu1 %v12886_v11 }
 0x6ad   :  { %12207 = vmatmul.mubr.msk.bf16.gmra.mrb[96].mxu0 %vm6474_vm10, %v17279_v14  ;;  %12303 = vmatmul.mubr.msk.bf16.gmra.mrb[88].mxu1 %vm6474_vm10, %v17283_v16  ;;  %v12894_v14 = vld [vmem:[%s17862_s11 + $0x1f0] sm:$0xff]  }
 0x6ae   :  { %12210 = vmatprep.mubr.msk.bf16.mxu0 %vm6474_vm10, %v17286_v42  ;;  %12306 = vmatprep.mubr.msk.bf16.mxu1 %vm6474_vm10, %v17290_v37  ;;  %v8075_v16 = vld [vmem:[#allocation3 + $0x91] sm:$0xff] }
 0x6af   :  { %12223 = vmatpush3.bf16.msra.mxu0 %v12885_v9  ;;  %12319 = vmatpush3.bf16.msra.mxu1 %v12886_v11  ;;  %v12895_v37 = vld [vmem:[%s17862_s11 + $0x178] sm:$0xff]  }
 0x6b0   :  { %12224 = vmatprep.subr.bf16.mxu0 %v12887_v31  ;;  %12320 = vmatprep.subr.bf16.mxu1 %v12888_v26 }
 0x6b3   :  { %12225 = vmatpush3.bf16.msra.mxu0 %v12887_v31  ;;  %12321 = vmatpush3.bf16.msra.mxu1 %v12888_v26 }
 0x6b4   :  { %12242 = vmatprep.subr.bf16.mxu0 %v12889_v36  ;;  %12338 = vmatprep.subr.bf16.mxu1 %v12890_v41 }
 0x6b5   :  { %12211 = vmatmul.mubr.msk.bf16.gmra.mrb[100].mxu0 %vm6474_vm10, %v17313_v4  ;;  %12307 = vmatmul.mubr.msk.bf16.gmra.mrb[92].mxu1 %vm6474_vm10, %v17317_v53  ;;  %v8094_v53 = vld [vmem:[#allocation3 + $0x42] sm:$0xff] }
 0x6b6   :  { %12214 = vmatprep.mubr.msk.bf16.mxu0 %vm6474_vm10, %v17319_v30  ;;  %12310 = vmatprep.mubr.msk.bf16.mxu1 %vm6474_vm10, %v17323_v12  ;;  %v8096_v12 = vld [vmem:[#allocation3 + $0x62] sm:$0xff] }
 0x6bd   :  { %12215 = vmatmul.mubr.msk.bf16.gmra.mrb[104].mxu0 %vm6474_vm10, %v17338_v22  ;;  %12311 = vmatmul.mubr.msk.bf16.gmra.mrb[96].mxu1 %vm6474_vm10, %v17342_v55 }
 0x6be   :  { %12226 = vmatprep.mubr.msk.bf16.mxu0 %vm6474_vm10, %v17161_v34  ;;  %12322 = vmatprep.mubr.msk.bf16.mxu1 %vm6474_vm10, %v8084_v52  ;;  %v12893_v34 = vld [vmem:[%s17862_s11 + $0x170] sm:$0xff]  }
 0x6c5   :  { %12227 = vmatmul.mubr.msk.bf16.vlgmr.msra.gmra.mrb[92].mxu0 %vm6474_vm10, %v17174_v44  ;;  %12323 = vmatmul.mubr.msk.bf16.vlgmr.msra.gmra.mrb[84].mxu1 %vm6474_vm10, %v8085_v1  ;;  %v8051_v44 = vld [vmem:[#allocation3 + $0x90] sm:$0xff] }
 0x6c6   :  { %12243 = vmatpush3.bf16.msra.mxu0 %v12889_v36  ;;  %12339 = vmatpush3.bf16.msra.mxu1 %v12890_v41  ;;  %v8063_v42 = vpack.c.bf16 %v8051_v44, %v17273_v58  ;;  %v8083_v58 = vld [vmem:[#allocation3 + $0x131] sm:$0xff] }
 0x6c7   :  { %12230 = vmatprep.mubr.msk.bf16.mxu0 %vm6474_vm10, %v17193_v7  ;;  %12326 = vmatprep.mubr.msk.bf16.mxu1 %vm6474_vm10, %v17084_v56  ;;  %v8087_v7 = vpack.c.bf16 %v8075_v16, %v17275_v46  ;;  %v8093_v46 = vld [vmem:[#allocation3 + $0x32] sm:$0xff]  ;;  %v8091_v10 = vpack.c.bf16 %v8083_v58, %v17335_v2 }
 0x6c8   :  { %12244 = vmatprep.subr.bf16.mxu0 %v12891_v5  ;;  %12340 = vmatprep.subr.bf16.mxu1 %v12892_v39  ;;  %v8108_v4 = vpack.c.bf16 %v8093_v46, %v8092_v54  ;;  %v8101_v2 = vld [vmem:[#allocation3 + $0xd2] sm:$0xff] }
 0x6c9   :  { %v8112_v17 = vpack.c.bf16 %v8101_v2, %v8100_v15 }
 0x6ca   :  { %12245 = vmatpush3.bf16.msra.mxu0 %v12891_v5  ;;  %12341 = vmatpush3.bf16.msra.mxu1 %v12892_v39 }
 0x6cb   :  { %12246 = vmatprep.subr.bf16.mxu0 %v12893_v34  ;;  %12342 = vmatprep.subr.bf16.mxu1 %v12894_v14 }
 0x6cd   :  { %12231 = vmatmul.mubr.msk.bf16.gmra.mrb[96].mxu0 %vm6474_vm10, %v8063_v42  ;;  %12327 = vmatmul.mubr.msk.bf16.gmra.mrb[88].mxu1 %vm6474_vm10, %v8087_v7 }
 0x6ce   :  { %12234 = vmatprep.mubr.msk.bf16.mxu0 %vm6474_vm10, %v17218_v45  ;;  %12330 = vmatprep.mubr.msk.bf16.mxu1 %vm6474_vm10, %v17111_v63  ;;  %v8059_v45 = vld [vmem:[#allocation3 + $0x130] sm:$0xff] }
 0x6cf   :  { %12247 = vmatpush3.bf16.msra.mxu0 %v12893_v34  ;;  %12343 = vmatpush3.bf16.msra.mxu1 %v12894_v14  ;;  %v8067_v38 = vpack.c.bf16 %v8059_v45, %v17333_v61  ;;  %v8099_v61 = vld [vmem:[#allocation3 + $0x92] sm:$0xff] }
 0x6d0   :  { %12248 = vmatprep.subr.bf16.mxu0 %v12895_v37  ;;  %12344 = vmatprep.subr.bf16.mxu1 %v12896_v49  ;;  %v8111_v55 = vpack.c.bf16 %v8099_v61, %v17372_v60  ;;  %v8107_v60 = vld [vmem:[#allocation3 + $0x132] sm:$0xff] }
 0x6d3   :  { %12249 = vmatpush3.bf16.msra.mxu0 %v12895_v37  ;;  %12345 = vmatpush3.bf16.msra.mxu1 %v12896_v49 }
 0x6d5   :  { %12235 = vmatmul.mubr.msk.bf16.gmra.mrb[100].mxu0 %vm6474_vm10, %v17220_v29  ;;  %12331 = vmatmul.mubr.msk.bf16.gmra.mrb[92].mxu1 %vm6474_vm10, %v17119_v24  ;;  %v8095_v29 = vld [vmem:[#allocation3 + $0x52] sm:$0xff] }
 0x6d6   :  { %12238 = vmatprep.mubr.msk.bf16.mxu0 %vm6474_vm10, %v17230_v51  ;;  %12334 = vmatprep.mubr.msk.bf16.mxu1 %vm6474_vm10, %v17143_v13  ;;  %v8097_v51 = vld [vmem:[#allocation3 + $0x72] sm:$0xff]  ;;  %v8109_v30 = vpack.c.bf16 %v8095_v29, %v8094_v53 }
 0x6d7   :  { %v8110_v22 = vpack.c.bf16 %v8097_v51, %v8096_v12 }
 0x6dd   :  { %12239 = vmatmul.mubr.msk.bf16.gmra.mrb[104].mxu0 %vm6474_vm10, %v8067_v38  ;;  %12335 = vmatmul.mubr.msk.bf16.gmra.mrb[96].mxu1 %vm6474_vm10, %v8091_v10 }
 0x6de   :  { %12250 = vmatprep.mubr.msk.bf16.mxu0 %vm6474_vm10, %v8084_v52  ;;  %12346 = vmatprep.mubr.msk.bf16.mxu1 %vm6474_vm10, %v8108_v4 }
 0x6e5   :  { %12251 = vmatmul.mubr.msk.bf16.vlgmr.msra.gmra.mrb[92].mxu0 %vm6474_vm10, %v8085_v1  ;;  %12347 = vmatmul.mubr.msk.bf16.vlgmr.msra.gmra.mrb[84].mxu1 %vm6474_vm10, %v8109_v30 }
 0x6e6   :  { %12254 = vmatprep.mubr.msk.bf16.mxu0 %vm6474_vm10, %v17084_v56  ;;  %12350 = vmatprep.mubr.msk.bf16.mxu1 %vm6474_vm10, %v8110_v22  ;;  %v8102_v56 = vld [vmem:[#allocation3 + $0xe2] sm:$0xff] }
 0x6e7   :  { %v8113_v8 = vpack.c.bf16 %v8103_v59, %v8102_v56 }
 0x6ed   :  { %12255 = vmatmul.mubr.msk.bf16.gmra.mrb[96].mxu0 %vm6474_vm10, %v8087_v7  ;;  %12351 = vmatmul.mubr.msk.bf16.gmra.mrb[88].mxu1 %vm6474_vm10, %v8111_v55 }
 0x6ee   :  { %12258 = vmatprep.mubr.msk.bf16.mxu0 %vm6474_vm10, %v17111_v63  ;;  %12354 = vmatprep.mubr.msk.bf16.mxu1 %vm6474_vm10, %v8112_v17  ;;  %v8115_v63 = vpack.c.bf16 %v8107_v60, %v17403_v48 }
 0x6f5   :  { %12259 = vmatmul.mubr.msk.bf16.gmra.mrb[100].mxu0 %vm6474_vm10, %v17119_v24  ;;  %12355 = vmatmul.mubr.msk.bf16.gmra.mrb[92].mxu1 %vm6474_vm10, %v8113_v8 }
 0x6f6   :  { %12262 = vmatprep.mubr.msk.bf16.mxu0 %vm6474_vm10, %v17143_v13  ;;  %12358 = vmatprep.mubr.msk.bf16.mxu1 %vm6474_vm10, %v8114_v50 }
 0x6fd   :  { %12263 = vmatmul.mubr.msk.bf16.gmra.mrb[104].mxu0 %vm6474_vm10, %v8091_v10  ;;  %12359 = vmatmul.mubr.msk.bf16.gmra.mrb[96].mxu1 %vm6474_vm10, %v8115_v63 }
 0x738   :  { %v12060_v24 = vpop.f32.mrb[76].mxu0  ;;  %v12156_v18 = vpop.f32.mrb[68].mxu1 }
 0x739   :  { %v8772_v62 = vadd.f32 %v12060_v24, %v17593_v6  ;;  %v9404_v13 = vadd.f32 %v12156_v18, %v17593_v6  ;;  %v8685_v20 = vpop.f32.mrb[77].mxu0  ;;  %v9323_v27 = vpop.f32.mrb[69].mxu1 }
 0x73a   :  { %v8770_v57 = vadd.f32 %v17593_v6, %v8685_v20  ;;  %v9402_v48 = vadd.f32 %v17593_v6, %v9323_v27  ;;  %v12061_v25 = vpop.f32.mrb[78].mxu0  ;;  %v12157_v35 = vpop.f32.mrb[70].mxu1 }
 0x73b   :  { %8788 = vst [vmem:[%s17864_s13 + $0x10] sm:$0xff] %v8772_v62  ;;  %11195 = vst [vmem:[%s17864_s13 + $0x90] sm:$0xff] %v9404_v13  ;;  %v8773_v3 = vadd.f32 %v12061_v25, %v17593_v6  ;;  %v9405_v28 = vadd.f32 %v12157_v35, %v17593_v6  ;;  %v8688_v19 = vpop.f32.mrb[79].mxu0  ;;  %v9326_v40 = vpop.f32.mrb[71].mxu1 }
 0x73c   :  { %8786 = vst [vmem:[%s17864_s13] sm:$0xff] %v8770_v57  ;;  %11193 = vst [vmem:[%s17864_s13 + $0x80] sm:$0xff] %v9402_v48  ;;  %v8771_v21 = vadd.f32 %v17593_v6, %v8688_v19  ;;  %v9403_v9 = vadd.f32 %v17593_v6, %v9326_v40 }
 0x73d   :  { %8789 = vst [vmem:[%s17864_s13 + $0x18] sm:$0xff] %v8773_v3  ;;  %11196 = vst [vmem:[%s17864_s13 + $0x98] sm:$0xff] %v9405_v28 }
 0x73e   :  { %8787 = vst [vmem:[%s17864_s13 + $0x8] sm:$0xff] %v8771_v21  ;;  %11194 = vst [vmem:[%s17864_s13 + $0x88] sm:$0xff] %v9403_v9 }
 0x740   :  { %v12064_v11 = vpop.f32.mrb[80].mxu0  ;;  %v12160_v31 = vpop.f32.mrb[72].mxu1 }
 0x741   :  { %v8776_v26 = vadd.f32 %v12064_v11, %v17593_v6  ;;  %v9408_v36 = vadd.f32 %v12160_v31, %v17593_v6  ;;  %v8701_v41 = vpop.f32.mrb[81].mxu0  ;;  %v9339_v43 = vpop.f32.mrb[73].mxu1 }
 0x742   :  { %v8774_v23 = vadd.f32 %v17593_v6, %v8701_v41  ;;  %v9406_v52 = vadd.f32 %v17593_v6, %v9339_v43  ;;  %v12065_v0 = vpop.f32.mrb[82].mxu0  ;;  %v12161_v33 = vpop.f32.mrb[74].mxu1 }
 0x743   :  { %8792 = vst [vmem:[%s17864_s13 + $0x30] sm:$0xff] %v8776_v26  ;;  %11199 = vst [vmem:[%s17864_s13 + $0xb0] sm:$0xff] %v9408_v36  ;;  %v8777_v1 = vadd.f32 %v12065_v0, %v17593_v6  ;;  %v9409_v5 = vadd.f32 %v12161_v33, %v17593_v6  ;;  %v8704_v39 = vpop.f32.mrb[83].mxu0  ;;  %v9342_v34 = vpop.f32.mrb[75].mxu1 }
 0x744   :  { %8790 = vst [vmem:[%s17864_s13 + $0x20] sm:$0xff] %v8774_v23  ;;  %11197 = vst [vmem:[%s17864_s13 + $0xa0] sm:$0xff] %v9406_v52  ;;  %v8775_v14 = vadd.f32 %v17593_v6, %v8704_v39  ;;  %v9407_v44 = vadd.f32 %v17593_v6, %v9342_v34 }
 0x745   :  { %8793 = vst [vmem:[%s17864_s13 + $0x38] sm:$0xff] %v8777_v1  ;;  %11200 = vst [vmem:[%s17864_s13 + $0xb8] sm:$0xff] %v9409_v5 }
 0x746   :  { %8791 = vst [vmem:[%s17864_s13 + $0x28] sm:$0xff] %v8775_v14  ;;  %11198 = vst [vmem:[%s17864_s13 + $0xa8] sm:$0xff] %v9407_v44 }
 0x748   :  { %v12068_v16 = vpop.f32.mrb[84].mxu0  ;;  %v12164_v42 = vpop.f32.mrb[76].mxu1 }
 0x749   :  { %v8780_v7 = vadd.f32 %v12068_v16, %v17593_v6  ;;  %v9412_v37 = vadd.f32 %v12164_v42, %v17593_v6  ;;  %v8717_v49 = vpop.f32.mrb[85].mxu0  ;;  %v9355_v45 = vpop.f32.mrb[77].mxu1 }
 0x74a   :  { %v8778_v58 = vadd.f32 %v17593_v6, %v8717_v49  ;;  %v9410_v46 = vadd.f32 %v17593_v6, %v9355_v45  ;;  %v12069_v38 = vpop.f32.mrb[86].mxu0  ;;  %v12165_v10 = vpop.f32.mrb[78].mxu1 }
 0x74b   :  { %8796 = vst [vmem:[%s17864_s13 + $0x50] sm:$0xff] %v8780_v7  ;;  %11203 = vst [vmem:[%s17864_s13 + $0xd0] sm:$0xff] %v9412_v37  ;;  %v8781_v54 = vadd.f32 %v12069_v38, %v17593_v6  ;;  %v9413_v4 = vadd.f32 %v12165_v10, %v17593_v6  ;;  %v8720_v29 = vpop.f32.mrb[87].mxu0  ;;  %v9358_v51 = vpop.f32.mrb[79].mxu1 }
 0x74c   :  { %8794 = vst [vmem:[%s17864_s13 + $0x40] sm:$0xff] %v8778_v58  ;;  %11201 = vst [vmem:[%s17864_s13 + $0xc0] sm:$0xff] %v9410_v46  ;;  %v8779_v53 = vadd.f32 %v17593_v6, %v8720_v29  ;;  %v9411_v30 = vadd.f32 %v17593_v6, %v9358_v51 }
 0x74d   :  { %8797 = vst [vmem:[%s17864_s13 + $0x58] sm:$0xff] %v8781_v54  ;;  %11204 = vst [vmem:[%s17864_s13 + $0xd8] sm:$0xff] %v9413_v4 }
 0x74e   :  { %8795 = vst [vmem:[%s17864_s13 + $0x48] sm:$0xff] %v8779_v53  ;;  %11202 = vst [vmem:[%s17864_s13 + $0xc8] sm:$0xff] %v9411_v30 }
 0x750   :  { %v12072_v12 = vpop.f32.mrb[88].mxu0  ;;  %v12168_v22 = vpop.f32.mrb[80].mxu1 }
 0x751   :  { %v8784_v61 = vadd.f32 %v12072_v12, %v17593_v6  ;;  %v9416_v2 = vadd.f32 %v12168_v22, %v17593_v6  ;;  %v8733_v55 = vpop.f32.mrb[89].mxu0  ;;  %v9371_v15 = vpop.f32.mrb[81].mxu1 }
 0x752   :  { %v8782_v17 = vadd.f32 %v17593_v6, %v8733_v55  ;;  %v9414_v59 = vadd.f32 %v17593_v6, %v9371_v15  ;;  %v12073_v32 = vpop.f32.mrb[90].mxu0  ;;  %v12169_v56 = vpop.f32.mrb[82].mxu1 }
 0x753   :  { %8800 = vst [vmem:[%s17864_s13 + $0x70] sm:$0xff] %v8784_v61  ;;  %11207 = vst [vmem:[%s17864_s13 + $0xf0] sm:$0xff] %v9416_v2  ;;  %v8785_v8 = vadd.f32 %v12073_v32, %v17593_v6  ;;  %v9417_v47 = vadd.f32 %v12169_v56, %v17593_v6  ;;  %v8736_v50 = vpop.f32.mrb[91].mxu0  ;;  %v9374_v60 = vpop.f32.mrb[83].mxu1 }
 0x754   :  { %8798 = vst [vmem:[%s17864_s13 + $0x60] sm:$0xff] %v8782_v17  ;;  %11205 = vst [vmem:[%s17864_s13 + $0xe0] sm:$0xff] %v9414_v59  ;;  %v8783_v63 = vadd.f32 %v17593_v6, %v8736_v50  ;;  %v9415_v24 = vadd.f32 %v17593_v6, %v9374_v60 }
 0x755   :  { %8801 = vst [vmem:[%s17864_s13 + $0x78] sm:$0xff] %v8785_v8  ;;  %11208 = vst [vmem:[%s17864_s13 + $0xf8] sm:$0xff] %v9417_v47 }
 0x756   :  { %8799 = vst [vmem:[%s17864_s13 + $0x68] sm:$0xff] %v8783_v63  ;;  %11206 = vst [vmem:[%s17864_s13 + $0xe8] sm:$0xff] %v9415_v24 }
 0x7b8   :  { %v12252_v18 = vpop.f32.mrb[92].mxu0  ;;  %v12348_v62 = vpop.f32.mrb[84].mxu1 }
 0x7b9   :  { %v10037_v13 = vadd.f32 %v12252_v18, %v17593_v6  ;;  %v10646_v20 = vadd.f32 %v12348_v62, %v17593_v6  ;;  %v9956_v27 = vpop.f32.mrb[93].mxu0  ;;  %v10565_v57 = vpop.f32.mrb[85].mxu1 }
 0x7ba   :  { %v10035_v48 = vadd.f32 %v17593_v6, %v9956_v27  ;;  %v10644_v25 = vadd.f32 %v17593_v6, %v10565_v57  ;;  %v12253_v35 = vpop.f32.mrb[94].mxu0  ;;  %v12349_v3 = vpop.f32.mrb[86].mxu1 }
 0x7bb   :  { %11291 = vst [vmem:[%s17864_s13 + $0x110] sm:$0xff] %v10037_v13  ;;  %11387 = vst [vmem:[%s17864_s13 + $0x190] sm:$0xff] %v10646_v20  ;;  %v10038_v28 = vadd.f32 %v12253_v35, %v17593_v6  ;;  %v10647_v19 = vadd.f32 %v12349_v3, %v17593_v6  ;;  %v9959_v40 = vpop.f32.mrb[95].mxu0  ;;  %v10568_v21 = vpop.f32.mrb[87].mxu1 }
 0x7bc   :  { %11289 = vst [vmem:[%s17864_s13 + $0x100] sm:$0xff] %v10035_v48  ;;  %11385 = vst [vmem:[%s17864_s13 + $0x180] sm:$0xff] %v10644_v25  ;;  %v10036_v9 = vadd.f32 %v17593_v6, %v9959_v40  ;;  %v10645_v11 = vadd.f32 %v17593_v6, %v10568_v21 }
 0x7bd   :  { %11292 = vst [vmem:[%s17864_s13 + $0x118] sm:$0xff] %v10038_v28  ;;  %11388 = vst [vmem:[%s17864_s13 + $0x198] sm:$0xff] %v10647_v19 }
 0x7be   :  { %11290 = vst [vmem:[%s17864_s13 + $0x108] sm:$0xff] %v10036_v9  ;;  %11386 = vst [vmem:[%s17864_s13 + $0x188] sm:$0xff] %v10645_v11 }
 0x7c0   :  { %v12256_v31 = vpop.f32.mrb[96].mxu0  ;;  %v12352_v26 = vpop.f32.mrb[88].mxu1 }
 0x7c1   :  { %v10041_v36 = vadd.f32 %v12256_v31, %v17593_v6  ;;  %v10650_v41 = vadd.f32 %v12352_v26, %v17593_v6  ;;  %v9972_v43 = vpop.f32.mrb[97].mxu0  ;;  %v10581_v23 = vpop.f32.mrb[89].mxu1 }
 0x7c2   :  { %v10039_v52 = vadd.f32 %v17593_v6, %v9972_v43  ;;  %v10648_v0 = vadd.f32 %v17593_v6, %v10581_v23  ;;  %v12257_v33 = vpop.f32.mrb[98].mxu0  ;;  %v12353_v1 = vpop.f32.mrb[90].mxu1 }
 0x7c3   :  { %11295 = vst [vmem:[%s17864_s13 + $0x130] sm:$0xff] %v10041_v36  ;;  %11391 = vst [vmem:[%s17864_s13 + $0x1b0] sm:$0xff] %v10650_v41  ;;  %v10042_v5 = vadd.f32 %v12257_v33, %v17593_v6  ;;  %v10651_v39 = vadd.f32 %v12353_v1, %v17593_v6  ;;  %v9975_v34 = vpop.f32.mrb[99].mxu0  ;;  %v10584_v14 = vpop.f32.mrb[91].mxu1 }
 0x7c4   :  { %11293 = vst [vmem:[%s17864_s13 + $0x120] sm:$0xff] %v10039_v52  ;;  %11389 = vst [vmem:[%s17864_s13 + $0x1a0] sm:$0xff] %v10648_v0  ;;  %v10040_v44 = vadd.f32 %v17593_v6, %v9975_v34  ;;  %v10649_v16 = vadd.f32 %v17593_v6, %v10584_v14 }
 0x7c5   :  { %11296 = vst [vmem:[%s17864_s13 + $0x138] sm:$0xff] %v10042_v5  ;;  %11392 = vst [vmem:[%s17864_s13 + $0x1b8] sm:$0xff] %v10651_v39 }
 0x7c6   :  { %11294 = vst [vmem:[%s17864_s13 + $0x128] sm:$0xff] %v10040_v44  ;;  %11390 = vst [vmem:[%s17864_s13 + $0x1a8] sm:$0xff] %v10649_v16 }
 0x7c8   :  { %v12260_v42 = vpop.f32.mrb[100].mxu0  ;;  %v12356_v7 = vpop.f32.mrb[92].mxu1 }
 0x7c9   :  { %v10045_v37 = vadd.f32 %v12260_v42, %v17593_v6  ;;  %v10654_v49 = vadd.f32 %v12356_v7, %v17593_v6  ;;  %v9988_v45 = vpop.f32.mrb[101].mxu0  ;;  %v10597_v58 = vpop.f32.mrb[93].mxu1 }
 0x7ca   :  { %v10043_v46 = vadd.f32 %v17593_v6, %v9988_v45  ;;  %v10652_v38 = vadd.f32 %v17593_v6, %v10597_v58  ;;  %v12261_v10 = vpop.f32.mrb[102].mxu0  ;;  %v12357_v54 = vpop.f32.mrb[94].mxu1 }
 0x7cb   :  { %11299 = vst [vmem:[%s17864_s13 + $0x150] sm:$0xff] %v10045_v37  ;;  %11395 = vst [vmem:[%s17864_s13 + $0x1d0] sm:$0xff] %v10654_v49  ;;  %v10046_v4 = vadd.f32 %v12261_v10, %v17593_v6  ;;  %v10655_v29 = vadd.f32 %v12357_v54, %v17593_v6  ;;  %v9991_v51 = vpop.f32.mrb[103].mxu0  ;;  %v10600_v53 = vpop.f32.mrb[95].mxu1 }
 0x7cc   :  { %11297 = vst [vmem:[%s17864_s13 + $0x140] sm:$0xff] %v10043_v46  ;;  %11393 = vst [vmem:[%s17864_s13 + $0x1c0] sm:$0xff] %v10652_v38  ;;  %v10044_v30 = vadd.f32 %v17593_v6, %v9991_v51  ;;  %v10653_v12 = vadd.f32 %v17593_v6, %v10600_v53 }
 0x7cd   :  { %11300 = vst [vmem:[%s17864_s13 + $0x158] sm:$0xff] %v10046_v4  ;;  %11396 = vst [vmem:[%s17864_s13 + $0x1d8] sm:$0xff] %v10655_v29 }
 0x7ce   :  { %11298 = vst [vmem:[%s17864_s13 + $0x148] sm:$0xff] %v10044_v30  ;;  %11394 = vst [vmem:[%s17864_s13 + $0x1c8] sm:$0xff] %v10653_v12 }
 0x7d0   :  { %v12264_v22 = vpop.f32.mrb[104].mxu0  ;;  %v12360_v61 = vpop.f32.mrb[96].mxu1 }
 0x7d1   :  { %v10049_v2 = vadd.f32 %v12264_v22, %v17593_v6  ;;  %v10658_v55 = vadd.f32 %v12360_v61, %v17593_v6  ;;  %v10004_v15 = vpop.f32.mrb[105].mxu0  ;;  %v10613_v17 = vpop.f32.mrb[97].mxu1 }
 0x7d2   :  { %v10047_v59 = vadd.f32 %v17593_v6, %v10004_v15  ;;  %v10656_v32 = vadd.f32 %v17593_v6, %v10613_v17  ;;  %v12265_v56 = vpop.f32.mrb[106].mxu0  ;;  %v12361_v8 = vpop.f32.mrb[98].mxu1 }
 0x7d3   :  { %11303 = vst [vmem:[%s17864_s13 + $0x170] sm:$0xff] %v10049_v2  ;;  %11399 = vst [vmem:[%s17864_s13 + $0x1f0] sm:$0xff] %v10658_v55  ;;  %v10050_v47 = vadd.f32 %v12265_v56, %v17593_v6  ;;  %v10659_v50 = vadd.f32 %v12361_v8, %v17593_v6  ;;  %v10007_v60 = vpop.f32.mrb[107].mxu0  ;;  %v10616_v63 = vpop.f32.mrb[99].mxu1 }
 0x7d4   :  { %11301 = vst [vmem:[%s17864_s13 + $0x160] sm:$0xff] %v10047_v59  ;;  %11397 = vst [vmem:[%s17864_s13 + $0x1e0] sm:$0xff] %v10656_v32  ;;  %v10048_v24 = vadd.f32 %v17593_v6, %v10007_v60  ;;  %v10657_v18 = vadd.f32 %v17593_v6, %v10616_v63 }
 0x7d5   :  { %11304 = vst [vmem:[%s17864_s13 + $0x178] sm:$0xff] %v10050_v47  ;;  %11400 = vst [vmem:[%s17864_s13 + $0x1f8] sm:$0xff] %v10659_v50 }
 0x7d6   :  { %11302 = vst [vmem:[%s17864_s13 + $0x168] sm:$0xff] %v10048_v24  ;;  %11398 = vst [vmem:[%s17864_s13 + $0x1e8] sm:$0xff] %v10657_v18 }

</bundles_post_ra>
